<compile_context>
chip_gen: v6e
topology: v6e:2x2x1
jax: 0.10.0
libtpu: 0.0.40
codegen_flags: <defaults>
</compile_context>

<pallas_src>
import jax
import jax.numpy as jnp
from jax import lax
from jax.experimental import pallas as pl
from jax.experimental.pallas import tpu as pltpu


# ----------------------------------------------------------------------------
# Fused whole-network kernel (one image per grid step)
# ----------------------------------------------------------------------------
def _make_den_kernel(H, W):
    HW = H * W
    PAD = W + 1                       # halo columns on each side of the flat axis
    PW = HW + 2 * PAD                 # padded flat width
    # Tap order (dy, dx) == (ky-1, kx-1), ky-major — matches the (3,3,Cout,Cin)
    # reshape used when building the weights from PyTorch OIHW layout.
    TAPS = [(dy, dx) for dy in (-1, 0, 1) for dx in (-1, 0, 1)]

    def kernel(x_ref,
               w1_ref, b1_ref, w2_ref, b2_ref, w3_ref, b3_ref,
               w4_ref, b4_ref, w5_ref, b5_ref,
               o_ref, pad_ref):
        # x_ref : (1, 3, HW) f32          o_ref : (1, 3, HW) f32
        # w*_ref: (9, Cout, Cin) bf16     b*_ref: (Cout, 1) f32
        # pad_ref: (64, PW) f32 VMEM scratch (flat padded activation).

        # Zero ONLY the halo columns; the interior is fully overwritten by
        # every layer before it is read, and the halo is never written, so
        # this is all the zeroing that is needed.
        zero_halo = jnp.zeros((pad_ref.shape[0], PAD), pad_ref.dtype)
        pad_ref[:, 0:PAD] = zero_halo
        pad_ref[:, PAD + HW:PW] = zero_halo

        # Left/right boundary masks on the flat spatial (lane) axis — hoisted
        # out of the layer loop (JAX does not CSE broadcasts).
        col = lax.broadcasted_iota(jnp.int32, (1, HW), 1) % W
        not_first_col = col != 0          # valid source when reading x-1
        not_last_col = col != (W - 1)     # valid source when reading x+1

        def conv3x3_relu(act, w_ref, b_ref):
            # act: (Cin, HW) f32 value.  Returns (Cout, HW) f32.
            cin = act.shape[0]
            cout = w_ref.shape[1]
            # Write interior; halo columns (already zero) supply the rows
            # above/below the image in flat index space.
            pad_ref[0:cin, PAD:PAD + HW] = act
            acc = jnp.zeros((cout, HW), jnp.float32)
            for t, (dy, dx) in enumerate(TAPS):
                start = PAD + dy * W + dx            # static lane offset
                src = pad_ref[0:cin, start:start + HW]   # (Cin, HW) f32
                # A +/-1 x-shift in flat space bleeds into the neighbouring
                # row; mask those lanes (y-shifts are handled by the halo).
                if dx == -1:
                    src = jnp.where(not_first_col, src, 0.0)
                elif dx == 1:
                    src = jnp.where(not_last_col, src, 0.0)
                acc = acc + jnp.dot(w_ref[t], src.astype(w_ref.dtype),
                                    preferred_element_type=jnp.float32)
            return jnp.maximum(acc + b_ref[...], 0.0)   # fused bias + ReLU

        act = x_ref[0]                                   # (3, HW) f32
        act = conv3x3_relu(act, w1_ref, b1_ref)          # conv_relu    : 3  -> 64
        act = conv3x3_relu(act, w2_ref, b2_ref)          # layer_2      : 64 -> 64
        act = conv3x3_relu(act, w3_ref, b3_ref)          # layer_3      : 64 -> 64
        act = conv3x3_relu(act, w4_ref, b4_ref)          # layer_4      : 64 -> 64
        act = conv3x3_relu(act, w5_ref, b5_ref)          # relu(conv_op): 64 -> 3
        o_ref[0] = act.astype(o_ref.dtype)               # (3, HW), 256-lane dense

    return kernel


# ----------------------------------------------------------------------------
# Wrapper (NCHW in / NCHW out, no transposes — only reshapes)
# ----------------------------------------------------------------------------
def den_forward(params, x_nchw):
    N, C, H, W = x_nchw.shape
    HW = H * W
    cout_last = params[-1]["w"].shape[1]
    x_flat = x_nchw.reshape(N, C, HW)                    # pure reshape, no transpose

    in_specs = [pl.BlockSpec((1, C, HW), lambda n: (n, 0, 0))]
    operands = [x_flat]
    for p in params:
        in_specs.append(pl.BlockSpec(p["w"].shape, lambda n: (0, 0, 0)))
        in_specs.append(pl.BlockSpec(p["b"].shape, lambda n: (0, 0)))
        operands.extend([p["w"], p["b"]])

    y_flat = pl.pallas_call(
        _make_den_kernel(H, W),
        out_shape=jax.ShapeDtypeStruct((N, cout_last, HW), jnp.float32),
        grid=(N,),
        in_specs=in_specs,
        out_specs=pl.BlockSpec((1, cout_last, HW), lambda n: (n, 0, 0)),
        scratch_shapes=[
            pltpu.VMEM((64, HW + 2 * (W + 1)), jnp.float32),  # flat padded activation
        ],
        compiler_params=pltpu.CompilerParams(
            dimension_semantics=("arbitrary",),
        ),
    )(*operands)
    return y_flat.reshape(N, cout_last, H, W)


den_forward_jit = jax.jit(den_forward)


# ----------------------------------------------------------------------------
# Parameter construction (deterministic, synthetic, PyTorch weight layout)
# ----------------------------------------------------------------------------
def init_den_params(key):
    dims = [(3, 64), (64, 64), (64, 64), (64, 64), (64, 3)]
    params = []
    for cin, cout in dims:
        key, kw, kb = jax.random.split(key, 3)
        # PyTorch Conv2d weight layout (Cout, Cin, 3, 3).
        w_oihw = jax.random.normal(kw, (cout, cin, 3, 3), jnp.float32) / jnp.sqrt(9.0 * cin)
        b = 0.01 * jax.random.normal(kb, (cout,), jnp.float32)
        # (Cout, Cin, ky, kx) -> (ky, kx, Cout, Cin) -> (9, Cout, Cin), ky-major.
        w_taps = jnp.transpose(w_oihw, (2, 3, 0, 1)).reshape(9, cout, cin)
        params.append({
            "w": w_taps.astype(jnp.bfloat16),      # bf16 MXU operand
            "b": b.reshape(cout, 1),               # broadcasts over the lane axis
        })
    return params


# ----------------------------------------------------------------------------
# Pure-JAX reference (XLA conv) for a correctness check
# ----------------------------------------------------------------------------
@jax.jit
def den_reference_nchw(params, x_nchw):
    act = x_nchw.astype(jnp.float32)
    for p in params:
        _, cout, cin = p["w"].shape
        w_oihw = jnp.transpose(
            p["w"].astype(jnp.float32).reshape(3, 3, cout, cin), (2, 3, 0, 1))
        y = lax.conv_general_dilated(
            act, w_oihw, window_strides=(1, 1), padding="SAME",
            dimension_numbers=("NCHW", "OIHW", "NCHW"))
        act = jnp.maximum(y + p["b"].reshape(1, cout, 1, 1), 0.0)
    return act


# ----------------------------------------------------------------------------
if __name__ == "__main__":
    key = jax.random.PRNGKey(0)
    k_params, k_x = jax.random.split(key)

    params = init_den_params(k_params)
    x = jax.random.normal(k_x, (2, 3, 16, 16), jnp.float32)   # NCHW, like PyTorch

    out = den_forward_jit(params, x)
    out = jax.block_until_ready(out)

    assert out.shape == (2, 3, 16, 16), out.shape
    assert bool(jnp.all(jnp.isfinite(out)))

    ref = den_reference_nchw(params, x)
    max_err = float(jnp.max(jnp.abs(out - ref)))
    # bf16 MXU operands vs f32 XLA reference -> small tolerance.
    assert max_err < 1e-1, f"max abs error vs reference: {max_err}"

    print("KERNEL_OK")
</pallas_src>

<mosaic_0001>
module attributes {stable_mosaic.version = 11 : i64} {
  func.func @kernel(%arg0: i32, %arg1: memref<1x3x256xf32, #tpu.memory_space<vmem>>, %arg2: memref<9x64x3xbf16, #tpu.memory_space<vmem>>, %arg3: memref<64x1xf32, #tpu.memory_space<vmem>>, %arg4: memref<9x64x64xbf16, #tpu.memory_space<vmem>>, %arg5: memref<64x1xf32, #tpu.memory_space<vmem>>, %arg6: memref<9x64x64xbf16, #tpu.memory_space<vmem>>, %arg7: memref<64x1xf32, #tpu.memory_space<vmem>>, %arg8: memref<9x64x64xbf16, #tpu.memory_space<vmem>>, %arg9: memref<64x1xf32, #tpu.memory_space<vmem>>, %arg10: memref<9x3x64xbf16, #tpu.memory_space<vmem>>, %arg11: memref<3x1xf32, #tpu.memory_space<vmem>>, %arg12: memref<1x3x256xf32, #tpu.memory_space<vmem>>, %arg13: memref<64x290xf32, #tpu.memory_space<vmem>>) attributes {dimension_semantics = [#tpu.dimension_semantics<arbitrary>], iteration_bounds = array<i64: 2>, scalar_prefetch = 0 : i64, scratch_operands = 1 : i64, tpu.core_type = #tpu.core_type<tc>, window_params = [{transform_indices = @transform_0, window_bounds = array<i64: 1, 3, 256>}, {pipeline_mode = #tpu.pipeline_mode<synchronous>, transform_indices = @transform_1, window_bounds = array<i64: 9, 64, 3>}, {pipeline_mode = #tpu.pipeline_mode<synchronous>, transform_indices = @transform_2, window_bounds = array<i64: 64, 1>}, {pipeline_mode = #tpu.pipeline_mode<synchronous>, transform_indices = @transform_3, window_bounds = array<i64: 9, 64, 64>}, {pipeline_mode = #tpu.pipeline_mode<synchronous>, transform_indices = @transform_4, window_bounds = array<i64: 64, 1>}, {pipeline_mode = #tpu.pipeline_mode<synchronous>, transform_indices = @transform_5, window_bounds = array<i64: 9, 64, 64>}, {pipeline_mode = #tpu.pipeline_mode<synchronous>, transform_indices = @transform_6, window_bounds = array<i64: 64, 1>}, {pipeline_mode = #tpu.pipeline_mode<synchronous>, transform_indices = @transform_7, window_bounds = array<i64: 9, 64, 64>}, {pipeline_mode = #tpu.pipeline_mode<synchronous>, transform_indices = @transform_8, window_bounds = array<i64: 64, 1>}, {pipeline_mode = #tpu.pipeline_mode<synchronous>, transform_indices = @transform_9, window_bounds = array<i64: 9, 3, 64>}, {pipeline_mode = #tpu.pipeline_mode<synchronous>, transform_indices = @transform_10, window_bounds = array<i64: 3, 1>}, {transform_indices = @transform_11, window_bounds = array<i64: 1, 3, 256>}]} {
    %cst = arith.constant 0.000000e+00 : f32
    %0 = vector.broadcast %cst : f32 to vector<64x17xf32>
    %c0 = arith.constant 0 : index
    %c0_0 = arith.constant 0 : index
    %1 = vector.load %arg13[%c0, %c0_0] : memref<64x290xf32, #tpu.memory_space<vmem>>, vector<64x17xf32>
    tpu.vector_store %arg13[%c0, %c0_0], %0 {strides = array<i32>} : memref<64x290xf32, #tpu.memory_space<vmem>>, vector<64x17xf32>,
    %c0_1 = arith.constant 0 : index
    %c273 = arith.constant 273 : index
    %2 = vector.load %arg13[%c0_1, %c273] : memref<64x290xf32, #tpu.memory_space<vmem>>, vector<64x17xf32>
    tpu.vector_store %arg13[%c0_1, %c273], %0 {strides = array<i32>} : memref<64x290xf32, #tpu.memory_space<vmem>>, vector<64x17xf32>,
    %3 = tpu.iota {dimensions = array<i32: 1>} : vector<1x256xi32>
    %c16_i32 = arith.constant 16 : i32
    %c0_i32 = arith.constant 0 : i32
    %4 = arith.cmpi eq, %c16_i32, %c0_i32 : i32
    %c1_i32 = arith.constant 1 : i32
    %5 = arith.select %4, %c1_i32, %c16_i32 : i32
    %6 = vector.broadcast %5 : i32 to vector<1x256xi32>
    %7 = arith.remsi %3, %6 : vector<1x256xi32>
    %c0_i32_2 = arith.constant 0 : i32
    %8 = vector.broadcast %c0_i32_2 : i32 to vector<1x256xi32>
    %9 = arith.cmpi ne, %7, %8 : vector<1x256xi32>
    %c0_i32_3 = arith.constant 0 : i32
    %10 = vector.broadcast %c0_i32_3 : i32 to vector<1x256xi32>
    %11 = arith.cmpi slt, %7, %10 : vector<1x256xi32>
    %c0_i32_4 = arith.constant 0 : i32
    %12 = arith.cmpi slt, %5, %c0_i32_4 : i32
    %13 = vector.broadcast %12 : i1 to vector<1x256xi1>
    %14 = vector.broadcast %13 : vector<1x256xi1> to vector<1x256xi1>
    %15 = arith.xori %11, %14 : vector<1x256xi1>
    %16 = arith.andi %15, %9 : vector<1x256xi1>
    %17 = vector.broadcast %5 : i32 to vector<1x256xi32>
    %18 = arith.addi %7, %17 : vector<1x256xi32>
    %19 = arith.select %16, %18, %7 : vector<1x256xi1>, vector<1x256xi32>
    %c0_i32_5 = arith.constant 0 : i32
    %20 = vector.broadcast %c0_i32_5 : i32 to vector<1x256xi32>
    %21 = arith.cmpi ne, %19, %20 : vector<1x256xi32>
    %c15_i32 = arith.constant 15 : i32
    %22 = vector.broadcast %c15_i32 : i32 to vector<1x256xi32>
    %23 = arith.cmpi ne, %19, %22 : vector<1x256xi32>
    %c0_6 = arith.constant 0 : index
    %c0_7 = arith.constant 0 : index
    %c0_8 = arith.constant 0 : index
    %24 = vector.load %arg1[%c0_6, %c0_7, %c0_8] : memref<1x3x256xf32, #tpu.memory_space<vmem>>, vector<1x3x256xf32>
    %25 = vector.shape_cast %24 : vector<1x3x256xf32> to vector<3x256xf32>
    %c0_9 = arith.constant 0 : index
    %c17 = arith.constant 17 : index
    %26 = vector.load %arg13[%c0_9, %c17] : memref<64x290xf32, #tpu.memory_space<vmem>>, vector<3x256xf32>
    tpu.vector_store %arg13[%c0_9, %c17], %25 {strides = array<i32>} : memref<64x290xf32, #tpu.memory_space<vmem>>, vector<3x256xf32>,
    %cst_10 = arith.constant 0.000000e+00 : f32
    %27 = vector.broadcast %cst_10 : f32 to vector<64x256xf32>
    %c0_11 = arith.constant 0 : index
    %c0_12 = arith.constant 0 : index
    %28 = vector.load %arg13[%c0_11, %c0_12] : memref<64x290xf32, #tpu.memory_space<vmem>>, vector<3x256xf32>
    %cst_13 = arith.constant 0.000000e+00 : f32
    %29 = vector.shape_cast %21 : vector<1x256xi1> to vector<1x256xi1>
    %30 = vector.broadcast %29 : vector<1x256xi1> to vector<3x256xi1>
    %31 = vector.broadcast %cst_13 : f32 to vector<3x256xf32>
    %32 = arith.select %30, %28, %31 : vector<3x256xi1>, vector<3x256xf32>
    %c0_14 = arith.constant 0 : index
    %c0_15 = arith.constant 0 : index
    %c0_16 = arith.constant 0 : index
    %33 = vector.load %arg2[%c0_14, %c0_15, %c0_16] : memref<9x64x3xbf16, #tpu.memory_space<vmem>>, vector<1x64x3xbf16>
    %34 = vector.shape_cast %33 : vector<1x64x3xbf16> to vector<64x3xbf16>
    %35 = arith.truncf %32 : vector<3x256xf32> to vector<3x256xbf16>
    %cst_17 = arith.constant dense<0.000000e+00> : vector<64x256xf32>
    %36 = tpu.matmul %34, %35, %cst_17 {dimension_numbers = #tpu.dot_dimension_numbers<[1], [0], [0], [1], [0, 0, 1, 1], [], []>} : vector<64x3xbf16>, vector<3x256xbf16>, vector<64x256xf32> -> vector<64x256xf32>
    %37 = arith.addf %27, %36 : vector<64x256xf32>
    %c0_18 = arith.constant 0 : index
    %c1 = arith.constant 1 : index
    %38 = vector.load %arg13[%c0_18, %c1] : memref<64x290xf32, #tpu.memory_space<vmem>>, vector<3x256xf32>
    %c1_19 = arith.constant 1 : index
    %c0_20 = arith.constant 0 : index
    %c0_21 = arith.constant 0 : index
    %39 = vector.load %arg2[%c1_19, %c0_20, %c0_21] : memref<9x64x3xbf16, #tpu.memory_space<vmem>>, vector<1x64x3xbf16>
    %40 = vector.shape_cast %39 : vector<1x64x3xbf16> to vector<64x3xbf16>
    %41 = arith.truncf %38 : vector<3x256xf32> to vector<3x256xbf16>
    %cst_22 = arith.constant dense<0.000000e+00> : vector<64x256xf32>
    %42 = tpu.matmul %40, %41, %cst_22 {dimension_numbers = #tpu.dot_dimension_numbers<[1], [0], [0], [1], [0, 0, 1, 1], [], []>} : vector<64x3xbf16>, vector<3x256xbf16>, vector<64x256xf32> -> vector<64x256xf32>
    %43 = arith.addf %37, %42 : vector<64x256xf32>
    %c0_23 = arith.constant 0 : index
    %c2 = arith.constant 2 : index
    %44 = vector.load %arg13[%c0_23, %c2] : memref<64x290xf32, #tpu.memory_space<vmem>>, vector<3x256xf32>
    %cst_24 = arith.constant 0.000000e+00 : f32
    %45 = vector.shape_cast %23 : vector<1x256xi1> to vector<1x256xi1>
    %46 = vector.broadcast %45 : vector<1x256xi1> to vector<3x256xi1>
    %47 = vector.broadcast %cst_24 : f32 to vector<3x256xf32>
    %48 = arith.select %46, %44, %47 : vector<3x256xi1>, vector<3x256xf32>
    %c2_25 = arith.constant 2 : index
    %c0_26 = arith.constant 0 : index
    %c0_27 = arith.constant 0 : index
    %49 = vector.load %arg2[%c2_25, %c0_26, %c0_27] : memref<9x64x3xbf16, #tpu.memory_space<vmem>>, vector<1x64x3xbf16>
    %50 = vector.shape_cast %49 : vector<1x64x3xbf16> to vector<64x3xbf16>
    %51 = arith.truncf %48 : vector<3x256xf32> to vector<3x256xbf16>
    %cst_28 = arith.constant dense<0.000000e+00> : vector<64x256xf32>
    %52 = tpu.matmul %50, %51, %cst_28 {dimension_numbers = #tpu.dot_dimension_numbers<[1], [0], [0], [1], [0, 0, 1, 1], [], []>} : vector<64x3xbf16>, vector<3x256xbf16>, vector<64x256xf32> -> vector<64x256xf32>
    %53 = arith.addf %43, %52 : vector<64x256xf32>
    %c0_29 = arith.constant 0 : index
    %c16 = arith.constant 16 : index
    %54 = vector.load %arg13[%c0_29, %c16] : memref<64x290xf32, #tpu.memory_space<vmem>>, vector<3x256xf32>
    %cst_30 = arith.constant 0.000000e+00 : f32
    %55 = vector.shape_cast %21 : vector<1x256xi1> to vector<1x256xi1>
    %56 = vector.broadcast %55 : vector<1x256xi1> to vector<3x256xi1>
    %57 = vector.broadcast %cst_30 : f32 to vector<3x256xf32>
    %58 = arith.select %56, %54, %57 : vector<3x256xi1>, vector<3x256xf32>
    %c3 = arith.constant 3 : index
    %c0_31 = arith.constant 0 : index
    %c0_32 = arith.constant 0 : index
    %59 = vector.load %arg2[%c3, %c0_31, %c0_32] : memref<9x64x3xbf16, #tpu.memory_space<vmem>>, vector<1x64x3xbf16>
    %60 = vector.shape_cast %59 : vector<1x64x3xbf16> to vector<64x3xbf16>
    %61 = arith.truncf %58 : vector<3x256xf32> to vector<3x256xbf16>
    %cst_33 = arith.constant dense<0.000000e+00> : vector<64x256xf32>
    %62 = tpu.matmul %60, %61, %cst_33 {dimension_numbers = #tpu.dot_dimension_numbers<[1], [0], [0], [1], [0, 0, 1, 1], [], []>} : vector<64x3xbf16>, vector<3x256xbf16>, vector<64x256xf32> -> vector<64x256xf32>
    %63 = arith.addf %53, %62 : vector<64x256xf32>
    %c0_34 = arith.constant 0 : index
    %c17_35 = arith.constant 17 : index
    %64 = vector.load %arg13[%c0_34, %c17_35] : memref<64x290xf32, #tpu.memory_space<vmem>>, vector<3x256xf32>
    %c4 = arith.constant 4 : index
    %c0_36 = arith.constant 0 : index
    %c0_37 = arith.constant 0 : index
    %65 = vector.load %arg2[%c4, %c0_36, %c0_37] : memref<9x64x3xbf16, #tpu.memory_space<vmem>>, vector<1x64x3xbf16>
    %66 = vector.shape_cast %65 : vector<1x64x3xbf16> to vector<64x3xbf16>
    %67 = arith.truncf %64 : vector<3x256xf32> to vector<3x256xbf16>
    %cst_38 = arith.constant dense<0.000000e+00> : vector<64x256xf32>
    %68 = tpu.matmul %66, %67, %cst_38 {dimension_numbers = #tpu.dot_dimension_numbers<[1], [0], [0], [1], [0, 0, 1, 1], [], []>} : vector<64x3xbf16>, vector<3x256xbf16>, vector<64x256xf32> -> vector<64x256xf32>
    %69 = arith.addf %63, %68 : vector<64x256xf32>
    %c0_39 = arith.constant 0 : index
    %c18 = arith.constant 18 : index
    %70 = vector.load %arg13[%c0_39, %c18] : memref<64x290xf32, #tpu.memory_space<vmem>>, vector<3x256xf32>
    %cst_40 = arith.constant 0.000000e+00 : f32
    %71 = vector.shape_cast %23 : vector<1x256xi1> to vector<1x256xi1>
    %72 = vector.broadcast %71 : vector<1x256xi1> to vector<3x256xi1>
    %73 = vector.broadcast %cst_40 : f32 to vector<3x256xf32>
    %74 = arith.select %72, %70, %73 : vector<3x256xi1>, vector<3x256xf32>
    %c5 = arith.constant 5 : index
    %c0_41 = arith.constant 0 : index
    %c0_42 = arith.constant 0 : index
    %75 = vector.load %arg2[%c5, %c0_41, %c0_42] : memref<9x64x3xbf16, #tpu.memory_space<vmem>>, vector<1x64x3xbf16>
    %76 = vector.shape_cast %75 : vector<1x64x3xbf16> to vector<64x3xbf16>
    %77 = arith.truncf %74 : vector<3x256xf32> to vector<3x256xbf16>
    %cst_43 = arith.constant dense<0.000000e+00> : vector<64x256xf32>
    %78 = tpu.matmul %76, %77, %cst_43 {dimension_numbers = #tpu.dot_dimension_numbers<[1], [0], [0], [1], [0, 0, 1, 1], [], []>} : vector<64x3xbf16>, vector<3x256xbf16>, vector<64x256xf32> -> vector<64x256xf32>
    %79 = arith.addf %69, %78 : vector<64x256xf32>
    %c0_44 = arith.constant 0 : index
    %c32 = arith.constant 32 : index
    %80 = vector.load %arg13[%c0_44, %c32] : memref<64x290xf32, #tpu.memory_space<vmem>>, vector<3x256xf32>
    %cst_45 = arith.constant 0.000000e+00 : f32
    %81 = vector.shape_cast %21 : vector<1x256xi1> to vector<1x256xi1>
    %82 = vector.broadcast %81 : vector<1x256xi1> to vector<3x256xi1>
    %83 = vector.broadcast %cst_45 : f32 to vector<3x256xf32>
    %84 = arith.select %82, %80, %83 : vector<3x256xi1>, vector<3x256xf32>
    %c6 = arith.constant 6 : index
    %c0_46 = arith.constant 0 : index
    %c0_47 = arith.constant 0 : index
    %85 = vector.load %arg2[%c6, %c0_46, %c0_47] : memref<9x64x3xbf16, #tpu.memory_space<vmem>>, vector<1x64x3xbf16>
    %86 = vector.shape_cast %85 : vector<1x64x3xbf16> to vector<64x3xbf16>
    %87 = arith.truncf %84 : vector<3x256xf32> to vector<3x256xbf16>
    %cst_48 = arith.constant dense<0.000000e+00> : vector<64x256xf32>
    %88 = tpu.matmul %86, %87, %cst_48 {dimension_numbers = #tpu.dot_dimension_numbers<[1], [0], [0], [1], [0, 0, 1, 1], [], []>} : vector<64x3xbf16>, vector<3x256xbf16>, vector<64x256xf32> -> vector<64x256xf32>
    %89 = arith.addf %79, %88 : vector<64x256xf32>
    %c0_49 = arith.constant 0 : index
    %c33 = arith.constant 33 : index
    %90 = vector.load %arg13[%c0_49, %c33] : memref<64x290xf32, #tpu.memory_space<vmem>>, vector<3x256xf32>
    %c7 = arith.constant 7 : index
    %c0_50 = arith.constant 0 : index
    %c0_51 = arith.constant 0 : index
    %91 = vector.load %arg2[%c7, %c0_50, %c0_51] : memref<9x64x3xbf16, #tpu.memory_space<vmem>>, vector<1x64x3xbf16>
    %92 = vector.shape_cast %91 : vector<1x64x3xbf16> to vector<64x3xbf16>
    %93 = arith.truncf %90 : vector<3x256xf32> to vector<3x256xbf16>
    %cst_52 = arith.constant dense<0.000000e+00> : vector<64x256xf32>
    %94 = tpu.matmul %92, %93, %cst_52 {dimension_numbers = #tpu.dot_dimension_numbers<[1], [0], [0], [1], [0, 0, 1, 1], [], []>} : vector<64x3xbf16>, vector<3x256xbf16>, vector<64x256xf32> -> vector<64x256xf32>
    %95 = arith.addf %89, %94 : vector<64x256xf32>
    %c0_53 = arith.constant 0 : index
    %c34 = arith.constant 34 : index
    %96 = vector.load %arg13[%c0_53, %c34] : memref<64x290xf32, #tpu.memory_space<vmem>>, vector<3x256xf32>
    %cst_54 = arith.constant 0.000000e+00 : f32
    %97 = vector.shape_cast %23 : vector<1x256xi1> to vector<1x256xi1>
    %98 = vector.broadcast %97 : vector<1x256xi1> to vector<3x256xi1>
    %99 = vector.broadcast %cst_54 : f32 to vector<3x256xf32>
    %100 = arith.select %98, %96, %99 : vector<3x256xi1>, vector<3x256xf32>
    %c8 = arith.constant 8 : index
    %c0_55 = arith.constant 0 : index
    %c0_56 = arith.constant 0 : index
    %101 = vector.load %arg2[%c8, %c0_55, %c0_56] : memref<9x64x3xbf16, #tpu.memory_space<vmem>>, vector<1x64x3xbf16>
    %102 = vector.shape_cast %101 : vector<1x64x3xbf16> to vector<64x3xbf16>
    %103 = arith.truncf %100 : vector<3x256xf32> to vector<3x256xbf16>
    %cst_57 = arith.constant dense<0.000000e+00> : vector<64x256xf32>
    %104 = tpu.matmul %102, %103, %cst_57 {dimension_numbers = #tpu.dot_dimension_numbers<[1], [0], [0], [1], [0, 0, 1, 1], [], []>} : vector<64x3xbf16>, vector<3x256xbf16>, vector<64x256xf32> -> vector<64x256xf32>
    %105 = arith.addf %95, %104 : vector<64x256xf32>
    %c0_58 = arith.constant 0 : index
    %c0_59 = arith.constant 0 : index
    %106 = vector.load %arg3[%c0_58, %c0_59] : memref<64x1xf32, #tpu.memory_space<vmem>>, vector<64x1xf32>
    %107 = vector.broadcast %106 : vector<64x1xf32> to vector<64x256xf32>
    %108 = arith.addf %105, %107 : vector<64x256xf32>
    %cst_60 = arith.constant 0.000000e+00 : f32
    %109 = vector.broadcast %cst_60 : f32 to vector<64x256xf32>
    %110 = arith.maximumf %108, %109 : vector<64x256xf32>
    %c0_61 = arith.constant 0 : index
    %c17_62 = arith.constant 17 : index
    %111 = vector.load %arg13[%c0_61, %c17_62] : memref<64x290xf32, #tpu.memory_space<vmem>>, vector<64x256xf32>
    tpu.vector_store %arg13[%c0_61, %c17_62], %110 {strides = array<i32>} : memref<64x290xf32, #tpu.memory_space<vmem>>, vector<64x256xf32>,
    %cst_63 = arith.constant 0.000000e+00 : f32
    %112 = vector.broadcast %cst_63 : f32 to vector<64x256xf32>
    %c0_64 = arith.constant 0 : index
    %c0_65 = arith.constant 0 : index
    %113 = vector.load %arg13[%c0_64, %c0_65] : memref<64x290xf32, #tpu.memory_space<vmem>>, vector<64x256xf32>
    %cst_66 = arith.constant 0.000000e+00 : f32
    %114 = vector.shape_cast %21 : vector<1x256xi1> to vector<1x256xi1>
    %115 = vector.broadcast %114 : vector<1x256xi1> to vector<64x256xi1>
    %116 = vector.broadcast %cst_66 : f32 to vector<64x256xf32>
    %117 = arith.select %115, %113, %116 : vector<64x256xi1>, vector<64x256xf32>
    %c0_67 = arith.constant 0 : index
    %c0_68 = arith.constant 0 : index
    %c0_69 = arith.constant 0 : index
    %118 = vector.load %arg4[%c0_67, %c0_68, %c0_69] : memref<9x64x64xbf16, #tpu.memory_space<vmem>>, vector<1x64x64xbf16>
    %119 = vector.shape_cast %118 : vector<1x64x64xbf16> to vector<64x64xbf16>
    %120 = arith.truncf %117 : vector<64x256xf32> to vector<64x256xbf16>
    %cst_70 = arith.constant dense<0.000000e+00> : vector<64x256xf32>
    %121 = tpu.matmul %119, %120, %cst_70 {dimension_numbers = #tpu.dot_dimension_numbers<[1], [0], [0], [1], [0, 0, 1, 1], [], []>} : vector<64x64xbf16>, vector<64x256xbf16>, vector<64x256xf32> -> vector<64x256xf32>
    %122 = arith.addf %112, %121 : vector<64x256xf32>
    %c0_71 = arith.constant 0 : index
    %c1_72 = arith.constant 1 : index
    %123 = vector.load %arg13[%c0_71, %c1_72] : memref<64x290xf32, #tpu.memory_space<vmem>>, vector<64x256xf32>
    %c1_73 = arith.constant 1 : index
    %c0_74 = arith.constant 0 : index
    %c0_75 = arith.constant 0 : index
    %124 = vector.load %arg4[%c1_73, %c0_74, %c0_75] : memref<9x64x64xbf16, #tpu.memory_space<vmem>>, vector<1x64x64xbf16>
    %125 = vector.shape_cast %124 : vector<1x64x64xbf16> to vector<64x64xbf16>
    %126 = arith.truncf %123 : vector<64x256xf32> to vector<64x256xbf16>
    %cst_76 = arith.constant dense<0.000000e+00> : vector<64x256xf32>
    %127 = tpu.matmul %125, %126, %cst_76 {dimension_numbers = #tpu.dot_dimension_numbers<[1], [0], [0], [1], [0, 0, 1, 1], [], []>} : vector<64x64xbf16>, vector<64x256xbf16>, vector<64x256xf32> -> vector<64x256xf32>
    %128 = arith.addf %122, %127 : vector<64x256xf32>
    %c0_77 = arith.constant 0 : index
    %c2_78 = arith.constant 2 : index
    %129 = vector.load %arg13[%c0_77, %c2_78] : memref<64x290xf32, #tpu.memory_space<vmem>>, vector<64x256xf32>
    %cst_79 = arith.constant 0.000000e+00 : f32
    %130 = vector.shape_cast %23 : vector<1x256xi1> to vector<1x256xi1>
    %131 = vector.broadcast %130 : vector<1x256xi1> to vector<64x256xi1>
    %132 = vector.broadcast %cst_79 : f32 to vector<64x256xf32>
    %133 = arith.select %131, %129, %132 : vector<64x256xi1>, vector<64x256xf32>
    %c2_80 = arith.constant 2 : index
    %c0_81 = arith.constant 0 : index
    %c0_82 = arith.constant 0 : index
    %134 = vector.load %arg4[%c2_80, %c0_81, %c0_82] : memref<9x64x64xbf16, #tpu.memory_space<vmem>>, vector<1x64x64xbf16>
    %135 = vector.shape_cast %134 : vector<1x64x64xbf16> to vector<64x64xbf16>
    %136 = arith.truncf %133 : vector<64x256xf32> to vector<64x256xbf16>
    %cst_83 = arith.constant dense<0.000000e+00> : vector<64x256xf32>
    %137 = tpu.matmul %135, %136, %cst_83 {dimension_numbers = #tpu.dot_dimension_numbers<[1], [0], [0], [1], [0, 0, 1, 1], [], []>} : vector<64x64xbf16>, vector<64x256xbf16>, vector<64x256xf32> -> vector<64x256xf32>
    %138 = arith.addf %128, %137 : vector<64x256xf32>
    %c0_84 = arith.constant 0 : index
    %c16_85 = arith.constant 16 : index
    %139 = vector.load %arg13[%c0_84, %c16_85] : memref<64x290xf32, #tpu.memory_space<vmem>>, vector<64x256xf32>
    %cst_86 = arith.constant 0.000000e+00 : f32
    %140 = vector.shape_cast %21 : vector<1x256xi1> to vector<1x256xi1>
    %141 = vector.broadcast %140 : vector<1x256xi1> to vector<64x256xi1>
    %142 = vector.broadcast %cst_86 : f32 to vector<64x256xf32>
    %143 = arith.select %141, %139, %142 : vector<64x256xi1>, vector<64x256xf32>
    %c3_87 = arith.constant 3 : index
    %c0_88 = arith.constant 0 : index
    %c0_89 = arith.constant 0 : index
    %144 = vector.load %arg4[%c3_87, %c0_88, %c0_89] : memref<9x64x64xbf16, #tpu.memory_space<vmem>>, vector<1x64x64xbf16>
    %145 = vector.shape_cast %144 : vector<1x64x64xbf16> to vector<64x64xbf16>
    %146 = arith.truncf %143 : vector<64x256xf32> to vector<64x256xbf16>
    %cst_90 = arith.constant dense<0.000000e+00> : vector<64x256xf32>
    %147 = tpu.matmul %145, %146, %cst_90 {dimension_numbers = #tpu.dot_dimension_numbers<[1], [0], [0], [1], [0, 0, 1, 1], [], []>} : vector<64x64xbf16>, vector<64x256xbf16>, vector<64x256xf32> -> vector<64x256xf32>
    %148 = arith.addf %138, %147 : vector<64x256xf32>
    %c0_91 = arith.constant 0 : index
    %c17_92 = arith.constant 17 : index
    %149 = vector.load %arg13[%c0_91, %c17_92] : memref<64x290xf32, #tpu.memory_space<vmem>>, vector<64x256xf32>
    %c4_93 = arith.constant 4 : index
    %c0_94 = arith.constant 0 : index
    %c0_95 = arith.constant 0 : index
    %150 = vector.load %arg4[%c4_93, %c0_94, %c0_95] : memref<9x64x64xbf16, #tpu.memory_space<vmem>>, vector<1x64x64xbf16>
    %151 = vector.shape_cast %150 : vector<1x64x64xbf16> to vector<64x64xbf16>
    %152 = arith.truncf %149 : vector<64x256xf32> to vector<64x256xbf16>
    %cst_96 = arith.constant dense<0.000000e+00> : vector<64x256xf32>
    %153 = tpu.matmul %151, %152, %cst_96 {dimension_numbers = #tpu.dot_dimension_numbers<[1], [0], [0], [1], [0, 0, 1, 1], [], []>} : vector<64x64xbf16>, vector<64x256xbf16>, vector<64x256xf32> -> vector<64x256xf32>
    %154 = arith.addf %148, %153 : vector<64x256xf32>
    %c0_97 = arith.constant 0 : index
    %c18_98 = arith.constant 18 : index
    %155 = vector.load %arg13[%c0_97, %c18_98] : memref<64x290xf32, #tpu.memory_space<vmem>>, vector<64x256xf32>
    %cst_99 = arith.constant 0.000000e+00 : f32
    %156 = vector.shape_cast %23 : vector<1x256xi1> to vector<1x256xi1>
    %157 = vector.broadcast %156 : vector<1x256xi1> to vector<64x256xi1>
    %158 = vector.broadcast %cst_99 : f32 to vector<64x256xf32>
    %159 = arith.select %157, %155, %158 : vector<64x256xi1>, vector<64x256xf32>
    %c5_100 = arith.constant 5 : index
    %c0_101 = arith.constant 0 : index
    %c0_102 = arith.constant 0 : index
    %160 = vector.load %arg4[%c5_100, %c0_101, %c0_102] : memref<9x64x64xbf16, #tpu.memory_space<vmem>>, vector<1x64x64xbf16>
    %161 = vector.shape_cast %160 : vector<1x64x64xbf16> to vector<64x64xbf16>
    %162 = arith.truncf %159 : vector<64x256xf32> to vector<64x256xbf16>
    %cst_103 = arith.constant dense<0.000000e+00> : vector<64x256xf32>
    %163 = tpu.matmul %161, %162, %cst_103 {dimension_numbers = #tpu.dot_dimension_numbers<[1], [0], [0], [1], [0, 0, 1, 1], [], []>} : vector<64x64xbf16>, vector<64x256xbf16>, vector<64x256xf32> -> vector<64x256xf32>
    %164 = arith.addf %154, %163 : vector<64x256xf32>
    %c0_104 = arith.constant 0 : index
    %c32_105 = arith.constant 32 : index
    %165 = vector.load %arg13[%c0_104, %c32_105] : memref<64x290xf32, #tpu.memory_space<vmem>>, vector<64x256xf32>
    %cst_106 = arith.constant 0.000000e+00 : f32
    %166 = vector.shape_cast %21 : vector<1x256xi1> to vector<1x256xi1>
    %167 = vector.broadcast %166 : vector<1x256xi1> to vector<64x256xi1>
    %168 = vector.broadcast %cst_106 : f32 to vector<64x256xf32>
    %169 = arith.select %167, %165, %168 : vector<64x256xi1>, vector<64x256xf32>
    %c6_107 = arith.constant 6 : index
    %c0_108 = arith.constant 0 : index
    %c0_109 = arith.constant 0 : index
    %170 = vector.load %arg4[%c6_107, %c0_108, %c0_109] : memref<9x64x64xbf16, #tpu.memory_space<vmem>>, vector<1x64x64xbf16>
    %171 = vector.shape_cast %170 : vector<1x64x64xbf16> to vector<64x64xbf16>
    %172 = arith.truncf %169 : vector<64x256xf32> to vector<64x256xbf16>
    %cst_110 = arith.constant dense<0.000000e+00> : vector<64x256xf32>
    %173 = tpu.matmul %171, %172, %cst_110 {dimension_numbers = #tpu.dot_dimension_numbers<[1], [0], [0], [1], [0, 0, 1, 1], [], []>} : vector<64x64xbf16>, vector<64x256xbf16>, vector<64x256xf32> -> vector<64x256xf32>
    %174 = arith.addf %164, %173 : vector<64x256xf32>
    %c0_111 = arith.constant 0 : index
    %c33_112 = arith.constant 33 : index
    %175 = vector.load %arg13[%c0_111, %c33_112] : memref<64x290xf32, #tpu.memory_space<vmem>>, vector<64x256xf32>
    %c7_113 = arith.constant 7 : index
    %c0_114 = arith.constant 0 : index
    %c0_115 = arith.constant 0 : index
    %176 = vector.load %arg4[%c7_113, %c0_114, %c0_115] : memref<9x64x64xbf16, #tpu.memory_space<vmem>>, vector<1x64x64xbf16>
    %177 = vector.shape_cast %176 : vector<1x64x64xbf16> to vector<64x64xbf16>
    %178 = arith.truncf %175 : vector<64x256xf32> to vector<64x256xbf16>
    %cst_116 = arith.constant dense<0.000000e+00> : vector<64x256xf32>
    %179 = tpu.matmul %177, %178, %cst_116 {dimension_numbers = #tpu.dot_dimension_numbers<[1], [0], [0], [1], [0, 0, 1, 1], [], []>} : vector<64x64xbf16>, vector<64x256xbf16>, vector<64x256xf32> -> vector<64x256xf32>
    %180 = arith.addf %174, %179 : vector<64x256xf32>
    %c0_117 = arith.constant 0 : index
    %c34_118 = arith.constant 34 : index
    %181 = vector.load %arg13[%c0_117, %c34_118] : memref<64x290xf32, #tpu.memory_space<vmem>>, vector<64x256xf32>
    %cst_119 = arith.constant 0.000000e+00 : f32
    %182 = vector.shape_cast %23 : vector<1x256xi1> to vector<1x256xi1>
    %183 = vector.broadcast %182 : vector<1x256xi1> to vector<64x256xi1>
    %184 = vector.broadcast %cst_119 : f32 to vector<64x256xf32>
    %185 = arith.select %183, %181, %184 : vector<64x256xi1>, vector<64x256xf32>
    %c8_120 = arith.constant 8 : index
    %c0_121 = arith.constant 0 : index
    %c0_122 = arith.constant 0 : index
    %186 = vector.load %arg4[%c8_120, %c0_121, %c0_122] : memref<9x64x64xbf16, #tpu.memory_space<vmem>>, vector<1x64x64xbf16>
    %187 = vector.shape_cast %186 : vector<1x64x64xbf16> to vector<64x64xbf16>
    %188 = arith.truncf %185 : vector<64x256xf32> to vector<64x256xbf16>
    %cst_123 = arith.constant dense<0.000000e+00> : vector<64x256xf32>
    %189 = tpu.matmul %187, %188, %cst_123 {dimension_numbers = #tpu.dot_dimension_numbers<[1], [0], [0], [1], [0, 0, 1, 1], [], []>} : vector<64x64xbf16>, vector<64x256xbf16>, vector<64x256xf32> -> vector<64x256xf32>
    %190 = arith.addf %180, %189 : vector<64x256xf32>
    %c0_124 = arith.constant 0 : index
    %c0_125 = arith.constant 0 : index
    %191 = vector.load %arg5[%c0_124, %c0_125] : memref<64x1xf32, #tpu.memory_space<vmem>>, vector<64x1xf32>
    %192 = vector.broadcast %191 : vector<64x1xf32> to vector<64x256xf32>
    %193 = arith.addf %190, %192 : vector<64x256xf32>
    %cst_126 = arith.constant 0.000000e+00 : f32
    %194 = vector.broadcast %cst_126 : f32 to vector<64x256xf32>
    %195 = arith.maximumf %193, %194 : vector<64x256xf32>
    %c0_127 = arith.constant 0 : index
    %c17_128 = arith.constant 17 : index
    %196 = vector.load %arg13[%c0_127, %c17_128] : memref<64x290xf32, #tpu.memory_space<vmem>>, vector<64x256xf32>
    tpu.vector_store %arg13[%c0_127, %c17_128], %195 {strides = array<i32>} : memref<64x290xf32, #tpu.memory_space<vmem>>, vector<64x256xf32>,
    %cst_129 = arith.constant 0.000000e+00 : f32
    %197 = vector.broadcast %cst_129 : f32 to vector<64x256xf32>
    %c0_130 = arith.constant 0 : index
    %c0_131 = arith.constant 0 : index
    %198 = vector.load %arg13[%c0_130, %c0_131] : memref<64x290xf32, #tpu.memory_space<vmem>>, vector<64x256xf32>
    %cst_132 = arith.constant 0.000000e+00 : f32
    %199 = vector.shape_cast %21 : vector<1x256xi1> to vector<1x256xi1>
    %200 = vector.broadcast %199 : vector<1x256xi1> to vector<64x256xi1>
    %201 = vector.broadcast %cst_132 : f32 to vector<64x256xf32>
    %202 = arith.select %200, %198, %201 : vector<64x256xi1>, vector<64x256xf32>
    %c0_133 = arith.constant 0 : index
    %c0_134 = arith.constant 0 : index
    %c0_135 = arith.constant 0 : index
    %203 = vector.load %arg6[%c0_133, %c0_134, %c0_135] : memref<9x64x64xbf16, #tpu.memory_space<vmem>>, vector<1x64x64xbf16>
    %204 = vector.shape_cast %203 : vector<1x64x64xbf16> to vector<64x64xbf16>
    %205 = arith.truncf %202 : vector<64x256xf32> to vector<64x256xbf16>
    %cst_136 = arith.constant dense<0.000000e+00> : vector<64x256xf32>
    %206 = tpu.matmul %204, %205, %cst_136 {dimension_numbers = #tpu.dot_dimension_numbers<[1], [0], [0], [1], [0, 0, 1, 1], [], []>} : vector<64x64xbf16>, vector<64x256xbf16>, vector<64x256xf32> -> vector<64x256xf32>
    %207 = arith.addf %197, %206 : vector<64x256xf32>
    %c0_137 = arith.constant 0 : index
    %c1_138 = arith.constant 1 : index
    %208 = vector.load %arg13[%c0_137, %c1_138] : memref<64x290xf32, #tpu.memory_space<vmem>>, vector<64x256xf32>
    %c1_139 = arith.constant 1 : index
    %c0_140 = arith.constant 0 : index
    %c0_141 = arith.constant 0 : index
    %209 = vector.load %arg6[%c1_139, %c0_140, %c0_141] : memref<9x64x64xbf16, #tpu.memory_space<vmem>>, vector<1x64x64xbf16>
    %210 = vector.shape_cast %209 : vector<1x64x64xbf16> to vector<64x64xbf16>
    %211 = arith.truncf %208 : vector<64x256xf32> to vector<64x256xbf16>
    %cst_142 = arith.constant dense<0.000000e+00> : vector<64x256xf32>
    %212 = tpu.matmul %210, %211, %cst_142 {dimension_numbers = #tpu.dot_dimension_numbers<[1], [0], [0], [1], [0, 0, 1, 1], [], []>} : vector<64x64xbf16>, vector<64x256xbf16>, vector<64x256xf32> -> vector<64x256xf32>
    %213 = arith.addf %207, %212 : vector<64x256xf32>
    %c0_143 = arith.constant 0 : index
    %c2_144 = arith.constant 2 : index
    %214 = vector.load %arg13[%c0_143, %c2_144] : memref<64x290xf32, #tpu.memory_space<vmem>>, vector<64x256xf32>
    %cst_145 = arith.constant 0.000000e+00 : f32
    %215 = vector.shape_cast %23 : vector<1x256xi1> to vector<1x256xi1>
    %216 = vector.broadcast %215 : vector<1x256xi1> to vector<64x256xi1>
    %217 = vector.broadcast %cst_145 : f32 to vector<64x256xf32>
    %218 = arith.select %216, %214, %217 : vector<64x256xi1>, vector<64x256xf32>
    %c2_146 = arith.constant 2 : index
    %c0_147 = arith.constant 0 : index
    %c0_148 = arith.constant 0 : index
    %219 = vector.load %arg6[%c2_146, %c0_147, %c0_148] : memref<9x64x64xbf16, #tpu.memory_space<vmem>>, vector<1x64x64xbf16>
    %220 = vector.shape_cast %219 : vector<1x64x64xbf16> to vector<64x64xbf16>
    %221 = arith.truncf %218 : vector<64x256xf32> to vector<64x256xbf16>
    %cst_149 = arith.constant dense<0.000000e+00> : vector<64x256xf32>
    %222 = tpu.matmul %220, %221, %cst_149 {dimension_numbers = #tpu.dot_dimension_numbers<[1], [0], [0], [1], [0, 0, 1, 1], [], []>} : vector<64x64xbf16>, vector<64x256xbf16>, vector<64x256xf32> -> vector<64x256xf32>
    %223 = arith.addf %213, %222 : vector<64x256xf32>
    %c0_150 = arith.constant 0 : index
    %c16_151 = arith.constant 16 : index
    %224 = vector.load %arg13[%c0_150, %c16_151] : memref<64x290xf32, #tpu.memory_space<vmem>>, vector<64x256xf32>
    %cst_152 = arith.constant 0.000000e+00 : f32
    %225 = vector.shape_cast %21 : vector<1x256xi1> to vector<1x256xi1>
    %226 = vector.broadcast %225 : vector<1x256xi1> to vector<64x256xi1>
    %227 = vector.broadcast %cst_152 : f32 to vector<64x256xf32>
    %228 = arith.select %226, %224, %227 : vector<64x256xi1>, vector<64x256xf32>
    %c3_153 = arith.constant 3 : index
    %c0_154 = arith.constant 0 : index
    %c0_155 = arith.constant 0 : index
    %229 = vector.load %arg6[%c3_153, %c0_154, %c0_155] : memref<9x64x64xbf16, #tpu.memory_space<vmem>>, vector<1x64x64xbf16>
    %230 = vector.shape_cast %229 : vector<1x64x64xbf16> to vector<64x64xbf16>
    %231 = arith.truncf %228 : vector<64x256xf32> to vector<64x256xbf16>
    %cst_156 = arith.constant dense<0.000000e+00> : vector<64x256xf32>
    %232 = tpu.matmul %230, %231, %cst_156 {dimension_numbers = #tpu.dot_dimension_numbers<[1], [0], [0], [1], [0, 0, 1, 1], [], []>} : vector<64x64xbf16>, vector<64x256xbf16>, vector<64x256xf32> -> vector<64x256xf32>
    %233 = arith.addf %223, %232 : vector<64x256xf32>
    %c0_157 = arith.constant 0 : index
    %c17_158 = arith.constant 17 : index
    %234 = vector.load %arg13[%c0_157, %c17_158] : memref<64x290xf32, #tpu.memory_space<vmem>>, vector<64x256xf32>
    %c4_159 = arith.constant 4 : index
    %c0_160 = arith.constant 0 : index
    %c0_161 = arith.constant 0 : index
    %235 = vector.load %arg6[%c4_159, %c0_160, %c0_161] : memref<9x64x64xbf16, #tpu.memory_space<vmem>>, vector<1x64x64xbf16>
    %236 = vector.shape_cast %235 : vector<1x64x64xbf16> to vector<64x64xbf16>
    %237 = arith.truncf %234 : vector<64x256xf32> to vector<64x256xbf16>
    %cst_162 = arith.constant dense<0.000000e+00> : vector<64x256xf32>
    %238 = tpu.matmul %236, %237, %cst_162 {dimension_numbers = #tpu.dot_dimension_numbers<[1], [0], [0], [1], [0, 0, 1, 1], [], []>} : vector<64x64xbf16>, vector<64x256xbf16>, vector<64x256xf32> -> vector<64x256xf32>
    %239 = arith.addf %233, %238 : vector<64x256xf32>
    %c0_163 = arith.constant 0 : index
    %c18_164 = arith.constant 18 : index
    %240 = vector.load %arg13[%c0_163, %c18_164] : memref<64x290xf32, #tpu.memory_space<vmem>>, vector<64x256xf32>
    %cst_165 = arith.constant 0.000000e+00 : f32
    %241 = vector.shape_cast %23 : vector<1x256xi1> to vector<1x256xi1>
    %242 = vector.broadcast %241 : vector<1x256xi1> to vector<64x256xi1>
    %243 = vector.broadcast %cst_165 : f32 to vector<64x256xf32>
    %244 = arith.select %242, %240, %243 : vector<64x256xi1>, vector<64x256xf32>
    %c5_166 = arith.constant 5 : index
    %c0_167 = arith.constant 0 : index
    %c0_168 = arith.constant 0 : index
    %245 = vector.load %arg6[%c5_166, %c0_167, %c0_168] : memref<9x64x64xbf16, #tpu.memory_space<vmem>>, vector<1x64x64xbf16>
    %246 = vector.shape_cast %245 : vector<1x64x64xbf16> to vector<64x64xbf16>
    %247 = arith.truncf %244 : vector<64x256xf32> to vector<64x256xbf16>
    %cst_169 = arith.constant dense<0.000000e+00> : vector<64x256xf32>
    %248 = tpu.matmul %246, %247, %cst_169 {dimension_numbers = #tpu.dot_dimension_numbers<[1], [0], [0], [1], [0, 0, 1, 1], [], []>} : vector<64x64xbf16>, vector<64x256xbf16>, vector<64x256xf32> -> vector<64x256xf32>
    %249 = arith.addf %239, %248 : vector<64x256xf32>
    %c0_170 = arith.constant 0 : index
    %c32_171 = arith.constant 32 : index
    %250 = vector.load %arg13[%c0_170, %c32_171] : memref<64x290xf32, #tpu.memory_space<vmem>>, vector<64x256xf32>
    %cst_172 = arith.constant 0.000000e+00 : f32
    %251 = vector.shape_cast %21 : vector<1x256xi1> to vector<1x256xi1>
    %252 = vector.broadcast %251 : vector<1x256xi1> to vector<64x256xi1>
    %253 = vector.broadcast %cst_172 : f32 to vector<64x256xf32>
    %254 = arith.select %252, %250, %253 : vector<64x256xi1>, vector<64x256xf32>
    %c6_173 = arith.constant 6 : index
    %c0_174 = arith.constant 0 : index
    %c0_175 = arith.constant 0 : index
    %255 = vector.load %arg6[%c6_173, %c0_174, %c0_175] : memref<9x64x64xbf16, #tpu.memory_space<vmem>>, vector<1x64x64xbf16>
    %256 = vector.shape_cast %255 : vector<1x64x64xbf16> to vector<64x64xbf16>
    %257 = arith.truncf %254 : vector<64x256xf32> to vector<64x256xbf16>
    %cst_176 = arith.constant dense<0.000000e+00> : vector<64x256xf32>
    %258 = tpu.matmul %256, %257, %cst_176 {dimension_numbers = #tpu.dot_dimension_numbers<[1], [0], [0], [1], [0, 0, 1, 1], [], []>} : vector<64x64xbf16>, vector<64x256xbf16>, vector<64x256xf32> -> vector<64x256xf32>
    %259 = arith.addf %249, %258 : vector<64x256xf32>
    %c0_177 = arith.constant 0 : index
    %c33_178 = arith.constant 33 : index
    %260 = vector.load %arg13[%c0_177, %c33_178] : memref<64x290xf32, #tpu.memory_space<vmem>>, vector<64x256xf32>
    %c7_179 = arith.constant 7 : index
    %c0_180 = arith.constant 0 : index
    %c0_181 = arith.constant 0 : index
    %261 = vector.load %arg6[%c7_179, %c0_180, %c0_181] : memref<9x64x64xbf16, #tpu.memory_space<vmem>>, vector<1x64x64xbf16>
    %262 = vector.shape_cast %261 : vector<1x64x64xbf16> to vector<64x64xbf16>
    %263 = arith.truncf %260 : vector<64x256xf32> to vector<64x256xbf16>
    %cst_182 = arith.constant dense<0.000000e+00> : vector<64x256xf32>
    %264 = tpu.matmul %262, %263, %cst_182 {dimension_numbers = #tpu.dot_dimension_numbers<[1], [0], [0], [1], [0, 0, 1, 1], [], []>} : vector<64x64xbf16>, vector<64x256xbf16>, vector<64x256xf32> -> vector<64x256xf32>
    %265 = arith.addf %259, %264 : vector<64x256xf32>
    %c0_183 = arith.constant 0 : index
    %c34_184 = arith.constant 34 : index
    %266 = vector.load %arg13[%c0_183, %c34_184] : memref<64x290xf32, #tpu.memory_space<vmem>>, vector<64x256xf32>
    %cst_185 = arith.constant 0.000000e+00 : f32
    %267 = vector.shape_cast %23 : vector<1x256xi1> to vector<1x256xi1>
    %268 = vector.broadcast %267 : vector<1x256xi1> to vector<64x256xi1>
    %269 = vector.broadcast %cst_185 : f32 to vector<64x256xf32>
    %270 = arith.select %268, %266, %269 : vector<64x256xi1>, vector<64x256xf32>
    %c8_186 = arith.constant 8 : index
    %c0_187 = arith.constant 0 : index
    %c0_188 = arith.constant 0 : index
    %271 = vector.load %arg6[%c8_186, %c0_187, %c0_188] : memref<9x64x64xbf16, #tpu.memory_space<vmem>>, vector<1x64x64xbf16>
    %272 = vector.shape_cast %271 : vector<1x64x64xbf16> to vector<64x64xbf16>
    %273 = arith.truncf %270 : vector<64x256xf32> to vector<64x256xbf16>
    %cst_189 = arith.constant dense<0.000000e+00> : vector<64x256xf32>
    %274 = tpu.matmul %272, %273, %cst_189 {dimension_numbers = #tpu.dot_dimension_numbers<[1], [0], [0], [1], [0, 0, 1, 1], [], []>} : vector<64x64xbf16>, vector<64x256xbf16>, vector<64x256xf32> -> vector<64x256xf32>
    %275 = arith.addf %265, %274 : vector<64x256xf32>
    %c0_190 = arith.constant 0 : index
    %c0_191 = arith.constant 0 : index
    %276 = vector.load %arg7[%c0_190, %c0_191] : memref<64x1xf32, #tpu.memory_space<vmem>>, vector<64x1xf32>
    %277 = vector.broadcast %276 : vector<64x1xf32> to vector<64x256xf32>
    %278 = arith.addf %275, %277 : vector<64x256xf32>
    %cst_192 = arith.constant 0.000000e+00 : f32
    %279 = vector.broadcast %cst_192 : f32 to vector<64x256xf32>
    %280 = arith.maximumf %278, %279 : vector<64x256xf32>
    %c0_193 = arith.constant 0 : index
    %c17_194 = arith.constant 17 : index
    %281 = vector.load %arg13[%c0_193, %c17_194] : memref<64x290xf32, #tpu.memory_space<vmem>>, vector<64x256xf32>
    tpu.vector_store %arg13[%c0_193, %c17_194], %280 {strides = array<i32>} : memref<64x290xf32, #tpu.memory_space<vmem>>, vector<64x256xf32>,
    %cst_195 = arith.constant 0.000000e+00 : f32
    %282 = vector.broadcast %cst_195 : f32 to vector<64x256xf32>
    %c0_196 = arith.constant 0 : index
    %c0_197 = arith.constant 0 : index
    %283 = vector.load %arg13[%c0_196, %c0_197] : memref<64x290xf32, #tpu.memory_space<vmem>>, vector<64x256xf32>
    %cst_198 = arith.constant 0.000000e+00 : f32
    %284 = vector.shape_cast %21 : vector<1x256xi1> to vector<1x256xi1>
    %285 = vector.broadcast %284 : vector<1x256xi1> to vector<64x256xi1>
    %286 = vector.broadcast %cst_198 : f32 to vector<64x256xf32>
    %287 = arith.select %285, %283, %286 : vector<64x256xi1>, vector<64x256xf32>
    %c0_199 = arith.constant 0 : index
    %c0_200 = arith.constant 0 : index
    %c0_201 = arith.constant 0 : index
    %288 = vector.load %arg8[%c0_199, %c0_200, %c0_201] : memref<9x64x64xbf16, #tpu.memory_space<vmem>>, vector<1x64x64xbf16>
    %289 = vector.shape_cast %288 : vector<1x64x64xbf16> to vector<64x64xbf16>
    %290 = arith.truncf %287 : vector<64x256xf32> to vector<64x256xbf16>
    %cst_202 = arith.constant dense<0.000000e+00> : vector<64x256xf32>
    %291 = tpu.matmul %289, %290, %cst_202 {dimension_numbers = #tpu.dot_dimension_numbers<[1], [0], [0], [1], [0, 0, 1, 1], [], []>} : vector<64x64xbf16>, vector<64x256xbf16>, vector<64x256xf32> -> vector<64x256xf32>
    %292 = arith.addf %282, %291 : vector<64x256xf32>
    %c0_203 = arith.constant 0 : index
    %c1_204 = arith.constant 1 : index
    %293 = vector.load %arg13[%c0_203, %c1_204] : memref<64x290xf32, #tpu.memory_space<vmem>>, vector<64x256xf32>
    %c1_205 = arith.constant 1 : index
    %c0_206 = arith.constant 0 : index
    %c0_207 = arith.constant 0 : index
    %294 = vector.load %arg8[%c1_205, %c0_206, %c0_207] : memref<9x64x64xbf16, #tpu.memory_space<vmem>>, vector<1x64x64xbf16>
    %295 = vector.shape_cast %294 : vector<1x64x64xbf16> to vector<64x64xbf16>
    %296 = arith.truncf %293 : vector<64x256xf32> to vector<64x256xbf16>
    %cst_208 = arith.constant dense<0.000000e+00> : vector<64x256xf32>
    %297 = tpu.matmul %295, %296, %cst_208 {dimension_numbers = #tpu.dot_dimension_numbers<[1], [0], [0], [1], [0, 0, 1, 1], [], []>} : vector<64x64xbf16>, vector<64x256xbf16>, vector<64x256xf32> -> vector<64x256xf32>
    %298 = arith.addf %292, %297 : vector<64x256xf32>
    %c0_209 = arith.constant 0 : index
    %c2_210 = arith.constant 2 : index
    %299 = vector.load %arg13[%c0_209, %c2_210] : memref<64x290xf32, #tpu.memory_space<vmem>>, vector<64x256xf32>
    %cst_211 = arith.constant 0.000000e+00 : f32
    %300 = vector.shape_cast %23 : vector<1x256xi1> to vector<1x256xi1>
    %301 = vector.broadcast %300 : vector<1x256xi1> to vector<64x256xi1>
    %302 = vector.broadcast %cst_211 : f32 to vector<64x256xf32>
    %303 = arith.select %301, %299, %302 : vector<64x256xi1>, vector<64x256xf32>
    %c2_212 = arith.constant 2 : index
    %c0_213 = arith.constant 0 : index
    %c0_214 = arith.constant 0 : index
    %304 = vector.load %arg8[%c2_212, %c0_213, %c0_214] : memref<9x64x64xbf16, #tpu.memory_space<vmem>>, vector<1x64x64xbf16>
    %305 = vector.shape_cast %304 : vector<1x64x64xbf16> to vector<64x64xbf16>
    %306 = arith.truncf %303 : vector<64x256xf32> to vector<64x256xbf16>
    %cst_215 = arith.constant dense<0.000000e+00> : vector<64x256xf32>
    %307 = tpu.matmul %305, %306, %cst_215 {dimension_numbers = #tpu.dot_dimension_numbers<[1], [0], [0], [1], [0, 0, 1, 1], [], []>} : vector<64x64xbf16>, vector<64x256xbf16>, vector<64x256xf32> -> vector<64x256xf32>
    %308 = arith.addf %298, %307 : vector<64x256xf32>
    %c0_216 = arith.constant 0 : index
    %c16_217 = arith.constant 16 : index
    %309 = vector.load %arg13[%c0_216, %c16_217] : memref<64x290xf32, #tpu.memory_space<vmem>>, vector<64x256xf32>
    %cst_218 = arith.constant 0.000000e+00 : f32
    %310 = vector.shape_cast %21 : vector<1x256xi1> to vector<1x256xi1>
    %311 = vector.broadcast %310 : vector<1x256xi1> to vector<64x256xi1>
    %312 = vector.broadcast %cst_218 : f32 to vector<64x256xf32>
    %313 = arith.select %311, %309, %312 : vector<64x256xi1>, vector<64x256xf32>
    %c3_219 = arith.constant 3 : index
    %c0_220 = arith.constant 0 : index
    %c0_221 = arith.constant 0 : index
    %314 = vector.load %arg8[%c3_219, %c0_220, %c0_221] : memref<9x64x64xbf16, #tpu.memory_space<vmem>>, vector<1x64x64xbf16>
    %315 = vector.shape_cast %314 : vector<1x64x64xbf16> to vector<64x64xbf16>
    %316 = arith.truncf %313 : vector<64x256xf32> to vector<64x256xbf16>
    %cst_222 = arith.constant dense<0.000000e+00> : vector<64x256xf32>
    %317 = tpu.matmul %315, %316, %cst_222 {dimension_numbers = #tpu.dot_dimension_numbers<[1], [0], [0], [1], [0, 0, 1, 1], [], []>} : vector<64x64xbf16>, vector<64x256xbf16>, vector<64x256xf32> -> vector<64x256xf32>
    %318 = arith.addf %308, %317 : vector<64x256xf32>
    %c0_223 = arith.constant 0 : index
    %c17_224 = arith.constant 17 : index
    %319 = vector.load %arg13[%c0_223, %c17_224] : memref<64x290xf32, #tpu.memory_space<vmem>>, vector<64x256xf32>
    %c4_225 = arith.constant 4 : index
    %c0_226 = arith.constant 0 : index
    %c0_227 = arith.constant 0 : index
    %320 = vector.load %arg8[%c4_225, %c0_226, %c0_227] : memref<9x64x64xbf16, #tpu.memory_space<vmem>>, vector<1x64x64xbf16>
    %321 = vector.shape_cast %320 : vector<1x64x64xbf16> to vector<64x64xbf16>
    %322 = arith.truncf %319 : vector<64x256xf32> to vector<64x256xbf16>
    %cst_228 = arith.constant dense<0.000000e+00> : vector<64x256xf32>
    %323 = tpu.matmul %321, %322, %cst_228 {dimension_numbers = #tpu.dot_dimension_numbers<[1], [0], [0], [1], [0, 0, 1, 1], [], []>} : vector<64x64xbf16>, vector<64x256xbf16>, vector<64x256xf32> -> vector<64x256xf32>
    %324 = arith.addf %318, %323 : vector<64x256xf32>
    %c0_229 = arith.constant 0 : index
    %c18_230 = arith.constant 18 : index
    %325 = vector.load %arg13[%c0_229, %c18_230] : memref<64x290xf32, #tpu.memory_space<vmem>>, vector<64x256xf32>
    %cst_231 = arith.constant 0.000000e+00 : f32
    %326 = vector.shape_cast %23 : vector<1x256xi1> to vector<1x256xi1>
    %327 = vector.broadcast %326 : vector<1x256xi1> to vector<64x256xi1>
    %328 = vector.broadcast %cst_231 : f32 to vector<64x256xf32>
    %329 = arith.select %327, %325, %328 : vector<64x256xi1>, vector<64x256xf32>
    %c5_232 = arith.constant 5 : index
    %c0_233 = arith.constant 0 : index
    %c0_234 = arith.constant 0 : index
    %330 = vector.load %arg8[%c5_232, %c0_233, %c0_234] : memref<9x64x64xbf16, #tpu.memory_space<vmem>>, vector<1x64x64xbf16>
    %331 = vector.shape_cast %330 : vector<1x64x64xbf16> to vector<64x64xbf16>
    %332 = arith.truncf %329 : vector<64x256xf32> to vector<64x256xbf16>
    %cst_235 = arith.constant dense<0.000000e+00> : vector<64x256xf32>
    %333 = tpu.matmul %331, %332, %cst_235 {dimension_numbers = #tpu.dot_dimension_numbers<[1], [0], [0], [1], [0, 0, 1, 1], [], []>} : vector<64x64xbf16>, vector<64x256xbf16>, vector<64x256xf32> -> vector<64x256xf32>
    %334 = arith.addf %324, %333 : vector<64x256xf32>
    %c0_236 = arith.constant 0 : index
    %c32_237 = arith.constant 32 : index
    %335 = vector.load %arg13[%c0_236, %c32_237] : memref<64x290xf32, #tpu.memory_space<vmem>>, vector<64x256xf32>
    %cst_238 = arith.constant 0.000000e+00 : f32
    %336 = vector.shape_cast %21 : vector<1x256xi1> to vector<1x256xi1>
    %337 = vector.broadcast %336 : vector<1x256xi1> to vector<64x256xi1>
    %338 = vector.broadcast %cst_238 : f32 to vector<64x256xf32>
    %339 = arith.select %337, %335, %338 : vector<64x256xi1>, vector<64x256xf32>
    %c6_239 = arith.constant 6 : index
    %c0_240 = arith.constant 0 : index
    %c0_241 = arith.constant 0 : index
    %340 = vector.load %arg8[%c6_239, %c0_240, %c0_241] : memref<9x64x64xbf16, #tpu.memory_space<vmem>>, vector<1x64x64xbf16>
    %341 = vector.shape_cast %340 : vector<1x64x64xbf16> to vector<64x64xbf16>
    %342 = arith.truncf %339 : vector<64x256xf32> to vector<64x256xbf16>
    %cst_242 = arith.constant dense<0.000000e+00> : vector<64x256xf32>
    %343 = tpu.matmul %341, %342, %cst_242 {dimension_numbers = #tpu.dot_dimension_numbers<[1], [0], [0], [1], [0, 0, 1, 1], [], []>} : vector<64x64xbf16>, vector<64x256xbf16>, vector<64x256xf32> -> vector<64x256xf32>
    %344 = arith.addf %334, %343 : vector<64x256xf32>
    %c0_243 = arith.constant 0 : index
    %c33_244 = arith.constant 33 : index
    %345 = vector.load %arg13[%c0_243, %c33_244] : memref<64x290xf32, #tpu.memory_space<vmem>>, vector<64x256xf32>
    %c7_245 = arith.constant 7 : index
    %c0_246 = arith.constant 0 : index
    %c0_247 = arith.constant 0 : index
    %346 = vector.load %arg8[%c7_245, %c0_246, %c0_247] : memref<9x64x64xbf16, #tpu.memory_space<vmem>>, vector<1x64x64xbf16>
    %347 = vector.shape_cast %346 : vector<1x64x64xbf16> to vector<64x64xbf16>
    %348 = arith.truncf %345 : vector<64x256xf32> to vector<64x256xbf16>
    %cst_248 = arith.constant dense<0.000000e+00> : vector<64x256xf32>
    %349 = tpu.matmul %347, %348, %cst_248 {dimension_numbers = #tpu.dot_dimension_numbers<[1], [0], [0], [1], [0, 0, 1, 1], [], []>} : vector<64x64xbf16>, vector<64x256xbf16>, vector<64x256xf32> -> vector<64x256xf32>
    %350 = arith.addf %344, %349 : vector<64x256xf32>
    %c0_249 = arith.constant 0 : index
    %c34_250 = arith.constant 34 : index
    %351 = vector.load %arg13[%c0_249, %c34_250] : memref<64x290xf32, #tpu.memory_space<vmem>>, vector<64x256xf32>
    %cst_251 = arith.constant 0.000000e+00 : f32
    %352 = vector.shape_cast %23 : vector<1x256xi1> to vector<1x256xi1>
    %353 = vector.broadcast %352 : vector<1x256xi1> to vector<64x256xi1>
    %354 = vector.broadcast %cst_251 : f32 to vector<64x256xf32>
    %355 = arith.select %353, %351, %354 : vector<64x256xi1>, vector<64x256xf32>
    %c8_252 = arith.constant 8 : index
    %c0_253 = arith.constant 0 : index
    %c0_254 = arith.constant 0 : index
    %356 = vector.load %arg8[%c8_252, %c0_253, %c0_254] : memref<9x64x64xbf16, #tpu.memory_space<vmem>>, vector<1x64x64xbf16>
    %357 = vector.shape_cast %356 : vector<1x64x64xbf16> to vector<64x64xbf16>
    %358 = arith.truncf %355 : vector<64x256xf32> to vector<64x256xbf16>
    %cst_255 = arith.constant dense<0.000000e+00> : vector<64x256xf32>
    %359 = tpu.matmul %357, %358, %cst_255 {dimension_numbers = #tpu.dot_dimension_numbers<[1], [0], [0], [1], [0, 0, 1, 1], [], []>} : vector<64x64xbf16>, vector<64x256xbf16>, vector<64x256xf32> -> vector<64x256xf32>
    %360 = arith.addf %350, %359 : vector<64x256xf32>
    %c0_256 = arith.constant 0 : index
    %c0_257 = arith.constant 0 : index
    %361 = vector.load %arg9[%c0_256, %c0_257] : memref<64x1xf32, #tpu.memory_space<vmem>>, vector<64x1xf32>
    %362 = vector.broadcast %361 : vector<64x1xf32> to vector<64x256xf32>
    %363 = arith.addf %360, %362 : vector<64x256xf32>
    %cst_258 = arith.constant 0.000000e+00 : f32
    %364 = vector.broadcast %cst_258 : f32 to vector<64x256xf32>
    %365 = arith.maximumf %363, %364 : vector<64x256xf32>
    %c0_259 = arith.constant 0 : index
    %c17_260 = arith.constant 17 : index
    %366 = vector.load %arg13[%c0_259, %c17_260] : memref<64x290xf32, #tpu.memory_space<vmem>>, vector<64x256xf32>
    tpu.vector_store %arg13[%c0_259, %c17_260], %365 {strides = array<i32>} : memref<64x290xf32, #tpu.memory_space<vmem>>, vector<64x256xf32>,
    %cst_261 = arith.constant 0.000000e+00 : f32
    %367 = vector.broadcast %cst_261 : f32 to vector<3x256xf32>
    %c0_262 = arith.constant 0 : index
    %c0_263 = arith.constant 0 : index
    %368 = vector.load %arg13[%c0_262, %c0_263] : memref<64x290xf32, #tpu.memory_space<vmem>>, vector<64x256xf32>
    %cst_264 = arith.constant 0.000000e+00 : f32
    %369 = vector.shape_cast %21 : vector<1x256xi1> to vector<1x256xi1>
    %370 = vector.broadcast %369 : vector<1x256xi1> to vector<64x256xi1>
    %371 = vector.broadcast %cst_264 : f32 to vector<64x256xf32>
    %372 = arith.select %370, %368, %371 : vector<64x256xi1>, vector<64x256xf32>
    %c0_265 = arith.constant 0 : index
    %c0_266 = arith.constant 0 : index
    %c0_267 = arith.constant 0 : index
    %373 = vector.load %arg10[%c0_265, %c0_266, %c0_267] : memref<9x3x64xbf16, #tpu.memory_space<vmem>>, vector<1x3x64xbf16>
    %374 = vector.shape_cast %373 : vector<1x3x64xbf16> to vector<3x64xbf16>
    %375 = arith.truncf %372 : vector<64x256xf32> to vector<64x256xbf16>
    %cst_268 = arith.constant dense<0.000000e+00> : vector<3x256xf32>
    %376 = tpu.matmul %374, %375, %cst_268 {dimension_numbers = #tpu.dot_dimension_numbers<[1], [0], [0], [1], [0, 0, 1, 1], [], []>} : vector<3x64xbf16>, vector<64x256xbf16>, vector<3x256xf32> -> vector<3x256xf32>
    %377 = arith.addf %367, %376 : vector<3x256xf32>
    %c0_269 = arith.constant 0 : index
    %c1_270 = arith.constant 1 : index
    %378 = vector.load %arg13[%c0_269, %c1_270] : memref<64x290xf32, #tpu.memory_space<vmem>>, vector<64x256xf32>
    %c1_271 = arith.constant 1 : index
    %c0_272 = arith.constant 0 : index
    %c0_273 = arith.constant 0 : index
    %379 = vector.load %arg10[%c1_271, %c0_272, %c0_273] : memref<9x3x64xbf16, #tpu.memory_space<vmem>>, vector<1x3x64xbf16>
    %380 = vector.shape_cast %379 : vector<1x3x64xbf16> to vector<3x64xbf16>
    %381 = arith.truncf %378 : vector<64x256xf32> to vector<64x256xbf16>
    %cst_274 = arith.constant dense<0.000000e+00> : vector<3x256xf32>
    %382 = tpu.matmul %380, %381, %cst_274 {dimension_numbers = #tpu.dot_dimension_numbers<[1], [0], [0], [1], [0, 0, 1, 1], [], []>} : vector<3x64xbf16>, vector<64x256xbf16>, vector<3x256xf32> -> vector<3x256xf32>
    %383 = arith.addf %377, %382 : vector<3x256xf32>
    %c0_275 = arith.constant 0 : index
    %c2_276 = arith.constant 2 : index
    %384 = vector.load %arg13[%c0_275, %c2_276] : memref<64x290xf32, #tpu.memory_space<vmem>>, vector<64x256xf32>
    %cst_277 = arith.constant 0.000000e+00 : f32
    %385 = vector.shape_cast %23 : vector<1x256xi1> to vector<1x256xi1>
    %386 = vector.broadcast %385 : vector<1x256xi1> to vector<64x256xi1>
    %387 = vector.broadcast %cst_277 : f32 to vector<64x256xf32>
    %388 = arith.select %386, %384, %387 : vector<64x256xi1>, vector<64x256xf32>
    %c2_278 = arith.constant 2 : index
    %c0_279 = arith.constant 0 : index
    %c0_280 = arith.constant 0 : index
    %389 = vector.load %arg10[%c2_278, %c0_279, %c0_280] : memref<9x3x64xbf16, #tpu.memory_space<vmem>>, vector<1x3x64xbf16>
    %390 = vector.shape_cast %389 : vector<1x3x64xbf16> to vector<3x64xbf16>
    %391 = arith.truncf %388 : vector<64x256xf32> to vector<64x256xbf16>
    %cst_281 = arith.constant dense<0.000000e+00> : vector<3x256xf32>
    %392 = tpu.matmul %390, %391, %cst_281 {dimension_numbers = #tpu.dot_dimension_numbers<[1], [0], [0], [1], [0, 0, 1, 1], [], []>} : vector<3x64xbf16>, vector<64x256xbf16>, vector<3x256xf32> -> vector<3x256xf32>
    %393 = arith.addf %383, %392 : vector<3x256xf32>
    %c0_282 = arith.constant 0 : index
    %c16_283 = arith.constant 16 : index
    %394 = vector.load %arg13[%c0_282, %c16_283] : memref<64x290xf32, #tpu.memory_space<vmem>>, vector<64x256xf32>
    %cst_284 = arith.constant 0.000000e+00 : f32
    %395 = vector.shape_cast %21 : vector<1x256xi1> to vector<1x256xi1>
    %396 = vector.broadcast %395 : vector<1x256xi1> to vector<64x256xi1>
    %397 = vector.broadcast %cst_284 : f32 to vector<64x256xf32>
    %398 = arith.select %396, %394, %397 : vector<64x256xi1>, vector<64x256xf32>
    %c3_285 = arith.constant 3 : index
    %c0_286 = arith.constant 0 : index
    %c0_287 = arith.constant 0 : index
    %399 = vector.load %arg10[%c3_285, %c0_286, %c0_287] : memref<9x3x64xbf16, #tpu.memory_space<vmem>>, vector<1x3x64xbf16>
    %400 = vector.shape_cast %399 : vector<1x3x64xbf16> to vector<3x64xbf16>
    %401 = arith.truncf %398 : vector<64x256xf32> to vector<64x256xbf16>
    %cst_288 = arith.constant dense<0.000000e+00> : vector<3x256xf32>
    %402 = tpu.matmul %400, %401, %cst_288 {dimension_numbers = #tpu.dot_dimension_numbers<[1], [0], [0], [1], [0, 0, 1, 1], [], []>} : vector<3x64xbf16>, vector<64x256xbf16>, vector<3x256xf32> -> vector<3x256xf32>
    %403 = arith.addf %393, %402 : vector<3x256xf32>
    %c0_289 = arith.constant 0 : index
    %c17_290 = arith.constant 17 : index
    %404 = vector.load %arg13[%c0_289, %c17_290] : memref<64x290xf32, #tpu.memory_space<vmem>>, vector<64x256xf32>
    %c4_291 = arith.constant 4 : index
    %c0_292 = arith.constant 0 : index
    %c0_293 = arith.constant 0 : index
    %405 = vector.load %arg10[%c4_291, %c0_292, %c0_293] : memref<9x3x64xbf16, #tpu.memory_space<vmem>>, vector<1x3x64xbf16>
    %406 = vector.shape_cast %405 : vector<1x3x64xbf16> to vector<3x64xbf16>
    %407 = arith.truncf %404 : vector<64x256xf32> to vector<64x256xbf16>
    %cst_294 = arith.constant dense<0.000000e+00> : vector<3x256xf32>
    %408 = tpu.matmul %406, %407, %cst_294 {dimension_numbers = #tpu.dot_dimension_numbers<[1], [0], [0], [1], [0, 0, 1, 1], [], []>} : vector<3x64xbf16>, vector<64x256xbf16>, vector<3x256xf32> -> vector<3x256xf32>
    %409 = arith.addf %403, %408 : vector<3x256xf32>
    %c0_295 = arith.constant 0 : index
    %c18_296 = arith.constant 18 : index
    %410 = vector.load %arg13[%c0_295, %c18_296] : memref<64x290xf32, #tpu.memory_space<vmem>>, vector<64x256xf32>
    %cst_297 = arith.constant 0.000000e+00 : f32
    %411 = vector.shape_cast %23 : vector<1x256xi1> to vector<1x256xi1>
    %412 = vector.broadcast %411 : vector<1x256xi1> to vector<64x256xi1>
    %413 = vector.broadcast %cst_297 : f32 to vector<64x256xf32>
    %414 = arith.select %412, %410, %413 : vector<64x256xi1>, vector<64x256xf32>
    %c5_298 = arith.constant 5 : index
    %c0_299 = arith.constant 0 : index
    %c0_300 = arith.constant 0 : index
    %415 = vector.load %arg10[%c5_298, %c0_299, %c0_300] : memref<9x3x64xbf16, #tpu.memory_space<vmem>>, vector<1x3x64xbf16>
    %416 = vector.shape_cast %415 : vector<1x3x64xbf16> to vector<3x64xbf16>
    %417 = arith.truncf %414 : vector<64x256xf32> to vector<64x256xbf16>
    %cst_301 = arith.constant dense<0.000000e+00> : vector<3x256xf32>
    %418 = tpu.matmul %416, %417, %cst_301 {dimension_numbers = #tpu.dot_dimension_numbers<[1], [0], [0], [1], [0, 0, 1, 1], [], []>} : vector<3x64xbf16>, vector<64x256xbf16>, vector<3x256xf32> -> vector<3x256xf32>
    %419 = arith.addf %409, %418 : vector<3x256xf32>
    %c0_302 = arith.constant 0 : index
    %c32_303 = arith.constant 32 : index
    %420 = vector.load %arg13[%c0_302, %c32_303] : memref<64x290xf32, #tpu.memory_space<vmem>>, vector<64x256xf32>
    %cst_304 = arith.constant 0.000000e+00 : f32
    %421 = vector.shape_cast %21 : vector<1x256xi1> to vector<1x256xi1>
    %422 = vector.broadcast %421 : vector<1x256xi1> to vector<64x256xi1>
    %423 = vector.broadcast %cst_304 : f32 to vector<64x256xf32>
    %424 = arith.select %422, %420, %423 : vector<64x256xi1>, vector<64x256xf32>
    %c6_305 = arith.constant 6 : index
    %c0_306 = arith.constant 0 : index
    %c0_307 = arith.constant 0 : index
    %425 = vector.load %arg10[%c6_305, %c0_306, %c0_307] : memref<9x3x64xbf16, #tpu.memory_space<vmem>>, vector<1x3x64xbf16>
    %426 = vector.shape_cast %425 : vector<1x3x64xbf16> to vector<3x64xbf16>
    %427 = arith.truncf %424 : vector<64x256xf32> to vector<64x256xbf16>
    %cst_308 = arith.constant dense<0.000000e+00> : vector<3x256xf32>
    %428 = tpu.matmul %426, %427, %cst_308 {dimension_numbers = #tpu.dot_dimension_numbers<[1], [0], [0], [1], [0, 0, 1, 1], [], []>} : vector<3x64xbf16>, vector<64x256xbf16>, vector<3x256xf32> -> vector<3x256xf32>
    %429 = arith.addf %419, %428 : vector<3x256xf32>
    %c0_309 = arith.constant 0 : index
    %c33_310 = arith.constant 33 : index
    %430 = vector.load %arg13[%c0_309, %c33_310] : memref<64x290xf32, #tpu.memory_space<vmem>>, vector<64x256xf32>
    %c7_311 = arith.constant 7 : index
    %c0_312 = arith.constant 0 : index
    %c0_313 = arith.constant 0 : index
    %431 = vector.load %arg10[%c7_311, %c0_312, %c0_313] : memref<9x3x64xbf16, #tpu.memory_space<vmem>>, vector<1x3x64xbf16>
    %432 = vector.shape_cast %431 : vector<1x3x64xbf16> to vector<3x64xbf16>
    %433 = arith.truncf %430 : vector<64x256xf32> to vector<64x256xbf16>
    %cst_314 = arith.constant dense<0.000000e+00> : vector<3x256xf32>
    %434 = tpu.matmul %432, %433, %cst_314 {dimension_numbers = #tpu.dot_dimension_numbers<[1], [0], [0], [1], [0, 0, 1, 1], [], []>} : vector<3x64xbf16>, vector<64x256xbf16>, vector<3x256xf32> -> vector<3x256xf32>
    %435 = arith.addf %429, %434 : vector<3x256xf32>
    %c0_315 = arith.constant 0 : index
    %c34_316 = arith.constant 34 : index
    %436 = vector.load %arg13[%c0_315, %c34_316] : memref<64x290xf32, #tpu.memory_space<vmem>>, vector<64x256xf32>
    %cst_317 = arith.constant 0.000000e+00 : f32
    %437 = vector.shape_cast %23 : vector<1x256xi1> to vector<1x256xi1>
    %438 = vector.broadcast %437 : vector<1x256xi1> to vector<64x256xi1>
    %439 = vector.broadcast %cst_317 : f32 to vector<64x256xf32>
    %440 = arith.select %438, %436, %439 : vector<64x256xi1>, vector<64x256xf32>
    %c8_318 = arith.constant 8 : index
    %c0_319 = arith.constant 0 : index
    %c0_320 = arith.constant 0 : index
    %441 = vector.load %arg10[%c8_318, %c0_319, %c0_320] : memref<9x3x64xbf16, #tpu.memory_space<vmem>>, vector<1x3x64xbf16>
    %442 = vector.shape_cast %441 : vector<1x3x64xbf16> to vector<3x64xbf16>
    %443 = arith.truncf %440 : vector<64x256xf32> to vector<64x256xbf16>
    %cst_321 = arith.constant dense<0.000000e+00> : vector<3x256xf32>
    %444 = tpu.matmul %442, %443, %cst_321 {dimension_numbers = #tpu.dot_dimension_numbers<[1], [0], [0], [1], [0, 0, 1, 1], [], []>} : vector<3x64xbf16>, vector<64x256xbf16>, vector<3x256xf32> -> vector<3x256xf32>
    %445 = arith.addf %435, %444 : vector<3x256xf32>
    %c0_322 = arith.constant 0 : index
    %c0_323 = arith.constant 0 : index
    %446 = vector.load %arg11[%c0_322, %c0_323] : memref<3x1xf32, #tpu.memory_space<vmem>>, vector<3x1xf32>
    %447 = vector.broadcast %446 : vector<3x1xf32> to vector<3x256xf32>
    %448 = arith.addf %445, %447 : vector<3x256xf32>
    %cst_324 = arith.constant 0.000000e+00 : f32
    %449 = vector.broadcast %cst_324 : f32 to vector<3x256xf32>
    %450 = arith.maximumf %448, %449 : vector<3x256xf32>
    %c0_325 = arith.constant 0 : index
    %c0_326 = arith.constant 0 : index
    %c0_327 = arith.constant 0 : index
    %451 = vector.load %arg12[%c0_325, %c0_326, %c0_327] : memref<1x3x256xf32, #tpu.memory_space<vmem>>, vector<1x3x256xf32>
    %452 = vector.shape_cast %451 : vector<1x3x256xf32> to vector<3x256xf32>
    %453 = vector.shape_cast %450 : vector<3x256xf32> to vector<1x3x256xf32>
    tpu.vector_store %arg12[%c0_325, %c0_326, %c0_327], %453 {strides = array<i32>} : memref<1x3x256xf32, #tpu.memory_space<vmem>>, vector<1x3x256xf32>,
    return
  }
  func.func @transform_0(%arg0: i32) -> (i32, i32, i32) {
    %c0_i32 = arith.constant 0 : i32
    %c0_i32_0 = arith.constant 0 : i32
    %c0_i32_1 = arith.constant 0 : i32
    return %arg0, %c0_i32, %c0_i32_0 : i32, i32, i32
  }
  func.func @transform_1(%arg0: i32) -> (i32, i32, i32) {
    %c0_i32 = arith.constant 0 : i32
    %c0_i32_0 = arith.constant 0 : i32
    %c0_i32_1 = arith.constant 0 : i32
    %c0_i32_2 = arith.constant 0 : i32
    return %c0_i32, %c0_i32_0, %c0_i32_1 : i32, i32, i32
  }
  func.func @transform_2(%arg0: i32) -> (i32, i32) {
    %c0_i32 = arith.constant 0 : i32
    %c0_i32_0 = arith.constant 0 : i32
    %c0_i32_1 = arith.constant 0 : i32
    return %c0_i32, %c0_i32_0 : i32, i32
  }
  func.func @transform_3(%arg0: i32) -> (i32, i32, i32) {
    %c0_i32 = arith.constant 0 : i32
    %c0_i32_0 = arith.constant 0 : i32
    %c0_i32_1 = arith.constant 0 : i32
    %c0_i32_2 = arith.constant 0 : i32
    return %c0_i32, %c0_i32_0, %c0_i32_1 : i32, i32, i32
  }
  func.func @transform_4(%arg0: i32) -> (i32, i32) {
    %c0_i32 = arith.constant 0 : i32
    %c0_i32_0 = arith.constant 0 : i32
    %c0_i32_1 = arith.constant 0 : i32
    return %c0_i32, %c0_i32_0 : i32, i32
  }
  func.func @transform_5(%arg0: i32) -> (i32, i32, i32) {
    %c0_i32 = arith.constant 0 : i32
    %c0_i32_0 = arith.constant 0 : i32
    %c0_i32_1 = arith.constant 0 : i32
    %c0_i32_2 = arith.constant 0 : i32
    return %c0_i32, %c0_i32_0, %c0_i32_1 : i32, i32, i32
  }
  func.func @transform_6(%arg0: i32) -> (i32, i32) {
    %c0_i32 = arith.constant 0 : i32
    %c0_i32_0 = arith.constant 0 : i32
    %c0_i32_1 = arith.constant 0 : i32
    return %c0_i32, %c0_i32_0 : i32, i32
  }
  func.func @transform_7(%arg0: i32) -> (i32, i32, i32) {
    %c0_i32 = arith.constant 0 : i32
    %c0_i32_0 = arith.constant 0 : i32
    %c0_i32_1 = arith.constant 0 : i32
    %c0_i32_2 = arith.constant 0 : i32
    return %c0_i32, %c0_i32_0, %c0_i32_1 : i32, i32, i32
  }
  func.func @transform_8(%arg0: i32) -> (i32, i32) {
    %c0_i32 = arith.constant 0 : i32
    %c0_i32_0 = arith.constant 0 : i32
    %c0_i32_1 = arith.constant 0 : i32
    return %c0_i32, %c0_i32_0 : i32, i32
  }
  func.func @transform_9(%arg0: i32) -> (i32, i32, i32) {
    %c0_i32 = arith.constant 0 : i32
    %c0_i32_0 = arith.constant 0 : i32
    %c0_i32_1 = arith.constant 0 : i32
    %c0_i32_2 = arith.constant 0 : i32
    return %c0_i32, %c0_i32_0, %c0_i32_1 : i32, i32, i32
  }
  func.func @transform_10(%arg0: i32) -> (i32, i32) {
    %c0_i32 = arith.constant 0 : i32
    %c0_i32_0 = arith.constant 0 : i32
    %c0_i32_1 = arith.constant 0 : i32
    return %c0_i32, %c0_i32_0 : i32, i32
  }
  func.func @transform_11(%arg0: i32) -> (i32, i32, i32) {
    %c0_i32 = arith.constant 0 : i32
    %c0_i32_0 = arith.constant 0 : i32
    %c0_i32_1 = arith.constant 0 : i32
    return %arg0, %c0_i32, %c0_i32_0 : i32, i32, i32
  }
}

</mosaic_0001>

<bundles_post_ra>
// kernel: den_forward.1
= control target key start
LH: loop header
LB: loop body
LE: loop exit
PB: predicated region body
PF: predicated region fallthrough
CT: control target
= control target key end

     0   :  { %16 = vsyncpa [#allocation4], 0  ;;  %s12000_s17 = smov 0   ;;  %s16723_s0 = inlined_call_operand.vmem [shape: f32[2,3,256], index: 0, kind: input, shape index: {}]   ;;  %s16724_s1 = inlined_call_operand.vmem [shape: bf16[9,64,3], index: 1, kind: input, shape index: {}]   ;;  %s16725_s2 = inlined_call_operand.vmem [shape: f32[64,1], index: 2, kind: input, shape index: {}]   ;;  %s16726_s3 = inlined_call_operand.vmem [shape: bf16[9,64,64], index: 3, kind: input, shape index: {}]   ;;  %s16727_s4 = inlined_call_operand.vmem [shape: f32[64,1], index: 4, kind: input, shape index: {}]   ;;  %s16728_s5 = inlined_call_operand.vmem [shape: bf16[9,64,64], index: 5, kind: input, shape index: {}]   ;;  %s16729_s6 = inlined_call_operand.vmem [shape: f32[64,1], index: 6, kind: input, shape index: {}]   ;;  %s16730_s7 = inlined_call_operand.hbm [shape: bf16[9,64,64], index: 7, kind: input, shape index: {}]   ;;  %s16731_s8 = inlined_call_operand.vmem [shape: f32[64,1], index: 8, kind: input, shape index: {}]   ;;  %s16732_s9 = inlined_call_operand.vmem [shape: bf16[9,3,64], index: 9, kind: input, shape index: {}]   ;;  %s16733_s10 = inlined_call_operand.vmem [shape: f32[3,1], index: 10, kind: input, shape index: {}]   ;;  %s16734_s11 = inlined_call_operand.vmem [shape: f32[2,3,256], index: 11, kind: output, shape index: {}]  }
   0x1 LB: > { %s12006_s18 = sadd.s32 4294967295, %s11923_s17   ;;  %p9394_p0 = scmp.ge.s32.totalorder %s11923_s17, 1  ;;  %s11923_s17 = sphi %s12000_s17, %s22_s17  }
   0x2   : > { %p289_p1 = scmp.lt.s32.totalorder %s11923_s17, 3  ;;  %s11925_s19 = smov [#allocation3]  }
   0x3   : > { %s319_s20 = sshll.u32 %s11925_s19, 4  ;;  %p10490_p3 = scmp.eq.s32.totalorder %s12006_s18, 0  ;;  %s320_s20 = int_to_ptr.vmem [resolvable:$true] %s319_s20 }
   0x4   : > { %p12010_p2 = pnand %p9394_p0, %p289_p1  ;;  %s11898_s22 = scalar_lea.vmem %s320_s20, 4608 }
   0x5   : > { %p11899_p7 = scmp.ne.s32.totalorder %s320_s20, %s11898_s22  ;;  %p11906_p10 = scmp.lt.s32.totalorder %s320_s20, %s320_s20 }
   0x6   : > { %p10486_p4 = pneg %p12010_p2  ;;  %p11907_p11 = scmp.lt.s32.totalorder %s11898_s22, %s11898_s22 }
   0x8   : > { %p10487_p5 = pnand %p10490_p3, %p10486_p4  ;;  %p11908_p12 = por %p11907_p11, %p11906_p10 }
   0xa   : > { %p11889_p6 = pneg %p10487_p5 }
   0xc   : > { %p11901_p8 = pnand %p11899_p7, %p11889_p6 }
   0xe   : > { %p11902_p9 = pneg %p11901_p8 }
  0x10   : > { %p11909_p13 = pnand %p11908_p12, %p11902_p9 }
  0x12   : > { %11912 = shalt.err (!%p11909_p13)
}
  0x13   : > { %s11926_s23 = smov 64   ;;  %s11927_s24 = smov 4  }
  0x14   : > { %10489 = dma.hbm_to_vmem [thread:$0]  (!%p10487_p5), %s16730_s7, 4608, %s320_s20, [#allocation4], %s11926_s23, %s11926_s23, %s11927_s24  }
  0x15   : > { %352 = sbr.rel (%p12010_p2) target bundleno = 3277 (0xccd), region = 64 }
  0x1a   : > { %11918 = dma.done.wait (%p10490_p3), [#allocation4], 4608  }
  0x1b   : > { %11920 = vsyncadd (%p10490_p3), [#allocation4], 4294962688  ;;  %p392_p0 = scmp.lt.s32.totalorder %s12006_s18, 1  ;;  %vm403_vm0 = vcmask 138240   ;;  %v11928_v0 = vmov 0.0   ;;  %vm412_vm1 = vcmask 277640   ;;  %v421_v14 = vlaneseq }
  0x1c   : > { %404 = vst.msk [vmem:[#allocation2] sm:$0xff] %vm403_vm0, %v11928_v0  ;;  %405 = vst.msk [vmem:[#allocation2 + $0x18] sm:$0xff] %vm403_vm0, %v11928_v0  ;;  %s11929_s12 = smov 17   ;;  %vm463_vm2 = vcmask 1042568   ;;  %vm466_vm3 = vcmask 133120   ;;  %s11930_s13 = smov 127  }
  0x1d   : > { %406 = vst.msk [vmem:[#allocation2 + $0x30] sm:$0xff] %vm403_vm0, %v11928_v0  ;;  %407 = vst.msk [vmem:[#allocation2 + $0x48] sm:$0xff] %vm403_vm0, %v11928_v0  ;;  %s17088_s18 = smov (!%p392_p0, %s12006_s18), 1  ;;  %v16736_v10 = vmov 0   ;;  %s11932_s14 = smov 126   ;;  %v422_v15 = vand.u32 127, %v421_v14 }
  0x1e   : > { %408 = vst.msk [vmem:[#allocation2 + $0x60] sm:$0xff] %vm403_vm0, %v11928_v0  ;;  %409 = vst.msk [vmem:[#allocation2 + $0x78] sm:$0xff] %vm403_vm0, %v11928_v0  ;;  %s16735_s27 = sshll.u32 %s17088_s18, 3  ;;  %586 = vmatprep.mubr.bf16.mxu0 %v16736_v10  ;;  %616 = vmatprep.mubr.bf16.mxu1 %v16736_v10  ;;  %s11933_s15 = smov 112   ;;  %v16778_v20 = vmov 0  ;;  %vm544_vm5 = vcmask 1040384  }
  0x1f   : > { %410 = vst.msk [vmem:[#allocation2 + $0x90] sm:$0xff] %vm403_vm0, %v11928_v0  ;;  %411 = vst.msk [vmem:[#allocation2 + $0xa8] sm:$0xff] %vm403_vm0, %v11928_v0  ;;  %s396_s30 = scalar_lea.vmem %s16723_s0, %s16735_s27  ;;  %10541 = vset.pattern.permute.xlu0 %v16736_v10  ;;  %10540 = vset.pattern.permute.xlu1 %v16736_v10  ;;  %s11934_s16 = smov 111   ;;  %v423_v16 = vadd.s32 128, %v422_v15  ;;  %v428_v19 = vand.u32 15, %v422_v15  ;;  %v16781_v23 = vmov 0 }
  0x20   : > { %413 = vst.msk [vmem:[#allocation2 + $0x10] sm:$0xff] %vm412_vm1, %v11928_v0  ;;  %414 = vst.msk [vmem:[#allocation2 + $0x28] sm:$0xff] %vm412_vm1, %v11928_v0  ;;  %v452_v1 = vld [vmem:[%s396_s30] sm:$0x77]  ;;  %s11935_s19 = smov 110   ;;  %s11936_s20 = smov 96  }
  0x21   : > { %415 = vst.msk [vmem:[#allocation2 + $0x40] sm:$0xff] %vm412_vm1, %v11928_v0  ;;  %416 = vst.msk [vmem:[#allocation2 + $0x58] sm:$0xff] %vm412_vm1, %v11928_v0  ;;  %455 = vrot.lane.b32.xlu0 %v452_v1, %s11929_s12  ;;  %v454_v2 = vcombine.high %v452_v1, %v452_v1  ;;  %s11937_s21 = smov 94   ;;  %s11938_s22 = smov 95   ;;  %v435_v17 = vand.u32 15, %v423_v16  ;;  %vm12076_vm6 = vcmp.ne.s32.totalorder %v428_v19, 0 }
  0x22   : > { %417 = vst.msk [vmem:[#allocation2 + $0x70] sm:$0xff] %vm412_vm1, %v11928_v0  ;;  %418 = vst.msk [vmem:[#allocation2 + $0x88] sm:$0xff] %vm412_vm1, %v11928_v0  ;;  %v16782_v23 = vsel %vm12076_vm6, 4294967295, %v16781_v23  ;;  %vm528_vm7 = vcmask 1039360   ;;  %vm545_vm8 = vcmask 1041408   ;;  %v11939_v25 = vmov 65535  }
  0x23   : > { %419 = vst.msk [vmem:[#allocation2 + $0xa0] sm:$0xff] %vm412_vm1, %v11928_v0  ;;  %420 = vst.msk [vmem:[#allocation2 + $0xb8] sm:$0xff] %vm412_vm1, %v11928_v0  ;;  %vm12072_vm4 = vcmp.ne.s32.totalorder %v435_v17, 0  ;;  %v546_v26 = vsel %vm544_vm5, 4294967295, %v11939_v25  ;;  %vm12090_vm9 = vcmp.ne.s32.totalorder %v428_v19, 15  ;;  %v16784_v38 = vmov 0 }
  0x24   : > { %v16779_v20 = vsel %vm12072_vm4, 4294967295, %v16778_v20  ;;  %16783 = vst [vmem:[#allocation7_spill] sm:$0xff] %v16782_v23  ;;  %v12086_v33 = vsel %vm545_vm8, %v546_v26, 0  ;;  %v16785_v38 = vsel %vm12090_vm9, 4294967295, %v16784_v38  ;;  %vm751_vm10 = vcmask 1031168   ;;  %v11743_v41 = vld [vmem:[%s16724_s1 + $0x20] sm:$0xff]   ;;  %vm12654_vm8 = vmpackc.low %vm12072_vm4, %vm12072_vm4 }
  0x25   : > { %457 = vrot.lane.b32.xlu0 %v454_v2, %s11929_s12  ;;  %16780 = vst [vmem:[#allocation6_spill] sm:$0xff] %v16779_v20  ;;  %16786 = vst [vmem:[#allocation8_spill] sm:$0xff] %v16785_v38  ;;  %v11744_v42 = vld [vmem:[%s16724_s1 + $0x38] sm:$0xff]   ;;  %vm531_vm11 = vcmask 23552   ;;  %vm12101_vm12 = vcmp.ne.s32.totalorder %v435_v17, 15  ;;  %v16787_v45 = vmov 0 }
  0x26   : > { %v16788_v45 = vsel %vm12101_vm12, 4294967295, %v16787_v45  ;;  %vm902_vm13 = vcmask 916480   ;;  %vm1198_vm14 = vcmask 900096   ;;  %vm1082_vm15 = vcmask 908288   ;;  %v11745_v2 = vld [vmem:[%s16724_s1 + $0x28] sm:$0xff]   ;;  %v1797_v25 = vld [vmem:[%s16725_s2 + $0x38] sm:$0xff] }
  0x27   : > { %16789 = vst [vmem:[#allocation9_spill] sm:$0xff] %v16788_v45  ;;  %vm1349_vm1 = vcmask 785408   ;;  %v11748_v19 = vld [vmem:[%s16724_s1 + $0x8] sm:$0xff]   ;;  %vm1950_vm5 = vcmask 1047688  }
  0x93   : > { %v456_v3 = vpop.permute.xlu0 %455 }
  0x94   : > { %464 = vst.msk [vmem:[#allocation2] sm:$0x7] %vm463_vm2, %v456_v3  ;;  %vm1529_vm2 = vcmask 777216  }
  0x97   : > { %v458_v4 = vpop.permute.xlu0 %457 }
  0x98   : > { %v459_v5 = vsel %vm403_vm0, %v456_v3, %v458_v4  ;;  %467 = vst.msk [vmem:[#allocation2 + $0x10] sm:$0x7] %vm466_vm3, %v458_v4  ;;  %v11746_v3 = vld [vmem:[%s16724_s1] sm:$0xff]   ;;  %vm1645_vm3 = vcmask 769024  }
  0x99   : > { %465 = vst [vmem:[#allocation2 + $0x8] sm:$0x7] %v459_v5 }
  0x9b   : > { %v468_v6 = vld [vmem:[#allocation2] sm:$0x7] }
  0x9c   : > { %v496_v7 = vpack.c.bf16 %v468_v6, %v468_v6  ;;  %v474_v28 = vsel %vm12076_vm6, %v468_v6, 0.0 }
  0x9d   : > { %v484_v35 = vpack.c.bf16 %v474_v28, %v474_v28  ;;  %v1792_v28 = vld [vmem:[%s16725_s2 + $0x10] sm:$0xff] }
  0x9e   : > { %522 = vrot.lane.b32.xlu0 %v496_v7, %s11930_s13 }
  0x9f   : > { %v486_v11 = vld [vmem:[#allocation2 + $0x10] sm:$0x7]  ;;  %v660_v46 = vand.u32 %v12086_v33, %v484_v35 }
  0xa0   : > { %v469_v8 = vld [vmem:[#allocation2 + $0x8] sm:$0x7]  ;;  %v498_v12 = vpack.c.bf16 %v486_v11, %v486_v11 }
  0xa1   : > { %v497_v9 = vpack.c.bf16 %v469_v8, %v469_v8  ;;  %v10515_v13 = vpack.i.bf16 %v486_v11, %v469_v8  ;;  %v475_v24 = vsel %vm12072_vm4, %v469_v8, 0.0 }
  0xa2   : > { %745 = vrot.lane.b32.xlu0 %v468_v6, %s11932_s14  ;;  %v485_v31 = vpack.c.bf16 %v475_v24, %v475_v24  ;;  %v1796_v24 = vld [vmem:[%s16725_s2 + $0x30] sm:$0xff] }
  0xa3   : > { %524 = vrot.lane.b32.xlu1 %v497_v9, %s11930_s13 }
  0xa4   : > { %v663_v40 = vand.u32 %v12086_v33, %v485_v31  ;;  %v11750_v31 = vld [vmem:[%s16724_s1 + $0x40] sm:$0xff]  }
  0xa6   : > { %896 = vrot.lane.b32.xlu0 %v468_v6, %s11933_s15 }
  0xa7   : > { %526 = vrot.lane.b32.xlu1 %v498_v12, %s11930_s13 }
  0xaa   : > { %1080 = vrot.lane.b32.xlu0 %v498_v12, %s11934_s16 }
  0xab   : > { %10516 = vrot.lane.b32.xlu1 %v10515_v13, %s11932_s14 }
  0xae   : > { %10526 = vrot.lane.b32.xlu0 %v10515_v13, %s11935_s19 }
  0xaf   : > { %10521 = vrot.lane.b32.xlu1 %v10515_v13, %s11933_s15 }
  0xb2   : > { %10531 = vrot.lane.b32.xlu0 %v10515_v13, %s11936_s20 }
  0xb3   : > { %1078 = vrot.lane.b32.xlu1 %v497_v9, %s11934_s16 }
  0xb6   : > { %10536 = vrot.lane.b32.xlu0 %v10515_v13, %s11937_s21 }
  0xb7   : > { %1076 = vrot.lane.b32.xlu1 %v496_v7, %s11934_s16 }
  0xba   : > { %1527 = vrot.lane.b32.xlu0 %v498_v12, %s11938_s22 }
  0xbb   : > { %1192 = vrot.lane.b32.xlu1 %v468_v6, %s11935_s19 }
  0xbe   : > { %1523 = vrot.lane.b32.xlu0 %v496_v7, %s11938_s22 }
  0xbf   : > { %1343 = vrot.lane.b32.xlu1 %v468_v6, %s11936_s20 }
  0xc2   : > { %1835 = vperm.xlu0 %10541, %v1797_v25  }
  0xc3   : > { %1525 = vrot.lane.b32.xlu1 %v497_v9, %s11938_s22 }
  0xc6   : > { %1810 = vperm.xlu0 %10541, %v1792_v28   ;;  %v11770_v28 = vld [vmem:[%s16724_s1 + $0xe0] sm:$0xff]  }
  0xc7   : > { %1639 = vrot.lane.b32.xlu1 %v468_v6, %s11937_s21 }
  0xcb   : > { %1830 = vperm.xlu1 %10540, %v1796_v24   ;;  %v11766_v24 = vld [vmem:[%s16724_s1 + $0xc0] sm:$0xff]  }
 0x110   : > { %v523_v18 = vpop.permute.xlu0 %522 }
 0x114   : > { %v746_v21 = vpop.permute.xlu0 %745 }
 0x115   : > { %v525_v22 = vpop.permute.xlu1 %524 }
 0x116   : > { %v529_v30 = vsel %vm528_vm7, %v523_v18, %v525_v22  ;;  %v11747_v18 = vld [vmem:[%s16724_s1 + $0x30] sm:$0xff]  }
 0x117   : > { %v549_v37 = vand.u32 %v12086_v33, %v529_v30  ;;  %v11749_v30 = vld [vmem:[%s16724_s1 + $0x10] sm:$0xff]  }
 0x118   : > { %v897_v27 = vpop.permute.xlu0 %896 }
 0x119   : > { %v527_v29 = vpop.permute.xlu1 %526 }
 0x11a   : > { %v530_v32 = vsel %vm528_vm7, %v525_v22, %v527_v29 }
 0x11b   : > { %v552_v34 = vand.u32 %v12086_v33, %v530_v32 }
 0x11c   : > { %v1081_v36 = vpop.permute.xlu0 %1080 }
 0x11d   : > { %568 = vmatprep.subr.bf16.mxu0 %v552_v34  ;;  %10480 = vmatprep.subr.bf16.mxu1 %v552_v34  ;;  %v10517_v39 = vpop.permute.xlu1 %10516 }
 0x11e   : > { %v10519_v43 = vunpack.i.h.bf16 %v10517_v39  ;;  %v10518_v44 = vunpack.i.l.bf16 %v10517_v39  ;;  %569 = vmatpush1.bf16.msra.mxu0 %v549_v37  ;;  %10481 = vmatpush1.bf16.msra.mxu1 %v549_v37  ;;  %v1795_v37 = vld [vmem:[%s16725_s2 + $0x28] sm:$0xff]  ;;  %v1790_v39 = vld [vmem:[%s16725_s2] sm:$0xff] }
 0x11f   : > { %679 = vmatprep.subr.bf16.mxu1 %v663_v40  ;;  %1800 = vperm.xlu0 %10541, %v1790_v39  }
 0x120   : > { %v752_v47 = vsel %vm751_vm10, %v746_v21, %v10518_v44  ;;  %v12107_v48 = vpop.permute.xlu0 %10526  ;;  %v753_v49 = vsel %vm751_vm10, %v10518_v44, %v10519_v43  ;;  %v1793_v43 = vld [vmem:[%s16725_s2 + $0x18] sm:$0xff] }
 0x121   : > { %v756_v50 = vsel %vm12090_vm9, %v752_v47, 0.0  ;;  %v10529_v51 = vunpack.i.h.bf16 %v12107_v48  ;;  %v10528_v52 = vunpack.i.l.bf16 %v12107_v48  ;;  %v10522_v53 = vpop.permute.xlu1 %10521  ;;  %9415 = vmatmul.mubr.msk.bf16.vlgmr.msra.gmra.mxu0 %vm531_vm11, %v11743_v41  ;;  %9418 = vmatmul.mubr.msk.bf16.vlgmr.msra.gmra.mxu1 %vm531_vm11, %v11744_v42  ;;  %v757_v54 = vsel %vm12101_vm12, %v753_v49, 0.0  ;;  %v11751_v41 = vld [vmem:[%s16724_s1 + $0x18] sm:$0xff]   ;;  %v11752_v42 = vld [vmem:[%s16724_s1 + $0x48] sm:$0xff]  }
 0x122   : > { %v767_v55 = vpack.c.bf16 %v756_v50, %v756_v50  ;;  %v10524_v56 = vunpack.i.h.bf16 %v10522_v53  ;;  %v10523_v57 = vunpack.i.l.bf16 %v10522_v53  ;;  %680 = vmatpush1.bf16.msra.mxu1 %v660_v46  ;;  %v768_v58 = vpack.c.bf16 %v757_v54, %v757_v54  ;;  %596 = vmatprep.mubr.bf16.mxu0 %v16736_v10 }
 0x123   : > { %697 = vmatprep.mubr.bf16.mxu1 %v16736_v10  ;;  %v1200_v59 = vsel %vm1198_vm14, %v10528_v52, %v10529_v51  ;;  %v11753_v51 = vld [vmem:[%s16724_s1 + $0x50] sm:$0xff]  }
 0x124   : > { %v903_v60 = vsel %vm902_vm13, %v897_v27, %v10523_v57  ;;  %v805_v61 = vand.u32 %v768_v58, %v12086_v33  ;;  %v802_v62 = vand.u32 %v767_v55, %v12086_v33  ;;  %v904_v63 = vsel %vm902_vm13, %v10523_v57, %v10524_v56  ;;  %v12141_v12 = vpop.permute.xlu0 %10531  ;;  %v1794_v27 = vld [vmem:[%s16725_s2 + $0x20] sm:$0xff]  ;;  %v11755_v58 = vld [vmem:[%s16724_s1 + $0x58] sm:$0xff]  }
 0x125   : > { %v907_v0 = vsel %vm12076_vm6, %v903_v60, 0.0  ;;  %v1079_v1 = vpop.permute.xlu1 %1078  ;;  %v908_v4 = vsel %vm12072_vm4, %v904_v63, 0.0  ;;  %v1204_v8 = vsel %vm12101_vm12, %v1200_v59, 0.0  ;;  %v10534_v16 = vunpack.i.h.bf16 %v12141_v12  ;;  %1820 = vperm.xlu1 %10540, %v1794_v27   ;;  %v11756_v59 = vld [vmem:[%s16724_s1 + $0x68] sm:$0xff]  }
 0x126   : > { %v918_v5 = vpack.c.bf16 %v907_v0, %v907_v0  ;;  %v1084_v6 = vsel %vm1082_vm15, %v1079_v1, %v1081_v36  ;;  %821 = vmatprep.subr.bf16.mxu0 %v805_v61  ;;  %v919_v7 = vpack.c.bf16 %v908_v4, %v908_v4  ;;  %v1215_v11 = vpack.c.bf16 %v1204_v8, %v1204_v8  ;;  %v1791_v8 = vld [vmem:[%s16725_s2 + $0x8] sm:$0xff] }
 0x127   : > { %822 = vmatpush1.bf16.msra.mxu0 %v802_v62  ;;  %v1101_v9 = vand.u32 %v1084_v6, %v12086_v33  ;;  %v10533_v17 = vunpack.i.l.bf16 %v12141_v12  ;;  %v11759_v6 = vld [vmem:[%s16724_s1 + $0x78] sm:$0xff]   ;;  %v11761_v12 = vld [vmem:[%s16724_s1 + $0x90] sm:$0xff]   ;;  %v11768_v27 = vld [vmem:[%s16724_s1 + $0xc8] sm:$0xff]  }
 0x128   : > { %v956_v13 = vand.u32 %v919_v7, %v12086_v33  ;;  %v953_v14 = vand.u32 %v918_v5, %v12086_v33  ;;  %v1252_v15 = vand.u32 %v1215_v11, %v12086_v33  ;;  %v12210_v46 = vpop.permute.xlu0 %10536  ;;  %v11760_v7 = vld [vmem:[%s16724_s1 + $0x88] sm:$0xff]  }
 0x129   : > { %9416 = vmatmul.mubr.msk.bf16.gmra.mxu0 %vm531_vm11, %v11745_v2  ;;  %9423 = vmatmul.mubr.msk.bf16.vlgmr.msra.gmra.mxu1 %vm531_vm11, %v11746_v3  ;;  %v1351_v21 = vsel %vm1349_vm1, %v10533_v17, %v10534_v16  ;;  %v1077_v22 = vpop.permute.xlu1 %1076  ;;  %v10539_v56 = vunpack.i.h.bf16 %v12210_v46  ;;  %v10538_v57 = vunpack.i.l.bf16 %v12210_v46  ;;  %v11758_v2 = vld [vmem:[%s16724_s1 + $0x80] sm:$0xff]   ;;  %v11763_v16 = vld [vmem:[%s16724_s1 + $0x98] sm:$0xff]  }
 0x12a   : > { %1117 = vmatprep.subr.bf16.mxu0 %v1101_v9  ;;  %972 = vmatprep.subr.bf16.mxu1 %v956_v13  ;;  %v1355_v26 = vsel %vm12072_vm4, %v1351_v21, 0.0  ;;  %v1083_v29 = vsel %vm1082_vm15, %v1077_v22, %v1079_v1  ;;  %v11757_v1 = vld [vmem:[%s16724_s1 + $0x70] sm:$0xff]   ;;  %v11762_v13 = vld [vmem:[%s16724_s1 + $0xa0] sm:$0xff]   ;;  %vm12680_vm4 = vmpackc.low %vm12076_vm6, %vm12076_vm6 }
 0x12b   : > { %973 = vmatpush1.bf16.msra.mxu1 %v953_v14  ;;  %606 = vmatprep.mubr.bf16.mxu0 %v16736_v10  ;;  %v1366_v32 = vpack.c.bf16 %v1355_v26, %v1355_v26  ;;  %v1098_v35 = vand.u32 %v1083_v29, %v12086_v33  ;;  %v1647_v61 = vsel %vm1645_vm3, %v10538_v57, %v10539_v56  ;;  %v11765_v22 = vld [vmem:[%s16724_s1 + $0xb0] sm:$0xff]   ;;  %v11767_v26 = vld [vmem:[%s16724_s1 + $0xb8] sm:$0xff]  }
 0x12c   : > { %1268 = vmatprep.subr.bf16.mxu1 %v1252_v15  ;;  %707 = vmatprep.mubr.bf16.mxu1 %v16736_v10  ;;  %v1528_v48 = vpop.permute.xlu0 %1527  ;;  %v1651_v63 = vsel %vm12101_vm12, %v1647_v61, 0.0  ;;  %v11771_v29 = vld [vmem:[%s16724_s1 + $0xd8] sm:$0xff]  }
 0x12d   : > { %v1193_v34 = vpop.permute.xlu1 %1192  ;;  %v1403_v36 = vand.u32 %v1366_v32, %v12086_v33  ;;  %1825 = vperm.xlu1 %10540, %v1795_v37   ;;  %v1662_v3 = vpack.c.bf16 %v1651_v63, %v1651_v63  ;;  %v11774_v32 = vld [vmem:[%s16724_s1 + $0x100] sm:$0xff]   ;;  %v11778_v37 = vld [vmem:[%s16724_s1 + $0x118] sm:$0xff]  }
 0x12e   : > { %v1199_v44 = vsel %vm1198_vm14, %v1193_v34, %v10528_v52  ;;  %v11754_v52 = vld [vmem:[%s16724_s1 + $0x60] sm:$0xff]   ;;  %v11775_v34 = vld [vmem:[%s16724_s1 + $0xf8] sm:$0xff]  }
 0x12f   : > { %v1203_v47 = vsel %vm12090_vm9, %v1199_v44, 0.0  ;;  %v1699_v5 = vand.u32 %v1662_v3, %v12086_v33 }
 0x130   : > { %v1214_v50 = vpack.c.bf16 %v1203_v47, %v1203_v47  ;;  %v1524_v9 = vpop.permute.xlu0 %1523 }
 0x131   : > { %9417 = vmatmul.mubr.msk.bf16.gmra.mxu0 %vm531_vm11, %v11747_v18  ;;  %9424 = vmatmul.mubr.msk.bf16.gmra.mxu1 %vm531_vm11, %v11748_v19  ;;  %v1344_v40 = vpop.permute.xlu1 %1343 }
 0x132   : > { %717 = vmatprep.mubr.bf16.mxu1 %v16736_v10  ;;  %839 = vmatprep.mubr.bf16.mxu0 %v16736_v10  ;;  %v1249_v54 = vand.u32 %v1214_v50, %v12086_v33  ;;  %v1350_v60 = vsel %vm1349_vm1, %v1344_v40, %v10533_v17  ;;  %v11764_v17 = vld [vmem:[%s16724_s1 + $0xa8] sm:$0xff]  }
 0x133   : > { %1815 = vperm.xlu1 %10540, %v1793_v43   ;;  %v1354_v62 = vsel %vm12076_vm6, %v1350_v60, 0.0  ;;  %vm2124_vm6 = vcmask 523264  }
 0x134   : > { %v1365_v0 = vpack.c.bf16 %v1354_v62, %v1354_v62 }
 0x135   : > { %v1526_v49 = vpop.permute.xlu1 %1525 }
 0x136   : > { %v1531_v53 = vsel %vm1529_vm2, %v1526_v49, %v1528_v48  ;;  %v1400_v4 = vand.u32 %v1365_v0, %v12086_v33  ;;  %v1530_v11 = vsel %vm1529_vm2, %v1524_v9, %v1526_v49 }
 0x137   : > { %v1548_v55 = vand.u32 %v1531_v53, %v12086_v33  ;;  %1805 = vperm.xlu1 %10540, %v1791_v8   ;;  %v1545_v14 = vand.u32 %v1530_v11, %v12086_v33 }
 0x139   : > { %9425 = vmatmul.mubr.msk.bf16.gmra.mxu1 %vm531_vm11, %v11749_v30  ;;  %9439 = vmatmul.mubr.msk.bf16.vlgmr.msra.gmra.mxu0 %vm531_vm11, %v11750_v31  ;;  %v1640_v15 = vpop.permute.xlu1 %1639  ;;  %v11772_v30 = vld [vmem:[%s16724_s1 + $0xe8] sm:$0xff]   ;;  %v11773_v31 = vld [vmem:[%s16724_s1 + $0xf0] sm:$0xff]  }
 0x13a   : > { %1118 = vmatpush1.bf16.msra.mxu0 %v1098_v35  ;;  %727 = vmatprep.mubr.bf16.mxu1 %v16736_v10  ;;  %v1646_v18 = vsel %vm1645_vm3, %v1640_v15, %v10538_v57  ;;  %v11776_v35 = vld [vmem:[%s16724_s1 + $0x108] sm:$0xff]  }
 0x13b   : > { %1419 = vmatprep.subr.bf16.mxu0 %v1403_v36  ;;  %849 = vmatprep.mubr.bf16.mxu0 %v16736_v10  ;;  %v1650_v19 = vsel %vm12090_vm9, %v1646_v18, 0.0  ;;  %v11777_v36 = vld [vmem:[%s16724_s1 + $0x110] sm:$0xff]  }
 0x13c   : > { %v1661_v21 = vpack.c.bf16 %v1650_v19, %v1650_v19 }
 0x13e   : > { %v1696_v25 = vand.u32 %v1661_v21, %v12086_v33  ;;  %v11769_v33 = vld [vmem:[%s16724_s1 + $0xd0] sm:$0xff]  }
 0x141   : > { %9426 = vmatmul.mubr.msk.bf16.gmra.mxu1 %vm531_vm11, %v11751_v41  ;;  %9440 = vmatmul.mubr.msk.bf16.gmra.mxu0 %vm531_vm11, %v11752_v42 }
 0x142   : > { %859 = vmatprep.mubr.bf16.mxu0 %v16736_v10  ;;  %990 = vmatprep.mubr.bf16.mxu1 %v16736_v10 }
 0x149   : > { %9441 = vmatmul.mubr.msk.bf16.gmra.mxu0 %vm531_vm11, %v11753_v51  ;;  %9455 = vmatmul.mubr.msk.bf16.vlgmr.msra.gmra.mxu1 %vm531_vm11, %v11754_v52 }
 0x14a   : > { %1269 = vmatpush1.bf16.msra.mxu1 %v1249_v54  ;;  %869 = vmatprep.mubr.bf16.mxu0 %v16736_v10 }
 0x14b   : > { %1564 = vmatprep.subr.bf16.mxu1 %v1548_v55  ;;  %1000 = vmatprep.mubr.bf16.mxu1 %v16736_v10 }
 0x151   : > { %9442 = vmatmul.mubr.msk.bf16.gmra.mxu0 %vm531_vm11, %v11755_v58  ;;  %9456 = vmatmul.mubr.msk.bf16.gmra.mxu1 %vm531_vm11, %v11756_v59 }
 0x152   : > { %1010 = vmatprep.mubr.bf16.mxu1 %v16736_v10  ;;  %1135 = vmatprep.mubr.bf16.mxu0 %v16736_v10 }
 0x159   : > { %9457 = vmatmul.mubr.msk.bf16.gmra.mxu1 %vm531_vm11, %v11757_v1  ;;  %9471 = vmatmul.mubr.msk.bf16.vlgmr.msra.gmra.mxu0 %vm531_vm11, %v11758_v2 }
 0x15a   : > { %1420 = vmatpush1.bf16.msra.mxu0 %v1400_v4  ;;  %1020 = vmatprep.mubr.bf16.mxu1 %v16736_v10 }
 0x15b   : > { %1715 = vmatprep.subr.bf16.mxu0 %v1699_v5  ;;  %1145 = vmatprep.mubr.bf16.mxu0 %v16736_v10 }
 0x161   : > { %9458 = vmatmul.mubr.msk.bf16.gmra.mxu1 %vm531_vm11, %v11759_v6  ;;  %9472 = vmatmul.mubr.msk.bf16.gmra.mxu0 %vm531_vm11, %v11760_v7 }
 0x162   : > { %1155 = vmatprep.mubr.bf16.mxu0 %v16736_v10  ;;  %1286 = vmatprep.mubr.bf16.mxu1 %v16736_v10 }
 0x169   : > { %9473 = vmatmul.mubr.msk.bf16.gmra.mxu0 %vm531_vm11, %v11761_v12  ;;  %9487 = vmatmul.mubr.msk.bf16.vlgmr.msra.gmra.mxu1 %vm531_vm11, %v11762_v13 }
 0x16a   : > { %1565 = vmatpush1.bf16.msra.mxu1 %v1545_v14  ;;  %1165 = vmatprep.mubr.bf16.mxu0 %v16736_v10 }
 0x16b   : > { %1296 = vmatprep.mubr.bf16.mxu1 %v16736_v10 }
 0x171   : > { %9474 = vmatmul.mubr.msk.bf16.gmra.mxu0 %vm531_vm11, %v11763_v16  ;;  %9488 = vmatmul.mubr.msk.bf16.gmra.mxu1 %vm531_vm11, %v11764_v17 }
 0x172   : > { %1306 = vmatprep.mubr.bf16.mxu1 %v16736_v10  ;;  %1437 = vmatprep.mubr.bf16.mxu0 %v16736_v10 }
 0x179   : > { %9489 = vmatmul.mubr.msk.bf16.gmra.mxu1 %vm531_vm11, %v11765_v22  ;;  %9503 = vmatmul.mubr.msk.bf16.vlgmr.msra.gmra.mxu0 %vm531_vm11, %v11766_v24 }
 0x17a   : > { %1716 = vmatpush1.bf16.msra.mxu0 %v1696_v25  ;;  %1316 = vmatprep.mubr.bf16.mxu1 %v16736_v10 }
 0x17b   : > { %1447 = vmatprep.mubr.bf16.mxu0 %v16736_v10 }
 0x181   : > { %9490 = vmatmul.mubr.msk.bf16.gmra.mxu1 %vm531_vm11, %v11767_v26  ;;  %9504 = vmatmul.mubr.msk.bf16.gmra.mxu0 %vm531_vm11, %v11768_v27 }
 0x182   : > { %1457 = vmatprep.mubr.bf16.mxu0 %v16736_v10  ;;  %1582 = vmatprep.mubr.bf16.mxu1 %v16736_v10 }
 0x189   : > { %9505 = vmatmul.mubr.msk.bf16.gmra.mxu0 %vm531_vm11, %v11769_v33  ;;  %9519 = vmatmul.mubr.msk.bf16.vlgmr.msra.gmra.mxu1 %vm531_vm11, %v11770_v28 }
 0x18a   : > { %1467 = vmatprep.mubr.bf16.mxu0 %v16736_v10  ;;  %1592 = vmatprep.mubr.bf16.mxu1 %v16736_v10 }
 0x191   : > { %9506 = vmatmul.mubr.msk.bf16.gmra.mxu0 %vm531_vm11, %v11771_v29  ;;  %9520 = vmatmul.mubr.msk.bf16.gmra.mxu1 %vm531_vm11, %v11772_v30 }
 0x192   : > { %1602 = vmatprep.mubr.bf16.mxu1 %v16736_v10  ;;  %1733 = vmatprep.mubr.bf16.mxu0 %v16736_v10 }
 0x199   : > { %9521 = vmatmul.mubr.msk.bf16.gmra.mxu1 %vm531_vm11, %v11773_v31  ;;  %9535 = vmatmul.mubr.msk.bf16.vlgmr.msra.gmra.mxu0 %vm531_vm11, %v11774_v32 }
 0x19a   : > { %1612 = vmatprep.mubr.bf16.mxu1 %v16736_v10  ;;  %1743 = vmatprep.mubr.bf16.mxu0 %v16736_v10 }
 0x1a1   : > { %9522 = vmatmul.mubr.msk.bf16.gmra.mxu1 %vm531_vm11, %v11775_v34  ;;  %9536 = vmatmul.mubr.msk.bf16.gmra.mxu0 %vm531_vm11, %v11776_v35 }
 0x1a2   : > { %1753 = vmatprep.mubr.bf16.mxu0 %v16736_v10  ;;  %2169 = vmatprep.mubr.bf16.mxu1 %v16736_v10 }
 0x1a9   : > { %9537 = vmatmul.mubr.msk.bf16.gmra.mxu0 %vm531_vm11, %v11777_v36 }
 0x1aa   : > { %1763 = vmatprep.mubr.bf16.mxu0 %v16736_v10 }
 0x1b1   : > { %9538 = vmatmul.mubr.msk.bf16.gmra.mxu0 %vm531_vm11, %v11778_v37  ;;  %vm13050_vm11 = vmpackc.low %vm12101_vm12, %vm12101_vm12 }
 0x1b2   : > { %2274 = vmatprep.mubr.bf16.mxu0 %v16736_v10  ;;  %vm13082_vm12 = vmpackc.low %vm12090_vm9, %vm12090_vm9 }
 0x1e1   : > { %v588_v39 = vpop.f32.mrf.mxu0  ;;  %v618_v40 = vpop.f32.mrf.mxu1 }
 0x1e3   : > { %v590_v41 = vpop.f32.mrf.mxu0  ;;  %v620_v42 = vpop.f32.mrf.mxu1 }
 0x1e5   : > { %v592_v43 = vpop.f32.mrf.mxu0  ;;  %v622_v44 = vpop.f32.mrf.mxu1 }
 0x1e7   : > { %v12372_v46 = vpop.f32.mrf.mxu0  ;;  %v12374_v47 = vpop.f32.mrf.mxu1 }
 0x1e9   : > { %v598_v49 = vpop.f32.mrf.mxu0  ;;  %v699_v50 = vpop.f32.mrf.mxu1 }
 0x1ea   : > { %v700_v48 = vadd.f32 %v699_v50, %v588_v39 }
 0x1eb   : > { %v600_v51 = vpop.f32.mrf.mxu0  ;;  %v701_v52 = vpop.f32.mrf.mxu1 }
 0x1ec   : > { %v702_v53 = vadd.f32 %v701_v52, %v590_v41 }
 0x1ed   : > { %v602_v54 = vpop.f32.mrf.mxu0  ;;  %v703_v55 = vpop.f32.mrf.mxu1 }
 0x1ee   : > { %v704_v56 = vadd.f32 %v703_v55, %v592_v43 }
 0x1ef   : > { %v12376_v57 = vpop.f32.mrf.mxu0  ;;  %v12378_v58 = vpop.f32.mrf.mxu1 }
 0x1f1   : > { %v608_v59 = vpop.f32.mrf.mxu0  ;;  %v709_v60 = vpop.f32.mrf.mxu1 }
 0x1f2   : > { %v710_v61 = vadd.f32 %v709_v60, %v598_v49 }
 0x1f3   : > { %v610_v62 = vpop.f32.mrf.mxu0  ;;  %v711_v63 = vpop.f32.mrf.mxu1 }
 0x1f4   : > { %v712_v0 = vadd.f32 %v711_v63, %v600_v51 }
 0x1f5   : > { %v612_v1 = vpop.f32.mrf.mxu0  ;;  %v713_v2 = vpop.f32.mrf.mxu1 }
 0x1f6   : > { %v714_v3 = vadd.f32 %v713_v2, %v602_v54 }
 0x1f7   : > { %v12380_v4 = vpop.f32.mrf.mxu0  ;;  %v12382_v5 = vpop.f32.mrf.mxu1 }
 0x1f9   : > { %v719_v6 = vpop.f32.mrf.mxu1  ;;  %v841_v7 = vpop.f32.mrf.mxu0 }
 0x1fa   : > { %v720_v8 = vadd.f32 %v719_v6, %v608_v59  ;;  %v880_v9 = vadd.f32 %v841_v7, %v700_v48 }
 0x1fb   : > { %v721_v11 = vpop.f32.mrf.mxu1  ;;  %v843_v12 = vpop.f32.mrf.mxu0 }
 0x1fc   : > { %v722_v13 = vadd.f32 %v721_v11, %v610_v62  ;;  %v881_v14 = vadd.f32 %v843_v12, %v702_v53 }
 0x1fd   : > { %v723_v15 = vpop.f32.mrf.mxu1  ;;  %v845_v16 = vpop.f32.mrf.mxu0 }
 0x1fe   : > { %v724_v17 = vadd.f32 %v723_v15, %v612_v1  ;;  %v882_v18 = vadd.f32 %v845_v16, %v704_v56 }
 0x1ff   : > { %v12384_v19 = vpop.f32.mrf.mxu1  ;;  %v12386_v21 = vpop.f32.mrf.mxu0 }
 0x200   : > { %16790 = vst [vmem:[#allocation10_spill] sm:$0xff] %v12386_v21 }
 0x201   : > { %v729_v22 = vpop.f32.mrf.mxu1  ;;  %v851_v24 = vpop.f32.mrf.mxu0 }
 0x202   : > { %v730_v25 = vadd.f32 %v729_v22, %v618_v40  ;;  %v12388_v26 = vadd.f32 %v851_v24, %v710_v61 }
 0x203   : > { %v731_v27 = vpop.f32.mrf.mxu1  ;;  %v853_v33 = vpop.f32.mrf.mxu0 }
 0x204   : > { %v732_v28 = vadd.f32 %v731_v27, %v620_v42  ;;  %v12390_v29 = vadd.f32 %v853_v33, %v712_v0 }
 0x205   : > { %v733_v30 = vpop.f32.mrf.mxu1  ;;  %v855_v31 = vpop.f32.mrf.mxu0 }
 0x206   : > { %v734_v32 = vadd.f32 %v733_v30, %v622_v44  ;;  %v886_v34 = vadd.f32 %v855_v31, %v714_v3 }
 0x207   : > { %v12392_v35 = vpop.f32.mrf.mxu1  ;;  %v12394_v36 = vpop.f32.mrf.mxu0 }
 0x209   : > { %v861_v37 = vpop.f32.mrf.mxu0  ;;  %v992_v39 = vpop.f32.mrf.mxu1 }
 0x20a   : > { %v12396_v41 = vadd.f32 %v861_v37, %v720_v8  ;;  %v1031_v40 = vadd.f32 %v992_v39, %v880_v9 }
 0x20b   : > { %v863_v43 = vpop.f32.mrf.mxu0  ;;  %v994_v49 = vpop.f32.mrf.mxu1 }
 0x20c   : > { %v12398_v50 = vadd.f32 %v863_v43, %v722_v13  ;;  %v1032_v42 = vadd.f32 %v994_v49, %v881_v14 }
 0x20d   : > { %v865_v48 = vpop.f32.mrf.mxu0  ;;  %v996_v51 = vpop.f32.mrf.mxu1 }
 0x20e   : > { %v12400_v52 = vadd.f32 %v865_v48, %v724_v17  ;;  %v1033_v44 = vadd.f32 %v996_v51, %v882_v18 }
 0x20f   : > { %v12402_v53 = vpop.f32.mrf.mxu0  ;;  %v12404_v54 = vpop.f32.mrf.mxu1 }
 0x210   : > { %16791 = vst [vmem:[#allocation11_spill] sm:$0xff] %v12404_v54 }
 0x211   : > { %v871_v55 = vpop.f32.mrf.mxu0  ;;  %v12406_v56 = vpop.f32.mrf.mxu1 }
 0x212   : > { %v12408_v59 = vadd.f32 %v871_v55, %v730_v25 }
 0x213   : > { %v873_v60 = vpop.f32.mrf.mxu0  ;;  %v12410_v61 = vpop.f32.mrf.mxu1 }
 0x214   : > { %v12412_v62 = vadd.f32 %v873_v60, %v732_v28 }
 0x215   : > { %v875_v63 = vpop.f32.mrf.mxu0  ;;  %v1006_v0 = vpop.f32.mrf.mxu1 }
 0x216   : > { %v12414_v1 = vadd.f32 %v875_v63, %v734_v32  ;;  %v1037_v2 = vadd.f32 %v1006_v0, %v886_v34 }
 0x217   : > { %v12416_v3 = vpop.f32.mrf.mxu0  ;;  %v12418_v6 = vpop.f32.mrf.mxu1 }
 0x219   : > { %v12420_v7 = vpop.f32.mrf.mxu1  ;;  %v1137_v8 = vpop.f32.mrf.mxu0 }
 0x21a   : > { %v1176_v9 = vadd.f32 %v1137_v8, %v1031_v40 }
 0x21b   : > { %v12422_v11 = vpop.f32.mrf.mxu1  ;;  %v1139_v12 = vpop.f32.mrf.mxu0 }
 0x21c   : > { %v1177_v13 = vadd.f32 %v1139_v12, %v1032_v42 }
 0x21d   : > { %v12424_v14 = vpop.f32.mrf.mxu1  ;;  %v1141_v15 = vpop.f32.mrf.mxu0 }
 0x21e   : > { %v1178_v16 = vadd.f32 %v1141_v15, %v1033_v44 }
 0x21f   : > { %v12426_v17 = vpop.f32.mrf.mxu1  ;;  %v12428_v18 = vpop.f32.mrf.mxu0 }
 0x220   : > { %16792 = vst [vmem:[#allocation12_spill] sm:$0xff] %v12428_v18 }
 0x221   : > { %v12430_v22 = vpop.f32.mrf.mxu1  ;;  %v12432_v24 = vpop.f32.mrf.mxu0 }
 0x223   : > { %v12434_v25 = vpop.f32.mrf.mxu1  ;;  %v12436_v27 = vpop.f32.mrf.mxu0 }
 0x225   : > { %v12438_v33 = vpop.f32.mrf.mxu1  ;;  %v1151_v28 = vpop.f32.mrf.mxu0 }
 0x226   : > { %v12440_v30 = vadd.f32 %v1151_v28, %v1037_v2 }
 0x227   : > { %v12442_v31 = vpop.f32.mrf.mxu1  ;;  %v12444_v32 = vpop.f32.mrf.mxu0 }
 0x228   : > { %16793 = vst [vmem:[#allocation13_spill] sm:$0xff] %v12440_v30  ;;  %16794 = vst [vmem:[#allocation14_spill] sm:$0xff] %v12444_v32 }
 0x229   : > { %v12446_v34 = vpop.f32.mrf.mxu0  ;;  %v1288_v37 = vpop.f32.mrf.mxu1 }
 0x22a   : > { %v1327_v39 = vadd.f32 %v1288_v37, %v1176_v9 }
 0x22b   : > { %v12448_v40 = vpop.f32.mrf.mxu0  ;;  %v1290_v43 = vpop.f32.mrf.mxu1 }
 0x22c   : > { %v1328_v49 = vadd.f32 %v1290_v43, %v1177_v13 }
 0x22d   : > { %v12450_v42 = vpop.f32.mrf.mxu0  ;;  %v1292_v48 = vpop.f32.mrf.mxu1 }
 0x22e   : > { %v1329_v51 = vadd.f32 %v1292_v48, %v1178_v16 }
 0x22f   : > { %v12452_v44 = vpop.f32.mrf.mxu0  ;;  %v12454_v55 = vpop.f32.mrf.mxu1 }
 0x230   : > { %16795 = vst [vmem:[#allocation15_spill] sm:$0xff] %v12454_v55 }
 0x231   : > { %v12456_v60 = vpop.f32.mrf.mxu0  ;;  %v1298_v63 = vpop.f32.mrf.mxu1 }
 0x233   : > { %v12458_v0 = vpop.f32.mrf.mxu0  ;;  %v1300_v2 = vpop.f32.mrf.mxu1 }
 0x235   : > { %v12460_v8 = vpop.f32.mrf.mxu0  ;;  %v12462_v9 = vpop.f32.mrf.mxu1 }
 0x236   : > { %16796 = vst [vmem:[#allocation16_spill] sm:$0xff] %v12460_v8  ;;  %16797 = vst [vmem:[#allocation17_spill] sm:$0xff] %v12462_v9 }
 0x237   : > { %v12464_v12 = vpop.f32.mrf.mxu0  ;;  %v12466_v13 = vpop.f32.mrf.mxu1 }
 0x238   : > { %16798 = vst [vmem:[#allocation18_spill] sm:$0xff] %v12464_v12  ;;  %16799 = vst [vmem:[#allocation19_spill] sm:$0xff] %v12466_v13 }
 0x239   : > { %v12468_v15 = vpop.f32.mrf.mxu1  ;;  %v1439_v16 = vpop.f32.mrf.mxu0 }
 0x23a   : > { %v12470_v28 = vadd.f32 %v1439_v16, %v1327_v39 }
 0x23b   : > { %v12472_v37 = vpop.f32.mrf.mxu1  ;;  %v1441_v43 = vpop.f32.mrf.mxu0 }
 0x23c   : > { %16800 = vst [vmem:[#allocation20_spill] sm:$0xff] %v12470_v28  ;;  %v12474_v48 = vadd.f32 %v1441_v43, %v1328_v49 }
 0x23d   : > { %v12476_v10 = vpop.f32.mrf.mxu1  ;;  %v1443_v38 = vpop.f32.mrf.mxu0 }
 0x23e   : > { %16801 = vst [vmem:[#allocation21_spill] sm:$0xff] %v12474_v48  ;;  %v12478_v45 = vadd.f32 %v1443_v38, %v1329_v51 }
 0x23f   : > { %v12480_v23 = vpop.f32.mrf.mxu1  ;;  %v12482_v20 = vpop.f32.mrf.mxu0 }
 0x240   : > { %16802 = vst [vmem:[#allocation22_spill] sm:$0xff] %v12478_v45  ;;  %16803 = vst [vmem:[#allocation23_spill] sm:$0xff] %v12482_v20 }
 0x241   : > { %v12484_v55 = vpop.f32.mrf.mxu1  ;;  %v1449_v18 = vpop.f32.mrf.mxu0 }
 0x242   : > { %16804 = vst [vmem:[#allocation24_spill] sm:$0xff] %v12484_v55 }
 0x243   : > { %v12486_v54 = vpop.f32.mrf.mxu1  ;;  %v1451_v39 = vpop.f32.mrf.mxu0 }
 0x244   : > { %16805 = vst [vmem:[#allocation25_spill] sm:$0xff] %v12486_v54 }
 0x245   : > { %v12488_v16 = vpop.f32.mrf.mxu1  ;;  %v12490_v28 = vpop.f32.mrf.mxu0 }
 0x246   : > { %16806 = vst [vmem:[#allocation26_spill] sm:$0xff] %v12488_v16  ;;  %16807 = vst [vmem:[#allocation27_spill] sm:$0xff] %v12490_v28 }
 0x247   : > { %v12492_v49 = vpop.f32.mrf.mxu1  ;;  %v12494_v43 = vpop.f32.mrf.mxu0 }
 0x248   : > { %16808 = vst [vmem:[#allocation28_spill] sm:$0xff] %v12492_v49  ;;  %16809 = vst [vmem:[#allocation29_spill] sm:$0xff] %v12494_v43 }
 0x249   : > { %v1459_v38 = vpop.f32.mrf.mxu0  ;;  %v12496_v51 = vpop.f32.mrf.mxu1 }
 0x24a   : > { %16810 = vst [vmem:[#allocation30_spill] sm:$0xff] %v12496_v51 }
 0x24b   : > { %v12498_v45 = vpop.f32.mrf.mxu0  ;;  %v12500_v20 = vpop.f32.mrf.mxu1 }
 0x24c   : > { %16811 = vst [vmem:[#allocation31_spill] sm:$0xff] %v12500_v20 }
 0x24d   : > { %v12502_v48 = vpop.f32.mrf.mxu0  ;;  %v12504_v21 = vpop.f32.mrf.mxu1 }
 0x24e   : > { %16812 = vst [vmem:[#allocation32_spill] sm:$0xff] %v12504_v21  ;;  %v1035_v21 = vadd.f32 %v12406_v56, %v12388_v26 }
 0x24f   : > { %v12506_v13 = vpop.f32.mrf.mxu0  ;;  %v12508_v16 = vpop.f32.mrf.mxu1 }
 0x250   : > { %16813 = vst [vmem:[#allocation33_spill] sm:$0xff] %v12506_v13  ;;  %16814 = vst [vmem:[#allocation34_spill] sm:$0xff] %v12508_v16  ;;  %v1036_v16 = vadd.f32 %v12410_v61, %v12390_v29  ;;  %v1039_v29 = vadd.f32 %v12420_v7, %v12396_v41  ;;  %v1041_v41 = vadd.f32 %v12424_v14, %v12400_v52 }
 0x251   : > { %v12510_v28 = vpop.f32.mrf.mxu0  ;;  %v1594_v49 = vpop.f32.mrf.mxu1 }
 0x252   : > { %16815 = vst [vmem:[#allocation35_spill] sm:$0xff] %v12510_v28 }
 0x253   : > { %v12512_v12 = vpop.f32.mrf.mxu0  ;;  %v1596_v43 = vpop.f32.mrf.mxu1 }
 0x254   : > { %16816 = vst [vmem:[#allocation36_spill] sm:$0xff] %v12512_v12  ;;  %v1180_v12 = vadd.f32 %v12432_v24, %v1035_v21  ;;  %v726_v24 = vadd.f32 %v12384_v19, %v12380_v4 }
 0x255   : > { %v12514_v9 = vpop.f32.mrf.mxu0  ;;  %v12516_v51 = vpop.f32.mrf.mxu1 }
 0x256   : > { %16817 = vst [vmem:[#allocation37_spill] sm:$0xff] %v12514_v9  ;;  %16818 = vst [vmem:[#allocation38_spill] sm:$0xff] %v12516_v51  ;;  %v1181_v51 = vadd.f32 %v12436_v27, %v1036_v16  ;;  %v1331_v9 = vadd.f32 %v1298_v63, %v1180_v12  ;;  %v1040_v27 = vadd.f32 %v12422_v11, %v12398_v50  ;;  %v12545_v12 = vpop.permute.xlu1 %1830 }
 0x257   : > { %v12518_v30 = vpop.f32.mrf.mxu0  ;;  %v12520_v20 = vpop.f32.mrf.mxu1  ;;  %v1184_v63 = vadd.f32 %v12446_v34, %v1039_v29  ;;  %v891_v16 = vadd.f32 %v12402_v53, %v726_v24  ;;  %v12554_v11 = vadd.f32 %v12378_v58, %v12372_v46  ;;  %v1186_v34 = vadd.f32 %v12450_v42, %v1041_v41 }
 0x258   : > { %16819 = vst [vmem:[#allocation39_spill] sm:$0xff] %v12518_v30  ;;  %16820 = vst [vmem:[#allocation40_spill] sm:$0xff] %v12520_v20  ;;  %v12532_v30 = vpop.permute.xlu0 %1835  ;;  %v1332_v13 = vadd.f32 %v1300_v2, %v1181_v51  ;;  %v1482_v26 = vadd.f32 %v1449_v18, %v1331_v9  ;;  %v1185_v4 = vadd.f32 %v12448_v40, %v1040_v27 }
 0x259   : > { %v1604_v54 = vpop.f32.mrf.mxu1  ;;  %v12524_v8 = vpop.f32.mrf.mxu0  ;;  %v1335_v19 = vadd.f32 %v12468_v15, %v1184_v63  ;;  %v1042_v53 = vadd.f32 %v12426_v17, %v891_v16  ;;  %v1043_v58 = vadd.f32 %v12430_v22, %v12408_v59  ;;  %v1337_v42 = vadd.f32 %v12476_v10, %v1186_v34  ;;  %v16831_v34 = vld [vmem:[#allocation26_spill] sm:$0xff] }
 0x25a   : > { %v1483_v61 = vadd.f32 %v1451_v39, %v1332_v13  ;;  %v1627_v21 = vadd.f32 %v1594_v49, %v1482_v26  ;;  %v1336_v14 = vadd.f32 %v12472_v37, %v1185_v4 }
 0x25b   : > { %v1606_v28 = vpop.f32.mrf.mxu1  ;;  %v12529_v32 = vpop.f32.mrf.mxu0  ;;  %v1486_v40 = vadd.f32 %v1459_v38, %v1335_v19  ;;  %v1188_v59 = vadd.f32 %v12456_v60, %v1043_v58  ;;  %v1488_v10 = vadd.f32 %v12502_v48, %v1337_v42 }
 0x25c   : > { %16821 = vst [vmem:[#allocation41_spill] sm:$0xff] %v12529_v32  ;;  %v1628_v18 = vadd.f32 %v1596_v43, %v1483_v61  ;;  %v1811_v2 = vpop.permute.xlu0 %1810  ;;  %v736_v43 = vadd.f32 %v12392_v35, %v12374_v47  ;;  %v1487_v37 = vadd.f32 %v12498_v45, %v1336_v14  ;;  %v1821_v38 = vpop.permute.xlu1 %1820  ;;  %v16822_v61 = vld [vmem:[#allocation24_spill] sm:$0xff] }
 0x25d   : > { %v12534_v20 = vpop.f32.mrf.mxu0  ;;  %v1608_v56 = vpop.f32.mrf.mxu1  ;;  %v1631_v51 = vadd.f32 %v1604_v54, %v1486_v40  ;;  %v1045_v54 = vadd.f32 %v12438_v33, %v12414_v1  ;;  %v16827_v1 = vld [vmem:[#allocation35_spill] sm:$0xff]  ;;  %v16832_v40 = vld [vmem:[#allocation36_spill] sm:$0xff] }
 0x25e   : > { %v895_v47 = vadd.f32 %v12416_v3, %v736_v43  ;;  %v1632_v45 = vadd.f32 %v1606_v28, %v1487_v37  ;;  %v16824_v28 = vld [vmem:[#allocation14_spill] sm:$0xff] }
 0x25f   : > { %v12536_v55 = vpop.f32.mrf.mxu0  ;;  %v1610_v7 = vpop.f32.mrf.mxu1 }
 0x260   : > { %v1046_v3 = vadd.f32 %v12442_v31, %v895_v47  ;;  %v1826_v41 = vpop.permute.xlu1 %1825 }
 0x261   : > { %v1745_v32 = vpop.f32.mrf.mxu0 }
 0x262   : > { %v1778_v9 = vadd.f32 %v1745_v32, %v1627_v21  ;;  %v716_v32 = vadd.f32 %v12382_v5, %v12376_v57  ;;  %v1187_v57 = vadd.f32 %v12452_v44, %v1042_v53  ;;  %v1614_v5 = vpop.f32.mrf.mxu1  ;;  %v16823_v21 = vld [vmem:[#allocation33_spill] sm:$0xff] }
 0x263   : > { %v1747_v13 = vpop.f32.mrf.mxu0 }
 0x264   : > { %v1842_v39 = vadd.f32 %v1811_v2, %v1778_v9  ;;  %v1779_v50 = vadd.f32 %v1747_v13, %v1628_v18  ;;  %v887_v46 = vadd.f32 %v12394_v36, %v716_v32  ;;  %v1044_v36 = vadd.f32 %v12434_v25, %v12412_v62  ;;  %v1616_v25 = vpop.f32.mrf.mxu1  ;;  %v16825_v18 = vld [vmem:[#allocation16_spill] sm:$0xff]  ;;  %v16826_v9 = vld [vmem:[#allocation25_spill] sm:$0xff] }
 0x265   : > { %v12560_v52 = vpop.f32.mrf.mxu0  ;;  %v1338_v44 = vadd.f32 %v12480_v23, %v1187_v57  ;;  %v1339_v62 = vadd.f32 %v16822_v61, %v1188_v59  ;;  %v1633_v23 = vadd.f32 %v1608_v56, %v1488_v10  ;;  %v16830_v56 = vld [vmem:[#allocation18_spill] sm:$0xff] }
 0x266   : > { %v1858_v49 = vmax.f32 %v1842_v39, 0.0  ;;  %v1843_v15 = vadd.f32 %v1811_v2, %v1779_v50  ;;  %v1038_v35 = vadd.f32 %v12418_v6, %v887_v46  ;;  %v1189_v6 = vadd.f32 %v12458_v0, %v1044_v36  ;;  %v16828_v39 = vld [vmem:[#allocation13_spill] sm:$0xff] }
 0x267   : > { %v12569_v17 = vpop.f32.mrf.mxu0  ;;  %v1489_v24 = vadd.f32 %v16823_v21, %v1338_v44  ;;  %v1190_v2 = vadd.f32 %v16825_v18, %v1045_v54  ;;  %v1490_v33 = vadd.f32 %v16827_v1, %v1339_v62  ;;  %v16829_v50 = vld [vmem:[#allocation17_spill] sm:$0xff]  ;;  %v1191_v53 = vadd.f32 %v16830_v56, %v1046_v3  ;;  %v16840_v62 = vld [vmem:[#allocation39_spill] sm:$0xff]  ;;  %v16842_v18 = vld [vmem:[#allocation40_spill] sm:$0xff] }
 0x268   : > { %v1859_v26 = vmax.f32 %v1843_v15, 0.0  ;;  %1894 = vrot.lane.b32.xlu0 %v1858_v49, %s11929_s12  ;;  %v1183_v63 = vadd.f32 %v16824_v28, %v1038_v35  ;;  %v1340_v16 = vadd.f32 %v16826_v9, %v1189_v6  ;;  %v1333_v32 = vadd.f32 %v16829_v50, %v16828_v39  ;;  %v1618_v15 = vpop.f32.mrf.mxu1  ;;  %v16836_v35 = vld [vmem:[#allocation37_spill] sm:$0xff]  ;;  %v16839_v6 = vld [vmem:[#allocation38_spill] sm:$0xff]  ;;  %v16841_v28 = vld [vmem:[#allocation11_spill] sm:$0xff] }
 0x269   : > { %v1755_v22 = vpop.f32.mrf.mxu0  ;;  %v1634_v0 = vadd.f32 %v1610_v7, %v1489_v24  ;;  %v1341_v14 = vadd.f32 %v16831_v34, %v1190_v2  ;;  %v1635_v46 = vadd.f32 %v1614_v5, %v1490_v33  ;;  %v16833_v7 = vld [vmem:[#allocation19_spill] sm:$0xff]  ;;  %v16837_v5 = vld [vmem:[#allocation10_spill] sm:$0xff]  ;;  %v16838_v54 = vld [vmem:[#allocation29_spill] sm:$0xff] }
 0x26a   : > { %v1782_v29 = vadd.f32 %v1755_v22, %v1631_v51  ;;  %1896 = vrot.lane.b32.xlu1 %v1859_v26, %s11929_s12  ;;  %v1491_v49 = vadd.f32 %v16832_v40, %v1340_v16  ;;  %v1334_v37 = vadd.f32 %v16833_v7, %v1183_v63  ;;  %v16835_v26 = vld [vmem:[#allocation28_spill] sm:$0xff]  ;;  %v1620_v21 = vpop.f32.mrf.mxu1  ;;  %v16850_v7 = vld [vmem:[#allocation22_spill] sm:$0xff] }
 0x26b   : > { %v1757_v60 = vpop.f32.mrf.mxu0  ;;  %v1342_v47 = vadd.f32 %v16835_v26, %v1191_v53  ;;  %v1492_v36 = vadd.f32 %v16836_v35, %v1341_v14  ;;  %v16846_v53 = vld [vmem:[#allocation15_spill] sm:$0xff] }
 0x26c   : > { %v1846_v27 = vadd.f32 %v1821_v38, %v1782_v29  ;;  %v1783_v48 = vadd.f32 %v1757_v60, %v1632_v45  ;;  %v1636_v22 = vadd.f32 %v1616_v25, %v1491_v49  ;;  %v883_v29 = vadd.f32 %v16837_v5, %v12554_v11  ;;  %v16848_v14 = vld [vmem:[#allocation31_spill] sm:$0xff]  ;;  %v1816_v49 = vpop.permute.xlu1 %1815 }
 0x26d   : > { %v1759_v31 = vpop.f32.mrf.mxu0  ;;  %v1485_v3 = vadd.f32 %v16838_v54, %v1334_v37  ;;  %v1493_v60 = vadd.f32 %v16840_v62, %v1342_v47  ;;  %v16851_v37 = vld [vmem:[#allocation32_spill] sm:$0xff] }
 0x26e   : > { %v1862_v13 = vmax.f32 %v1846_v27, 0.0  ;;  %v1847_v4 = vadd.f32 %v1821_v38, %v1783_v48  ;;  %v1784_v19 = vadd.f32 %v1759_v31, %v1633_v23  ;;  %v16834_v38 = vld [vmem:[#allocation27_spill] sm:$0xff]  ;;  %v1637_v23 = vadd.f32 %v1618_v15, %v1492_v36  ;;  %v16853_v36 = vld [vmem:[#allocation34_spill] sm:$0xff] }
 0x26f   : > { %v1761_v43 = vpop.f32.mrf.mxu0  ;;  %v1484_v51 = vadd.f32 %v16834_v38, %v1333_v32  ;;  %v1034_v63 = vadd.f32 %v16841_v28, %v883_v29  ;;  %v1630_v2 = vadd.f32 %v16842_v18, %v1485_v3  ;;  %v1638_v16 = vadd.f32 %v1620_v21, %v1493_v60 }
 0x270   : > { %v1863_v58 = vmax.f32 %v1847_v4, 0.0  ;;  %v1848_v57 = vadd.f32 %v1826_v41, %v1784_v19  ;;  %v1785_v42 = vadd.f32 %v1761_v43, %v1634_v0  ;;  %1902 = vrot.lane.b32.xlu0 %v1862_v13, %s11929_s12  ;;  %v16844_v13 = vld [vmem:[#allocation20_spill] sm:$0xff]  ;;  %v16845_v4 = vld [vmem:[#allocation30_spill] sm:$0xff]  ;;  %v1625_v38 = vadd.f32 %v16851_v37, %v16850_v7 }
 0x271   : > { %v1765_v59 = vpop.f32.mrf.mxu0  ;;  %v1629_v61 = vadd.f32 %v16839_v6, %v1484_v51  ;;  %v1623_v19 = vadd.f32 %v16845_v4, %v16844_v13  ;;  %v1781_v50 = vadd.f32 %v12569_v17, %v1630_v2  ;;  %v16849_v17 = vld [vmem:[#allocation23_spill] sm:$0xff]  ;;  %v16852_v51 = vld [vmem:[#allocation41_spill] sm:$0xff]  ;;  %v16855_v18 = vmov 0 }
 0x272   : > { %v1864_v44 = vmax.f32 %v1848_v57, 0.0  ;;  %v1849_v10 = vadd.f32 %v1826_v41, %v1785_v42  ;;  %v1786_v45 = vadd.f32 %v1765_v59, %v1635_v46  ;;  %1904 = vrot.lane.b32.xlu1 %v1863_v58, %s11929_s12  ;;  %v16843_v41 = vld [vmem:[#allocation12_spill] sm:$0xff]  ;;  %v1801_v42 = vpop.permute.xlu0 %1800  ;;  %v16856_v18 = vsel %vm12654_vm8, 4294967295, %v16855_v18 }
 0x273   : > { %v1767_v24 = vpop.f32.mrf.mxu0  ;;  %v1780_v11 = vadd.f32 %v12560_v52, %v1629_v61  ;;  %v1179_v0 = vadd.f32 %v16843_v41, %v1034_v63  ;;  %v1774_v15 = vadd.f32 %v12524_v8, %v1623_v19  ;;  %v1845_v47 = vadd.f32 %v1816_v49, %v1781_v50  ;;  %16857 = vst [vmem:[#allocation24_spill] sm:$0xff] %v16856_v18 }
 0x274   : > { %v1850_v27 = vadd.f32 %v12545_v12, %v1786_v45  ;;  %v1787_v25 = vadd.f32 %v1767_v24, %v1636_v22  ;;  %1906 = vrot.lane.b32.xlu0 %v1864_v44, %s11929_s12  ;;  %v1865_v48 = vmax.f32 %v1849_v10, 0.0  ;;  %v1776_v22 = vadd.f32 %v12534_v20, %v1625_v38  ;;  %v1806_v44 = vpop.permute.xlu1 %1805 }
 0x275   : > { %v1769_v9 = vpop.f32.mrf.mxu0  ;;  %v1330_v34 = vadd.f32 %v16846_v53, %v1179_v0  ;;  %v1844_v43 = vadd.f32 %v1816_v49, %v1780_v11  ;;  %v1838_v59 = vadd.f32 %v1801_v42, %v1774_v15  ;;  %v1861_v5 = vmax.f32 %v1845_v47, 0.0 }
 0x276   : > { %v1866_v1 = vmax.f32 %v1850_v27, 0.0  ;;  %v1851_v33 = vadd.f32 %v12545_v12, %v1787_v25  ;;  %v1788_v31 = vadd.f32 %v1769_v9, %v1637_v23  ;;  %1908 = vrot.lane.b32.xlu1 %v1865_v48, %s11929_s12  ;;  %v16847_v12 = vld [vmem:[#allocation21_spill] sm:$0xff]  ;;  %v1840_v29 = vadd.f32 %v1806_v44, %v1776_v22 }
 0x277   : > { %v1771_v39 = vpop.f32.mrf.mxu0  ;;  %v1624_v40 = vadd.f32 %v16848_v14, %v16847_v12  ;;  %v1481_v57 = vadd.f32 %v16849_v17, %v1330_v34  ;;  %v1854_v54 = vmax.f32 %v1838_v59, 0.0  ;;  %v16859_v41 = vmov 0 }
 0x278   : > { %v1867_v32 = vmax.f32 %v1851_v33, 0.0  ;;  %v1852_v56 = vadd.f32 %v12532_v30, %v1788_v31  ;;  %v1789_v52 = vadd.f32 %v1771_v39, %v1638_v16  ;;  %1910 = vrot.lane.b32.xlu0 %v1866_v1, %s11929_s12  ;;  %v1856_v20 = vmax.f32 %v1840_v29, 0.0 }
 0x279   : > { %v1775_v26 = vadd.f32 %v16852_v51, %v1624_v40  ;;  %v1626_v8 = vadd.f32 %v16853_v36, %v1481_v57  ;;  %v16860_v41 = vsel %vm12680_vm4, 4294967295, %v16859_v41 }
 0x27a   : > { %v1868_v46 = vmax.f32 %v1852_v56, 0.0  ;;  %v1853_v58 = vadd.f32 %v12532_v30, %v1789_v52  ;;  %1912 = vrot.lane.b32.xlu1 %v1867_v32, %s11929_s12  ;;  %v1860_v30 = vmax.f32 %v1844_v43, 0.0  ;;  %16861 = vst [vmem:[#allocation33_spill] sm:$0xff] %v16860_v41 }
 0x27b   : > { %v1839_v10 = vadd.f32 %v1801_v42, %v1775_v26  ;;  %v1777_v45 = vadd.f32 %v12536_v55, %v1626_v8 }
 0x27c   : > { %1914 = vrot.lane.b32.xlu0 %v1868_v46, %s11929_s12  ;;  %v1869_v35 = vmax.f32 %v1853_v58, 0.0 }
 0x27d   : > { %v1855_v3 = vmax.f32 %v1839_v10, 0.0  ;;  %v1841_v6 = vadd.f32 %v1806_v44, %v1777_v45 }
 0x27e   : > { %1916 = vrot.lane.b32.xlu1 %v1869_v35, %s11929_s12 }
 0x27f   : > { %v1857_v61 = vmax.f32 %v1841_v6, 0.0 }
 0x280   : > { %1898 = vrot.lane.b32.xlu0 %v1860_v30, %s11929_s12 }
 0x282   : > { %1900 = vrot.lane.b32.xlu1 %v1861_v5, %s11929_s12 }
 0x284   : > { %1886 = vrot.lane.b32.xlu0 %v1854_v54, %s11929_s12 }
 0x286   : > { %1888 = vrot.lane.b32.xlu1 %v1855_v3, %s11929_s12 }
 0x288   : > { %1890 = vrot.lane.b32.xlu0 %v1856_v20, %s11929_s12 }
 0x28a   : > { %1892 = vrot.lane.b32.xlu1 %v1857_v61, %s11929_s12 }
 0x2da   : > { %v1895_v55 = vpop.permute.xlu0 %1894 }
 0x2db   : > { %1957 = vst.msk [vmem:[#allocation2 + $0x30] sm:$0xff] %vm1950_vm5, %v1895_v55 }
 0x2dc   : > { %v1897_v62 = vpop.permute.xlu1 %1896 }
 0x2dd   : > { %1959 = vst.msk [vmem:[#allocation2 + $0x40] sm:$0xff] %vm403_vm0, %v1897_v62  ;;  %v1920_v12 = vsel %vm403_vm0, %v1895_v55, %v1897_v62 }
 0x2e2   : > { %v1903_v60 = vpop.permute.xlu0 %1902  ;;  %v1979_v46 = vld [vmem:[#allocation2 + $0x30] sm:$0xff] }
 0x2e3   : > { %1963 = vst.msk [vmem:[#allocation2 + $0x60] sm:$0xff] %vm1950_vm5, %v1903_v60 }
 0x2e4   : > { %v1905_v21 = vpop.permute.xlu1 %1904  ;;  %v2025_v8 = vld [vmem:[#allocation2 + $0x40] sm:$0xff] }
 0x2e5   : > { %1965 = vst.msk [vmem:[#allocation2 + $0x70] sm:$0xff] %vm403_vm0, %v1905_v21  ;;  %v1922_v19 = vsel %vm403_vm0, %v1903_v60, %v1905_v21  ;;  %v12753_v59 = vpack.i.bf16 %v2025_v8, %v1920_v12 }
 0x2e6   : > { %v1907_v24 = vpop.permute.xlu0 %1906 }
 0x2e7   : > { %1966 = vst.msk [vmem:[#allocation2 + $0x78] sm:$0xff] %vm1950_vm5, %v1907_v24 }
 0x2e8   : > { %v1909_v23 = vpop.permute.xlu1 %1908 }
 0x2e9   : > { %1968 = vst.msk [vmem:[#allocation2 + $0x88] sm:$0xff] %vm403_vm0, %v1909_v23  ;;  %v12674_v33 = vsel %vm403_vm0, %v1907_v24, %v1909_v23  ;;  %v11779_v24 = vld [vmem:[%s16726_s3] sm:$0xff]   ;;  %v16862_v23 = vmov 0  }
 0x2ea   : > { %v1911_v27 = vpop.permute.xlu0 %1910  ;;  %v12695_v32 = vpack.c.bf16 %v12674_v33, %v1922_v19  ;;  %v1983_v34 = vld [vmem:[#allocation2 + $0x60] sm:$0xff] }
 0x2eb   : > { %1969 = vst.msk [vmem:[#allocation2 + $0x90] sm:$0xff] %vm1950_vm5, %v1911_v27 }
 0x2ec   : > { %v1913_v25 = vpop.permute.xlu1 %1912  ;;  %v2027_v45 = vld [vmem:[#allocation2 + $0x70] sm:$0xff] }
 0x2ed   : > { %1971 = vst.msk [vmem:[#allocation2 + $0xa0] sm:$0xff] %vm403_vm0, %v1913_v25  ;;  %v12659_v2 = vsel %vm403_vm0, %v1911_v27, %v1913_v25  ;;  %v12773_v5 = vpack.i.bf16 %v2027_v45, %v1922_v19  ;;  %v11782_v27 = vld [vmem:[%s16726_s3 + $0x8] sm:$0xff]   ;;  %v11784_v25 = vld [vmem:[%s16726_s3 + $0x10] sm:$0xff]  }
 0x2ee   : > { %v1915_v48 = vpop.permute.xlu0 %1914  ;;  %v1985_v56 = vld [vmem:[#allocation2 + $0x78] sm:$0xff] }
 0x2ef   : > { %1972 = vst.msk [vmem:[#allocation2 + $0xa8] sm:$0xff] %vm1950_vm5, %v1915_v48  ;;  %v12707_v14 = vpack.c.bf16 %v1985_v56, %v1983_v34  ;;  %v12782_v3 = vpack.i.bf16 %v1985_v56, %v1983_v34 }
 0x2f0   : > { %v1917_v28 = vpop.permute.xlu1 %1916  ;;  %v2028_v29 = vld [vmem:[#allocation2 + $0x88] sm:$0xff] }
 0x2f1   : > { %v12662_v11 = vsel %vm403_vm0, %v1915_v48, %v1917_v28  ;;  %1974 = vst.msk [vmem:[#allocation2 + $0xb8] sm:$0xff] %vm403_vm0, %v1917_v28  ;;  %v12780_v54 = vpack.i.bf16 %v2028_v29, %v12674_v33  ;;  %v12788_v6 = vpack.c.bf16 %v2028_v29, %v2027_v45  ;;  %v11786_v48 = vld [vmem:[%s16726_s3 + $0x18] sm:$0xff]  }
 0x2f2   : > { %v1899_v9 = vpop.permute.xlu0 %1898  ;;  %v12667_v16 = vpack.c.bf16 %v12662_v11, %v12659_v2  ;;  %v12684_v13 = vld [vmem:[#allocation2 + $0x90] sm:$0xff] }
 0x2f3   : > { %1960 = vst.msk [vmem:[#allocation2 + $0x48] sm:$0xff] %vm1950_vm5, %v1899_v9 }
 0x2f4   : > { %v1901_v1 = vpop.permute.xlu1 %1900  ;;  %9561 = vmatprep.subr.msk.bf16.mxu0 %vm12654_vm8, %v12667_v16  ;;  %v2029_v20 = vld [vmem:[#allocation2 + $0xa0] sm:$0xff] }
 0x2f5   : > { %1962 = vst.msk [vmem:[#allocation2 + $0x58] sm:$0xff] %vm403_vm0, %v1901_v1  ;;  %v1921_v52 = vsel %vm403_vm0, %v1899_v9, %v1901_v1  ;;  %v12795_v61 = vpack.i.bf16 %v2029_v20, %v12659_v2 }
 0x2f6   : > { %v1887_v0 = vpop.permute.xlu0 %1886  ;;  %v12686_v4 = vld [vmem:[#allocation2 + $0xa8] sm:$0xff]  ;;  %v12709_v49 = vpack.c.bf16 %v1921_v52, %v1920_v12 }
 0x2f7   : > { %1951 = vst.msk [vmem:[#allocation2] sm:$0xff] %vm1950_vm5, %v1887_v0  ;;  %v12692_v39 = vpack.c.bf16 %v12686_v4, %v12684_v13  ;;  %v12810_v60 = vpack.i.bf16 %v12686_v4, %v12684_v13 }
 0x2f8   : > { %v1889_v50 = vpop.permute.xlu1 %1888  ;;  %v2030_v55 = vld [vmem:[#allocation2 + $0xb8] sm:$0xff] }
 0x2f9   : > { %1953 = vst.msk [vmem:[#allocation2 + $0x10] sm:$0xff] %vm403_vm0, %v1889_v50  ;;  %9564 = vmatpush1.bf16.msk.msra.mxu0 %vm12680_vm4, %v12692_v39  ;;  %v1918_v58 = vsel %vm403_vm0, %v1887_v0, %v1889_v50  ;;  %v12802_v62 = vpack.i.bf16 %v2030_v55, %v12662_v11  ;;  %v12816_v21 = vpack.c.bf16 %v2030_v55, %v2029_v20 }
 0x2fa   : > { %v1891_v53 = vpop.permute.xlu0 %1890  ;;  %9567 = vmatprep.subr.msk.bf16.mxu0 %vm12654_vm8, %v12695_v32  ;;  %v1981_v15 = vld [vmem:[#allocation2 + $0x48] sm:$0xff] }
 0x2fb   : > { %1954 = vst.msk [vmem:[#allocation2 + $0x18] sm:$0xff] %vm1950_vm5, %v1891_v53  ;;  %v12720_v17 = vpack.c.bf16 %v1981_v15, %v1979_v46  ;;  %v12759_v30 = vpack.i.bf16 %v1981_v15, %v1979_v46 }
 0x2fc   : > { %v1893_v40 = vpop.permute.xlu1 %1892  ;;  %v2026_v22 = vld [vmem:[#allocation2 + $0x58] sm:$0xff] }
 0x2fd   : > { %v1919_v43 = vsel %vm403_vm0, %v1891_v53, %v1893_v40  ;;  %1956 = vst.msk [vmem:[#allocation2 + $0x28] sm:$0xff] %vm403_vm0, %v1893_v40  ;;  %9570 = vmatpush1.bf16.msk.msra.mxu0 %vm12680_vm4, %v12707_v14  ;;  %v12761_v44 = vpack.i.bf16 %v2026_v22, %v1921_v52  ;;  %v12767_v10 = vpack.c.bf16 %v2026_v22, %v2025_v8 }
 0x2fe   : > { %9573 = vmatprep.subr.msk.bf16.mxu0 %vm12654_vm8, %v12709_v49  ;;  %v12722_v42 = vpack.c.bf16 %v1919_v43, %v1918_v58  ;;  %v1975_v37 = vld [vmem:[#allocation2] sm:$0xff] }
 0x300   : > { %v2023_v57 = vld [vmem:[#allocation2 + $0x10] sm:$0xff] }
 0x301   : > { %v12724_v7 = vpack.i.bf16 %v2023_v57, %v1918_v58  ;;  %9576 = vmatpush1.bf16.msk.msra.mxu0 %vm12680_vm4, %v12720_v17 }
 0x302   : > { %v1977_v38 = vld [vmem:[#allocation2 + $0x18] sm:$0xff]  ;;  %9579 = vmatprep.subr.msk.bf16.mxu0 %vm12654_vm8, %v12722_v42 }
 0x303   : > { %10543 = vrot.lane.b32.xlu1 %v12724_v7, %s11932_s14  ;;  %v12734_v51 = vpack.c.bf16 %v1977_v38, %v1975_v37  ;;  %v12736_v47 = vpack.i.bf16 %v1977_v38, %v1975_v37 }
 0x304   : > { %v2024_v26 = vld [vmem:[#allocation2 + $0x28] sm:$0xff] }
 0x305   : > { %v12738_v35 = vpack.i.bf16 %v2024_v26, %v1919_v43  ;;  %9582 = vmatpush1.bf16.msk.msra.mxu0 %vm12680_vm4, %v12734_v51  ;;  %v12747_v36 = vpack.c.bf16 %v2024_v26, %v2023_v57 }
 0x307   : > { %10548 = vrot.lane.b32.xlu1 %v12736_v47, %s11932_s14  ;;  %10553 = vrot.lane.b32.xlu0 %v12738_v35, %s11932_s14 }
 0x308   : > { %9583 = vmatmul.mubr.msk.bf16.vlgmr.msra.gmra.mxu0 %vm2124_vm6, %v11779_v24 }
 0x309   : > { %2284 = vmatprep.mubr.bf16.mxu0 %v16862_v23 }
 0x30b   : > { %2084 = vrot.lane.b32.xlu1 %v12734_v51, %s11930_s13  ;;  %2088 = vrot.lane.b32.xlu0 %v12747_v36, %s11930_s13 }
 0x30f   : > { %10558 = vrot.lane.b32.xlu0 %v12753_v59, %s11932_s14  ;;  %2086 = vrot.lane.b32.xlu1 %v12722_v42, %s11930_s13 }
 0x310   : > { %9584 = vmatmul.mubr.msk.bf16.gmra.mxu0 %vm2124_vm6, %v11782_v27 }
 0x311   : > { %2294 = vmatprep.mubr.bf16.mxu0 %v16862_v23 }
 0x313   : > { %10563 = vrot.lane.b32.xlu0 %v12759_v30, %s11932_s14  ;;  %10568 = vrot.lane.b32.xlu1 %v12761_v44, %s11932_s14 }
 0x317   : > { %2090 = vrot.lane.b32.xlu0 %v12720_v17, %s11930_s13  ;;  %2094 = vrot.lane.b32.xlu1 %v12767_v10, %s11930_s13 }
 0x318   : > { %9585 = vmatmul.mubr.msk.bf16.gmra.mxu0 %vm2124_vm6, %v11784_v25 }
 0x319   : > { %2304 = vmatprep.mubr.bf16.mxu0 %v16862_v23 }
 0x31b   : > { %2092 = vrot.lane.b32.xlu0 %v12709_v49, %s11930_s13  ;;  %10573 = vrot.lane.b32.xlu1 %v12773_v5, %s11932_s14 }
 0x31f   : > { %10583 = vrot.lane.b32.xlu0 %v12780_v54, %s11932_s14  ;;  %10578 = vrot.lane.b32.xlu1 %v12782_v3, %s11932_s14 }
 0x320   : > { %9586 = vmatmul.mubr.msk.bf16.gmra.mxu0 %vm2124_vm6, %v11786_v48 }
 0x321   : > { %2750 = vmatprep.mubr.bf16.mxu0 %v16862_v23 }
 0x323   : > { %2100 = vrot.lane.b32.xlu0 %v12788_v6, %s11930_s13  ;;  %2096 = vrot.lane.b32.xlu1 %v12707_v14, %s11930_s13 }
 0x327   : > { %10588 = vrot.lane.b32.xlu0 %v12795_v61, %s11932_s14  ;;  %2098 = vrot.lane.b32.xlu1 %v12695_v32, %s11930_s13 }
 0x32b   : > { %10593 = vrot.lane.b32.xlu0 %v12795_v61, %s11933_s15  ;;  %10603 = vrot.lane.b32.xlu1 %v12802_v62, %s11932_s14 }
 0x32f   : > { %10598 = vrot.lane.b32.xlu0 %v12810_v60, %s11932_s14  ;;  %10608 = vrot.lane.b32.xlu1 %v12802_v62, %s11933_s15 }
 0x333   : > { %2102 = vrot.lane.b32.xlu0 %v12692_v39, %s11930_s13  ;;  %2106 = vrot.lane.b32.xlu1 %v12816_v21, %s11930_s13 }
 0x337   : > { %2104 = vrot.lane.b32.xlu0 %v12667_v16, %s11930_s13  ;;  %10618 = vrot.lane.b32.xlu1 %v12773_v5, %s11933_s15 }
 0x33b   : > { %10613 = vrot.lane.b32.xlu0 %v12810_v60, %s11933_s15  ;;  %10628 = vrot.lane.b32.xlu1 %v12782_v3, %s11933_s15 }
 0x33f   : > { %10623 = vrot.lane.b32.xlu0 %v12780_v54, %s11933_s15  ;;  %10633 = vrot.lane.b32.xlu1 %v12753_v59, %s11933_s15 }
 0x343   : > { %2858 = vrot.lane.b32.xlu0 %v12816_v21, %s11934_s16  ;;  %2850 = vrot.lane.b32.xlu1 %v12695_v32, %s11934_s16 }
 0x347   : > { %2854 = vrot.lane.b32.xlu0 %v12692_v39, %s11934_s16  ;;  %10643 = vrot.lane.b32.xlu1 %v12759_v30, %s11933_s15 }
 0x34b   : > { %10638 = vrot.lane.b32.xlu0 %v12761_v44, %s11933_s15  ;;  %10648 = vrot.lane.b32.xlu1 %v12724_v7, %s11933_s15 }
 0x34f   : > { %2852 = vrot.lane.b32.xlu0 %v12788_v6, %s11934_s16  ;;  %2844 = vrot.lane.b32.xlu1 %v12709_v49, %s11934_s16 }
 0x353   : > { %2848 = vrot.lane.b32.xlu0 %v12707_v14, %s11934_s16  ;;  %10658 = vrot.lane.b32.xlu1 %v12736_v47, %s11933_s15 }
 0x357   : > { %10653 = vrot.lane.b32.xlu0 %v12738_v35, %s11933_s15  ;;  %2838 = vrot.lane.b32.xlu1 %v12722_v42, %s11934_s16 }
 0x35b   : > { %2846 = vrot.lane.b32.xlu0 %v12767_v10, %s11934_s16  ;;  %2836 = vrot.lane.b32.xlu1 %v12734_v51, %s11934_s16 }
 0x35f   : > { %2842 = vrot.lane.b32.xlu0 %v12720_v17, %s11934_s16  ;;  %10668 = vrot.lane.b32.xlu1 %v12802_v62, %s11935_s19 }
 0x363   : > { %2840 = vrot.lane.b32.xlu0 %v12747_v36, %s11934_s16  ;;  %10678 = vrot.lane.b32.xlu1 %v12795_v61, %s11936_s20 }
 0x367   : > { %10663 = vrot.lane.b32.xlu0 %v12795_v61, %s11935_s19  ;;  %10688 = vrot.lane.b32.xlu1 %v12810_v60, %s11936_s20 }
 0x36b   : > { %10673 = vrot.lane.b32.xlu0 %v12810_v60, %s11935_s19  ;;  %10698 = vrot.lane.b32.xlu1 %v12780_v54, %s11935_s19 }
 0x36f   : > { %10683 = vrot.lane.b32.xlu0 %v12802_v62, %s11936_s20  ;;  %10708 = vrot.lane.b32.xlu1 %v12773_v5, %s11936_s20 }
 0x373   : > { %10693 = vrot.lane.b32.xlu0 %v12773_v5, %s11935_s19  ;;  %2856 = vrot.lane.b32.xlu1 %v12667_v16, %s11934_s16 }
 0x375   : > { %v12906_v28 = vpop.permute.xlu1 %10543 }
 0x377   : > { %10703 = vrot.lane.b32.xlu0 %v12782_v3, %s11935_s19  ;;  %10718 = vrot.lane.b32.xlu1 %v12782_v3, %s11936_s20 }
 0x379   : > { %v12912_v63 = vpop.permute.xlu1 %10548  ;;  %v12914_v2 = vpop.permute.xlu0 %10553 }
 0x37b   : > { %10713 = vrot.lane.b32.xlu0 %v12780_v54, %s11936_s20  ;;  %10728 = vrot.lane.b32.xlu1 %v12761_v44, %s11935_s19 }
 0x37d   : > { %v12920_v11 = vpop.permute.xlu1 %2084  ;;  %v12922_v9 = vpop.permute.xlu0 %2088 }
 0x37f   : > { %10723 = vrot.lane.b32.xlu0 %v12753_v59, %s11935_s19  ;;  %10738 = vrot.lane.b32.xlu1 %v12753_v59, %s11936_s20 }
 0x381   : > { %v12928_v1 = vpop.permute.xlu0 %10558  ;;  %v12930_v33 = vpop.permute.xlu1 %2086 }
 0x383   : > { %10733 = vrot.lane.b32.xlu0 %v12759_v30, %s11935_s19  ;;  %10748 = vrot.lane.b32.xlu1 %v12759_v30, %s11936_s20 }
 0x385   : > { %v12936_v31 = vpop.permute.xlu0 %10563  ;;  %v12938_v0 = vpop.permute.xlu1 %10568 }
 0x387   : > { %10743 = vrot.lane.b32.xlu0 %v12761_v44, %s11936_s20  ;;  %10758 = vrot.lane.b32.xlu1 %v12738_v35, %s11935_s19 }
 0x389   : > { %v12944_v13 = vpop.permute.xlu0 %2090  ;;  %v2095_v4 = vpop.permute.xlu1 %2094 }
 0x38b   : > { %10753 = vrot.lane.b32.xlu0 %v12724_v7, %s11935_s19  ;;  %10768 = vrot.lane.b32.xlu1 %v12724_v7, %s11936_s20 }
 0x38d   : > { %v12950_v19 = vpop.permute.xlu0 %2092  ;;  %v12952_v50 = vpop.permute.xlu1 %10573 }
 0x38f   : > { %10763 = vrot.lane.b32.xlu0 %v12736_v47, %s11935_s19  ;;  %10778 = vrot.lane.b32.xlu1 %v12736_v47, %s11936_s20 }
 0x391   : > { %v12958_v56 = vpop.permute.xlu0 %10583  ;;  %v12960_v52 = vpop.permute.xlu1 %10578 }
 0x393   : > { %10773 = vrot.lane.b32.xlu0 %v12738_v35, %s11936_s20  ;;  %3496 = vrot.lane.b32.xlu1 %v12816_v21, %s11938_s22 }
 0x395   : > { %v2101_v53 = vpop.permute.xlu0 %2100  ;;  %v2097_v34 = vpop.permute.xlu1 %2096 }
 0x397   : > { %10783 = vrot.lane.b32.xlu0 %v12795_v61, %s11937_s21  ;;  %10788 = vrot.lane.b32.xlu1 %v12802_v62, %s11937_s21 }
 0x399   : > { %v12970_v12 = vpop.permute.xlu0 %10588  ;;  %v2099_v40 = vpop.permute.xlu1 %2098 }
 0x39b   : > { %3492 = vrot.lane.b32.xlu0 %v12692_v39, %s11938_s22  ;;  %10793 = vrot.lane.b32.xlu1 %v12810_v60, %s11937_s21  ;;  %v2109_v60 = vsel %vm528_vm7, %v12930_v33, %v12922_v9  ;;  %v10586_v9 = vunpack.i.h.bf16 %v12958_v56 }
 0x39d   : > { %v10594_v15 = vpop.permute.xlu0 %10593  ;;  %v12976_v43 = vpop.permute.xlu1 %10603 }
 0x39e   : > { %v10596_v46 = vunpack.i.h.bf16 %v10594_v15  ;;  %v10595_v58 = vunpack.i.l.bf16 %v10594_v15  ;;  %v10605_v48 = vunpack.i.l.bf16 %v12976_v43 }
 0x39f   : > { %3488 = vrot.lane.b32.xlu0 %v12695_v32, %s11938_s22  ;;  %3490 = vrot.lane.b32.xlu1 %v12788_v6, %s11938_s22 }
 0x3a0   : > { %v2634_v39 = vsel %vm902_vm13, %v10595_v58, %v10596_v46 }
 0x3a1   : > { %v12982_v57 = vpop.permute.xlu0 %10598  ;;  %v10609_v37 = vpop.permute.xlu1 %10608 }
 0x3a2   : > { %v10611_v38 = vunpack.i.h.bf16 %v10609_v37  ;;  %v10610_v26 = vunpack.i.l.bf16 %v10609_v37  ;;  %v10590_v37 = vunpack.i.l.bf16 %v12970_v12 }
 0x3a3   : > { %10798 = vrot.lane.b32.xlu0 %v12773_v5, %s11937_s21  ;;  %10803 = vrot.lane.b32.xlu1 %v12780_v54, %s11937_s21 }
 0x3a4   : > { %v2636_v32 = vsel %vm902_vm13, %v10610_v26, %v10611_v38  ;;  %v10600_v38 = vunpack.i.l.bf16 %v12982_v57 }
 0x3a5   : > { %v2103_v8 = vpop.permute.xlu0 %2102  ;;  %v2107_v22 = vpop.permute.xlu1 %2106  ;;  %v9640_v45 = vpack.c.bf16 %v2636_v32, %v2634_v39 }
 0x3a7   : > { %3486 = vrot.lane.b32.xlu0 %v12707_v14, %s11938_s22  ;;  %10808 = vrot.lane.b32.xlu1 %v12782_v3, %s11937_s21  ;;  %v2113_v3 = vsel %vm528_vm7, %v2099_v40, %v2101_v53 }
 0x3a8   : > { %9641 = vmatprep.subr.msk.bf16.mxu0 %vm12654_vm8, %v9640_v45  ;;  %v10570_v45 = vunpack.i.l.bf16 %v12938_v0 }
 0x3a9   : > { %v2105_v5 = vpop.permute.xlu0 %2104  ;;  %v10619_v29 = vpop.permute.xlu1 %10618 }
 0x3aa   : > { %v2115_v54 = vsel %vm528_vm7, %v2105_v5, %v2107_v22  ;;  %v2114_v6 = vsel %vm528_vm7, %v2103_v8, %v2105_v5  ;;  %v10621_v62 = vunpack.i.h.bf16 %v10619_v29  ;;  %v10620_v21 = vunpack.i.l.bf16 %v10619_v29 }
 0x3ab   : > { %3482 = vrot.lane.b32.xlu0 %v12709_v49, %s11938_s22  ;;  %3484 = vrot.lane.b32.xlu1 %v12767_v10, %s11938_s22  ;;  %v2112_v49 = vsel %vm528_vm7, %v2097_v34, %v2099_v40  ;;  %v2111_v10 = vsel %vm528_vm7, %v12950_v19, %v2095_v4  ;;  %v2110_v4 = vsel %vm528_vm7, %v12944_v13, %v12950_v19  ;;  %v10571_v22 = vunpack.i.h.bf16 %v12938_v0 }
 0x3ac   : > { %2145 = vmatprep.subr.bf16.mxu1 %v2115_v54  ;;  %v2630_v13 = vsel %vm902_vm13, %v10620_v21, %v10621_v62  ;;  %v10576_v5 = vunpack.i.h.bf16 %v12952_v50  ;;  %v10575_v29 = vunpack.i.l.bf16 %v12952_v50  ;;  %v2399_v0 = vsel %vm751_vm10, %v10600_v38, %v10590_v37 }
 0x3ad   : > { %2146 = vmatpush1.bf16.msra.mxu1 %v2114_v6  ;;  %v10614_v14 = vpop.permute.xlu0 %10613  ;;  %v10629_v20 = vpop.permute.xlu1 %10628  ;;  %v10581_v6 = vunpack.i.h.bf16 %v12960_v52 }
 0x3ae   : > { %v10616_v61 = vunpack.i.h.bf16 %v10614_v14  ;;  %v10615_v55 = vunpack.i.l.bf16 %v10614_v14  ;;  %2147 = vmatprep.subr.bf16.mxu1 %v2113_v3  ;;  %v10630_v25 = vunpack.i.l.bf16 %v10629_v20  ;;  %v10631_v40 = vunpack.i.h.bf16 %v10629_v20 }
 0x3af   : > { %10813 = vrot.lane.b32.xlu0 %v12753_v59, %s11937_s21  ;;  %10818 = vrot.lane.b32.xlu1 %v12761_v44, %s11937_s21  ;;  %v10606_v59 = vunpack.i.h.bf16 %v12976_v43  ;;  %v10601_v43 = vunpack.i.h.bf16 %v12982_v57  ;;  %v10580_v14 = vunpack.i.l.bf16 %v12960_v52  ;;  %v2108_v20 = vsel %vm528_vm7, %v12920_v11, %v12930_v33 }
 0x3b0   : > { %v2633_v24 = vsel %vm902_vm13, %v10615_v55, %v10595_v58  ;;  %v2635_v27 = vsel %vm902_vm13, %v10616_v61, %v10610_v26  ;;  %v10591_v58 = vunpack.i.h.bf16 %v12970_v12  ;;  %v2629_v19 = vsel %vm902_vm13, %v10630_v25, %v10620_v21  ;;  %v11780_v61 = vld [vmem:[%s16726_s3 + $0x20] sm:$0xff]  }
 0x3b1   : > { %v9643_v44 = vpack.c.bf16 %v2635_v27, %v2633_v24  ;;  %2148 = vmatpush1.bf16.msra.mxu1 %v2112_v49  ;;  %v10624_v53 = vpop.permute.xlu0 %10623  ;;  %v13017_v34 = vpop.permute.xlu1 %10633  ;;  %v10585_v12 = vunpack.i.l.bf16 %v12958_v56  ;;  %v2402_v57 = vsel %vm751_vm10, %v10605_v48, %v10606_v59  ;;  %v16864_v56 = vmov 0 }
 0x3b2   : > { %v10626_v15 = vunpack.i.h.bf16 %v10624_v53  ;;  %v10625_v46 = vunpack.i.l.bf16 %v10624_v53  ;;  %2149 = vmatprep.subr.bf16.mxu1 %v2111_v10  ;;  %v16865_v56 = vsel %vm13050_vm11, 4294967295, %v16864_v56  ;;  %v2400_v3 = vsel %vm751_vm10, %v10590_v37, %v10591_v58 }
 0x3b3   : > { %3494 = vrot.lane.b32.xlu0 %v12667_v16, %s11938_s22  ;;  %10823 = vrot.lane.b32.xlu1 %v12759_v30, %s11937_s21  ;;  %16866 = vst [vmem:[#allocation14_spill] sm:$0xff] %v16865_v56  ;;  %v2401_v50 = vsel %vm751_vm10, %v10601_v43, %v10605_v48  ;;  %v9600_v52 = vpack.c.bf16 %v2402_v57, %v2400_v3  ;;  %v10560_v55 = vunpack.i.l.bf16 %v12928_v1  ;;  %v16868_v10 = vmov 0  ;;  %v3854_v3 = vld [vmem:[%s16727_s4 + $0x28] sm:$0xff] }
 0x3b4   : > { %v2631_v26 = vsel %vm902_vm13, %v10631_v40, %v10625_v46  ;;  %v2632_v39 = vsel %vm902_vm13, %v10625_v46, %v10626_v15  ;;  %9644 = vmatpush1.bf16.msk.msra.mxu0 %vm12680_vm4, %v9643_v44  ;;  %v2398_v62 = vsel %vm751_vm10, %v10585_v12, %v10586_v9  ;;  %v16869_v10 = vsel %vm13082_vm12, 4294967295, %v16868_v10 }
 0x3b5   : > { %v9649_v32 = vpack.c.bf16 %v2631_v26, %v2629_v19  ;;  %2150 = vmatpush1.bf16.msra.mxu1 %v2110_v4  ;;  %v13039_v16 = vpop.permute.xlu0 %2858  ;;  %v13041_v30 = vpop.permute.xlu1 %2850  ;;  %v9646_v8 = vpack.c.bf16 %v2632_v39, %v2630_v13  ;;  %16870 = vst [vmem:[#allocation16_spill] sm:$0xff] %v16869_v10  ;;  %v2394_v21 = vsel %vm751_vm10, %v10570_v45, %v10571_v22  ;;  %v10566_v27 = vunpack.i.h.bf16 %v12936_v31 }
 0x3b6   : > { %2151 = vmatprep.subr.bf16.mxu1 %v2109_v60  ;;  %v10545_v60 = vunpack.i.l.bf16 %v12906_v28  ;;  %v2396_v24 = vsel %vm751_vm10, %v10575_v29, %v10576_v5  ;;  %v2397_v25 = vsel %vm751_vm10, %v10581_v6, %v10585_v12  ;;  %v2395_v59 = vsel %vm751_vm10, %v10580_v14, %v10575_v29  ;;  %v3855_v14 = vld [vmem:[%s16727_s4 + $0x30] sm:$0xff] }
 0x3b7   : > { %3480 = vrot.lane.b32.xlu0 %v12720_v17, %s11938_s22  ;;  %3478 = vrot.lane.b32.xlu1 %v12747_v36, %s11938_s22  ;;  %v10546_v17 = vunpack.i.h.bf16 %v12906_v28  ;;  %v10561_v36 = vunpack.i.h.bf16 %v12928_v1  ;;  %v10565_v1 = vunpack.i.l.bf16 %v12936_v31  ;;  %v9603_v48 = vpack.c.bf16 %v2401_v50, %v2399_v0 }
 0x3b8   : > { %9647 = vmatprep.subr.msk.bf16.mxu0 %vm12654_vm8, %v9646_v8  ;;  %v10636_v28 = vunpack.i.h.bf16 %v13017_v34  ;;  %v10635_v44 = vunpack.i.l.bf16 %v13017_v34  ;;  %v9606_v4 = vpack.c.bf16 %v2398_v62, %v2396_v24  ;;  %v10551_v31 = vunpack.i.h.bf16 %v12912_v63 }
 0x3b9   : > { %2152 = vmatpush1.bf16.msra.mxu1 %v2108_v20  ;;  %9650 = vmatpush1.bf16.msk.msra.mxu0 %vm12680_vm4, %v9649_v32  ;;  %v13077_v49 = vpop.permute.xlu0 %2854  ;;  %v10644_v11 = vpop.permute.xlu1 %10643  ;;  %v10556_v9 = vunpack.i.h.bf16 %v12914_v2  ;;  %v10555_v40 = vunpack.i.l.bf16 %v12914_v2  ;;  %v2392_v15 = vsel %vm751_vm10, %v10560_v55, %v10561_v36  ;;  %v2391_v34 = vsel %vm751_vm10, %v10565_v1, %v10560_v55  ;;  %v3852_v36 = vld [vmem:[%s16727_s4 + $0x18] sm:$0xff]  ;;  %v11783_v55 = vld [vmem:[%s16726_s3 + $0x30] sm:$0xff]  }
 0x3ba   : > { %9601 = vmatprep.subr.msk.bf16.mxu1 %vm13050_vm11, %v9600_v52  ;;  %v10645_v53 = vunpack.i.l.bf16 %v10644_v11  ;;  %v10646_v46 = vunpack.i.h.bf16 %v10644_v11  ;;  %v10550_v2 = vunpack.i.l.bf16 %v12912_v63  ;;  %v2393_v43 = vsel %vm751_vm10, %v10566_v27, %v10570_v45  ;;  %v3856_v63 = vld [vmem:[%s16727_s4 + $0x38] sm:$0xff] }
 0x3bb   : > { %3476 = vrot.lane.b32.xlu0 %v12722_v42, %s11938_s22  ;;  %10833 = vrot.lane.b32.xlu1 %v12738_v35, %s11937_s21  ;;  %v9609_v38 = vpack.c.bf16 %v2397_v25, %v2395_v59  ;;  %v9612_v13 = vpack.c.bf16 %v2394_v21, %v2392_v15  ;;  %v2626_v19 = vsel %vm902_vm13, %v10635_v44, %v10636_v28  ;;  %v3851_v59 = vld [vmem:[%s16727_s4 + $0x10] sm:$0xff] }
 0x3bc   : > { %9551 = vmatmul.mubr.msk.bf16.vlgmr.msra.gmra.mxu1 %vm2124_vm6, %v11780_v61  ;;  %v2625_v26 = vsel %vm902_vm13, %v10645_v53, %v10635_v44  ;;  %v2390_v57 = vsel %vm751_vm10, %v10555_v40, %v10556_v9  ;;  %v2388_v45 = vsel %vm751_vm10, %v10545_v60, %v10546_v17  ;;  %v9615_v5 = vpack.c.bf16 %v2393_v43, %v2391_v34  ;;  %v3853_v17 = vld [vmem:[%s16727_s4 + $0x20] sm:$0xff]  ;;  %v11785_v9 = vld [vmem:[%s16726_s3 + $0x38] sm:$0xff]  }
 0x3bd   : > { %9604 = vmatpush1.bf16.msk.msra.mxu1 %vm13082_vm12, %v9603_v48  ;;  %v10639_v42 = vpop.permute.xlu0 %10638  ;;  %v13108_v35 = vpop.permute.xlu1 %10648  ;;  %2179 = vmatprep.mubr.bf16.mxu1 %v16862_v23  ;;  %v2387_v29 = vsel %vm751_vm10, %v10550_v2, %v10545_v60  ;;  %v2389_v54 = vsel %vm751_vm10, %v10551_v31, %v10555_v40  ;;  %v9618_v6 = vpack.c.bf16 %v2390_v57, %v2388_v45  ;;  %v3850_v48 = vld [vmem:[%s16727_s4 + $0x8] sm:$0xff]  ;;  %v3849_v31 = vld [vmem:[%s16727_s4] sm:$0xff] }
 0x3be   : > { %v10641_v58 = vunpack.i.h.bf16 %v10639_v42  ;;  %v10640_v37 = vunpack.i.l.bf16 %v10639_v42  ;;  %9607 = vmatprep.subr.msk.bf16.mxu1 %vm13050_vm11, %v9606_v4  ;;  %v9621_v50 = vpack.c.bf16 %v2389_v54, %v2387_v29  ;;  %v10651_v20 = vunpack.i.h.bf16 %v13108_v35  ;;  %v11788_v40 = vld [vmem:[%s16726_s3 + $0x60] sm:$0xff]   ;;  %v11790_v2 = vld [vmem:[%s16726_s3 + $0x68] sm:$0xff]   ;;  %v11792_v29 = vld [vmem:[%s16726_s3 + $0x70] sm:$0xff]  }
 0x3bf   : > { %10828 = vrot.lane.b32.xlu0 %v12724_v7, %s11937_s21  ;;  %10838 = vrot.lane.b32.xlu1 %v12736_v47, %s11937_s21  ;;  %v11781_v7 = vld [vmem:[%s16726_s3 + $0x28] sm:$0xff]   ;;  %v10650_v52 = vunpack.i.l.bf16 %v13108_v35 }
 0x3c0   : > { %v2627_v39 = vsel %vm902_vm13, %v10646_v46, %v10640_v37  ;;  %v2628_v12 = vsel %vm902_vm13, %v10640_v37, %v10641_v58  ;;  %v11787_v37 = vld [vmem:[%s16726_s3 + $0x40] sm:$0xff]  }
 0x3c1   : > { %v9655_v47 = vpack.c.bf16 %v2627_v39, %v2625_v26  ;;  %9610 = vmatpush1.bf16.msk.msra.mxu1 %vm13082_vm12, %v9609_v38  ;;  %v13133_v32 = vpop.permute.xlu0 %2852  ;;  %v13135_v8 = vpop.permute.xlu1 %2844  ;;  %v9652_v22 = vpack.c.bf16 %v2628_v12, %v2626_v19  ;;  %v2622_v21 = vsel %vm902_vm13, %v10650_v52, %v10651_v20 }
 0x3c2   : > { %9613 = vmatprep.subr.msk.bf16.mxu1 %vm13050_vm11, %v9612_v13 }
 0x3c3   : > { %3474 = vrot.lane.b32.xlu0 %v12734_v51, %s11938_s22  ;;  %3894 = vperm.xlu1 %10540, %v3856_v63  }
 0x3c4   : > { %9552 = vmatmul.mubr.msk.bf16.gmra.mxu1 %vm2124_vm6, %v11781_v7  ;;  %9653 = vmatprep.subr.msk.bf16.mxu0 %vm12654_vm8, %v9652_v22 }
 0x3c5   : > { %9616 = vmatpush1.bf16.msk.msra.mxu1 %vm13082_vm12, %v9615_v5  ;;  %9656 = vmatpush1.bf16.msk.msra.mxu0 %vm12680_vm4, %v9655_v47  ;;  %v13157_v51 = vpop.permute.xlu0 %2848  ;;  %v10659_v0 = vpop.permute.xlu1 %10658  ;;  %v11789_v5 = vld [vmem:[%s16726_s3 + $0x48] sm:$0xff]  }
 0x3c6   : > { %9619 = vmatprep.subr.msk.bf16.mxu1 %vm13050_vm11, %v9618_v6  ;;  %2189 = vmatprep.mubr.bf16.mxu1 %v16862_v23  ;;  %v10660_v61 = vunpack.i.l.bf16 %v10659_v0  ;;  %v10661_v33 = vunpack.i.h.bf16 %v10659_v0 }
 0x3c7   : > { %3889 = vperm.xlu0 %10541, %v3855_v14   ;;  %3884 = vperm.xlu1 %10540, %v3854_v3  }
 0x3c8   : > { %v2621_v24 = vsel %vm902_vm13, %v10660_v61, %v10650_v52 }
 0x3c9   : > { %9622 = vmatpush1.bf16.msk.msra.mxu1 %vm13082_vm12, %v9621_v50  ;;  %v10654_v62 = vpop.permute.xlu0 %10653  ;;  %v13175_v11 = vpop.permute.xlu1 %2838 }
 0x3ca   : > { %v10656_v60 = vunpack.i.h.bf16 %v10654_v62  ;;  %v10655_v1 = vunpack.i.l.bf16 %v10654_v62 }
 0x3cb   : > { %3879 = vperm.xlu0 %10541, %v3853_v17   ;;  %3874 = vperm.xlu1 %10540, %v3852_v36  }
 0x3cc   : > { %v2623_v27 = vsel %vm902_vm13, %v10661_v33, %v10655_v1  ;;  %v2624_v25 = vsel %vm902_vm13, %v10655_v1, %v10656_v60  ;;  %9553 = vmatmul.mubr.msk.bf16.gmra.mxu1 %vm2124_vm6, %v11783_v55  ;;  %v2865_v33 = vsel %vm1082_vm15, %v13041_v30, %v13133_v32  ;;  %v11791_v60 = vld [vmem:[%s16726_s3 + $0x50] sm:$0xff]   ;;  %v2864_v32 = vsel %vm1082_vm15, %v13157_v51, %v13041_v30 }
 0x3cd   : > { %v9661_v28 = vpack.c.bf16 %v2623_v27, %v2621_v24  ;;  %v13188_v44 = vpop.permute.xlu0 %2846  ;;  %v13190_v53 = vpop.permute.xlu1 %2836  ;;  %v9658_v4 = vpack.c.bf16 %v2624_v25, %v2622_v21  ;;  %2199 = vmatprep.mubr.bf16.mxu1 %v16862_v23 }
 0x3ce   : > { %v2863_v30 = vsel %vm1082_vm15, %v13135_v8, %v13188_v44  ;;  %v11793_v44 = vld [vmem:[%s16726_s3 + $0x58] sm:$0xff]  }
 0x3cf   : > { %3869 = vperm.xlu0 %10541, %v3851_v59   ;;  %3864 = vperm.xlu1 %10540, %v3850_v48  }
 0x3d0   : > { %9659 = vmatprep.subr.msk.bf16.mxu0 %vm12654_vm8, %v9658_v4 }
 0x3d1   : > { %9662 = vmatpush1.bf16.msk.msra.mxu0 %vm12680_vm4, %v9661_v28  ;;  %v13206_v15 = vpop.permute.xlu0 %2842  ;;  %v10669_v42 = vpop.permute.xlu1 %10668 }
 0x3d2   : > { %v10671_v46 = vunpack.i.h.bf16 %v10669_v42  ;;  %v10670_v58 = vunpack.i.l.bf16 %v10669_v42  ;;  %v2862_v42 = vsel %vm1082_vm15, %v13206_v15, %v13135_v8  ;;  %v2860_v15 = vsel %vm1082_vm15, %v13190_v53, %v13175_v11 }
 0x3d3   : > { %3859 = vperm.xlu0 %10541, %v3849_v31  }
 0x3d4   : > { %9554 = vmatmul.mubr.msk.bf16.gmra.mxu1 %vm2124_vm6, %v11785_v9  ;;  %9663 = vmatmul.mubr.msk.bf16.vlgmr.msra.gmra.mxu0 %vm2124_vm6, %v11788_v40  ;;  %v3040_v26 = vsel %vm1198_vm14, %v10670_v58, %v10671_v46 }
 0x3d5   : > { %v13210_v35 = vpop.permute.xlu0 %2840  ;;  %v13212_v34 = vpop.permute.xlu1 %10678  ;;  %2516 = vmatprep.mubr.bf16.mxu1 %v16862_v23  ;;  %2760 = vmatprep.mubr.bf16.mxu0 %v16862_v23 }
 0x3d6   : > { %v10681_v51 = vunpack.i.h.bf16 %v13212_v34  ;;  %v10680_v40 = vunpack.i.l.bf16 %v13212_v34  ;;  %v2861_v34 = vsel %vm1082_vm15, %v13175_v11, %v13210_v35 }
 0x3d8   : > { %v3272_v8 = vsel %vm1349_vm1, %v10680_v40, %v10681_v51 }
 0x3d9   : > { %v10664_v43 = vpop.permute.xlu0 %10663  ;;  %v13222_v38 = vpop.permute.xlu1 %10688 }
 0x3da   : > { %v10666_v13 = vunpack.i.h.bf16 %v10664_v43  ;;  %v10665_v19 = vunpack.i.l.bf16 %v10664_v43 }
 0x3dc   : > { %v3038_v39 = vsel %vm1198_vm14, %v10665_v19, %v10666_v13  ;;  %9623 = vmatmul.mubr.msk.bf16.vlgmr.msra.gmra.mxu1 %vm2124_vm6, %v11787_v37  ;;  %9664 = vmatmul.mubr.msk.bf16.gmra.mxu0 %vm2124_vm6, %v11790_v2 }
 0x3dd   : > { %v10674_v12 = vpop.permute.xlu0 %10673  ;;  %v10699_v63 = vpop.permute.xlu1 %10698  ;;  %v9696_v7 = vpack.c.bf16 %v3040_v26, %v3038_v39  ;;  %2526 = vmatprep.mubr.bf16.mxu1 %v16862_v23  ;;  %2770 = vmatprep.mubr.bf16.mxu0 %v16862_v23 }
 0x3de   : > { %v10676_v57 = vunpack.i.h.bf16 %v10674_v12  ;;  %v10675_v47 = vunpack.i.l.bf16 %v10674_v12  ;;  %v10701_v3 = vunpack.i.h.bf16 %v10699_v63  ;;  %v10700_v0 = vunpack.i.l.bf16 %v10699_v63 }
 0x3df   : > { %9697 = vmatprep.subr.msk.bf16.mxu0 %vm13050_vm11, %v9696_v7  ;;  %v10691_v63 = vunpack.i.h.bf16 %v13222_v38 }
 0x3e0   : > { %v3037_v22 = vsel %vm1198_vm14, %v10675_v47, %v10665_v19  ;;  %v3039_v45 = vsel %vm1198_vm14, %v10676_v57, %v10670_v58  ;;  %v3036_v55 = vsel %vm1198_vm14, %v10700_v0, %v10701_v3 }
 0x3e1   : > { %v9699_v54 = vpack.c.bf16 %v3039_v45, %v3037_v22  ;;  %v13240_v6 = vpop.permute.xlu0 %10683  ;;  %v13242_v14 = vpop.permute.xlu1 %10708  ;;  %v10690_v45 = vunpack.i.l.bf16 %v13222_v38 }
 0x3e2   : > { %v10686_v48 = vunpack.i.h.bf16 %v13240_v6  ;;  %v10685_v28 = vunpack.i.l.bf16 %v13240_v6 }
 0x3e3   : > { %9700 = vmatpush1.bf16.msk.msra.mxu0 %vm13082_vm12, %v9699_v54  ;;  %v10710_v54 = vunpack.i.l.bf16 %v13242_v14 }
 0x3e4   : > { %9624 = vmatmul.mubr.msk.bf16.gmra.mxu1 %vm2124_vm6, %v11789_v5  ;;  %9665 = vmatmul.mubr.msk.bf16.gmra.mxu0 %vm2124_vm6, %v11792_v29  ;;  %v3274_v37 = vsel %vm1349_vm1, %v10685_v28, %v10686_v48  ;;  %v3273_v5 = vsel %vm1349_vm1, %v10691_v63, %v10685_v28  ;;  %v10711_v29 = vunpack.i.h.bf16 %v13242_v14 }
 0x3e5   : > { %v10694_v50 = vpop.permute.xlu0 %10693  ;;  %v2857_v20 = vpop.permute.xlu1 %2856  ;;  %2536 = vmatprep.mubr.bf16.mxu1 %v16862_v23  ;;  %2780 = vmatprep.mubr.bf16.mxu0 %v16862_v23  ;;  %v9736_v12 = vpack.c.bf16 %v3274_v37, %v3272_v8 }
 0x3e6   : > { %v10696_v52 = vunpack.i.h.bf16 %v10694_v50  ;;  %v10695_v61 = vunpack.i.l.bf16 %v10694_v50  ;;  %v2867_v17 = vsel %vm1082_vm15, %v2857_v20, %v13039_v16  ;;  %v2866_v36 = vsel %vm1082_vm15, %v13077_v49, %v2857_v20  ;;  %v11794_v16 = vld [vmem:[%s16726_s3 + $0x78] sm:$0xff]   ;;  %v11795_v50 = vld [vmem:[%s16726_s3 + $0x80] sm:$0xff]  }
 0x3e7   : > { %2896 = vmatprep.subr.bf16.mxu1 %v2867_v17 }
 0x3e8   : > { %v3034_v62 = vsel %vm1198_vm14, %v10695_v61, %v10696_v52  ;;  %2897 = vmatpush1.bf16.msra.mxu1 %v2866_v36 }
 0x3e9   : > { %v10704_v1 = vpop.permute.xlu0 %10703  ;;  %v13265_v49 = vpop.permute.xlu1 %10718  ;;  %2898 = vmatprep.subr.bf16.mxu1 %v2865_v33  ;;  %v9702_v21 = vpack.c.bf16 %v3036_v55, %v3034_v62  ;;  %v3271_v55 = vsel %vm1349_vm1, %v10690_v45, %v10680_v40  ;;  %v11797_v45 = vld [vmem:[%s16726_s3 + $0xa0] sm:$0xff]  }
 0x3ea   : > { %v10706_v24 = vunpack.i.h.bf16 %v10704_v1  ;;  %v10705_v27 = vunpack.i.l.bf16 %v10704_v1  ;;  %v10721_v6 = vunpack.i.h.bf16 %v13265_v49  ;;  %v10720_v3 = vunpack.i.l.bf16 %v13265_v49 }
 0x3eb   : > { %9703 = vmatprep.subr.msk.bf16.mxu0 %vm13050_vm11, %v9702_v21 }
 0x3ec   : > { %v3033_v25 = vsel %vm1198_vm14, %v10705_v27, %v10695_v61  ;;  %v3035_v59 = vsel %vm1198_vm14, %v10706_v24, %v10700_v0  ;;  %9625 = vmatmul.mubr.msk.bf16.gmra.mxu1 %vm2124_vm6, %v11791_v60  ;;  %9666 = vmatmul.mubr.msk.bf16.gmra.mxu0 %vm2124_vm6, %v11794_v16  ;;  %v9739_v60 = vpack.c.bf16 %v3273_v5, %v3271_v55 }
 0x3ed   : > { %v9705_v4 = vpack.c.bf16 %v3035_v59, %v3033_v25  ;;  %2899 = vmatpush1.bf16.msra.mxu1 %v2864_v32  ;;  %v10714_v31 = vpop.permute.xlu0 %10713  ;;  %v10729_v9 = vpop.permute.xlu1 %10728  ;;  %2546 = vmatprep.mubr.bf16.mxu1 %v16862_v23  ;;  %v3268_v16 = vsel %vm1349_vm1, %v10710_v54, %v10711_v29  ;;  %v3267_v32 = vsel %vm1349_vm1, %v10720_v3, %v10710_v54  ;;  %v11798_v54 = vld [vmem:[%s16726_s3 + $0x90] sm:$0xff]  }
 0x3ee   : > { %2900 = vmatprep.subr.bf16.mxu1 %v2863_v30  ;;  %3154 = vmatprep.mubr.bf16.mxu0 %v16862_v23  ;;  %v10731_v46 = vunpack.i.h.bf16 %v10729_v9  ;;  %v10730_v58 = vunpack.i.l.bf16 %v10729_v9  ;;  %v10716_v7 = vunpack.i.h.bf16 %v10714_v31  ;;  %v10715_v35 = vunpack.i.l.bf16 %v10714_v31 }
 0x3ef   : > { %9706 = vmatpush1.bf16.msk.msra.mxu0 %vm13082_vm12, %v9705_v4 }
 0x3f0   : > { %v3032_v26 = vsel %vm1198_vm14, %v10730_v58, %v10731_v46  ;;  %v3270_v20 = vsel %vm1349_vm1, %v10715_v35, %v10716_v7  ;;  %v3269_v1 = vsel %vm1349_vm1, %v10721_v6, %v10715_v35 }
 0x3f1   : > { %2901 = vmatpush1.bf16.msra.mxu1 %v2862_v42  ;;  %v10724_v2 = vpop.permute.xlu0 %10723  ;;  %v13294_v43 = vpop.permute.xlu1 %10738  ;;  %v9742_v27 = vpack.c.bf16 %v3270_v20, %v3268_v16  ;;  %v9745_v51 = vpack.c.bf16 %v3269_v1, %v3267_v32 }
 0x3f2   : > { %v10726_v13 = vunpack.i.h.bf16 %v10724_v2  ;;  %v10725_v19 = vunpack.i.l.bf16 %v10724_v2  ;;  %2902 = vmatprep.subr.bf16.mxu1 %v2861_v34  ;;  %v10741_v52 = vunpack.i.h.bf16 %v13294_v43  ;;  %v10740_v14 = vunpack.i.l.bf16 %v13294_v43 }
 0x3f4   : > { %v3030_v39 = vsel %vm1198_vm14, %v10725_v19, %v10726_v13  ;;  %9626 = vmatmul.mubr.msk.bf16.gmra.mxu1 %vm2124_vm6, %v11793_v44  ;;  %v3264_v25 = vsel %vm1349_vm1, %v10740_v14, %v10741_v52 }
 0x3f5   : > { %2903 = vmatpush1.bf16.msra.mxu1 %v2860_v15  ;;  %v10734_v57 = vpop.permute.xlu0 %10733  ;;  %v10749_v47 = vpop.permute.xlu1 %10748  ;;  %v9708_v22 = vpack.c.bf16 %v3032_v26, %v3030_v39  ;;  %2920 = vmatprep.mubr.bf16.mxu1 %v16862_v23 }
 0x3f6   : > { %v10736_v11 = vunpack.i.h.bf16 %v10734_v57  ;;  %v10735_v53 = vunpack.i.l.bf16 %v10734_v57  ;;  %9737 = vmatprep.subr.msk.bf16.mxu1 %vm12654_vm8, %v9736_v12  ;;  %v10751_v59 = vunpack.i.h.bf16 %v10749_v47  ;;  %v10750_v4 = vunpack.i.l.bf16 %v10749_v47 }
 0x3f7   : > { %9709 = vmatprep.subr.msk.bf16.mxu0 %vm13050_vm11, %v9708_v22 }
 0x3f8   : > { %v3029_v38 = vsel %vm1198_vm14, %v10735_v53, %v10725_v19  ;;  %v3031_v0 = vsel %vm1198_vm14, %v10736_v11, %v10730_v58  ;;  %v11796_v58 = vld [vmem:[%s16726_s3 + $0x88] sm:$0xff]   ;;  %v3263_v43 = vsel %vm1349_vm1, %v10750_v4, %v10740_v14 }
 0x3f9   : > { %v9711_v61 = vpack.c.bf16 %v3031_v0, %v3029_v38  ;;  %v10744_v17 = vpop.permute.xlu0 %10743  ;;  %v10759_v36 = vpop.permute.xlu1 %10758 }
 0x3fa   : > { %v10746_v62 = vunpack.i.h.bf16 %v10744_v17  ;;  %v10745_v33 = vunpack.i.l.bf16 %v10744_v17  ;;  %v10761_v21 = vunpack.i.h.bf16 %v10759_v36  ;;  %v10760_v24 = vunpack.i.l.bf16 %v10759_v36 }
 0x3fb   : > { %9712 = vmatpush1.bf16.msk.msra.mxu0 %vm13082_vm12, %v9711_v61 }
 0x3fc   : > { %v3266_v49 = vsel %vm1349_vm1, %v10745_v33, %v10746_v62  ;;  %9679 = vmatmul.mubr.msk.bf16.vlgmr.msra.gmra.mxu1 %vm2124_vm6, %v11795_v50  ;;  %v3265_v40 = vsel %vm1349_vm1, %v10751_v59, %v10745_v33  ;;  %v3028_v42 = vsel %vm1198_vm14, %v10760_v24, %v10761_v21  ;;  %v11799_v33 = vld [vmem:[%s16726_s3 + $0xa8] sm:$0xff]  }
 0x3fd   : > { %9740 = vmatpush1.bf16.msk.msra.mxu1 %vm12680_vm4, %v9739_v60  ;;  %v10754_v48 = vpop.permute.xlu0 %10753  ;;  %v10769_v28 = vpop.permute.xlu1 %10768  ;;  %2930 = vmatprep.mubr.bf16.mxu1 %v16862_v23  ;;  %v9748_v30 = vpack.c.bf16 %v3266_v49, %v3264_v25  ;;  %v9751_v19 = vpack.c.bf16 %v3265_v40, %v3263_v43  ;;  %v11800_v60 = vld [vmem:[%s16726_s3 + $0x98] sm:$0xff]  }
 0x3fe   : > { %9743 = vmatprep.subr.msk.bf16.mxu1 %vm12654_vm8, %v9742_v27  ;;  %v10756_v31 = vunpack.i.h.bf16 %v10754_v48  ;;  %v10755_v9 = vunpack.i.l.bf16 %v10754_v48  ;;  %v10771_v8 = vunpack.i.h.bf16 %v10769_v28  ;;  %v10770_v15 = vunpack.i.l.bf16 %v10769_v28  ;;  %v11801_v28 = vld [vmem:[%s16726_s3 + $0xb0] sm:$0xff]  }
 0x400   : > { %v3026_v46 = vsel %vm1198_vm14, %v10755_v9, %v10756_v31  ;;  %v3260_v11 = vsel %vm1349_vm1, %v10770_v15, %v10771_v8  ;;  %v11803_v8 = vld [vmem:[%s16726_s3 + $0xb8] sm:$0xff]  }
 0x401   : > { %9746 = vmatpush1.bf16.msk.msra.mxu1 %vm12680_vm4, %v9745_v51  ;;  %v10764_v44 = vpop.permute.xlu0 %10763  ;;  %v10779_v37 = vpop.permute.xlu1 %10778  ;;  %v9714_v2 = vpack.c.bf16 %v3028_v42, %v3026_v46  ;;  %v11802_v51 = vld [vmem:[%s16726_s3 + $0xc0] sm:$0xff]  }
 0x402   : > { %9749 = vmatprep.subr.msk.bf16.mxu1 %vm12654_vm8, %v9748_v30  ;;  %v10766_v34 = vunpack.i.h.bf16 %v10764_v44  ;;  %v10765_v13 = vunpack.i.l.bf16 %v10764_v44  ;;  %v10780_v12 = vunpack.i.l.bf16 %v10779_v37  ;;  %v10781_v57 = vunpack.i.h.bf16 %v10779_v37 }
 0x403   : > { %9715 = vmatprep.subr.msk.bf16.mxu0 %vm13050_vm11, %v9714_v2 }
 0x404   : > { %v3025_v26 = vsel %vm1198_vm14, %v10765_v13, %v10755_v9  ;;  %v3027_v39 = vsel %vm1198_vm14, %v10766_v34, %v10760_v24  ;;  %9680 = vmatmul.mubr.msk.bf16.gmra.mxu1 %vm2124_vm6, %v11796_v58  ;;  %v3259_v53 = vsel %vm1349_vm1, %v10780_v12, %v10770_v15  ;;  %v11804_v15 = vld [vmem:[%s16726_s3 + $0xc8] sm:$0xff]  }
 0x405   : > { %v9717_v63 = vpack.c.bf16 %v3027_v39, %v3025_v26  ;;  %9752 = vmatpush1.bf16.msk.msra.mxu1 %vm12680_vm4, %v9751_v19  ;;  %v10774_v7 = vpop.permute.xlu0 %10773  ;;  %v13358_v35 = vpop.permute.xlu1 %3496  ;;  %2940 = vmatprep.mubr.bf16.mxu1 %v16862_v23 }
 0x406   : > { %v10776_v47 = vunpack.i.h.bf16 %v10774_v7  ;;  %v10775_v22 = vunpack.i.l.bf16 %v10774_v7 }
 0x407   : > { %9718 = vmatpush1.bf16.msk.msra.mxu0 %vm13082_vm12, %v9717_v63 }
 0x408   : > { %v3261_v5 = vsel %vm1349_vm1, %v10781_v57, %v10775_v22  ;;  %v3262_v29 = vsel %vm1349_vm1, %v10775_v22, %v10776_v47 }
 0x409   : > { %v9757_v6 = vpack.c.bf16 %v3261_v5, %v3259_v53  ;;  %v10784_v3 = vpop.permute.xlu0 %10783  ;;  %v10789_v38 = vpop.permute.xlu1 %10788  ;;  %v9754_v0 = vpack.c.bf16 %v3262_v29, %v3260_v11 }
 0x40a   : > { %v10786_v50 = vunpack.i.h.bf16 %v10784_v3  ;;  %v10785_v20 = vunpack.i.l.bf16 %v10784_v3  ;;  %v10791_v52 = vunpack.i.h.bf16 %v10789_v38  ;;  %v10790_v14 = vunpack.i.l.bf16 %v10789_v38  ;;  %9719 = vmatmul.mubr.msk.bf16.vlgmr.msra.gmra.mxu0 %vm2124_vm6, %v11797_v45 }
 0x40b   : > { %9755 = vmatprep.subr.msk.bf16.mxu1 %vm12654_vm8, %v9754_v0  ;;  %3164 = vmatprep.mubr.bf16.mxu0 %v16862_v23 }
 0x40c   : > { %v3676_v61 = vsel %vm1645_vm3, %v10785_v20, %v10786_v50  ;;  %v3678_v17 = vsel %vm1645_vm3, %v10790_v14, %v10791_v52  ;;  %9681 = vmatmul.mubr.msk.bf16.gmra.mxu1 %vm2124_vm6, %v11798_v54 }
 0x40d   : > { %9758 = vmatpush1.bf16.msk.msra.mxu1 %vm12680_vm4, %v9757_v6  ;;  %v13382_v36 = vpop.permute.xlu0 %3492  ;;  %v10794_v55 = vpop.permute.xlu1 %10793  ;;  %v9792_v62 = vpack.c.bf16 %v3678_v17, %v3676_v61  ;;  %2950 = vmatprep.mubr.bf16.mxu1 %v16862_v23 }
 0x40e   : > { %v10796_v49 = vunpack.i.h.bf16 %v10794_v55  ;;  %v10795_v21 = vunpack.i.l.bf16 %v10794_v55 }
 0x40f   : > { %9793 = vmatprep.subr.msk.bf16.mxu1 %vm13050_vm11, %v9792_v62 }
 0x410   : > { %v3675_v4 = vsel %vm1645_vm3, %v10795_v21, %v10785_v20  ;;  %v3677_v31 = vsel %vm1645_vm3, %v10796_v49, %v10790_v14 }
 0x411   : > { %v13393_v16 = vpop.permute.xlu0 %3488  ;;  %v13395_v1 = vpop.permute.xlu1 %3490  ;;  %v9795_v37 = vpack.c.bf16 %v3677_v31, %v3675_v4 }
 0x412   : > { %9720 = vmatmul.mubr.msk.bf16.gmra.mxu0 %vm2124_vm6, %v11799_v33  ;;  %v3503_v0 = vsel %vm1529_vm2, %v13393_v16, %v13395_v1 }
 0x413   : > { %3174 = vmatprep.mubr.bf16.mxu0 %v16862_v23 }
 0x414   : > { %9682 = vmatmul.mubr.msk.bf16.gmra.mxu1 %vm2124_vm6, %v11800_v60 }
 0x415   : > { %v10799_v24 = vpop.permute.xlu0 %10798  ;;  %v10804_v27 = vpop.permute.xlu1 %10803  ;;  %3388 = vmatprep.mubr.bf16.mxu1 %v16862_v23 }
 0x416   : > { %v10801_v32 = vunpack.i.h.bf16 %v10799_v24  ;;  %v10800_v25 = vunpack.i.l.bf16 %v10799_v24  ;;  %v10806_v59 = vunpack.i.h.bf16 %v10804_v27  ;;  %v10805_v48 = vunpack.i.l.bf16 %v10804_v27 }
 0x418   : > { %v3672_v9 = vsel %vm1645_vm3, %v10800_v25, %v10801_v32  ;;  %v3674_v30 = vsel %vm1645_vm3, %v10805_v48, %v10806_v59 }
 0x419   : > { %v3487_v40 = vpop.permute.xlu0 %3486  ;;  %v10809_v42 = vpop.permute.xlu1 %10808  ;;  %v9798_v44 = vpack.c.bf16 %v3674_v30, %v3672_v9 }
 0x41a   : > { %v10811_v46 = vunpack.i.h.bf16 %v10809_v42  ;;  %v10810_v58 = vunpack.i.l.bf16 %v10809_v42  ;;  %9721 = vmatmul.mubr.msk.bf16.gmra.mxu0 %vm2124_vm6, %v11801_v28  ;;  %v3502_v14 = vsel %vm1529_vm2, %v3487_v40, %v13393_v16  ;;  %v11806_v16 = vld [vmem:[%s16726_s3 + $0xd8] sm:$0xff]   ;;  %v11808_v40 = vld [vmem:[%s16726_s3 + $0x100] sm:$0xff]   ;;  %v11809_v42 = vld [vmem:[%s16726_s3 + $0xe8] sm:$0xff]  }
 0x41b   : > { %3184 = vmatprep.mubr.bf16.mxu0 %v16862_v23 }
 0x41c   : > { %v3671_v2 = vsel %vm1645_vm3, %v10810_v58, %v10800_v25  ;;  %v3673_v43 = vsel %vm1645_vm3, %v10811_v46, %v10805_v48  ;;  %9759 = vmatmul.mubr.msk.bf16.vlgmr.msra.gmra.mxu1 %vm2124_vm6, %v11802_v51  ;;  %v11807_v51 = vld [vmem:[%s16726_s3 + $0xe0] sm:$0xff]   ;;  %v11810_v46 = vld [vmem:[%s16726_s3 + $0x108] sm:$0xff]   ;;  %v11811_v58 = vld [vmem:[%s16726_s3 + $0xf0] sm:$0xff]  }
 0x41d   : > { %v9801_v34 = vpack.c.bf16 %v3673_v43, %v3671_v2  ;;  %9796 = vmatpush1.bf16.msk.msra.mxu1 %vm13082_vm12, %v9795_v37  ;;  %v3483_v13 = vpop.permute.xlu0 %3482  ;;  %v3485_v19 = vpop.permute.xlu1 %3484  ;;  %3398 = vmatprep.mubr.bf16.mxu1 %v16862_v23  ;;  %v11813_v37 = vld [vmem:[%s16726_s3 + $0xf8] sm:$0xff]  }
 0x41e   : > { %9799 = vmatprep.subr.msk.bf16.mxu1 %vm13050_vm11, %v9798_v44  ;;  %v3501_v61 = vsel %vm1529_vm2, %v3483_v13, %v3485_v19  ;;  %v11812_v44 = vld [vmem:[%s16726_s3 + $0x110] sm:$0xff]   ;;  %v11814_v2 = vld [vmem:[%s16726_s3 + $0x118] sm:$0xff]   ;;  %v2276_v43 = vpop.f32.mrf.mxu0 }
 0x421   : > { %9802 = vmatpush1.bf16.msk.msra.mxu1 %vm13082_vm12, %v9801_v34  ;;  %v10814_v26 = vpop.permute.xlu0 %10813  ;;  %v10819_v39 = vpop.permute.xlu1 %10818 }
 0x422   : > { %v10816_v12 = vunpack.i.h.bf16 %v10814_v26  ;;  %v10815_v63 = vunpack.i.l.bf16 %v10814_v26  ;;  %v10821_v7 = vunpack.i.h.bf16 %v10819_v39  ;;  %v10820_v57 = vunpack.i.l.bf16 %v10819_v39  ;;  %9722 = vmatmul.mubr.msk.bf16.gmra.mxu0 %vm2124_vm6, %v11803_v8  ;;  %v2278_v34 = vpop.f32.mrf.mxu0 }
 0x423   : > { %3558 = vmatprep.mubr.bf16.mxu0 %v16862_v23 }
 0x424   : > { %v3668_v47 = vsel %vm1645_vm3, %v10815_v63, %v10816_v12  ;;  %v3670_v22 = vsel %vm1645_vm3, %v10820_v57, %v10821_v7  ;;  %9760 = vmatmul.mubr.msk.bf16.gmra.mxu1 %vm2124_vm6, %v11804_v15 }
 0x425   : > { %v3495_v45 = vpop.permute.xlu0 %3494  ;;  %v10824_v11 = vpop.permute.xlu1 %10823  ;;  %v9804_v53 = vpack.c.bf16 %v3670_v22, %v3668_v47  ;;  %3408 = vmatprep.mubr.bf16.mxu1 %v16862_v23 }
 0x426   : > { %v10826_v5 = vunpack.i.h.bf16 %v10824_v11  ;;  %v10825_v29 = vunpack.i.l.bf16 %v10824_v11  ;;  %v3505_v54 = vsel %vm1529_vm2, %v3495_v45, %v13358_v35  ;;  %v3504_v6 = vsel %vm1529_vm2, %v13382_v36, %v3495_v45  ;;  %v11805_v35 = vld [vmem:[%s16726_s3 + $0xd0] sm:$0xff]  }
 0x427   : > { %3534 = vmatprep.subr.bf16.mxu0 %v3505_v54  ;;  %9805 = vmatprep.subr.msk.bf16.mxu1 %vm13050_vm11, %v9804_v53 }
 0x428   : > { %v3667_v3 = vsel %vm1645_vm3, %v10825_v29, %v10815_v63  ;;  %v3669_v38 = vsel %vm1645_vm3, %v10826_v5, %v10820_v57  ;;  %3535 = vmatpush1.bf16.msra.mxu0 %v3504_v6 }
 0x429   : > { %v9807_v50 = vpack.c.bf16 %v3669_v38, %v3667_v3  ;;  %v3481_v20 = vpop.permute.xlu0 %3480  ;;  %v3479_v52 = vpop.permute.xlu1 %3478  ;;  %3536 = vmatprep.subr.bf16.mxu0 %v3503_v0 }
 0x42a   : > { %v3500_v55 = vsel %vm1529_vm2, %v3481_v20, %v3483_v13  ;;  %v2280_v13 = vpop.f32.mrf.mxu0 }
 0x42b   : > { %9808 = vmatpush1.bf16.msk.msra.mxu1 %vm13082_vm12, %v9807_v50 }
 0x42c   : > { %9761 = vmatmul.mubr.msk.bf16.gmra.mxu1 %vm2124_vm6, %v11805_v35  ;;  %3537 = vmatpush1.bf16.msra.mxu0 %v3502_v14  ;;  %v13512_v19 = vpop.f32.mrf.mxu0 }
 0x42d   : > { %v3477_v17 = vpop.permute.xlu0 %3476  ;;  %v10834_v36 = vpop.permute.xlu1 %10833  ;;  %3538 = vmatprep.subr.bf16.mxu0 %v3501_v61  ;;  %3418 = vmatprep.mubr.bf16.mxu1 %v16862_v23 }
 0x42e   : > { %v10836_v62 = vunpack.i.h.bf16 %v10834_v36  ;;  %v10835_v33 = vunpack.i.l.bf16 %v10834_v36  ;;  %v3499_v60 = vsel %vm1529_vm2, %v3477_v17, %v3479_v52  ;;  %v2286_v8 = vpop.f32.mrf.mxu0 }
 0x430   : > { %3539 = vmatpush1.bf16.msra.mxu0 %v3500_v55  ;;  %v3666_v25 = vsel %vm1645_vm3, %v10835_v33, %v10836_v62  ;;  %v2288_v15 = vpop.f32.mrf.mxu0 }
 0x431   : > { %v10829_v1 = vpop.permute.xlu0 %10828  ;;  %v10839_v49 = vpop.permute.xlu1 %10838  ;;  %3540 = vmatprep.subr.bf16.mxu0 %v3499_v60 }
 0x432   : > { %v10831_v21 = vunpack.i.h.bf16 %v10829_v1  ;;  %v10830_v24 = vunpack.i.l.bf16 %v10829_v1  ;;  %v10841_v27 = vunpack.i.h.bf16 %v10839_v49  ;;  %v10840_v32 = vunpack.i.l.bf16 %v10839_v49  ;;  %v2290_v26 = vpop.f32.mrf.mxu0 }
 0x434   : > { %v3664_v59 = vsel %vm1645_vm3, %v10830_v24, %v10831_v21  ;;  %v3663_v48 = vsel %vm1645_vm3, %v10840_v32, %v10830_v24  ;;  %v3665_v28 = vsel %vm1645_vm3, %v10841_v27, %v10835_v33  ;;  %9762 = vmatmul.mubr.msk.bf16.gmra.mxu1 %vm2124_vm6, %v11806_v16  ;;  %v13514_v39 = vpop.f32.mrf.mxu0 }
 0x435   : > { %v9813_v4 = vpack.c.bf16 %v3665_v28, %v3663_v48  ;;  %v3475_v31 = vpop.permute.xlu0 %3474  ;;  %v9810_v9 = vpack.c.bf16 %v3666_v25, %v3664_v59  ;;  %3792 = vmatprep.mubr.bf16.mxu1 %v16862_v23 }
 0x436   : > { %v3498_v30 = vsel %vm1529_vm2, %v3475_v31, %v3477_v17  ;;  %v2296_v12 = vpop.f32.mrf.mxu0 }
 0x437   : > { %3541 = vmatpush1.bf16.msra.mxu0 %v3498_v30  ;;  %9811 = vmatprep.subr.msk.bf16.mxu1 %vm13050_vm11, %v9810_v9 }
 0x438   : > { %9814 = vmatpush1.bf16.msk.msra.mxu1 %vm13082_vm12, %v9813_v4  ;;  %v2298_v63 = vpop.f32.mrf.mxu0 }
 0x43a   : > { %9775 = vmatmul.mubr.msk.bf16.vlgmr.msra.gmra.mxu0 %vm2124_vm6, %v11807_v51  ;;  %v2300_v47 = vpop.f32.mrf.mxu0 }
 0x43b   : > { %3568 = vmatprep.mubr.bf16.mxu0 %v16862_v23 }
 0x43c   : > { %9815 = vmatmul.mubr.msk.bf16.vlgmr.msra.gmra.mxu1 %vm2124_vm6, %v11808_v40  ;;  %v13518_v11 = vpop.f32.mrf.mxu0 }
 0x43d   : > { %3802 = vmatprep.mubr.bf16.mxu1 %v16862_v23 }
 0x43e   : > { %v2306_v29 = vpop.f32.mrf.mxu0 }
 0x440   : > { %v2308_v3 = vpop.f32.mrf.mxu0 }
 0x442   : > { %9776 = vmatmul.mubr.msk.bf16.gmra.mxu0 %vm2124_vm6, %v11809_v42  ;;  %v2310_v35 = vpop.f32.mrf.mxu0 }
 0x443   : > { %3578 = vmatprep.mubr.bf16.mxu0 %v16862_v23 }
 0x444   : > { %9816 = vmatmul.mubr.msk.bf16.gmra.mxu1 %vm2124_vm6, %v11810_v46  ;;  %v13524_v52 = vpop.f32.mrf.mxu0 }
 0x445   : > { %3812 = vmatprep.mubr.bf16.mxu1 %v16862_v23 }
 0x44a   : > { %9777 = vmatmul.mubr.msk.bf16.gmra.mxu0 %vm2124_vm6, %v11811_v58 }
 0x44b   : > { %3588 = vmatprep.mubr.bf16.mxu0 %v16862_v23 }
 0x44c   : > { %9817 = vmatmul.mubr.msk.bf16.gmra.mxu1 %vm2124_vm6, %v11812_v44 }
 0x44d   : > { %3822 = vmatprep.mubr.bf16.mxu1 %v16862_v23 }
 0x452   : > { %9778 = vmatmul.mubr.msk.bf16.gmra.mxu0 %vm2124_vm6, %v11813_v37 }
 0x453   : > { %4226 = vmatprep.mubr.bf16.mxu0 %v16862_v23 }
 0x454   : > { %9818 = vmatmul.mubr.msk.bf16.gmra.mxu1 %vm2124_vm6, %v11814_v2 }
 0x455   : > { %4331 = vmatprep.mubr.bf16.mxu1 %v16862_v23 }
 0x47c   : > { %v2171_v7 = vpop.f32.mrf.mxu1 }
 0x47d   : > { %v2277_v16 = vadd.f32 %v2276_v43, %v2171_v7 }
 0x47e   : > { %v2173_v57 = vpop.f32.mrf.mxu1 }
 0x47f   : > { %v2279_v21 = vadd.f32 %v2278_v34, %v2173_v57 }
 0x480   : > { %v2175_v22 = vpop.f32.mrf.mxu1 }
 0x481   : > { %v2281_v32 = vadd.f32 %v2280_v13, %v2175_v22 }
 0x482   : > { %v13516_v45 = vpop.f32.mrf.mxu1 }
 0x484   : > { %v2181_v53 = vpop.f32.mrf.mxu1 }
 0x485   : > { %v2287_v30 = vadd.f32 %v2286_v8, %v2181_v53 }
 0x486   : > { %v2183_v5 = vpop.f32.mrf.mxu1 }
 0x487   : > { %v2289_v46 = vadd.f32 %v2288_v15, %v2183_v5 }
 0x488   : > { %v2185_v54 = vpop.f32.mrf.mxu1 }
 0x489   : > { %v2291_v37 = vadd.f32 %v2290_v26, %v2185_v54 }
 0x48a   : > { %v13520_v6 = vpop.f32.mrf.mxu1 }
 0x48c   : > { %v2191_v38 = vpop.f32.mrf.mxu1 }
 0x48d   : > { %v2297_v57 = vadd.f32 %v2296_v12, %v2191_v38 }
 0x48e   : > { %v2193_v0 = vpop.f32.mrf.mxu1 }
 0x48f   : > { %v2299_v53 = vadd.f32 %v2298_v63, %v2193_v0 }
 0x490   : > { %v2195_v50 = vpop.f32.mrf.mxu1 }
 0x491   : > { %v2301_v5 = vadd.f32 %v2300_v47, %v2195_v50 }
 0x492   : > { %v13522_v20 = vpop.f32.mrf.mxu1 }
 0x494   : > { %v2201_v14 = vpop.f32.mrf.mxu1  ;;  %v2752_v61 = vpop.f32.mrf.mxu0 }
 0x496   : > { %v2203_v17 = vpop.f32.mrf.mxu1  ;;  %v2754_v36 = vpop.f32.mrf.mxu0 }
 0x498   : > { %v2205_v55 = vpop.f32.mrf.mxu1  ;;  %v2756_v62 = vpop.f32.mrf.mxu0 }
 0x499   : > { %v2311_v0 = vadd.f32 %v2310_v35, %v2205_v55 }
 0x49a   : > { %v13526_v33 = vpop.f32.mrf.mxu1  ;;  %v13528_v60 = vpop.f32.mrf.mxu0 }
 0x49b   : > { %16871 = vst [vmem:[#allocation25_spill] sm:$0xff] %v13528_v60 }
 0x49c   : > { %v2518_v1 = vpop.f32.mrf.mxu1  ;;  %v13530_v49 = vpop.f32.mrf.mxu0 }
 0x49d   : > { %v2557_v24 = vadd.f32 %v2518_v1, %v2277_v16 }
 0x49e   : > { %v2520_v27 = vpop.f32.mrf.mxu1  ;;  %v13532_v28 = vpop.f32.mrf.mxu0 }
 0x49f   : > { %v2558_v25 = vadd.f32 %v2520_v27, %v2279_v21  ;;  %v2791_v59 = vadd.f32 %v2752_v61, %v2557_v24  ;;  %v2307_v21 = vadd.f32 %v2306_v29, %v2201_v14  ;;  %v2309_v24 = vadd.f32 %v2308_v3, %v2203_v17 }
 0x4a0   : > { %v2522_v48 = vpop.f32.mrf.mxu1  ;;  %v2766_v42 = vpop.f32.mrf.mxu0 }
 0x4a1   : > { %v2559_v4 = vadd.f32 %v2522_v48, %v2281_v32  ;;  %v2792_v31 = vadd.f32 %v2754_v36, %v2558_v25 }
 0x4a2   : > { %v13534_v9 = vpop.f32.mrf.mxu1  ;;  %v13540_v34 = vpop.f32.mrf.mxu0 }
 0x4a3   : > { %v2793_v51 = vadd.f32 %v2756_v62, %v2559_v4 }
 0x4a4   : > { %v2528_v40 = vpop.f32.mrf.mxu1  ;;  %v13544_v8 = vpop.f32.mrf.mxu0 }
 0x4a5   : > { %v13536_v58 = vadd.f32 %v2528_v40, %v2287_v30 }
 0x4a6   : > { %v2530_v44 = vpop.f32.mrf.mxu1  ;;  %v13550_v54 = vpop.f32.mrf.mxu0 }
 0x4a7   : > { %v13538_v2 = vadd.f32 %v2530_v44, %v2289_v46 }
 0x4a8   : > { %v2532_v43 = vpop.f32.mrf.mxu1  ;;  %v13556_v12 = vpop.f32.mrf.mxu0 }
 0x4a9   : > { %v2563_v13 = vadd.f32 %v2532_v43, %v2291_v37 }
 0x4aa   : > { %v13542_v7 = vpop.f32.mrf.mxu1  ;;  %v13562_v47 = vpop.f32.mrf.mxu0 }
 0x4ab   : > { %v2797_v22 = vadd.f32 %v2766_v42, %v2563_v13 }
 0x4ac   : > { %v2538_v61 = vpop.f32.mrf.mxu1  ;;  %v13568_v4 = vpop.f32.mrf.mxu0 }
 0x4ad   : > { %v13546_v36 = vadd.f32 %v2538_v61, %v2297_v57 }
 0x4ae   : > { %v2540_v15 = vpop.f32.mrf.mxu1  ;;  %v13570_v3 = vpop.f32.mrf.mxu0 }
 0x4af   : > { %v13548_v62 = vadd.f32 %v2540_v15, %v2299_v53 }
 0x4b0   : > { %v2542_v26 = vpop.f32.mrf.mxu1  ;;  %v13574_v55 = vpop.f32.mrf.mxu0 }
 0x4b1   : > { %v13552_v16 = vadd.f32 %v2542_v26, %v2301_v5 }
 0x4b2   : > { %v13554_v1 = vpop.f32.mrf.mxu1  ;;  %v13576_v37 = vpop.f32.mrf.mxu0 }
 0x4b4   : > { %v2548_v38 = vpop.f32.mrf.mxu1 }
 0x4b5   : > { %v13558_v27 = vadd.f32 %v2548_v38, %v2307_v21 }
 0x4b6   : > { %v2550_v63 = vpop.f32.mrf.mxu1 }
 0x4b7   : > { %v13560_v32 = vadd.f32 %v2550_v63, %v2309_v24 }
 0x4b8   : > { %v2552_v50 = vpop.f32.mrf.mxu1 }
 0x4b9   : > { %v13564_v25 = vadd.f32 %v2552_v50, %v2311_v0 }
 0x4ba   : > { %v13566_v48 = vpop.f32.mrf.mxu1 }
 0x4bc   : > { %v2922_v29 = vpop.f32.mrf.mxu1 }
 0x4bd   : > { %v2961_v14 = vadd.f32 %v2922_v29, %v2791_v59 }
 0x4be   : > { %v2924_v30 = vpop.f32.mrf.mxu1 }
 0x4bf   : > { %v2962_v40 = vadd.f32 %v2924_v30, %v2792_v31 }
 0x4c0   : > { %v2926_v17 = vpop.f32.mrf.mxu1 }
 0x4c1   : > { %v2963_v42 = vadd.f32 %v2926_v17, %v2793_v51 }
 0x4c2   : > { %v13572_v35 = vpop.f32.mrf.mxu1 }
 0x4c3   : > { %16872 = vst [vmem:[#allocation35_spill] sm:$0xff] %v13572_v35 }
 0x4c4   : > { %v2932_v46 = vpop.f32.mrf.mxu1 }
 0x4c6   : > { %v2934_v44 = vpop.f32.mrf.mxu1 }
 0x4c8   : > { %v2936_v43 = vpop.f32.mrf.mxu1 }
 0x4c9   : > { %v13578_v13 = vadd.f32 %v2936_v43, %v2797_v22 }
 0x4ca   : > { %v13580_v57 = vpop.f32.mrf.mxu1  ;;  %v3156_v59 = vpop.f32.mrf.mxu0 }
 0x4cb   : > { %v3195_v61 = vadd.f32 %v3156_v59, %v2961_v14 }
 0x4cc   : > { %v13582_v31 = vpop.f32.mrf.mxu1  ;;  %v3158_v53 = vpop.f32.mrf.mxu0 }
 0x4cd   : > { %v3196_v15 = vadd.f32 %v3158_v53, %v2962_v40 }
 0x4ce   : > { %v13584_v51 = vpop.f32.mrf.mxu1  ;;  %v3160_v5 = vpop.f32.mrf.mxu0 }
 0x4cf   : > { %v3197_v26 = vadd.f32 %v3160_v5, %v2963_v42 }
 0x4d0   : > { %v13586_v21 = vpop.f32.mrf.mxu1  ;;  %v13588_v38 = vpop.f32.mrf.mxu0 }
 0x4d1   : > { %16873 = vst [vmem:[#allocation13_spill] sm:$0xff] %v13588_v38 }
 0x4d2   : > { %v13590_v24 = vpop.f32.mrf.mxu1  ;;  %v3166_v22 = vpop.f32.mrf.mxu0 }
 0x4d4   : > { %v13592_v63 = vpop.f32.mrf.mxu1  ;;  %v3168_v0 = vpop.f32.mrf.mxu0 }
 0x4d6   : > { %v13594_v50 = vpop.f32.mrf.mxu1  ;;  %v13596_v29 = vpop.f32.mrf.mxu0 }
 0x4d7   : > { %16874 = vst [vmem:[#allocation17_spill] sm:$0xff] %v13596_v29 }
 0x4d8   : > { %v13598_v14 = vpop.f32.mrf.mxu1  ;;  %v13600_v30 = vpop.f32.mrf.mxu0 }
 0x4d9   : > { %16875 = vst [vmem:[#allocation18_spill] sm:$0xff] %v13598_v14  ;;  %16876 = vst [vmem:[#allocation26_spill] sm:$0xff] %v13600_v30 }
 0x4da   : > { %v13602_v40 = vpop.f32.mrf.mxu1  ;;  %v13604_v17 = vpop.f32.mrf.mxu0 }
 0x4db   : > { %16877 = vst [vmem:[#allocation36_spill] sm:$0xff] %v13602_v40  ;;  %v13644_v40 = vpop.permute.xlu0 %3889 }
 0x4dc   : > { %v3390_v42 = vpop.f32.mrf.mxu1  ;;  %v13610_v5 = vpop.f32.mrf.mxu0  ;;  %16892 = vst [vmem:[#allocation21_spill] sm:$0xff] %v13644_v40 }
 0x4dd   : > { %v13606_v43 = vadd.f32 %v3390_v42, %v3195_v61 }
 0x4de   : > { %v3392_v59 = vpop.f32.mrf.mxu1  ;;  %v13616_v41 = vpop.f32.mrf.mxu0 }
 0x4df   : > { %16878 = vst [vmem:[#allocation19_spill] sm:$0xff] %v13606_v43  ;;  %v13608_v53 = vadd.f32 %v3392_v59, %v3196_v15  ;;  %v13662_v40 = vpop.permute.xlu0 %3879 }
 0x4e0   : > { %v3394_v10 = vpop.f32.mrf.mxu1  ;;  %v13618_v35 = vpop.f32.mrf.mxu0 }
 0x4e1   : > { %16879 = vst [vmem:[#allocation27_spill] sm:$0xff] %v13608_v53  ;;  %v13612_v56 = vadd.f32 %v3394_v10, %v3197_v26 }
 0x4e2   : > { %v13614_v23 = vpop.f32.mrf.mxu1  ;;  %v13624_v42 = vpop.f32.mrf.mxu0 }
 0x4e3   : > { %16880 = vst [vmem:[#allocation28_spill] sm:$0xff] %v13612_v56  ;;  %16881 = vst [vmem:[#allocation37_spill] sm:$0xff] %v13614_v23 }
 0x4e4   : > { %v3400_v18 = vpop.f32.mrf.mxu1  ;;  %16884 = vst [vmem:[#allocation38_spill] sm:$0xff] %v13624_v42  ;;  %v13628_v53 = vpop.f32.mrf.mxu0 }
 0x4e5   : > { %16885 = vst [vmem:[#allocation39_spill] sm:$0xff] %v13628_v53  ;;  %v2795_v53 = vadd.f32 %v13530_v49, %v13536_v58 }
 0x4e6   : > { %v3402_v38 = vpop.f32.mrf.mxu1  ;;  %v13634_v56 = vpop.f32.mrf.mxu0 }
 0x4e7   : > { %16887 = vst [vmem:[#allocation40_spill] sm:$0xff] %v13634_v56 }
 0x4e8   : > { %v13620_v60 = vpop.f32.mrf.mxu1 }
 0x4e9   : > { %16882 = vst [vmem:[#allocation10_spill] sm:$0xff] %v13620_v60  ;;  %v13640_v60 = vpop.f32.mrf.mxu0 }
 0x4ea   : > { %v13622_v61 = vpop.f32.mrf.mxu1  ;;  %16890 = vst [vmem:[#allocation30_spill] sm:$0xff] %v13640_v60 }
 0x4eb   : > { %16883 = vst [vmem:[#allocation29_spill] sm:$0xff] %v13622_v61 }
 0x4ec   : > { %v3410_v15 = vpop.f32.mrf.mxu1 }
 0x4ee   : > { %v13626_v59 = vpop.f32.mrf.mxu1 }
 0x4f0   : > { %v13630_v10 = vpop.f32.mrf.mxu1 }
 0x4f2   : > { %v13632_v26 = vpop.f32.mrf.mxu1 }
 0x4f3   : > { %16886 = vst [vmem:[#allocation11_spill] sm:$0xff] %v13632_v26 }
 0x4f4   : > { %v13636_v23 = vpop.f32.mrf.mxu1 }
 0x4f5   : > { %16888 = vst [vmem:[#allocation12_spill] sm:$0xff] %v13636_v23  ;;  %v2965_v23 = vadd.f32 %v2932_v46, %v2795_v53 }
 0x4f6   : > { %v13638_v43 = vpop.f32.mrf.mxu1 }
 0x4f7   : > { %16889 = vst [vmem:[#allocation20_spill] sm:$0xff] %v13638_v43  ;;  %v2796_v43 = vadd.f32 %v13532_v28, %v13538_v2  ;;  %v3199_v42 = vadd.f32 %v3166_v22, %v2965_v23  ;;  %v2799_v2 = vadd.f32 %v13544_v8, %v13546_v36  ;;  %v2293_v23 = vadd.f32 %v13514_v39, %v13520_v6 }
 0x4f8   : > { %v13642_v61 = vpop.f32.mrf.mxu1  ;;  %v2313_v8 = vadd.f32 %v13524_v52, %v13526_v33  ;;  %v2801_v39 = vadd.f32 %v13556_v12, %v13552_v16 }
 0x4f9   : > { %16891 = vst [vmem:[#allocation15_spill] sm:$0xff] %v13642_v61  ;;  %v3433_v58 = vadd.f32 %v3400_v18, %v3199_v42  ;;  %v2800_v18 = vadd.f32 %v13550_v54, %v13548_v62  ;;  %v2564_v36 = vadd.f32 %v13542_v7, %v2293_v23 }
 0x4fa   : > { %v13646_v30 = vpop.f32.mrf.mxu1  ;;  %v13648_v14 = vpop.f32.mrf.mxu0  ;;  %v2572_v52 = vadd.f32 %v13566_v48, %v2313_v8  ;;  %v2971_v33 = vadd.f32 %v13586_v21, %v2801_v39  ;;  %v16901_v8 = vld [vmem:[#allocation26_spill] sm:$0xff] }
 0x4fb   : > { %16893 = vst [vmem:[#allocation31_spill] sm:$0xff] %v13646_v30  ;;  %16894 = vst [vmem:[#allocation23_spill] sm:$0xff] %v13648_v14  ;;  %v2966_v30 = vadd.f32 %v2934_v44, %v2796_v43 }
 0x4fc   : > { %v13652_v26 = vpop.f32.mrf.mxu1  ;;  %v13654_v56 = vpop.f32.mrf.mxu0 }
 0x4fd   : > { %16895 = vst [vmem:[#allocation22_spill] sm:$0xff] %v13652_v26  ;;  %16896 = vst [vmem:[#allocation32_spill] sm:$0xff] %v13654_v56  ;;  %v3200_v49 = vadd.f32 %v3168_v0, %v2966_v30  ;;  %v2303_v26 = vadd.f32 %v13518_v11, %v13522_v20  ;;  %v3870_v0 = vpop.permute.xlu0 %3869  ;;  %v2969_v11 = vadd.f32 %v13582_v31, %v2799_v2 }
 0x4fe   : > { %v13658_v60 = vpop.f32.mrf.mxu1  ;;  %v13660_v61 = vpop.f32.mrf.mxu0  ;;  %v2283_v31 = vadd.f32 %v13512_v19, %v13516_v45  ;;  %v2798_v19 = vadd.f32 %v13540_v34, %v2564_v36  ;;  %v2803_v45 = vadd.f32 %v13568_v4, %v13558_v27  ;;  %v2805_v34 = vadd.f32 %v13574_v55, %v13564_v25  ;;  %v16897_v25 = vld [vmem:[#allocation17_spill] sm:$0xff]  ;;  %v16898_v55 = vld [vmem:[#allocation38_spill] sm:$0xff] }
 0x4ff   : > { %v3434_v46 = vadd.f32 %v3402_v38, %v3200_v49  ;;  %v2568_v44 = vadd.f32 %v13554_v1, %v2303_v26  ;;  %v2970_v38 = vadd.f32 %v13584_v51, %v2800_v18  ;;  %v3203_v42 = vadd.f32 %v13604_v17, %v2969_v11 }
 0x500   : > { %v13664_v14 = vpop.f32.mrf.mxu1  ;;  %v13666_v29 = vpop.f32.mrf.mxu0  ;;  %v2806_v27 = vadd.f32 %v13576_v37, %v2572_v52  ;;  %v2973_v4 = vadd.f32 %v13592_v63, %v2803_v45  ;;  %v16904_v52 = vld [vmem:[#allocation36_spill] sm:$0xff] }
 0x501   : > { %v2802_v26 = vadd.f32 %v13562_v47, %v2568_v44  ;;  %v3204_v12 = vadd.f32 %v13610_v5, %v2970_v38  ;;  %v3437_v51 = vadd.f32 %v3410_v15, %v3203_v42  ;;  %v3205_v5 = vadd.f32 %v13616_v41, %v2971_v33 }
 0x502   : > { %v13670_v56 = vpop.f32.mrf.mxu1  ;;  %v3570_v28 = vpop.f32.mrf.mxu0  ;;  %v3207_v37 = vadd.f32 %v16898_v55, %v2973_v4  ;;  %v2976_v33 = vadd.f32 %v16904_v52, %v2806_v27  ;;  %v16912_v55 = vld [vmem:[#allocation31_spill] sm:$0xff] }
 0x503   : > { %v3603_v53 = vadd.f32 %v3570_v28, %v3433_v58  ;;  %v13700_v58 = vadd.f32 %v13534_v9, %v2283_v31  ;;  %v2972_v47 = vadd.f32 %v13590_v24, %v2802_v26  ;;  %v13708_v28 = vpop.permute.xlu1 %3894  ;;  %v3438_v15 = vadd.f32 %v13626_v59, %v3204_v12  ;;  %v16905_v12 = vld [vmem:[#allocation40_spill] sm:$0xff] }
 0x504   : > { %v3804_v22 = vpop.f32.mrf.mxu1  ;;  %v3572_v43 = vpop.f32.mrf.mxu0  ;;  %v2804_v9 = vadd.f32 %v13570_v3, %v13560_v32  ;;  %v3439_v59 = vadd.f32 %v13630_v10, %v3205_v5  ;;  %v3201_v3 = vadd.f32 %v16897_v25, %v13578_v13  ;;  %v16911_v25 = vld [vmem:[#allocation25_spill] sm:$0xff] }
 0x505   : > { %v3837_v20 = vadd.f32 %v3804_v22, %v3603_v53  ;;  %v3604_v30 = vadd.f32 %v3572_v43, %v3434_v46  ;;  %v3206_v41 = vadd.f32 %v13618_v35, %v2972_v47  ;;  %v2968_v22 = vadd.f32 %v13580_v57, %v2798_v19  ;;  %v16902_v57 = vld [vmem:[#allocation39_spill] sm:$0xff]  ;;  %v16907_v19 = vld [vmem:[#allocation20_spill] sm:$0xff] }
 0x506   : > { %v3806_v6 = vpop.f32.mrf.mxu1  ;;  %v13685_v1 = vpop.f32.mrf.mxu0  ;;  %v2974_v32 = vadd.f32 %v13594_v50, %v2804_v9  ;;  %v16903_v50 = vld [vmem:[#allocation12_spill] sm:$0xff]  ;;  %v16908_v9 = vld [vmem:[#allocation30_spill] sm:$0xff] }
 0x507   : > { %v3901_v62 = vadd.f32 %v3870_v0, %v3837_v20  ;;  %v3838_v54 = vadd.f32 %v3806_v6, %v3604_v30  ;;  %v16900_v20 = vld [vmem:[#allocation18_spill] sm:$0xff]  ;;  %v3202_v36 = vadd.f32 %v16901_v8, %v2968_v22  ;;  %v3441_v6 = vadd.f32 %v16903_v50, %v3207_v37  ;;  %v3885_v42 = vpop.permute.xlu1 %3884  ;;  %v16915_v8 = vld [vmem:[#allocation19_spill] sm:$0xff] }
 0x508   : > { %v13694_v7 = vpop.f32.mrf.mxu1  ;;  %v13696_v16 = vpop.f32.mrf.mxu0  ;;  %v2975_v30 = vadd.f32 %v16900_v20, %v2805_v34  ;;  %v3208_v39 = vadd.f32 %v16902_v57, %v2974_v32  ;;  %v16909_v34 = vld [vmem:[#allocation29_spill] sm:$0xff]  ;;  %v16914_v20 = vld [vmem:[#allocation35_spill] sm:$0xff] }
 0x509   : > { %v3917_v49 = vmax.f32 %v3901_v62, 0.0  ;;  %v3902_v17 = vadd.f32 %v3870_v0, %v3838_v54  ;;  %v16899_v0 = vld [vmem:[#allocation11_spill] sm:$0xff]  ;;  %v3436_v4 = vadd.f32 %v16909_v34, %v3202_v36 }
 0x50a   : > { %v13706_v48 = vpop.f32.mrf.mxu1  ;;  %v3580_v21 = vpop.f32.mrf.mxu0  ;;  %v3440_v18 = vadd.f32 %v16899_v0, %v3206_v41  ;;  %v3442_v45 = vadd.f32 %v16907_v19, %v3208_v39  ;;  %v16916_v36 = vld [vmem:[#allocation23_spill] sm:$0xff] }
 0x50b   : > { %v3918_v2 = vmax.f32 %v3902_v17, 0.0  ;;  %v3607_v46 = vadd.f32 %v3580_v21, %v3437_v51  ;;  %3953 = vrot.lane.b32.xlu0 %v3917_v49, %s11929_s12  ;;  %v3209_v51 = vadd.f32 %v16905_v12, %v2975_v30  ;;  %v16906_v49 = vld [vmem:[#allocation10_spill] sm:$0xff]  ;;  %v3599_v57 = vadd.f32 %v16916_v36, %v16915_v8 }
 0x50c   : > { %v3814_v24 = vpop.f32.mrf.mxu1  ;;  %v3582_v53 = vpop.f32.mrf.mxu0  ;;  %v3435_v17 = vadd.f32 %v16906_v49, %v3201_v3  ;;  %v2794_v3 = vadd.f32 %v16911_v25, %v13700_v58 }
 0x50d   : > { %v3841_v23 = vadd.f32 %v3814_v24, %v3607_v46  ;;  %v3608_v44 = vadd.f32 %v3582_v53, %v3438_v15  ;;  %3955 = vrot.lane.b32.xlu1 %v3918_v2, %s11929_s12  ;;  %v16910_v24 = vld [vmem:[#allocation15_spill] sm:$0xff]  ;;  %v3875_v49 = vpop.permute.xlu1 %3874 }
 0x50e   : > { %v3816_v63 = vpop.f32.mrf.mxu1  ;;  %v3584_v43 = vpop.f32.mrf.mxu0  ;;  %v3443_v27 = vadd.f32 %v16910_v24, %v3209_v51  ;;  %v3605_v53 = vadd.f32 %v13685_v1, %v3435_v17  ;;  %v2964_v30 = vadd.f32 %v16914_v20, %v2794_v3  ;;  %v16920_v17 = vld [vmem:[#allocation37_spill] sm:$0xff] }
 0x50f   : > { %v3905_v35 = vadd.f32 %v13662_v40, %v3841_v23  ;;  %v3842_v10 = vadd.f32 %v3816_v63, %v3608_v44  ;;  %v3609_v11 = vadd.f32 %v3584_v43, %v3439_v59  ;;  %v3606_v63 = vadd.f32 %v13696_v16, %v3436_v4  ;;  %v3860_v4 = vpop.permute.xlu0 %3859 }
 0x510   : > { %v3818_v38 = vpop.f32.mrf.mxu1  ;;  %v3586_v13 = vpop.f32.mrf.mxu0  ;;  %v3839_v58 = vadd.f32 %v13694_v7, %v3605_v53 }
 0x511   : > { %v3921_v62 = vmax.f32 %v3905_v35, 0.0  ;;  %v3906_v54 = vadd.f32 %v13662_v40, %v3842_v10  ;;  %v3843_v31 = vadd.f32 %v3818_v38, %v3609_v11  ;;  %v3610_v26 = vadd.f32 %v3586_v13, %v3440_v18  ;;  %v16913_v35 = vld [vmem:[#allocation21_spill] sm:$0xff] }
 0x512   : > { %v3820_v47 = vpop.f32.mrf.mxu1  ;;  %v3590_v21 = vpop.f32.mrf.mxu0  ;;  %v3210_v40 = vadd.f32 %v16908_v9, %v2976_v33  ;;  %v3840_v33 = vadd.f32 %v13706_v48, %v3606_v63 }
 0x513   : > { %v3922_v5 = vmax.f32 %v3906_v54, 0.0  ;;  %v3907_v15 = vadd.f32 %v3885_v42, %v3843_v31  ;;  %v3844_v2 = vadd.f32 %v3820_v47, %v3610_v26  ;;  %v3611_v46 = vadd.f32 %v3590_v21, %v3441_v6  ;;  %3961 = vrot.lane.b32.xlu0 %v3921_v62, %s11929_s12  ;;  %v16918_v54 = vld [vmem:[#allocation27_spill] sm:$0xff]  ;;  %v16919_v31 = vld [vmem:[#allocation32_spill] sm:$0xff] }
 0x514   : > { %v3824_v41 = vpop.f32.mrf.mxu1  ;;  %v3592_v59 = vpop.f32.mrf.mxu0  ;;  %v3444_v37 = vadd.f32 %v16912_v55, %v3210_v40  ;;  %v3600_v26 = vadd.f32 %v16919_v31, %v16918_v54  ;;  %v16922_v21 = vld [vmem:[#allocation28_spill] sm:$0xff]  ;;  %v3904_v40 = vadd.f32 %v3875_v49, %v3840_v33 }
 0x515   : > { %v3923_v23 = vmax.f32 %v3907_v15, 0.0  ;;  %v3908_v44 = vadd.f32 %v3885_v42, %v3844_v2  ;;  %v3845_v22 = vadd.f32 %v3824_v41, %v3611_v46  ;;  %v3612_v32 = vadd.f32 %v3592_v59, %v3442_v45  ;;  %3963 = vrot.lane.b32.xlu1 %v3922_v5, %s11929_s12  ;;  %v16917_v42 = vld [vmem:[#allocation13_spill] sm:$0xff]  ;;  %v16921_v45 = vld [vmem:[#allocation22_spill] sm:$0xff] }
 0x516   : > { %v3826_v43 = vpop.f32.mrf.mxu1  ;;  %v3594_v0 = vpop.f32.mrf.mxu0  ;;  %v3198_v62 = vadd.f32 %v16917_v42, %v2964_v30  ;;  %v3833_v47 = vadd.f32 %v16921_v45, %v3599_v57  ;;  %v3601_v5 = vadd.f32 %v13660_v61, %v16922_v21  ;;  %v3903_v15 = vadd.f32 %v3875_v49, %v3839_v58 }
 0x517   : > { %v3924_v18 = vmax.f32 %v3908_v44, 0.0  ;;  %v3909_v1 = vadd.f32 %v16913_v35, %v3845_v22  ;;  %v3846_v10 = vadd.f32 %v3826_v43, %v3612_v32  ;;  %v3613_v11 = vadd.f32 %v3594_v0, %v3443_v27  ;;  %3965 = vrot.lane.b32.xlu0 %v3923_v23, %s11929_s12 }
 0x518   : > { %v3828_v39 = vpop.f32.mrf.mxu1  ;;  %v3596_v50 = vpop.f32.mrf.mxu0  ;;  %v3432_v19 = vadd.f32 %v16920_v17, %v3198_v62  ;;  %v3834_v48 = vadd.f32 %v13658_v60, %v3600_v26  ;;  %v3897_v24 = vadd.f32 %v3860_v4, %v3833_v47  ;;  %v3835_v27 = vadd.f32 %v13664_v14, %v3601_v5 }
 0x519   : > { %v3925_v6 = vmax.f32 %v3909_v1, 0.0  ;;  %v3910_v16 = vadd.f32 %v16913_v35, %v3846_v10  ;;  %v3847_v38 = vadd.f32 %v3828_v39, %v3613_v11  ;;  %v3614_v13 = vadd.f32 %v3596_v50, %v3444_v37  ;;  %3967 = vrot.lane.b32.xlu1 %v3924_v18, %s11929_s12  ;;  %v3865_v60 = vpop.permute.xlu1 %3864 }
 0x51a   : > { %v3830_v52 = vpop.f32.mrf.mxu1  ;;  %v3602_v9 = vadd.f32 %v13666_v29, %v3432_v19  ;;  %v3919_v53 = vmax.f32 %v3903_v15, 0.0  ;;  %v3898_v61 = vadd.f32 %v3860_v4, %v3834_v48  ;;  %v3920_v41 = vmax.f32 %v3904_v40, 0.0 }
 0x51b   : > { %v3926_v12 = vmax.f32 %v3910_v16, 0.0  ;;  %v3911_v7 = vadd.f32 %v13708_v28, %v3847_v38  ;;  %v3848_v51 = vadd.f32 %v3830_v52, %v3614_v13  ;;  %3969 = vrot.lane.b32.xlu0 %v3925_v6, %s11929_s12  ;;  %v3913_v59 = vmax.f32 %v3897_v24, 0.0 }
 0x51c   : > { %v3899_v29 = vadd.f32 %v3865_v60, %v3835_v27  ;;  %v3914_v23 = vmax.f32 %v3898_v61, 0.0 }
 0x51d   : > { %v3927_v2 = vmax.f32 %v3911_v7, 0.0  ;;  %v3912_v46 = vadd.f32 %v13708_v28, %v3848_v51  ;;  %3971 = vrot.lane.b32.xlu1 %v3926_v12, %s11929_s12  ;;  %v3836_v28 = vadd.f32 %v13670_v56, %v3602_v9 }
 0x51e   : > { %v3915_v22 = vmax.f32 %v3899_v29, 0.0 }
 0x51f   : > { %v3928_v34 = vmax.f32 %v3912_v46, 0.0  ;;  %3973 = vrot.lane.b32.xlu0 %v3927_v2, %s11929_s12  ;;  %v3900_v44 = vadd.f32 %v3865_v60, %v3836_v28 }
 0x521   : > { %3975 = vrot.lane.b32.xlu1 %v3928_v34, %s11929_s12  ;;  %v3916_v14 = vmax.f32 %v3900_v44, 0.0 }
 0x523   : > { %3957 = vrot.lane.b32.xlu0 %v3919_v53, %s11929_s12 }
 0x525   : > { %3959 = vrot.lane.b32.xlu1 %v3920_v41, %s11929_s12 }
 0x527   : > { %3945 = vrot.lane.b32.xlu0 %v3913_v59, %s11929_s12 }
 0x529   : > { %3947 = vrot.lane.b32.xlu1 %v3914_v23, %s11929_s12 }
 0x52b   : > { %3949 = vrot.lane.b32.xlu0 %v3915_v22, %s11929_s12 }
 0x52d   : > { %3951 = vrot.lane.b32.xlu1 %v3916_v14, %s11929_s12 }
 0x57d   : > { %v3954_v56 = vpop.permute.xlu0 %3953 }
 0x57e   : > { %4015 = vst.msk [vmem:[#allocation2 + $0x30] sm:$0xff] %vm1950_vm5, %v3954_v56 }
 0x57f   : > { %v3956_v32 = vpop.permute.xlu1 %3955 }
 0x580   : > { %4017 = vst.msk [vmem:[#allocation2 + $0x40] sm:$0xff] %vm403_vm0, %v3956_v32  ;;  %v3979_v31 = vsel %vm403_vm0, %v3954_v56, %v3956_v32 }
 0x585   : > { %v3962_v25 = vpop.permute.xlu0 %3961  ;;  %v4037_v51 = vld [vmem:[#allocation2 + $0x30] sm:$0xff] }
 0x586   : > { %4021 = vst.msk [vmem:[#allocation2 + $0x60] sm:$0xff] %vm1950_vm5, %v3962_v25 }
 0x587   : > { %v3964_v3 = vpop.permute.xlu1 %3963  ;;  %v4083_v40 = vld [vmem:[#allocation2 + $0x40] sm:$0xff] }
 0x588   : > { %4023 = vst.msk [vmem:[#allocation2 + $0x70] sm:$0xff] %vm403_vm0, %v3964_v3  ;;  %v3981_v39 = vsel %vm403_vm0, %v3962_v25, %v3964_v3  ;;  %v13877_v34 = vpack.i.bf16 %v4083_v40, %v3979_v31  ;;  %v11815_v25 = vld [vmem:[%s16728_s5] sm:$0xff]   ;;  %v16925_v3 = vmov 0  }
 0x589   : > { %v3966_v55 = vpop.permute.xlu0 %3965 }
 0x58a   : > { %4024 = vst.msk [vmem:[#allocation2 + $0x78] sm:$0xff] %vm1950_vm5, %v3966_v55 }
 0x58b   : > { %v3968_v37 = vpop.permute.xlu1 %3967 }
 0x58c   : > { %4026 = vst.msk [vmem:[#allocation2 + $0x88] sm:$0xff] %vm403_vm0, %v3968_v37  ;;  %v13805_v8 = vsel %vm403_vm0, %v3966_v55, %v3968_v37  ;;  %v11818_v55 = vld [vmem:[%s16728_s5 + $0x8] sm:$0xff]   ;;  %v11820_v37 = vld [vmem:[%s16728_s5 + $0x10] sm:$0xff]  }
 0x58d   : > { %v3970_v63 = vpop.permute.xlu0 %3969  ;;  %v13819_v16 = vpack.c.bf16 %v13805_v8, %v3981_v39  ;;  %v4041_v54 = vld [vmem:[#allocation2 + $0x60] sm:$0xff] }
 0x58e   : > { %4027 = vst.msk [vmem:[#allocation2 + $0x90] sm:$0xff] %vm1950_vm5, %v3970_v63 }
 0x58f   : > { %v3972_v43 = vpop.permute.xlu1 %3971  ;;  %v4085_v61 = vld [vmem:[#allocation2 + $0x70] sm:$0xff] }
 0x590   : > { %4029 = vst.msk [vmem:[#allocation2 + $0xa0] sm:$0xff] %vm403_vm0, %v3972_v43  ;;  %v13790_v35 = vsel %vm403_vm0, %v3970_v63, %v3972_v43  ;;  %v13897_v28 = vpack.i.bf16 %v4085_v61, %v3981_v39  ;;  %v11822_v63 = vld [vmem:[%s16728_s5 + $0x18] sm:$0xff]  }
 0x591   : > { %v3974_v0 = vpop.permute.xlu0 %3973  ;;  %v4043_v38 = vld [vmem:[#allocation2 + $0x78] sm:$0xff] }
 0x592   : > { %4030 = vst.msk [vmem:[#allocation2 + $0xa8] sm:$0xff] %vm1950_vm5, %v3974_v0  ;;  %v13831_v26 = vpack.c.bf16 %v4043_v38, %v4041_v54  ;;  %v13906_v59 = vpack.i.bf16 %v4043_v38, %v4041_v54 }
 0x593   : > { %v3976_v18 = vpop.permute.xlu1 %3975  ;;  %v4086_v41 = vld [vmem:[#allocation2 + $0x88] sm:$0xff] }
 0x594   : > { %v13793_v1 = vsel %vm403_vm0, %v3974_v0, %v3976_v18  ;;  %4032 = vst.msk [vmem:[#allocation2 + $0xb8] sm:$0xff] %vm403_vm0, %v3976_v18  ;;  %v13904_v60 = vpack.i.bf16 %v4086_v41, %v13805_v8  ;;  %v13912_v29 = vpack.c.bf16 %v4086_v41, %v4085_v61 }
 0x595   : > { %v3958_v10 = vpop.permute.xlu0 %3957  ;;  %v13798_v11 = vpack.c.bf16 %v13793_v1, %v13790_v35  ;;  %v13808_v57 = vld [vmem:[#allocation2 + $0x90] sm:$0xff] }
 0x596   : > { %4018 = vst.msk [vmem:[#allocation2 + $0x48] sm:$0xff] %vm1950_vm5, %v3958_v10 }
 0x597   : > { %v3960_v20 = vpop.permute.xlu1 %3959  ;;  %9841 = vmatprep.subr.msk.bf16.mxu1 %vm12654_vm8, %v13798_v11  ;;  %v4087_v23 = vld [vmem:[#allocation2 + $0xa0] sm:$0xff] }
 0x598   : > { %4020 = vst.msk [vmem:[#allocation2 + $0x58] sm:$0xff] %vm403_vm0, %v3960_v20  ;;  %v3980_v13 = vsel %vm403_vm0, %v3958_v10, %v3960_v20  ;;  %v13919_v44 = vpack.i.bf16 %v4087_v23, %v13790_v35 }
 0x599   : > { %v3946_v36 = vpop.permute.xlu0 %3945  ;;  %v13810_v58 = vld [vmem:[#allocation2 + $0xa8] sm:$0xff]  ;;  %v13833_v33 = vpack.c.bf16 %v3980_v13, %v3979_v31 }
 0x59a   : > { %4009 = vst.msk [vmem:[#allocation2] sm:$0xff] %vm1950_vm5, %v3946_v36  ;;  %v13816_v50 = vpack.c.bf16 %v13810_v58, %v13808_v57  ;;  %v13934_v56 = vpack.i.bf16 %v13810_v58, %v13808_v57 }
 0x59b   : > { %v3948_v6 = vpop.permute.xlu1 %3947  ;;  %v4088_v22 = vld [vmem:[#allocation2 + $0xb8] sm:$0xff] }
 0x59c   : > { %4011 = vst.msk [vmem:[#allocation2 + $0x10] sm:$0xff] %vm403_vm0, %v3948_v6  ;;  %9844 = vmatpush1.bf16.msk.msra.mxu1 %vm12680_vm4, %v13816_v50  ;;  %v3977_v49 = vsel %vm403_vm0, %v3946_v36, %v3948_v6  ;;  %v13926_v14 = vpack.i.bf16 %v4088_v22, %v13793_v1  ;;  %v13940_v32 = vpack.c.bf16 %v4088_v22, %v4087_v23 }
 0x59d   : > { %v3950_v62 = vpop.permute.xlu0 %3949  ;;  %9847 = vmatprep.subr.msk.bf16.mxu1 %vm12654_vm8, %v13819_v16  ;;  %v4039_v12 = vld [vmem:[#allocation2 + $0x48] sm:$0xff] }
 0x59e   : > { %4012 = vst.msk [vmem:[#allocation2 + $0x18] sm:$0xff] %vm1950_vm5, %v3950_v62  ;;  %v13844_v17 = vpack.c.bf16 %v4039_v12, %v4037_v51  ;;  %v13883_v24 = vpack.i.bf16 %v4039_v12, %v4037_v51 }
 0x59f   : > { %v3952_v52 = vpop.permute.xlu1 %3951  ;;  %v4084_v4 = vld [vmem:[#allocation2 + $0x58] sm:$0xff] }
 0x5a0   : > { %v3978_v7 = vsel %vm403_vm0, %v3950_v62, %v3952_v52  ;;  %4014 = vst.msk [vmem:[#allocation2 + $0x28] sm:$0xff] %vm403_vm0, %v3952_v52  ;;  %9850 = vmatpush1.bf16.msk.msra.mxu1 %vm12680_vm4, %v13831_v26  ;;  %v13885_v27 = vpack.i.bf16 %v4084_v4, %v3980_v13  ;;  %v13891_v53 = vpack.c.bf16 %v4084_v4, %v4083_v40 }
 0x5a1   : > { %9853 = vmatprep.subr.msk.bf16.mxu1 %vm12654_vm8, %v13833_v33  ;;  %v13846_v45 = vpack.c.bf16 %v3978_v7, %v3977_v49  ;;  %v4033_v21 = vld [vmem:[#allocation2] sm:$0xff] }
 0x5a3   : > { %v4081_v19 = vld [vmem:[#allocation2 + $0x10] sm:$0xff] }
 0x5a4   : > { %v13848_v47 = vpack.i.bf16 %v4081_v19, %v3977_v49  ;;  %9856 = vmatpush1.bf16.msk.msra.mxu1 %vm12680_vm4, %v13844_v17 }
 0x5a5   : > { %v4035_v5 = vld [vmem:[#allocation2 + $0x18] sm:$0xff]  ;;  %9859 = vmatprep.subr.msk.bf16.mxu1 %vm12654_vm8, %v13846_v45 }
 0x5a6   : > { %10843 = vrot.lane.b32.xlu1 %v13848_v47, %s11932_s14  ;;  %v13858_v15 = vpack.c.bf16 %v4035_v5, %v4033_v21  ;;  %v13860_v46 = vpack.i.bf16 %v4035_v5, %v4033_v21 }
 0x5a7   : > { %v4082_v2 = vld [vmem:[#allocation2 + $0x28] sm:$0xff] }
 0x5a8   : > { %v13862_v48 = vpack.i.bf16 %v4082_v2, %v3978_v7  ;;  %9862 = vmatpush1.bf16.msk.msra.mxu1 %vm12680_vm4, %v13858_v15  ;;  %v13871_v9 = vpack.c.bf16 %v4082_v2, %v4081_v19 }
 0x5aa   : > { %10848 = vrot.lane.b32.xlu1 %v13860_v46, %s11932_s14  ;;  %10853 = vrot.lane.b32.xlu0 %v13862_v48, %s11932_s14 }
 0x5ab   : > { %9863 = vmatmul.mubr.msk.bf16.vlgmr.msra.gmra.mxu1 %vm2124_vm6, %v11815_v25 }
 0x5ac   : > { %4341 = vmatprep.mubr.bf16.mxu1 %v16925_v3 }
 0x5ae   : > { %4142 = vrot.lane.b32.xlu1 %v13858_v15, %s11930_s13  ;;  %4146 = vrot.lane.b32.xlu0 %v13871_v9, %s11930_s13 }
 0x5b2   : > { %10858 = vrot.lane.b32.xlu0 %v13877_v34, %s11932_s14  ;;  %4144 = vrot.lane.b32.xlu1 %v13846_v45, %s11930_s13 }
 0x5b3   : > { %9864 = vmatmul.mubr.msk.bf16.gmra.mxu1 %vm2124_vm6, %v11818_v55 }
 0x5b4   : > { %4351 = vmatprep.mubr.bf16.mxu1 %v16925_v3 }
 0x5b6   : > { %10863 = vrot.lane.b32.xlu0 %v13883_v24, %s11932_s14  ;;  %10868 = vrot.lane.b32.xlu1 %v13885_v27, %s11932_s14 }
 0x5ba   : > { %4148 = vrot.lane.b32.xlu0 %v13844_v17, %s11930_s13  ;;  %4152 = vrot.lane.b32.xlu1 %v13891_v53, %s11930_s13 }
 0x5bb   : > { %9865 = vmatmul.mubr.msk.bf16.gmra.mxu1 %vm2124_vm6, %v11820_v37 }
 0x5bc   : > { %4361 = vmatprep.mubr.bf16.mxu1 %v16925_v3 }
 0x5be   : > { %4150 = vrot.lane.b32.xlu0 %v13833_v33, %s11930_s13  ;;  %10873 = vrot.lane.b32.xlu1 %v13897_v28, %s11932_s14 }
 0x5c2   : > { %10883 = vrot.lane.b32.xlu0 %v13904_v60, %s11932_s14  ;;  %10878 = vrot.lane.b32.xlu1 %v13906_v59, %s11932_s14 }
 0x5c3   : > { %9866 = vmatmul.mubr.msk.bf16.gmra.mxu1 %vm2124_vm6, %v11822_v63 }
 0x5c4   : > { %4807 = vmatprep.mubr.bf16.mxu1 %v16925_v3 }
 0x5c6   : > { %4158 = vrot.lane.b32.xlu0 %v13912_v29, %s11930_s13  ;;  %4154 = vrot.lane.b32.xlu1 %v13831_v26, %s11930_s13 }
 0x5ca   : > { %10888 = vrot.lane.b32.xlu0 %v13919_v44, %s11932_s14  ;;  %4156 = vrot.lane.b32.xlu1 %v13819_v16, %s11930_s13 }
 0x5ce   : > { %10893 = vrot.lane.b32.xlu0 %v13919_v44, %s11933_s15  ;;  %10903 = vrot.lane.b32.xlu1 %v13926_v14, %s11932_s14 }
 0x5d2   : > { %10898 = vrot.lane.b32.xlu0 %v13934_v56, %s11932_s14  ;;  %10908 = vrot.lane.b32.xlu1 %v13926_v14, %s11933_s15 }
 0x5d6   : > { %4160 = vrot.lane.b32.xlu0 %v13816_v50, %s11930_s13  ;;  %4164 = vrot.lane.b32.xlu1 %v13940_v32, %s11930_s13 }
 0x5da   : > { %4162 = vrot.lane.b32.xlu0 %v13798_v11, %s11930_s13  ;;  %10918 = vrot.lane.b32.xlu1 %v13897_v28, %s11933_s15 }
 0x5de   : > { %10913 = vrot.lane.b32.xlu0 %v13934_v56, %s11933_s15  ;;  %10928 = vrot.lane.b32.xlu1 %v13906_v59, %s11933_s15 }
 0x5e2   : > { %10923 = vrot.lane.b32.xlu0 %v13904_v60, %s11933_s15  ;;  %10933 = vrot.lane.b32.xlu1 %v13877_v34, %s11933_s15 }
 0x5e6   : > { %4915 = vrot.lane.b32.xlu0 %v13940_v32, %s11934_s16  ;;  %4907 = vrot.lane.b32.xlu1 %v13819_v16, %s11934_s16 }
 0x5ea   : > { %4911 = vrot.lane.b32.xlu0 %v13816_v50, %s11934_s16  ;;  %10943 = vrot.lane.b32.xlu1 %v13883_v24, %s11933_s15 }
 0x5ee   : > { %10938 = vrot.lane.b32.xlu0 %v13885_v27, %s11933_s15  ;;  %10948 = vrot.lane.b32.xlu1 %v13848_v47, %s11933_s15 }
 0x5f2   : > { %4909 = vrot.lane.b32.xlu0 %v13912_v29, %s11934_s16  ;;  %4901 = vrot.lane.b32.xlu1 %v13833_v33, %s11934_s16 }
 0x5f6   : > { %4905 = vrot.lane.b32.xlu0 %v13831_v26, %s11934_s16  ;;  %10958 = vrot.lane.b32.xlu1 %v13860_v46, %s11933_s15 }
 0x5fa   : > { %10953 = vrot.lane.b32.xlu0 %v13862_v48, %s11933_s15  ;;  %4895 = vrot.lane.b32.xlu1 %v13846_v45, %s11934_s16 }
 0x5fe   : > { %4903 = vrot.lane.b32.xlu0 %v13891_v53, %s11934_s16  ;;  %4893 = vrot.lane.b32.xlu1 %v13858_v15, %s11934_s16 }
 0x602   : > { %4899 = vrot.lane.b32.xlu0 %v13844_v17, %s11934_s16  ;;  %10968 = vrot.lane.b32.xlu1 %v13926_v14, %s11935_s19 }
 0x606   : > { %4897 = vrot.lane.b32.xlu0 %v13871_v9, %s11934_s16  ;;  %10978 = vrot.lane.b32.xlu1 %v13919_v44, %s11936_s20 }
 0x60a   : > { %10963 = vrot.lane.b32.xlu0 %v13919_v44, %s11935_s19  ;;  %10988 = vrot.lane.b32.xlu1 %v13934_v56, %s11936_s20 }
 0x60e   : > { %10973 = vrot.lane.b32.xlu0 %v13934_v56, %s11935_s19  ;;  %10998 = vrot.lane.b32.xlu1 %v13904_v60, %s11935_s19 }
 0x612   : > { %10983 = vrot.lane.b32.xlu0 %v13926_v14, %s11936_s20  ;;  %11008 = vrot.lane.b32.xlu1 %v13897_v28, %s11936_s20 }
 0x616   : > { %10993 = vrot.lane.b32.xlu0 %v13897_v28, %s11935_s19  ;;  %4913 = vrot.lane.b32.xlu1 %v13798_v11, %s11934_s16 }
 0x618   : > { %v14030_v43 = vpop.permute.xlu1 %10843 }
 0x61a   : > { %11003 = vrot.lane.b32.xlu0 %v13906_v59, %s11935_s19  ;;  %11018 = vrot.lane.b32.xlu1 %v13906_v59, %s11936_s20 }
 0x61c   : > { %v14036_v0 = vpop.permute.xlu1 %10848  ;;  %v14038_v18 = vpop.permute.xlu0 %10853 }
 0x61e   : > { %11013 = vrot.lane.b32.xlu0 %v13904_v60, %s11936_s20  ;;  %11028 = vrot.lane.b32.xlu1 %v13885_v27, %s11935_s19 }
 0x620   : > { %v14044_v35 = vpop.permute.xlu1 %4142  ;;  %v14046_v1 = vpop.permute.xlu0 %4146 }
 0x622   : > { %11023 = vrot.lane.b32.xlu0 %v13877_v34, %s11935_s19  ;;  %11038 = vrot.lane.b32.xlu1 %v13877_v34, %s11936_s20 }
 0x624   : > { %v14052_v10 = vpop.permute.xlu0 %10858  ;;  %v14054_v20 = vpop.permute.xlu1 %4144 }
 0x626   : > { %11033 = vrot.lane.b32.xlu0 %v13883_v24, %s11935_s19  ;;  %11048 = vrot.lane.b32.xlu1 %v13883_v24, %s11936_s20 }
 0x628   : > { %v14060_v8 = vpop.permute.xlu0 %10863  ;;  %v14062_v36 = vpop.permute.xlu1 %10868 }
 0x62a   : > { %11043 = vrot.lane.b32.xlu0 %v13885_v27, %s11936_s20  ;;  %11058 = vrot.lane.b32.xlu1 %v13862_v48, %s11935_s19 }
 0x62c   : > { %v14068_v57 = vpop.permute.xlu0 %4148  ;;  %v4153_v58 = vpop.permute.xlu1 %4152 }
 0x62e   : > { %11053 = vrot.lane.b32.xlu0 %v13848_v47, %s11935_s19  ;;  %11068 = vrot.lane.b32.xlu1 %v13848_v47, %s11936_s20 }
 0x630   : > { %v14074_v39 = vpop.permute.xlu0 %4150  ;;  %v14076_v6 = vpop.permute.xlu1 %10873 }
 0x632   : > { %11063 = vrot.lane.b32.xlu0 %v13860_v46, %s11935_s19  ;;  %11078 = vrot.lane.b32.xlu1 %v13860_v46, %s11936_s20 }
 0x634   : > { %v14082_v38 = vpop.permute.xlu0 %10883  ;;  %v14084_v13 = vpop.permute.xlu1 %10878 }
 0x636   : > { %11073 = vrot.lane.b32.xlu0 %v13862_v48, %s11936_s20  ;;  %5553 = vrot.lane.b32.xlu1 %v13940_v32, %s11938_s22 }
 0x638   : > { %v4159_v62 = vpop.permute.xlu0 %4158  ;;  %v4155_v54 = vpop.permute.xlu1 %4154 }
 0x63a   : > { %11083 = vrot.lane.b32.xlu0 %v13919_v44, %s11937_s21  ;;  %11088 = vrot.lane.b32.xlu1 %v13926_v14, %s11937_s21 }
 0x63c   : > { %v14094_v31 = vpop.permute.xlu0 %10888  ;;  %v4157_v52 = vpop.permute.xlu1 %4156 }
 0x63e   : > { %5549 = vrot.lane.b32.xlu0 %v13816_v50, %s11938_s22  ;;  %11093 = vrot.lane.b32.xlu1 %v13934_v56, %s11937_s21  ;;  %v4167_v56 = vsel %vm528_vm7, %v14054_v20, %v14046_v1  ;;  %v10886_v1 = vunpack.i.h.bf16 %v14082_v38 }
 0x640   : > { %v10894_v12 = vpop.permute.xlu0 %10893  ;;  %v14100_v7 = vpop.permute.xlu1 %10903 }
 0x641   : > { %v10896_v51 = vunpack.i.h.bf16 %v10894_v12  ;;  %v10895_v49 = vunpack.i.l.bf16 %v10894_v12  ;;  %v10905_v63 = vunpack.i.l.bf16 %v14100_v7 }
 0x642   : > { %5545 = vrot.lane.b32.xlu0 %v13819_v16, %s11938_s22  ;;  %5547 = vrot.lane.b32.xlu1 %v13912_v29, %s11938_s22 }
 0x643   : > { %v4691_v50 = vsel %vm902_vm13, %v10895_v49, %v10896_v51 }
 0x644   : > { %v14106_v19 = vpop.permute.xlu0 %10898  ;;  %v10909_v21 = vpop.permute.xlu1 %10908 }
 0x645   : > { %v10911_v5 = vunpack.i.h.bf16 %v10909_v21  ;;  %v10910_v2 = vunpack.i.l.bf16 %v10909_v21  ;;  %v10890_v21 = vunpack.i.l.bf16 %v14094_v31 }
 0x646   : > { %11098 = vrot.lane.b32.xlu0 %v13897_v28, %s11937_s21  ;;  %11103 = vrot.lane.b32.xlu1 %v13904_v60, %s11937_s21 }
 0x647   : > { %v4693_v16 = vsel %vm902_vm13, %v10910_v2, %v10911_v5  ;;  %v10900_v5 = vunpack.i.l.bf16 %v14106_v19 }
 0x648   : > { %v4161_v40 = vpop.permute.xlu0 %4160  ;;  %v4165_v4 = vpop.permute.xlu1 %4164  ;;  %v9920_v61 = vpack.c.bf16 %v4693_v16, %v4691_v50 }
 0x64a   : > { %5543 = vrot.lane.b32.xlu0 %v13831_v26, %s11938_s22  ;;  %11108 = vrot.lane.b32.xlu1 %v13906_v59, %s11937_s21  ;;  %v4171_v59 = vsel %vm528_vm7, %v4157_v52, %v4159_v62 }
 0x64b   : > { %9921 = vmatprep.subr.msk.bf16.mxu1 %vm12654_vm8, %v9920_v61  ;;  %v10870_v61 = vunpack.i.l.bf16 %v14062_v36 }
 0x64c   : > { %v4163_v28 = vpop.permute.xlu0 %4162  ;;  %v10919_v41 = vpop.permute.xlu1 %10918 }
 0x64d   : > { %v4173_v60 = vsel %vm528_vm7, %v4163_v28, %v4165_v4  ;;  %v4172_v29 = vsel %vm528_vm7, %v4161_v40, %v4163_v28  ;;  %v10921_v14 = vunpack.i.h.bf16 %v10919_v41  ;;  %v10920_v32 = vunpack.i.l.bf16 %v10919_v41 }
 0x64e   : > { %5539 = vrot.lane.b32.xlu0 %v13833_v33, %s11938_s22  ;;  %5541 = vrot.lane.b32.xlu1 %v13891_v53, %s11938_s22  ;;  %v4170_v33 = vsel %vm528_vm7, %v4155_v54, %v4157_v52  ;;  %v4169_v53 = vsel %vm528_vm7, %v14074_v39, %v4153_v58  ;;  %v4168_v58 = vsel %vm528_vm7, %v14068_v57, %v14074_v39  ;;  %v10871_v4 = vunpack.i.h.bf16 %v14062_v36 }
 0x64f   : > { %4202 = vmatprep.subr.bf16.mxu0 %v4173_v60  ;;  %v4687_v57 = vsel %vm902_vm13, %v10920_v32, %v10921_v14  ;;  %v10876_v28 = vunpack.i.h.bf16 %v14076_v6  ;;  %v10875_v41 = vunpack.i.l.bf16 %v14076_v6  ;;  %v10880_v60 = vunpack.i.l.bf16 %v14084_v13 }
 0x650   : > { %4203 = vmatpush1.bf16.msra.mxu0 %v4172_v29  ;;  %v10914_v26 = vpop.permute.xlu0 %10913  ;;  %v10929_v23 = vpop.permute.xlu1 %10928  ;;  %v4166_v6 = vsel %vm528_vm7, %v14044_v35, %v14054_v20  ;;  %v10845_v20 = vunpack.i.l.bf16 %v14030_v43  ;;  %v10865_v14 = vunpack.i.l.bf16 %v14060_v8 }
 0x651   : > { %v10916_v44 = vunpack.i.h.bf16 %v10914_v26  ;;  %v10915_v22 = vunpack.i.l.bf16 %v10914_v26  ;;  %4204 = vmatprep.subr.bf16.mxu0 %v4171_v59  ;;  %v10930_v37 = vunpack.i.l.bf16 %v10929_v23  ;;  %v10931_v52 = vunpack.i.h.bf16 %v10929_v23  ;;  %v11816_v59 = vld [vmem:[%s16728_s5 + $0x20] sm:$0xff]  }
 0x652   : > { %11113 = vrot.lane.b32.xlu0 %v13877_v34, %s11937_s21  ;;  %11118 = vrot.lane.b32.xlu1 %v13885_v27, %s11937_s21  ;;  %v10906_v34 = vunpack.i.h.bf16 %v14100_v7  ;;  %v10901_v7 = vunpack.i.h.bf16 %v14106_v19  ;;  %v4456_v26 = vsel %vm751_vm10, %v10900_v5, %v10890_v21  ;;  %v10860_v23 = vunpack.i.l.bf16 %v14052_v10 }
 0x653   : > { %v4690_v25 = vsel %vm902_vm13, %v10915_v22, %v10895_v49  ;;  %v4692_v55 = vsel %vm902_vm13, %v10916_v44, %v10910_v2  ;;  %v10891_v49 = vunpack.i.h.bf16 %v14094_v31  ;;  %v4686_v39 = vsel %vm902_vm13, %v10930_v37, %v10920_v32 }
 0x654   : > { %v9923_v27 = vpack.c.bf16 %v4692_v55, %v4690_v25  ;;  %4205 = vmatpush1.bf16.msra.mxu0 %v4170_v33  ;;  %v10924_v62 = vpop.permute.xlu0 %10923  ;;  %v14141_v54 = vpop.permute.xlu1 %10933  ;;  %v10885_v31 = vunpack.i.l.bf16 %v14082_v38  ;;  %v4459_v19 = vsel %vm751_vm10, %v10905_v63, %v10906_v34  ;;  %v10881_v38 = vunpack.i.h.bf16 %v14084_v13 }
 0x655   : > { %v10926_v12 = vunpack.i.h.bf16 %v10924_v62  ;;  %v10925_v51 = vunpack.i.l.bf16 %v10924_v62  ;;  %4206 = vmatprep.subr.bf16.mxu0 %v4169_v53  ;;  %v4457_v29 = vsel %vm751_vm10, %v10890_v21, %v10891_v49  ;;  %v4458_v36 = vsel %vm751_vm10, %v10901_v7, %v10905_v63 }
 0x656   : > { %5551 = vrot.lane.b32.xlu0 %v13798_v11, %s11938_s22  ;;  %11123 = vrot.lane.b32.xlu1 %v13883_v24, %s11937_s21  ;;  %v9880_v13 = vpack.c.bf16 %v4459_v19, %v4457_v29  ;;  %v4455_v44 = vsel %vm751_vm10, %v10885_v31, %v10886_v1  ;;  %v4451_v33 = vsel %vm751_vm10, %v10870_v61, %v10871_v4  ;;  %v10935_v37 = vunpack.i.l.bf16 %v14141_v54 }
 0x657   : > { %v4688_v2 = vsel %vm902_vm13, %v10931_v52, %v10925_v51  ;;  %v4689_v50 = vsel %vm902_vm13, %v10925_v51, %v10926_v12  ;;  %9924 = vmatpush1.bf16.msk.msra.mxu1 %vm12680_vm4, %v9923_v27  ;;  %v4453_v53 = vsel %vm751_vm10, %v10875_v41, %v10876_v28  ;;  %v4454_v32 = vsel %vm751_vm10, %v10881_v38, %v10885_v31  ;;  %v5912_v38 = vld [vmem:[%s16729_s6 + $0x30] sm:$0xff] }
 0x658   : > { %v9929_v16 = vpack.c.bf16 %v4688_v2, %v4686_v39  ;;  %4207 = vmatpush1.bf16.msra.mxu0 %v4168_v58  ;;  %v14163_v11 = vpop.permute.xlu0 %4915  ;;  %v14165_v24 = vpop.permute.xlu1 %4907  ;;  %v9926_v40 = vpack.c.bf16 %v4689_v50, %v4687_v57  ;;  %v4452_v25 = vsel %vm751_vm10, %v10880_v60, %v10875_v41  ;;  %v9883_v55 = vpack.c.bf16 %v4458_v36, %v4456_v26  ;;  %v5911_v60 = vld [vmem:[%s16729_s6 + $0x28] sm:$0xff] }
 0x659   : > { %4208 = vmatprep.subr.bf16.mxu0 %v4167_v56  ;;  %v9886_v63 = vpack.c.bf16 %v4455_v44, %v4453_v53  ;;  %v10856_v27 = vunpack.i.h.bf16 %v14038_v18  ;;  %v10855_v62 = vunpack.i.l.bf16 %v14038_v18  ;;  %v10850_v18 = vunpack.i.l.bf16 %v14036_v0 }
 0x65a   : > { %5537 = vrot.lane.b32.xlu0 %v13844_v17, %s11938_s22  ;;  %5535 = vrot.lane.b32.xlu1 %v13871_v9, %s11938_s22  ;;  %v10846_v17 = vunpack.i.h.bf16 %v14030_v43  ;;  %v10861_v9 = vunpack.i.h.bf16 %v14052_v10  ;;  %v10866_v10 = vunpack.i.h.bf16 %v14060_v8  ;;  %v10936_v43 = vunpack.i.h.bf16 %v14141_v54 }
 0x65b   : > { %9927 = vmatprep.subr.msk.bf16.mxu1 %vm12654_vm8, %v9926_v40  ;;  %v10851_v8 = vunpack.i.h.bf16 %v14036_v0  ;;  %v4448_v54 = vsel %vm751_vm10, %v10865_v14, %v10860_v23  ;;  %v9889_v21 = vpack.c.bf16 %v4454_v32, %v4452_v25  ;;  %v5913_v0 = vld [vmem:[%s16729_s6 + $0x38] sm:$0xff]  ;;  %v4447_v50 = vsel %vm751_vm10, %v10855_v62, %v10856_v27  ;;  %v5908_v25 = vld [vmem:[%s16729_s6 + $0x10] sm:$0xff] }
 0x65c   : > { %4209 = vmatpush1.bf16.msra.mxu0 %v4166_v6  ;;  %9930 = vmatpush1.bf16.msk.msra.mxu1 %vm12680_vm4, %v9929_v16  ;;  %v14194_v22 = vpop.permute.xlu0 %4911  ;;  %v10944_v35 = vpop.permute.xlu1 %10943  ;;  %v4449_v58 = vsel %vm751_vm10, %v10860_v23, %v10861_v9  ;;  %v4450_v49 = vsel %vm751_vm10, %v10866_v10, %v10870_v61  ;;  %v4683_v5 = vsel %vm902_vm13, %v10935_v37, %v10936_v43  ;;  %v11819_v9 = vld [vmem:[%s16728_s5 + $0x30] sm:$0xff]   ;;  %v11821_v27 = vld [vmem:[%s16728_s5 + $0x38] sm:$0xff]  }
 0x65d   : > { %9881 = vmatprep.subr.msk.bf16.mxu0 %vm13050_vm11, %v9880_v13  ;;  %v10945_v34 = vunpack.i.l.bf16 %v10944_v35  ;;  %v10946_v52 = vunpack.i.h.bf16 %v10944_v35  ;;  %v9892_v7 = vpack.c.bf16 %v4451_v33, %v4449_v58  ;;  %v4445_v40 = vsel %vm751_vm10, %v10845_v20, %v10846_v17  ;;  %v5909_v17 = vld [vmem:[%s16729_s6 + $0x18] sm:$0xff] }
 0x65e   : > { %5533 = vrot.lane.b32.xlu0 %v13846_v45, %s11938_s22  ;;  %11133 = vrot.lane.b32.xlu1 %v13862_v48, %s11937_s21  ;;  %v9895_v4 = vpack.c.bf16 %v4450_v49, %v4448_v54  ;;  %v4444_v61 = vsel %vm751_vm10, %v10850_v18, %v10845_v20  ;;  %v4446_v28 = vsel %vm751_vm10, %v10851_v8, %v10855_v62  ;;  %v5906_v8 = vld [vmem:[%s16729_s6] sm:$0xff]  ;;  %v11826_v18 = vld [vmem:[%s16728_s5 + $0x68] sm:$0xff]  }
 0x65f   : > { %9831 = vmatmul.mubr.msk.bf16.vlgmr.msra.gmra.mxu0 %vm2124_vm6, %v11816_v59  ;;  %v4682_v57 = vsel %vm902_vm13, %v10945_v34, %v10935_v37  ;;  %v9898_v41 = vpack.c.bf16 %v4447_v50, %v4445_v40  ;;  %v9901_v26 = vpack.c.bf16 %v4446_v28, %v4444_v61  ;;  %v5910_v59 = vld [vmem:[%s16729_s6 + $0x20] sm:$0xff]  ;;  %v11828_v61 = vld [vmem:[%s16728_s5 + $0x70] sm:$0xff]  }
 0x660   : > { %9884 = vmatpush1.bf16.msk.msra.mxu0 %vm13082_vm12, %v9883_v55  ;;  %v10939_v48 = vpop.permute.xlu0 %10938  ;;  %v14218_v1 = vpop.permute.xlu1 %10948  ;;  %4236 = vmatprep.mubr.bf16.mxu0 %v16925_v3  ;;  %v5907_v55 = vld [vmem:[%s16729_s6 + $0x8] sm:$0xff]  ;;  %v11824_v62 = vld [vmem:[%s16728_s5 + $0x60] sm:$0xff]  }
 0x661   : > { %v10941_v12 = vunpack.i.h.bf16 %v10939_v48  ;;  %v10940_v51 = vunpack.i.l.bf16 %v10939_v48  ;;  %9887 = vmatprep.subr.msk.bf16.mxu0 %vm13050_vm11, %v9886_v63  ;;  %v10951_v36 = vunpack.i.h.bf16 %v14218_v1  ;;  %v10950_v6 = vunpack.i.l.bf16 %v14218_v1 }
 0x662   : > { %11128 = vrot.lane.b32.xlu0 %v13848_v47, %s11937_s21  ;;  %11138 = vrot.lane.b32.xlu1 %v13860_v46, %s11937_s21  ;;  %v11817_v47 = vld [vmem:[%s16728_s5 + $0x28] sm:$0xff]  }
 0x663   : > { %v4684_v39 = vsel %vm902_vm13, %v10946_v52, %v10940_v51  ;;  %v4685_v2 = vsel %vm902_vm13, %v10940_v51, %v10941_v12  ;;  %v4679_v33 = vsel %vm902_vm13, %v10950_v6, %v10951_v36  ;;  %v11823_v51 = vld [vmem:[%s16728_s5 + $0x40] sm:$0xff]  }
 0x664   : > { %v9935_v46 = vpack.c.bf16 %v4684_v39, %v4682_v57  ;;  %9890 = vmatpush1.bf16.msk.msra.mxu0 %vm13082_vm12, %v9889_v21  ;;  %v14243_v31 = vpop.permute.xlu0 %4909  ;;  %v14245_v19 = vpop.permute.xlu1 %4901  ;;  %v9932_v16 = vpack.c.bf16 %v4685_v2, %v4683_v5 }
 0x665   : > { %9893 = vmatprep.subr.msk.bf16.mxu0 %vm13050_vm11, %v9892_v7 }
 0x666   : > { %5531 = vrot.lane.b32.xlu0 %v13858_v15, %s11938_s22  ;;  %5951 = vperm.xlu1 %10540, %v5913_v0  }
 0x667   : > { %9832 = vmatmul.mubr.msk.bf16.gmra.mxu0 %vm2124_vm6, %v11817_v47  ;;  %9933 = vmatprep.subr.msk.bf16.mxu1 %vm12654_vm8, %v9932_v16 }
 0x668   : > { %9896 = vmatpush1.bf16.msk.msra.mxu0 %vm13082_vm12, %v9895_v4  ;;  %9936 = vmatpush1.bf16.msk.msra.mxu1 %vm12680_vm4, %v9935_v46  ;;  %v14267_v15 = vpop.permute.xlu0 %4905  ;;  %v10959_v29 = vpop.permute.xlu1 %10958  ;;  %v11825_v4 = vld [vmem:[%s16728_s5 + $0x48] sm:$0xff]  }
 0x669   : > { %9899 = vmatprep.subr.msk.bf16.mxu0 %vm13050_vm11, %v9898_v41  ;;  %4246 = vmatprep.mubr.bf16.mxu0 %v16925_v3  ;;  %v10960_v13 = vunpack.i.l.bf16 %v10959_v29  ;;  %v10961_v35 = vunpack.i.h.bf16 %v10959_v29 }
 0x66a   : > { %5946 = vperm.xlu0 %10541, %v5912_v38   ;;  %5941 = vperm.xlu1 %10540, %v5911_v60  }
 0x66b   : > { %v4678_v53 = vsel %vm902_vm13, %v10960_v13, %v10950_v6 }
 0x66c   : > { %9902 = vmatpush1.bf16.msk.msra.mxu0 %vm13082_vm12, %v9901_v26  ;;  %v10954_v23 = vpop.permute.xlu0 %10953  ;;  %v14285_v44 = vpop.permute.xlu1 %4895 }
 0x66d   : > { %v10956_v20 = vunpack.i.h.bf16 %v10954_v23  ;;  %v10955_v14 = vunpack.i.l.bf16 %v10954_v23 }
 0x66e   : > { %5936 = vperm.xlu0 %10541, %v5910_v59   ;;  %5931 = vperm.xlu1 %10540, %v5909_v17  }
 0x66f   : > { %v4680_v10 = vsel %vm902_vm13, %v10961_v35, %v10955_v14  ;;  %v4681_v32 = vsel %vm902_vm13, %v10955_v14, %v10956_v20  ;;  %9833 = vmatmul.mubr.msk.bf16.gmra.mxu0 %vm2124_vm6, %v11819_v9  ;;  %v4922_v35 = vsel %vm1082_vm15, %v14165_v24, %v14243_v31  ;;  %v11827_v20 = vld [vmem:[%s16728_s5 + $0x50] sm:$0xff]   ;;  %v4921_v31 = vsel %vm1082_vm15, %v14267_v15, %v14165_v24 }
 0x670   : > { %v9941_v43 = vpack.c.bf16 %v4680_v10, %v4678_v53  ;;  %v14298_v37 = vpop.permute.xlu0 %4903  ;;  %v14300_v34 = vpop.permute.xlu1 %4893  ;;  %v9938_v63 = vpack.c.bf16 %v4681_v32, %v4679_v33  ;;  %4256 = vmatprep.mubr.bf16.mxu0 %v16925_v3 }
 0x671   : > { %v4920_v24 = vsel %vm1082_vm15, %v14245_v19, %v14298_v37  ;;  %v11829_v37 = vld [vmem:[%s16728_s5 + $0x58] sm:$0xff]  }
 0x672   : > { %5926 = vperm.xlu0 %10541, %v5908_v25   ;;  %5921 = vperm.xlu1 %10540, %v5907_v55  }
 0x673   : > { %9939 = vmatprep.subr.msk.bf16.mxu1 %vm12654_vm8, %v9938_v63 }
 0x674   : > { %9942 = vmatpush1.bf16.msk.msra.mxu1 %vm12680_vm4, %v9941_v43  ;;  %v14316_v58 = vpop.permute.xlu0 %4899  ;;  %v10969_v48 = vpop.permute.xlu1 %10968 }
 0x675   : > { %v10971_v52 = vunpack.i.h.bf16 %v10969_v48  ;;  %v10970_v12 = vunpack.i.l.bf16 %v10969_v48  ;;  %v4919_v48 = vsel %vm1082_vm15, %v14316_v58, %v14245_v19  ;;  %v4917_v58 = vsel %vm1082_vm15, %v14300_v34, %v14285_v44 }
 0x676   : > { %5916 = vperm.xlu0 %10541, %v5906_v8  }
 0x677   : > { %9834 = vmatmul.mubr.msk.bf16.gmra.mxu0 %vm2124_vm6, %v11821_v27  ;;  %9943 = vmatmul.mubr.msk.bf16.vlgmr.msra.gmra.mxu1 %vm2124_vm6, %v11824_v62  ;;  %v5097_v57 = vsel %vm1198_vm14, %v10970_v12, %v10971_v52 }
 0x678   : > { %v14320_v1 = vpop.permute.xlu0 %4897  ;;  %v14322_v54 = vpop.permute.xlu1 %10978  ;;  %4573 = vmatprep.mubr.bf16.mxu0 %v16925_v3  ;;  %4817 = vmatprep.mubr.bf16.mxu1 %v16925_v3 }
 0x679   : > { %v10981_v15 = vunpack.i.h.bf16 %v14322_v54  ;;  %v10980_v62 = vunpack.i.l.bf16 %v14322_v54  ;;  %v4918_v54 = vsel %vm1082_vm15, %v14285_v44, %v14320_v1 }
 0x67b   : > { %v5329_v19 = vsel %vm1349_vm1, %v10980_v62, %v10981_v15 }
 0x67c   : > { %v10964_v49 = vpop.permute.xlu0 %10963  ;;  %v14332_v21 = vpop.permute.xlu1 %10988 }
 0x67d   : > { %v10966_v7 = vunpack.i.h.bf16 %v10964_v49  ;;  %v10965_v5 = vunpack.i.l.bf16 %v10964_v49 }
 0x67f   : > { %v5095_v39 = vsel %vm1198_vm14, %v10965_v5, %v10966_v7  ;;  %9903 = vmatmul.mubr.msk.bf16.vlgmr.msra.gmra.mxu0 %vm2124_vm6, %v11823_v51  ;;  %9944 = vmatmul.mubr.msk.bf16.gmra.mxu1 %vm2124_vm6, %v11826_v18 }
 0x680   : > { %v10974_v2 = vpop.permute.xlu0 %10973  ;;  %v10999_v0 = vpop.permute.xlu1 %10998  ;;  %v9976_v47 = vpack.c.bf16 %v5097_v57, %v5095_v39  ;;  %4583 = vmatprep.mubr.bf16.mxu0 %v16925_v3  ;;  %4827 = vmatprep.mubr.bf16.mxu1 %v16925_v3 }
 0x681   : > { %v10976_v50 = vunpack.i.h.bf16 %v10974_v2  ;;  %v10975_v46 = vunpack.i.l.bf16 %v10974_v2  ;;  %v11001_v60 = vunpack.i.h.bf16 %v10999_v0  ;;  %v11000_v29 = vunpack.i.l.bf16 %v10999_v0 }
 0x682   : > { %9977 = vmatprep.subr.msk.bf16.mxu1 %vm13050_vm11, %v9976_v47  ;;  %v10991_v0 = vunpack.i.h.bf16 %v14332_v21 }
 0x683   : > { %v5094_v16 = vsel %vm1198_vm14, %v10975_v46, %v10965_v5  ;;  %v5096_v40 = vsel %vm1198_vm14, %v10976_v50, %v10970_v12  ;;  %v5093_v9 = vsel %vm1198_vm14, %v11000_v29, %v11001_v60 }
 0x684   : > { %v9979_v28 = vpack.c.bf16 %v5096_v40, %v5094_v16  ;;  %v14350_v41 = vpop.permute.xlu0 %10983  ;;  %v14352_v38 = vpop.permute.xlu1 %11008  ;;  %v10990_v40 = vunpack.i.l.bf16 %v14332_v21 }
 0x685   : > { %v10986_v55 = vunpack.i.h.bf16 %v14350_v41  ;;  %v10985_v43 = vunpack.i.l.bf16 %v14350_v41 }
 0x686   : > { %9980 = vmatpush1.bf16.msk.msra.mxu1 %vm13082_vm12, %v9979_v28  ;;  %v11010_v28 = vunpack.i.l.bf16 %v14352_v38 }
 0x687   : > { %9904 = vmatmul.mubr.msk.bf16.gmra.mxu0 %vm2124_vm6, %v11825_v4  ;;  %9945 = vmatmul.mubr.msk.bf16.gmra.mxu1 %vm2124_vm6, %v11828_v61  ;;  %v5331_v51 = vsel %vm1349_vm1, %v10985_v43, %v10986_v55  ;;  %v5330_v4 = vsel %vm1349_vm1, %v10991_v0, %v10985_v43  ;;  %v11011_v61 = vunpack.i.h.bf16 %v14352_v38 }
 0x688   : > { %v10994_v26 = vpop.permute.xlu0 %10993  ;;  %v4914_v36 = vpop.permute.xlu1 %4913  ;;  %4593 = vmatprep.mubr.bf16.mxu0 %v16925_v3  ;;  %4837 = vmatprep.mubr.bf16.mxu1 %v16925_v3  ;;  %v10016_v2 = vpack.c.bf16 %v5331_v51, %v5329_v19 }
 0x689   : > { %v10996_v6 = vunpack.i.h.bf16 %v10994_v26  ;;  %v10995_v13 = vunpack.i.l.bf16 %v10994_v26  ;;  %v4924_v59 = vsel %vm1082_vm15, %v4914_v36, %v14163_v11  ;;  %v4923_v17 = vsel %vm1082_vm15, %v14194_v22, %v4914_v36  ;;  %v11830_v11 = vld [vmem:[%s16728_s5 + $0x78] sm:$0xff]   ;;  %v11831_v26 = vld [vmem:[%s16728_s5 + $0x80] sm:$0xff]  }
 0x68a   : > { %4953 = vmatprep.subr.bf16.mxu0 %v4924_v59 }
 0x68b   : > { %v5091_v23 = vsel %vm1198_vm14, %v10995_v13, %v10996_v6  ;;  %4954 = vmatpush1.bf16.msra.mxu0 %v4923_v17 }
 0x68c   : > { %v11004_v14 = vpop.permute.xlu0 %11003  ;;  %v14375_v22 = vpop.permute.xlu1 %11018  ;;  %4955 = vmatprep.subr.bf16.mxu0 %v4922_v35  ;;  %v9982_v33 = vpack.c.bf16 %v5093_v9, %v5091_v23  ;;  %v5328_v9 = vsel %vm1349_vm1, %v10990_v40, %v10980_v62  ;;  %v11833_v40 = vld [vmem:[%s16728_s5 + $0xa0] sm:$0xff]  }
 0x68d   : > { %v11006_v53 = vunpack.i.h.bf16 %v11004_v14  ;;  %v11005_v10 = vunpack.i.l.bf16 %v11004_v14  ;;  %v11021_v41 = vunpack.i.h.bf16 %v14375_v22  ;;  %v11020_v60 = vunpack.i.l.bf16 %v14375_v22 }
 0x68e   : > { %9983 = vmatprep.subr.msk.bf16.mxu1 %vm13050_vm11, %v9982_v33 }
 0x68f   : > { %v5090_v32 = vsel %vm1198_vm14, %v11005_v10, %v10995_v13  ;;  %v5092_v25 = vsel %vm1198_vm14, %v11006_v53, %v11000_v29  ;;  %9905 = vmatmul.mubr.msk.bf16.gmra.mxu0 %vm2124_vm6, %v11827_v20  ;;  %9946 = vmatmul.mubr.msk.bf16.gmra.mxu1 %vm2124_vm6, %v11830_v11  ;;  %v10019_v20 = vpack.c.bf16 %v5330_v4, %v5328_v9 }
 0x690   : > { %v9985_v63 = vpack.c.bf16 %v5092_v25, %v5090_v32  ;;  %4956 = vmatpush1.bf16.msra.mxu0 %v4921_v31  ;;  %v11014_v8 = vpop.permute.xlu0 %11013  ;;  %v11029_v27 = vpop.permute.xlu1 %11028  ;;  %4603 = vmatprep.mubr.bf16.mxu0 %v16925_v3  ;;  %v5325_v11 = vsel %vm1349_vm1, %v11010_v28, %v11011_v61  ;;  %v5324_v31 = vsel %vm1349_vm1, %v11020_v60, %v11010_v28  ;;  %v11834_v28 = vld [vmem:[%s16728_s5 + $0x90] sm:$0xff]  }
 0x691   : > { %4957 = vmatprep.subr.bf16.mxu0 %v4920_v24  ;;  %5211 = vmatprep.mubr.bf16.mxu1 %v16925_v3  ;;  %v11031_v52 = vunpack.i.h.bf16 %v11029_v27  ;;  %v11030_v12 = vunpack.i.l.bf16 %v11029_v27  ;;  %v11016_v47 = vunpack.i.h.bf16 %v11014_v8  ;;  %v11015_v1 = vunpack.i.l.bf16 %v11014_v8 }
 0x692   : > { %9986 = vmatpush1.bf16.msk.msra.mxu1 %vm13082_vm12, %v9985_v63 }
 0x693   : > { %v5089_v57 = vsel %vm1198_vm14, %v11030_v12, %v11031_v52  ;;  %v5327_v36 = vsel %vm1349_vm1, %v11015_v1, %v11016_v47  ;;  %v5326_v14 = vsel %vm1349_vm1, %v11021_v41, %v11015_v1 }
 0x694   : > { %4958 = vmatpush1.bf16.msra.mxu0 %v4919_v48  ;;  %v11024_v18 = vpop.permute.xlu0 %11023  ;;  %v14404_v49 = vpop.permute.xlu1 %11038  ;;  %v10022_v10 = vpack.c.bf16 %v5327_v36, %v5325_v11  ;;  %v10025_v15 = vpack.c.bf16 %v5326_v14, %v5324_v31 }
 0x695   : > { %v11026_v7 = vunpack.i.h.bf16 %v11024_v18  ;;  %v11025_v5 = vunpack.i.l.bf16 %v11024_v18  ;;  %4959 = vmatprep.subr.bf16.mxu0 %v4918_v54  ;;  %v11041_v6 = vunpack.i.h.bf16 %v14404_v49  ;;  %v11040_v38 = vunpack.i.l.bf16 %v14404_v49 }
 0x697   : > { %v5087_v39 = vsel %vm1198_vm14, %v11025_v5, %v11026_v7  ;;  %9906 = vmatmul.mubr.msk.bf16.gmra.mxu0 %vm2124_vm6, %v11829_v37  ;;  %v5321_v32 = vsel %vm1349_vm1, %v11040_v38, %v11041_v6 }
 0x698   : > { %4960 = vmatpush1.bf16.msra.mxu0 %v4917_v58  ;;  %v11034_v50 = vpop.permute.xlu0 %11033  ;;  %v11049_v46 = vpop.permute.xlu1 %11048  ;;  %v9988_v16 = vpack.c.bf16 %v5089_v57, %v5087_v39  ;;  %4977 = vmatprep.mubr.bf16.mxu0 %v16925_v3 }
 0x699   : > { %v11036_v44 = vunpack.i.h.bf16 %v11034_v50  ;;  %v11035_v34 = vunpack.i.l.bf16 %v11034_v50  ;;  %10017 = vmatprep.subr.msk.bf16.mxu0 %vm12654_vm8, %v10016_v2  ;;  %v11051_v25 = vunpack.i.h.bf16 %v11049_v46  ;;  %v11050_v63 = vunpack.i.l.bf16 %v11049_v46 }
 0x69a   : > { %9989 = vmatprep.subr.msk.bf16.mxu1 %vm13050_vm11, %v9988_v16 }
 0x69b   : > { %v5086_v21 = vsel %vm1198_vm14, %v11035_v34, %v11025_v5  ;;  %v5088_v29 = vsel %vm1198_vm14, %v11036_v44, %v11030_v12  ;;  %v11832_v12 = vld [vmem:[%s16728_s5 + $0x88] sm:$0xff]   ;;  %v5320_v49 = vsel %vm1349_vm1, %v11050_v63, %v11040_v38 }
 0x69c   : > { %v9991_v13 = vpack.c.bf16 %v5088_v29, %v5086_v21  ;;  %v11044_v59 = vpop.permute.xlu0 %11043  ;;  %v11059_v17 = vpop.permute.xlu1 %11058 }
 0x69d   : > { %v11046_v23 = vunpack.i.h.bf16 %v11044_v59  ;;  %v11045_v35 = vunpack.i.l.bf16 %v11044_v59  ;;  %v11061_v33 = vunpack.i.h.bf16 %v11059_v17  ;;  %v11060_v53 = vunpack.i.l.bf16 %v11059_v17 }
 0x69e   : > { %9992 = vmatpush1.bf16.msk.msra.mxu1 %vm13082_vm12, %v9991_v13 }
 0x69f   : > { %v5323_v22 = vsel %vm1349_vm1, %v11045_v35, %v11046_v23  ;;  %9959 = vmatmul.mubr.msk.bf16.vlgmr.msra.gmra.mxu0 %vm2124_vm6, %v11831_v26  ;;  %v5322_v62 = vsel %vm1349_vm1, %v11051_v25, %v11045_v35  ;;  %v5085_v48 = vsel %vm1198_vm14, %v11060_v53, %v11061_v33  ;;  %v11835_v35 = vld [vmem:[%s16728_s5 + $0xa8] sm:$0xff]  }
 0x6a0   : > { %10020 = vmatpush1.bf16.msk.msra.mxu0 %vm12680_vm4, %v10019_v20  ;;  %v11054_v55 = vpop.permute.xlu0 %11053  ;;  %v11069_v43 = vpop.permute.xlu1 %11068  ;;  %4987 = vmatprep.mubr.bf16.mxu0 %v16925_v3  ;;  %v10028_v24 = vpack.c.bf16 %v5323_v22, %v5321_v32  ;;  %v10031_v5 = vpack.c.bf16 %v5322_v62, %v5320_v49  ;;  %v11836_v20 = vld [vmem:[%s16728_s5 + $0x98] sm:$0xff]  }
 0x6a1   : > { %10023 = vmatprep.subr.msk.bf16.mxu0 %vm12654_vm8, %v10022_v10  ;;  %v11056_v8 = vunpack.i.h.bf16 %v11054_v55  ;;  %v11055_v27 = vunpack.i.l.bf16 %v11054_v55  ;;  %v11071_v19 = vunpack.i.h.bf16 %v11069_v43  ;;  %v11070_v58 = vunpack.i.l.bf16 %v11069_v43  ;;  %v11837_v43 = vld [vmem:[%s16728_s5 + $0xb0] sm:$0xff]  }
 0x6a3   : > { %v5083_v52 = vsel %vm1198_vm14, %v11055_v27, %v11056_v8  ;;  %v5317_v44 = vsel %vm1349_vm1, %v11070_v58, %v11071_v19  ;;  %v11839_v19 = vld [vmem:[%s16728_s5 + $0xb8] sm:$0xff]  }
 0x6a4   : > { %10026 = vmatpush1.bf16.msk.msra.mxu0 %vm12680_vm4, %v10025_v15  ;;  %v11064_v37 = vpop.permute.xlu0 %11063  ;;  %v11079_v51 = vpop.permute.xlu1 %11078  ;;  %v9994_v18 = vpack.c.bf16 %v5085_v48, %v5083_v52  ;;  %v11838_v15 = vld [vmem:[%s16728_s5 + $0xc0] sm:$0xff]  }
 0x6a5   : > { %10029 = vmatprep.subr.msk.bf16.mxu0 %vm12654_vm8, %v10028_v24  ;;  %v11066_v54 = vunpack.i.h.bf16 %v11064_v37  ;;  %v11065_v7 = vunpack.i.l.bf16 %v11064_v37  ;;  %v11080_v2 = vunpack.i.l.bf16 %v11079_v51  ;;  %v11081_v50 = vunpack.i.h.bf16 %v11079_v51 }
 0x6a6   : > { %9995 = vmatprep.subr.msk.bf16.mxu1 %vm13050_vm11, %v9994_v18 }
 0x6a7   : > { %v5082_v57 = vsel %vm1198_vm14, %v11065_v7, %v11055_v27  ;;  %v5084_v39 = vsel %vm1198_vm14, %v11066_v54, %v11060_v53  ;;  %9960 = vmatmul.mubr.msk.bf16.gmra.mxu0 %vm2124_vm6, %v11832_v12  ;;  %v5316_v34 = vsel %vm1349_vm1, %v11080_v2, %v11070_v58  ;;  %v11840_v58 = vld [vmem:[%s16728_s5 + $0xc8] sm:$0xff]  }
 0x6a8   : > { %v9997_v0 = vpack.c.bf16 %v5084_v39, %v5082_v57  ;;  %10032 = vmatpush1.bf16.msk.msra.mxu0 %vm12680_vm4, %v10031_v5  ;;  %v11074_v47 = vpop.permute.xlu0 %11073  ;;  %v14468_v1 = vpop.permute.xlu1 %5553  ;;  %4997 = vmatprep.mubr.bf16.mxu0 %v16925_v3 }
 0x6a9   : > { %v11076_v46 = vunpack.i.h.bf16 %v11074_v47  ;;  %v11075_v16 = vunpack.i.l.bf16 %v11074_v47 }
 0x6aa   : > { %9998 = vmatpush1.bf16.msk.msra.mxu1 %vm13082_vm12, %v9997_v0 }
 0x6ab   : > { %v5318_v4 = vsel %vm1349_vm1, %v11081_v50, %v11075_v16  ;;  %v5319_v61 = vsel %vm1349_vm1, %v11075_v16, %v11076_v46 }
 0x6ac   : > { %v10037_v41 = vpack.c.bf16 %v5318_v4, %v5316_v34  ;;  %v11084_v60 = vpop.permute.xlu0 %11083  ;;  %v11089_v21 = vpop.permute.xlu1 %11088  ;;  %v10034_v29 = vpack.c.bf16 %v5319_v61, %v5317_v44 }
 0x6ad   : > { %v11086_v26 = vunpack.i.h.bf16 %v11084_v60  ;;  %v11085_v36 = vunpack.i.l.bf16 %v11084_v60  ;;  %v11091_v6 = vunpack.i.h.bf16 %v11089_v21  ;;  %v11090_v38 = vunpack.i.l.bf16 %v11089_v21  ;;  %9999 = vmatmul.mubr.msk.bf16.vlgmr.msra.gmra.mxu1 %vm2124_vm6, %v11833_v40 }
 0x6ae   : > { %10035 = vmatprep.subr.msk.bf16.mxu0 %vm12654_vm8, %v10034_v29  ;;  %5221 = vmatprep.mubr.bf16.mxu1 %v16925_v3 }
 0x6af   : > { %v5733_v13 = vsel %vm1645_vm3, %v11085_v36, %v11086_v26  ;;  %v5735_v59 = vsel %vm1645_vm3, %v11090_v38, %v11091_v6  ;;  %9961 = vmatmul.mubr.msk.bf16.gmra.mxu0 %vm2124_vm6, %v11834_v28 }
 0x6b0   : > { %10038 = vmatpush1.bf16.msk.msra.mxu0 %vm12680_vm4, %v10037_v41  ;;  %v14492_v17 = vpop.permute.xlu0 %5549  ;;  %v11094_v9 = vpop.permute.xlu1 %11093  ;;  %v10072_v23 = vpack.c.bf16 %v5735_v59, %v5733_v13  ;;  %5007 = vmatprep.mubr.bf16.mxu0 %v16925_v3 }
 0x6b1   : > { %v11096_v22 = vunpack.i.h.bf16 %v11094_v9  ;;  %v11095_v33 = vunpack.i.l.bf16 %v11094_v9 }
 0x6b2   : > { %10073 = vmatprep.subr.msk.bf16.mxu0 %vm13050_vm11, %v10072_v23 }
 0x6b3   : > { %v5732_v63 = vsel %vm1645_vm3, %v11095_v33, %v11085_v36  ;;  %v5734_v8 = vsel %vm1645_vm3, %v11096_v22, %v11090_v38 }
 0x6b4   : > { %v14503_v11 = vpop.permute.xlu0 %5545  ;;  %v14505_v14 = vpop.permute.xlu1 %5547  ;;  %v10075_v51 = vpack.c.bf16 %v5734_v8, %v5732_v63 }
 0x6b5   : > { %10000 = vmatmul.mubr.msk.bf16.gmra.mxu1 %vm2124_vm6, %v11835_v35  ;;  %v5560_v29 = vsel %vm1529_vm2, %v14503_v11, %v14505_v14 }
 0x6b6   : > { %5231 = vmatprep.mubr.bf16.mxu1 %v16925_v3 }
 0x6b7   : > { %9962 = vmatmul.mubr.msk.bf16.gmra.mxu0 %vm2124_vm6, %v11836_v20 }
 0x6b8   : > { %v11099_v53 = vpop.permute.xlu0 %11098  ;;  %v11104_v10 = vpop.permute.xlu1 %11103  ;;  %5445 = vmatprep.mubr.bf16.mxu0 %v16925_v3 }
 0x6b9   : > { %v11101_v31 = vunpack.i.h.bf16 %v11099_v53  ;;  %v11100_v32 = vunpack.i.l.bf16 %v11099_v53  ;;  %v11106_v25 = vunpack.i.h.bf16 %v11104_v10  ;;  %v11105_v55 = vunpack.i.l.bf16 %v11104_v10 }
 0x6bb   : > { %v5729_v27 = vsel %vm1645_vm3, %v11100_v32, %v11101_v31  ;;  %v5731_v24 = vsel %vm1645_vm3, %v11105_v55, %v11106_v25 }
 0x6bc   : > { %v5544_v62 = vpop.permute.xlu0 %5543  ;;  %v11109_v48 = vpop.permute.xlu1 %11108  ;;  %v10078_v37 = vpack.c.bf16 %v5731_v24, %v5729_v27 }
 0x6bd   : > { %v11111_v52 = vunpack.i.h.bf16 %v11109_v48  ;;  %v11110_v12 = vunpack.i.l.bf16 %v11109_v48  ;;  %10001 = vmatmul.mubr.msk.bf16.gmra.mxu1 %vm2124_vm6, %v11837_v43  ;;  %v5559_v38 = vsel %vm1529_vm2, %v5544_v62, %v14503_v11  ;;  %v11842_v11 = vld [vmem:[%s16728_s5 + $0xd8] sm:$0xff]   ;;  %v11844_v62 = vld [vmem:[%s16728_s5 + $0x100] sm:$0xff]   ;;  %v11845_v48 = vld [vmem:[%s16728_s5 + $0xe8] sm:$0xff]  }
 0x6be   : > { %5241 = vmatprep.mubr.bf16.mxu1 %v16925_v3 }
 0x6bf   : > { %v5728_v18 = vsel %vm1645_vm3, %v11110_v12, %v11100_v32  ;;  %v5730_v49 = vsel %vm1645_vm3, %v11111_v52, %v11105_v55  ;;  %10039 = vmatmul.mubr.msk.bf16.vlgmr.msra.gmra.mxu0 %vm2124_vm6, %v11838_v15  ;;  %v11843_v15 = vld [vmem:[%s16728_s5 + $0xe0] sm:$0xff]   ;;  %v11846_v52 = vld [vmem:[%s16728_s5 + $0x108] sm:$0xff]   ;;  %v11847_v12 = vld [vmem:[%s16728_s5 + $0xf0] sm:$0xff]  }
 0x6c0   : > { %v10081_v54 = vpack.c.bf16 %v5730_v49, %v5728_v18  ;;  %10076 = vmatpush1.bf16.msk.msra.mxu0 %vm13082_vm12, %v10075_v51  ;;  %v5540_v7 = vpop.permute.xlu0 %5539  ;;  %v5542_v5 = vpop.permute.xlu1 %5541  ;;  %5455 = vmatprep.mubr.bf16.mxu0 %v16925_v3  ;;  %v11849_v51 = vld [vmem:[%s16728_s5 + $0xf8] sm:$0xff]  }
 0x6c1   : > { %10079 = vmatprep.subr.msk.bf16.mxu0 %vm13050_vm11, %v10078_v37  ;;  %v5558_v13 = vsel %vm1529_vm2, %v5540_v7, %v5542_v5  ;;  %v11848_v37 = vld [vmem:[%s16728_s5 + $0x110] sm:$0xff]   ;;  %v11850_v18 = vld [vmem:[%s16728_s5 + $0x118] sm:$0xff]   ;;  %v4333_v49 = vpop.f32.mrf.mxu1 }
 0x6c4   : > { %10082 = vmatpush1.bf16.msk.msra.mxu0 %vm13082_vm12, %v10081_v54  ;;  %v11114_v57 = vpop.permute.xlu0 %11113  ;;  %v11119_v39 = vpop.permute.xlu1 %11118 }
 0x6c5   : > { %v11116_v2 = vunpack.i.h.bf16 %v11114_v57  ;;  %v11115_v0 = vunpack.i.l.bf16 %v11114_v57  ;;  %v11121_v47 = vunpack.i.h.bf16 %v11119_v39  ;;  %v11120_v50 = vunpack.i.l.bf16 %v11119_v39  ;;  %10002 = vmatmul.mubr.msk.bf16.gmra.mxu1 %vm2124_vm6, %v11839_v19  ;;  %v4335_v54 = vpop.f32.mrf.mxu1 }
 0x6c6   : > { %5615 = vmatprep.mubr.bf16.mxu1 %v16925_v3 }
 0x6c7   : > { %v5725_v46 = vsel %vm1645_vm3, %v11115_v0, %v11116_v2  ;;  %v5727_v16 = vsel %vm1645_vm3, %v11120_v50, %v11121_v47  ;;  %10040 = vmatmul.mubr.msk.bf16.gmra.mxu0 %vm2124_vm6, %v11840_v58 }
 0x6c8   : > { %v5552_v40 = vpop.permute.xlu0 %5551  ;;  %v11124_v44 = vpop.permute.xlu1 %11123  ;;  %v10084_v34 = vpack.c.bf16 %v5727_v16, %v5725_v46  ;;  %5465 = vmatprep.mubr.bf16.mxu0 %v16925_v3 }
 0x6c9   : > { %v11126_v4 = vunpack.i.h.bf16 %v11124_v44  ;;  %v11125_v61 = vunpack.i.l.bf16 %v11124_v44  ;;  %v5562_v28 = vsel %vm1529_vm2, %v5552_v40, %v14468_v1  ;;  %v5561_v41 = vsel %vm1529_vm2, %v14492_v17, %v5552_v40  ;;  %v11841_v1 = vld [vmem:[%s16728_s5 + $0xd0] sm:$0xff]  }
 0x6ca   : > { %5591 = vmatprep.subr.bf16.mxu1 %v5562_v28  ;;  %10085 = vmatprep.subr.msk.bf16.mxu0 %vm13050_vm11, %v10084_v34 }
 0x6cb   : > { %v5724_v60 = vsel %vm1645_vm3, %v11125_v61, %v11115_v0  ;;  %v5726_v21 = vsel %vm1645_vm3, %v11126_v4, %v11120_v50  ;;  %5592 = vmatpush1.bf16.msra.mxu1 %v5561_v41 }
 0x6cc   : > { %v10087_v26 = vpack.c.bf16 %v5726_v21, %v5724_v60  ;;  %v5538_v36 = vpop.permute.xlu0 %5537  ;;  %v5536_v6 = vpop.permute.xlu1 %5535  ;;  %5593 = vmatprep.subr.bf16.mxu1 %v5560_v29 }
 0x6cd   : > { %v5557_v9 = vsel %vm1529_vm2, %v5538_v36, %v5540_v7  ;;  %v4337_v7 = vpop.f32.mrf.mxu1 }
 0x6ce   : > { %10088 = vmatpush1.bf16.msk.msra.mxu0 %vm13082_vm12, %v10087_v26 }
 0x6cf   : > { %10041 = vmatmul.mubr.msk.bf16.gmra.mxu0 %vm2124_vm6, %v11841_v1  ;;  %5594 = vmatpush1.bf16.msra.mxu1 %v5559_v38  ;;  %v14622_v5 = vpop.f32.mrf.mxu1 }
 0x6d0   : > { %v5534_v59 = vpop.permute.xlu0 %5533  ;;  %v11134_v17 = vpop.permute.xlu1 %11133  ;;  %5595 = vmatprep.subr.bf16.mxu1 %v5558_v13  ;;  %5475 = vmatprep.mubr.bf16.mxu0 %v16925_v3 }
 0x6d1   : > { %v11136_v23 = vunpack.i.h.bf16 %v11134_v17  ;;  %v11135_v35 = vunpack.i.l.bf16 %v11134_v17  ;;  %v5556_v20 = vsel %vm1529_vm2, %v5534_v59, %v5536_v6  ;;  %v4343_v19 = vpop.f32.mrf.mxu1 }
 0x6d3   : > { %5596 = vmatpush1.bf16.msra.mxu1 %v5557_v9  ;;  %v5723_v32 = vsel %vm1645_vm3, %v11135_v35, %v11136_v23  ;;  %v4345_v58 = vpop.f32.mrf.mxu1 }
 0x6d4   : > { %v11129_v14 = vpop.permute.xlu0 %11128  ;;  %v11139_v22 = vpop.permute.xlu1 %11138  ;;  %5597 = vmatprep.subr.bf16.mxu1 %v5556_v20 }
 0x6d5   : > { %v11131_v33 = vunpack.i.h.bf16 %v11129_v14  ;;  %v11130_v53 = vunpack.i.l.bf16 %v11129_v14  ;;  %v11141_v10 = vunpack.i.h.bf16 %v11139_v22  ;;  %v11140_v31 = vunpack.i.l.bf16 %v11139_v22  ;;  %v4347_v57 = vpop.f32.mrf.mxu1 }
 0x6d7   : > { %v5721_v25 = vsel %vm1645_vm3, %v11130_v53, %v11131_v33  ;;  %v5720_v55 = vsel %vm1645_vm3, %v11140_v31, %v11130_v53  ;;  %v5722_v43 = vsel %vm1645_vm3, %v11141_v10, %v11135_v35  ;;  %10042 = vmatmul.mubr.msk.bf16.gmra.mxu0 %vm2124_vm6, %v11842_v11  ;;  %v14624_v39 = vpop.f32.mrf.mxu1 }
 0x6d8   : > { %v10093_v63 = vpack.c.bf16 %v5722_v43, %v5720_v55  ;;  %v5532_v8 = vpop.permute.xlu0 %5531  ;;  %v10090_v27 = vpack.c.bf16 %v5723_v32, %v5721_v25  ;;  %5849 = vmatprep.mubr.bf16.mxu0 %v16925_v3 }
 0x6d9   : > { %v5555_v24 = vsel %vm1529_vm2, %v5532_v8, %v5534_v59  ;;  %v4353_v2 = vpop.f32.mrf.mxu1 }
 0x6da   : > { %5598 = vmatpush1.bf16.msra.mxu1 %v5555_v24  ;;  %10091 = vmatprep.subr.msk.bf16.mxu0 %vm13050_vm11, %v10090_v27 }
 0x6db   : > { %10094 = vmatpush1.bf16.msk.msra.mxu0 %vm13082_vm12, %v10093_v63  ;;  %v4355_v0 = vpop.f32.mrf.mxu1 }
 0x6dd   : > { %10055 = vmatmul.mubr.msk.bf16.vlgmr.msra.gmra.mxu1 %vm2124_vm6, %v11843_v15  ;;  %v4357_v46 = vpop.f32.mrf.mxu1 }
 0x6de   : > { %5625 = vmatprep.mubr.bf16.mxu1 %v16925_v3 }
 0x6df   : > { %10095 = vmatmul.mubr.msk.bf16.vlgmr.msra.gmra.mxu0 %vm2124_vm6, %v11844_v62  ;;  %v14628_v44 = vpop.f32.mrf.mxu1 }
 0x6e0   : > { %5859 = vmatprep.mubr.bf16.mxu0 %v16925_v3 }
 0x6e1   : > { %v4363_v61 = vpop.f32.mrf.mxu1 }
 0x6e3   : > { %v4365_v60 = vpop.f32.mrf.mxu1 }
 0x6e5   : > { %10056 = vmatmul.mubr.msk.bf16.gmra.mxu1 %vm2124_vm6, %v11845_v48  ;;  %v4367_v1 = vpop.f32.mrf.mxu1 }
 0x6e6   : > { %5635 = vmatprep.mubr.bf16.mxu1 %v16925_v3 }
 0x6e7   : > { %10096 = vmatmul.mubr.msk.bf16.gmra.mxu0 %vm2124_vm6, %v11846_v52  ;;  %v14634_v6 = vpop.f32.mrf.mxu1 }
 0x6e8   : > { %5869 = vmatprep.mubr.bf16.mxu0 %v16925_v3 }
 0x6ed   : > { %10057 = vmatmul.mubr.msk.bf16.gmra.mxu1 %vm2124_vm6, %v11847_v12 }
 0x6ee   : > { %5645 = vmatprep.mubr.bf16.mxu1 %v16925_v3 }
 0x6ef   : > { %10097 = vmatmul.mubr.msk.bf16.gmra.mxu0 %vm2124_vm6, %v11848_v37 }
 0x6f0   : > { %5879 = vmatprep.mubr.bf16.mxu0 %v16925_v3 }
 0x6f5   : > { %10058 = vmatmul.mubr.msk.bf16.gmra.mxu1 %vm2124_vm6, %v11849_v51 }
 0x6f6   : > { %6283 = vmatprep.mubr.bf16.mxu1 %v16925_v3 }
 0x6f7   : > { %10098 = vmatmul.mubr.msk.bf16.gmra.mxu0 %vm2124_vm6, %v11850_v18 }
 0x6f8   : > { %6388 = vmatprep.mubr.bf16.mxu0 %v16925_v3 }
 0x71f   : > { %v4228_v47 = vpop.f32.mrf.mxu0 }
 0x720   : > { %v4334_v11 = vadd.f32 %v4333_v49, %v4228_v47 }
 0x721   : > { %v4230_v50 = vpop.f32.mrf.mxu0 }
 0x722   : > { %v4336_v33 = vadd.f32 %v4335_v54, %v4230_v50 }
 0x723   : > { %v4232_v16 = vpop.f32.mrf.mxu0 }
 0x724   : > { %v4338_v31 = vadd.f32 %v4337_v7, %v4232_v16 }
 0x725   : > { %v14626_v40 = vpop.f32.mrf.mxu0 }
 0x727   : > { %v4238_v34 = vpop.f32.mrf.mxu0 }
 0x728   : > { %v4344_v24 = vadd.f32 %v4343_v19, %v4238_v34 }
 0x729   : > { %v4240_v4 = vpop.f32.mrf.mxu0 }
 0x72a   : > { %v4346_v52 = vadd.f32 %v4345_v58, %v4240_v4 }
 0x72b   : > { %v4242_v28 = vpop.f32.mrf.mxu0 }
 0x72c   : > { %v4348_v51 = vadd.f32 %v4347_v57, %v4242_v28 }
 0x72d   : > { %v14630_v41 = vpop.f32.mrf.mxu0 }
 0x72f   : > { %v4248_v21 = vpop.f32.mrf.mxu0 }
 0x730   : > { %v4354_v50 = vadd.f32 %v4353_v2, %v4248_v21 }
 0x731   : > { %v4250_v29 = vpop.f32.mrf.mxu0 }
 0x732   : > { %v4356_v34 = vadd.f32 %v4355_v0, %v4250_v29 }
 0x733   : > { %v4252_v26 = vpop.f32.mrf.mxu0 }
 0x734   : > { %v4358_v4 = vadd.f32 %v4357_v46, %v4252_v26 }
 0x735   : > { %v14632_v36 = vpop.f32.mrf.mxu0 }
 0x737   : > { %v4258_v38 = vpop.f32.mrf.mxu0  ;;  %v4809_v13 = vpop.f32.mrf.mxu1 }
 0x739   : > { %v4260_v59 = vpop.f32.mrf.mxu0  ;;  %v4811_v17 = vpop.f32.mrf.mxu1 }
 0x73b   : > { %v4262_v9 = vpop.f32.mrf.mxu0  ;;  %v4813_v23 = vpop.f32.mrf.mxu1 }
 0x73c   : > { %v4368_v29 = vadd.f32 %v4367_v1, %v4262_v9 }
 0x73d   : > { %v14636_v35 = vpop.f32.mrf.mxu0  ;;  %v14638_v20 = vpop.f32.mrf.mxu1 }
 0x73e   : > { %16928 = vst [vmem:[#allocation41_spill] sm:$0xff] %v14638_v20 }
 0x73f   : > { %v4575_v14 = vpop.f32.mrf.mxu0  ;;  %v14640_v22 = vpop.f32.mrf.mxu1 }
 0x740   : > { %v4614_v53 = vadd.f32 %v4575_v14, %v4334_v11 }
 0x741   : > { %v4577_v10 = vpop.f32.mrf.mxu0  ;;  %v14642_v43 = vpop.f32.mrf.mxu1 }
 0x742   : > { %v4615_v32 = vadd.f32 %v4577_v10, %v4336_v33  ;;  %v4848_v25 = vadd.f32 %v4809_v13, %v4614_v53  ;;  %v4364_v33 = vadd.f32 %v4363_v61, %v4258_v38  ;;  %v4366_v53 = vadd.f32 %v4365_v60, %v4260_v59 }
 0x743   : > { %v4579_v55 = vpop.f32.mrf.mxu0  ;;  %v4823_v48 = vpop.f32.mrf.mxu1 }
 0x744   : > { %v4616_v63 = vadd.f32 %v4579_v55, %v4338_v31  ;;  %v4849_v8 = vadd.f32 %v4811_v17, %v4615_v32 }
 0x745   : > { %v14644_v27 = vpop.f32.mrf.mxu0  ;;  %v14650_v54 = vpop.f32.mrf.mxu1 }
 0x746   : > { %v4850_v15 = vadd.f32 %v4813_v23, %v4616_v63 }
 0x747   : > { %v4585_v62 = vpop.f32.mrf.mxu0  ;;  %v14654_v19 = vpop.f32.mrf.mxu1 }
 0x748   : > { %v14646_v12 = vadd.f32 %v4585_v62, %v4344_v24 }
 0x749   : > { %v4587_v37 = vpop.f32.mrf.mxu0  ;;  %v14660_v28 = vpop.f32.mrf.mxu1 }
 0x74a   : > { %v14648_v18 = vadd.f32 %v4587_v37, %v4346_v52 }
 0x74b   : > { %v4589_v49 = vpop.f32.mrf.mxu0  ;;  %v14666_v2 = vpop.f32.mrf.mxu1 }
 0x74c   : > { %v4620_v7 = vadd.f32 %v4589_v49, %v4348_v51 }
 0x74d   : > { %v14652_v47 = vpop.f32.mrf.mxu0  ;;  %v14672_v46 = vpop.f32.mrf.mxu1 }
 0x74e   : > { %v4854_v16 = vadd.f32 %v4823_v48, %v4620_v7 }
 0x74f   : > { %v4595_v13 = vpop.f32.mrf.mxu0  ;;  %v14678_v63 = vpop.f32.mrf.mxu1 }
 0x750   : > { %v14656_v17 = vadd.f32 %v4595_v13, %v4354_v50 }
 0x751   : > { %v4597_v58 = vpop.f32.mrf.mxu0  ;;  %v14680_v60 = vpop.f32.mrf.mxu1 }
 0x752   : > { %v14658_v23 = vadd.f32 %v4597_v58, %v4356_v34 }
 0x753   : > { %v4599_v57 = vpop.f32.mrf.mxu0  ;;  %v14684_v9 = vpop.f32.mrf.mxu1 }
 0x754   : > { %v14662_v11 = vadd.f32 %v4599_v57, %v4358_v4 }
 0x755   : > { %v14664_v14 = vpop.f32.mrf.mxu0  ;;  %v14686_v51 = vpop.f32.mrf.mxu1 }
 0x757   : > { %v4605_v21 = vpop.f32.mrf.mxu0 }
 0x758   : > { %v14668_v10 = vadd.f32 %v4605_v21, %v4364_v33 }
 0x759   : > { %v4607_v0 = vpop.f32.mrf.mxu0 }
 0x75a   : > { %v14670_v31 = vadd.f32 %v4607_v0, %v4366_v53 }
 0x75b   : > { %v4609_v26 = vpop.f32.mrf.mxu0 }
 0x75c   : > { %v14674_v32 = vadd.f32 %v4609_v26, %v4368_v29 }
 0x75d   : > { %v14676_v55 = vpop.f32.mrf.mxu0 }
 0x75f   : > { %v4979_v61 = vpop.f32.mrf.mxu0 }
 0x760   : > { %v5018_v38 = vadd.f32 %v4979_v61, %v4848_v25 }
 0x761   : > { %v4981_v24 = vpop.f32.mrf.mxu0 }
 0x762   : > { %v5019_v62 = vadd.f32 %v4981_v24, %v4849_v8 }
 0x763   : > { %v4983_v59 = vpop.f32.mrf.mxu0 }
 0x764   : > { %v5020_v48 = vadd.f32 %v4983_v59, %v4850_v15 }
 0x765   : > { %v14682_v1 = vpop.f32.mrf.mxu0 }
 0x766   : > { %16929 = vst [vmem:[#allocation34_spill] sm:$0xff] %v14682_v1 }
 0x767   : > { %v4989_v52 = vpop.f32.mrf.mxu0 }
 0x769   : > { %v4991_v37 = vpop.f32.mrf.mxu0 }
 0x76b   : > { %v4993_v49 = vpop.f32.mrf.mxu0 }
 0x76c   : > { %v14688_v7 = vadd.f32 %v4993_v49, %v4854_v16 }
 0x76d   : > { %v14690_v50 = vpop.f32.mrf.mxu0  ;;  %v5213_v25 = vpop.f32.mrf.mxu1 }
 0x76e   : > { %v5252_v13 = vadd.f32 %v5213_v25, %v5018_v38 }
 0x76f   : > { %v14692_v8 = vpop.f32.mrf.mxu0  ;;  %v5215_v34 = vpop.f32.mrf.mxu1 }
 0x770   : > { %v5253_v58 = vadd.f32 %v5215_v34, %v5019_v62 }
 0x771   : > { %v14694_v15 = vpop.f32.mrf.mxu0  ;;  %v5217_v4 = vpop.f32.mrf.mxu1 }
 0x772   : > { %v5254_v57 = vadd.f32 %v5217_v4, %v5020_v48 }
 0x773   : > { %v14696_v33 = vpop.f32.mrf.mxu0  ;;  %v14698_v21 = vpop.f32.mrf.mxu1 }
 0x774   : > { %16930 = vst [vmem:[#allocation6_spill] sm:$0xff] %v14698_v21 }
 0x775   : > { %v14700_v53 = vpop.f32.mrf.mxu0  ;;  %v5223_v16 = vpop.f32.mrf.mxu1 }
 0x777   : > { %v14702_v0 = vpop.f32.mrf.mxu0  ;;  %v5225_v29 = vpop.f32.mrf.mxu1 }
 0x779   : > { %v14704_v26 = vpop.f32.mrf.mxu0  ;;  %v14706_v61 = vpop.f32.mrf.mxu1 }
 0x77a   : > { %16931 = vst [vmem:[#allocation7_spill] sm:$0xff] %v14706_v61 }
 0x77b   : > { %v14708_v38 = vpop.f32.mrf.mxu0  ;;  %v14710_v24 = vpop.f32.mrf.mxu1 }
 0x77c   : > { %16932 = vst [vmem:[#allocation9_spill] sm:$0xff] %v14708_v38  ;;  %16933 = vst [vmem:[#allocation8_spill] sm:$0xff] %v14710_v24 }
 0x77d   : > { %v14712_v62 = vpop.f32.mrf.mxu0  ;;  %v14714_v59 = vpop.f32.mrf.mxu1 }
 0x77e   : > { %16934 = vst [vmem:[#allocation17_spill] sm:$0xff] %v14712_v62  ;;  %v14754_v62 = vpop.permute.xlu0 %5946 }
 0x77f   : > { %v5447_v48 = vpop.f32.mrf.mxu0  ;;  %v14720_v4 = vpop.f32.mrf.mxu1  ;;  %16949 = vst [vmem:[#allocation31_spill] sm:$0xff] %v14754_v62 }
 0x780   : > { %v14716_v49 = vadd.f32 %v5447_v48, %v5252_v13 }
 0x781   : > { %v5449_v25 = vpop.f32.mrf.mxu0  ;;  %v14726_v42 = vpop.f32.mrf.mxu1 }
 0x782   : > { %16935 = vst [vmem:[#allocation38_spill] sm:$0xff] %v14716_v49  ;;  %v14718_v34 = vadd.f32 %v5449_v25, %v5253_v58  ;;  %v14772_v62 = vpop.permute.xlu0 %5936 }
 0x783   : > { %v5451_v45 = vpop.f32.mrf.mxu0  ;;  %v14728_v1 = vpop.f32.mrf.mxu1 }
 0x784   : > { %16936 = vst [vmem:[#allocation11_spill] sm:$0xff] %v14718_v34  ;;  %v14722_v56 = vadd.f32 %v5451_v45, %v5254_v57 }
 0x785   : > { %v14724_v3 = vpop.f32.mrf.mxu0  ;;  %v14734_v48 = vpop.f32.mrf.mxu1 }
 0x786   : > { %16937 = vst [vmem:[#allocation18_spill] sm:$0xff] %v14722_v56  ;;  %16938 = vst [vmem:[#allocation26_spill] sm:$0xff] %v14724_v3 }
 0x787   : > { %v5457_v30 = vpop.f32.mrf.mxu0  ;;  %16941 = vst [vmem:[#allocation36_spill] sm:$0xff] %v14734_v48  ;;  %v14738_v34 = vpop.f32.mrf.mxu1 }
 0x788   : > { %16942 = vst [vmem:[#allocation40_spill] sm:$0xff] %v14738_v34  ;;  %v4852_v34 = vadd.f32 %v14640_v22, %v14646_v12 }
 0x789   : > { %v5459_v21 = vpop.f32.mrf.mxu0  ;;  %v14744_v56 = vpop.f32.mrf.mxu1 }
 0x78a   : > { %16944 = vst [vmem:[#allocation20_spill] sm:$0xff] %v14744_v56 }
 0x78b   : > { %v14730_v20 = vpop.f32.mrf.mxu0 }
 0x78c   : > { %16939 = vst [vmem:[#allocation39_spill] sm:$0xff] %v14730_v20  ;;  %v14750_v20 = vpop.f32.mrf.mxu1 }
 0x78d   : > { %v14732_v13 = vpop.f32.mrf.mxu0  ;;  %16947 = vst [vmem:[#allocation15_spill] sm:$0xff] %v14750_v20 }
 0x78e   : > { %16940 = vst [vmem:[#allocation12_spill] sm:$0xff] %v14732_v13 }
 0x78f   : > { %v5467_v58 = vpop.f32.mrf.mxu0 }
 0x791   : > { %v14736_v25 = vpop.f32.mrf.mxu0 }
 0x793   : > { %v14740_v45 = vpop.f32.mrf.mxu0 }
 0x795   : > { %v14742_v57 = vpop.f32.mrf.mxu0 }
 0x796   : > { %16943 = vst [vmem:[#allocation10_spill] sm:$0xff] %v14742_v57 }
 0x797   : > { %v14746_v3 = vpop.f32.mrf.mxu0 }
 0x798   : > { %16945 = vst [vmem:[#allocation30_spill] sm:$0xff] %v14746_v3  ;;  %v5022_v3 = vadd.f32 %v4989_v52, %v4852_v34 }
 0x799   : > { %v14748_v49 = vpop.f32.mrf.mxu0 }
 0x79a   : > { %16946 = vst [vmem:[#allocation29_spill] sm:$0xff] %v14748_v49  ;;  %v4853_v49 = vadd.f32 %v14642_v43, %v14648_v18  ;;  %v5256_v48 = vadd.f32 %v5223_v16, %v5022_v3  ;;  %v4856_v18 = vadd.f32 %v14654_v19, %v14656_v17  ;;  %v4350_v3 = vadd.f32 %v14624_v39, %v14630_v41 }
 0x79b   : > { %v14752_v13 = vpop.f32.mrf.mxu0  ;;  %v4370_v19 = vadd.f32 %v14634_v6, %v14636_v35  ;;  %v4858_v39 = vadd.f32 %v14666_v2, %v14662_v11 }
 0x79c   : > { %16948 = vst [vmem:[#allocation25_spill] sm:$0xff] %v14752_v13  ;;  %v5490_v12 = vadd.f32 %v5457_v30, %v5256_v48  ;;  %v4857_v30 = vadd.f32 %v14660_v28, %v14658_v23  ;;  %v4621_v17 = vadd.f32 %v14652_v47, %v4350_v3 }
 0x79d   : > { %v14756_v24 = vpop.f32.mrf.mxu0  ;;  %v14758_v38 = vpop.f32.mrf.mxu1  ;;  %v4629_v6 = vadd.f32 %v14676_v55, %v4370_v19  ;;  %v5028_v35 = vadd.f32 %v14696_v33, %v4858_v39  ;;  %v16958_v19 = vld [vmem:[#allocation8_spill] sm:$0xff] }
 0x79e   : > { %16950 = vst [vmem:[#allocation21_spill] sm:$0xff] %v14756_v24  ;;  %16951 = vst [vmem:[#allocation35_spill] sm:$0xff] %v14758_v38  ;;  %v5023_v24 = vadd.f32 %v4991_v37, %v4853_v49 }
 0x79f   : > { %v14762_v57 = vpop.f32.mrf.mxu0  ;;  %v14764_v56 = vpop.f32.mrf.mxu1 }
 0x7a0   : > { %16952 = vst [vmem:[#allocation19_spill] sm:$0xff] %v14762_v57  ;;  %16953 = vst [vmem:[#allocation23_spill] sm:$0xff] %v14764_v56  ;;  %v5257_v22 = vadd.f32 %v5225_v29, %v5023_v24  ;;  %v4360_v57 = vadd.f32 %v14628_v44, %v14632_v36  ;;  %v5927_v29 = vpop.permute.xlu0 %5926  ;;  %v5026_v44 = vadd.f32 %v14692_v8, %v4856_v18 }
 0x7a1   : > { %v14768_v20 = vpop.f32.mrf.mxu0  ;;  %v14770_v13 = vpop.f32.mrf.mxu1  ;;  %v4340_v8 = vadd.f32 %v14622_v5, %v14626_v40  ;;  %v4855_v5 = vadd.f32 %v14650_v54, %v4621_v17  ;;  %v4860_v40 = vadd.f32 %v14678_v63, %v14668_v10  ;;  %v4862_v54 = vadd.f32 %v14684_v9, %v14674_v32  ;;  %v16954_v32 = vld [vmem:[#allocation7_spill] sm:$0xff]  ;;  %v16955_v9 = vld [vmem:[#allocation36_spill] sm:$0xff] }
 0x7a2   : > { %v5491_v52 = vadd.f32 %v5459_v21, %v5257_v22  ;;  %v4625_v37 = vadd.f32 %v14664_v14, %v4360_v57  ;;  %v5027_v21 = vadd.f32 %v14694_v15, %v4857_v30  ;;  %v5260_v48 = vadd.f32 %v14714_v59, %v5026_v44 }
 0x7a3   : > { %v14774_v38 = vpop.f32.mrf.mxu0  ;;  %v14776_v61 = vpop.f32.mrf.mxu1  ;;  %v4863_v10 = vadd.f32 %v14686_v51, %v4629_v6  ;;  %v5030_v63 = vadd.f32 %v14702_v0, %v4860_v40  ;;  %v16961_v6 = vld [vmem:[#allocation17_spill] sm:$0xff] }
 0x7a4   : > { %v4859_v57 = vadd.f32 %v14672_v46, %v4625_v37  ;;  %v5261_v2 = vadd.f32 %v14720_v4, %v5027_v21  ;;  %v5494_v15 = vadd.f32 %v5467_v58, %v5260_v48  ;;  %v5262_v4 = vadd.f32 %v14726_v42, %v5028_v35 }
 0x7a5   : > { %v14780_v56 = vpop.f32.mrf.mxu0  ;;  %v5627_v43 = vpop.f32.mrf.mxu1  ;;  %v5264_v51 = vadd.f32 %v16955_v9, %v5030_v63  ;;  %v5033_v35 = vadd.f32 %v16961_v6, %v4863_v10  ;;  %v16969_v9 = vld [vmem:[#allocation21_spill] sm:$0xff] }
 0x7a6   : > { %v5660_v34 = vadd.f32 %v5627_v43, %v5490_v12  ;;  %v14810_v12 = vadd.f32 %v14644_v27, %v4340_v8  ;;  %v5029_v46 = vadd.f32 %v14700_v53, %v4859_v57  ;;  %v14818_v43 = vpop.permute.xlu1 %5951  ;;  %v5495_v58 = vadd.f32 %v14736_v25, %v5261_v2  ;;  %v16962_v2 = vld [vmem:[#allocation20_spill] sm:$0xff] }
 0x7a7   : > { %v5861_v16 = vpop.f32.mrf.mxu0  ;;  %v5629_v49 = vpop.f32.mrf.mxu1  ;;  %v4861_v27 = vadd.f32 %v14680_v60, %v14670_v31  ;;  %v5496_v25 = vadd.f32 %v14740_v45, %v5262_v4  ;;  %v5258_v60 = vadd.f32 %v16954_v32, %v14688_v7  ;;  %v16968_v32 = vld [vmem:[#allocation41_spill] sm:$0xff] }
 0x7a8   : > { %v5894_v36 = vadd.f32 %v5861_v16, %v5660_v34  ;;  %v5661_v24 = vadd.f32 %v5629_v49, %v5491_v52  ;;  %v5263_v42 = vadd.f32 %v14728_v1, %v5029_v46  ;;  %v5025_v16 = vadd.f32 %v14690_v50, %v4855_v5  ;;  %v16959_v50 = vld [vmem:[#allocation40_spill] sm:$0xff]  ;;  %v16964_v5 = vld [vmem:[#allocation29_spill] sm:$0xff] }
 0x7a9   : > { %v5863_v41 = vpop.f32.mrf.mxu0  ;;  %v14795_v14 = vpop.f32.mrf.mxu1  ;;  %v5031_v31 = vadd.f32 %v14704_v26, %v4861_v27  ;;  %v16960_v26 = vld [vmem:[#allocation30_spill] sm:$0xff]  ;;  %v16965_v27 = vld [vmem:[#allocation15_spill] sm:$0xff] }
 0x7aa   : > { %v5958_v23 = vadd.f32 %v5927_v29, %v5894_v36  ;;  %v5895_v28 = vadd.f32 %v5863_v41, %v5661_v24  ;;  %v16957_v36 = vld [vmem:[#allocation9_spill] sm:$0xff]  ;;  %v5259_v17 = vadd.f32 %v16958_v19, %v5025_v16  ;;  %v5498_v41 = vadd.f32 %v16960_v26, %v5264_v51  ;;  %v5942_v48 = vpop.permute.xlu1 %5941  ;;  %v16972_v19 = vld [vmem:[#allocation38_spill] sm:$0xff] }
 0x7ab   : > { %v14804_v47 = vpop.f32.mrf.mxu0  ;;  %v14806_v11 = vpop.f32.mrf.mxu1  ;;  %v5032_v24 = vadd.f32 %v16957_v36, %v4862_v54  ;;  %v5265_v39 = vadd.f32 %v16959_v50, %v5031_v31  ;;  %v16966_v54 = vld [vmem:[#allocation12_spill] sm:$0xff]  ;;  %v16971_v36 = vld [vmem:[#allocation34_spill] sm:$0xff] }
 0x7ac   : > { %v5974_v22 = vmax.f32 %v5958_v23, 0.0  ;;  %v5959_v59 = vadd.f32 %v5927_v29, %v5895_v28  ;;  %v16956_v29 = vld [vmem:[#allocation10_spill] sm:$0xff]  ;;  %v5493_v63 = vadd.f32 %v16966_v54, %v5259_v17  ;;  %v16973_v17 = vld [vmem:[#allocation35_spill] sm:$0xff] }
 0x7ad   : > { %v14816_v55 = vpop.f32.mrf.mxu0  ;;  %v5637_v33 = vpop.f32.mrf.mxu1  ;;  %v5497_v30 = vadd.f32 %v16956_v29, %v5263_v42  ;;  %v5499_v40 = vadd.f32 %v16964_v5, %v5265_v39  ;;  %v5656_v50 = vadd.f32 %v16973_v17, %v16972_v19 }
 0x7ae   : > { %v5975_v18 = vmax.f32 %v5959_v59, 0.0  ;;  %v5664_v52 = vadd.f32 %v5637_v33, %v5494_v15  ;;  %6010 = vrot.lane.b32.xlu0 %v5974_v22, %s11929_s12  ;;  %v5266_v15 = vadd.f32 %v16962_v2, %v5032_v24  ;;  %v16963_v22 = vld [vmem:[#allocation39_spill] sm:$0xff] }
 0x7af   : > { %v5871_v53 = vpop.f32.mrf.mxu0  ;;  %v5639_v34 = vpop.f32.mrf.mxu1  ;;  %v5492_v59 = vadd.f32 %v16963_v22, %v5258_v60  ;;  %v4851_v60 = vadd.f32 %v16968_v32, %v14810_v12 }
 0x7b0   : > { %v5898_v3 = vadd.f32 %v5871_v53, %v5664_v52  ;;  %v5665_v37 = vadd.f32 %v5639_v34, %v5495_v58  ;;  %6012 = vrot.lane.b32.xlu1 %v5975_v18, %s11929_s12  ;;  %v16967_v53 = vld [vmem:[#allocation25_spill] sm:$0xff]  ;;  %v5932_v22 = vpop.permute.xlu1 %5931 }
 0x7b1   : > { %v5873_v0 = vpop.f32.mrf.mxu0  ;;  %v5641_v49 = vpop.f32.mrf.mxu1  ;;  %v5500_v10 = vadd.f32 %v16967_v53, %v5266_v15  ;;  %v5662_v34 = vadd.f32 %v14795_v14, %v5492_v59  ;;  %v5021_v24 = vadd.f32 %v16971_v36, %v4851_v60  ;;  %v16977_v59 = vld [vmem:[#allocation26_spill] sm:$0xff] }
 0x7b2   : > { %v5962_v1 = vadd.f32 %v14772_v62, %v5898_v3  ;;  %v5899_v45 = vadd.f32 %v5873_v0, %v5665_v37  ;;  %v5666_v44 = vadd.f32 %v5641_v49, %v5496_v25  ;;  %v5663_v0 = vadd.f32 %v14806_v11, %v5493_v63  ;;  %v5917_v63 = vpop.permute.xlu0 %5916 }
 0x7b3   : > { %v5875_v21 = vpop.f32.mrf.mxu0  ;;  %v5643_v7 = vpop.f32.mrf.mxu1  ;;  %v5896_v12 = vadd.f32 %v14804_v47, %v5662_v34 }
 0x7b4   : > { %v5978_v23 = vmax.f32 %v5962_v1, 0.0  ;;  %v5963_v28 = vadd.f32 %v14772_v62, %v5899_v45  ;;  %v5900_v8 = vadd.f32 %v5875_v21, %v5666_v44  ;;  %v5667_v57 = vadd.f32 %v5643_v7, %v5497_v30  ;;  %v16970_v1 = vld [vmem:[#allocation31_spill] sm:$0xff] }
 0x7b5   : > { %v5877_v46 = vpop.f32.mrf.mxu0  ;;  %v5647_v33 = vpop.f32.mrf.mxu1  ;;  %v5267_v62 = vadd.f32 %v16965_v27, %v5033_v35  ;;  %v5897_v35 = vadd.f32 %v14816_v55, %v5663_v0 }
 0x7b6   : > { %v5979_v4 = vmax.f32 %v5963_v28, 0.0  ;;  %v5964_v58 = vadd.f32 %v5942_v48, %v5900_v8  ;;  %v5901_v18 = vadd.f32 %v5877_v46, %v5667_v57  ;;  %v5668_v52 = vadd.f32 %v5647_v33, %v5498_v41  ;;  %6018 = vrot.lane.b32.xlu0 %v5978_v23, %s11929_s12  ;;  %v16975_v28 = vld [vmem:[#allocation11_spill] sm:$0xff]  ;;  %v16979_v33 = vld [vmem:[#allocation18_spill] sm:$0xff] }
 0x7b7   : > { %v5881_v42 = vpop.f32.mrf.mxu0  ;;  %v5649_v25 = vpop.f32.mrf.mxu1  ;;  %v5501_v51 = vadd.f32 %v16969_v9, %v5267_v62  ;;  %v16976_v8 = vld [vmem:[#allocation23_spill] sm:$0xff]  ;;  %v5961_v62 = vadd.f32 %v5932_v22, %v5897_v35 }
 0x7b8   : > { %v5980_v3 = vmax.f32 %v5964_v58, 0.0  ;;  %v5965_v37 = vadd.f32 %v5942_v48, %v5901_v18  ;;  %v5902_v16 = vadd.f32 %v5881_v42, %v5668_v52  ;;  %v5669_v31 = vadd.f32 %v5649_v25, %v5499_v40  ;;  %6020 = vrot.lane.b32.xlu1 %v5979_v4, %s11929_s12  ;;  %v16974_v48 = vld [vmem:[#allocation6_spill] sm:$0xff]  ;;  %v16978_v40 = vld [vmem:[#allocation19_spill] sm:$0xff] }
 0x7b9   : > { %v5883_v49 = vpop.f32.mrf.mxu0  ;;  %v5651_v29 = vpop.f32.mrf.mxu1  ;;  %v5255_v23 = vadd.f32 %v16974_v48, %v5021_v24  ;;  %v5657_v57 = vadd.f32 %v16976_v8, %v16975_v28  ;;  %v5890_v46 = vadd.f32 %v16978_v40, %v5656_v50  ;;  %v5658_v4 = vadd.f32 %v14770_v13, %v16979_v33 }
 0x7ba   : > { %v5981_v30 = vmax.f32 %v5965_v37, 0.0  ;;  %v5966_v14 = vadd.f32 %v16970_v1, %v5902_v16  ;;  %v5903_v45 = vadd.f32 %v5883_v49, %v5669_v31  ;;  %v5670_v44 = vadd.f32 %v5651_v29, %v5500_v10  ;;  %6022 = vrot.lane.b32.xlu0 %v5980_v3, %s11929_s12 }
 0x7bb   : > { %v5885_v39 = vpop.f32.mrf.mxu0  ;;  %v5653_v26 = vpop.f32.mrf.mxu1  ;;  %v5489_v5 = vadd.f32 %v16977_v59, %v5255_v23  ;;  %v5960_v58 = vadd.f32 %v5932_v22, %v5896_v12  ;;  %v5891_v55 = vadd.f32 %v14768_v20, %v5657_v57  ;;  %v5954_v53 = vadd.f32 %v5917_v63, %v5890_v46 }
 0x7bc   : > { %v5982_v41 = vmax.f32 %v5966_v14, 0.0  ;;  %v5967_v11 = vadd.f32 %v16970_v1, %v5903_v45  ;;  %v5904_v21 = vadd.f32 %v5885_v39, %v5670_v44  ;;  %v5671_v7 = vadd.f32 %v5653_v26, %v5501_v51  ;;  %6024 = vrot.lane.b32.xlu1 %v5981_v30, %s11929_s12  ;;  %v5922_v20 = vpop.permute.xlu1 %5921 }
 0x7bd   : > { %v5887_v6 = vpop.f32.mrf.mxu0  ;;  %v5659_v27 = vadd.f32 %v14776_v61, %v5489_v5  ;;  %v5892_v10 = vadd.f32 %v14774_v38, %v5658_v4  ;;  %v5976_v34 = vmax.f32 %v5960_v58, 0.0  ;;  %v5955_v13 = vadd.f32 %v5917_v63, %v5891_v55 }
 0x7be   : > { %v5983_v2 = vmax.f32 %v5967_v11, 0.0  ;;  %v5968_v47 = vadd.f32 %v14818_v43, %v5904_v21  ;;  %v5905_v15 = vadd.f32 %v5887_v6, %v5671_v7  ;;  %6026 = vrot.lane.b32.xlu0 %v5982_v41, %s11929_s12  ;;  %v5977_v42 = vmax.f32 %v5961_v62, 0.0 }
 0x7bf   : > { %v5970_v25 = vmax.f32 %v5954_v53, 0.0  ;;  %v5956_v61 = vadd.f32 %v5922_v20, %v5892_v10  ;;  %v5971_v3 = vmax.f32 %v5955_v13, 0.0 }
 0x7c0   : > { %v5984_v18 = vmax.f32 %v5968_v47, 0.0  ;;  %v5969_v52 = vadd.f32 %v14818_v43, %v5905_v15  ;;  %6028 = vrot.lane.b32.xlu1 %v5983_v2, %s11929_s12  ;;  %v5893_v43 = vadd.f32 %v14780_v56, %v5659_v27 }
 0x7c1   : > { %v5972_v16 = vmax.f32 %v5956_v61, 0.0 }
 0x7c2   : > { %v5985_v54 = vmax.f32 %v5969_v52, 0.0  ;;  %6030 = vrot.lane.b32.xlu0 %v5984_v18, %s11929_s12  ;;  %v5957_v37 = vadd.f32 %v5922_v20, %v5893_v43 }
 0x7c4   : > { %6032 = vrot.lane.b32.xlu1 %v5985_v54, %s11929_s12  ;;  %v5973_v38 = vmax.f32 %v5957_v37, 0.0 }
 0x7c6   : > { %6014 = vrot.lane.b32.xlu0 %v5976_v34, %s11929_s12 }
 0x7c8   : > { %6016 = vrot.lane.b32.xlu1 %v5977_v42, %s11929_s12 }
 0x7ca   : > { %6002 = vrot.lane.b32.xlu0 %v5970_v25, %s11929_s12 }
 0x7cc   : > { %6004 = vrot.lane.b32.xlu1 %v5971_v3, %s11929_s12 }
 0x7ce   : > { %6006 = vrot.lane.b32.xlu0 %v5972_v16, %s11929_s12 }
 0x7d0   : > { %6008 = vrot.lane.b32.xlu1 %v5973_v38, %s11929_s12 }
 0x820   : > { %v6011_v56 = vpop.permute.xlu0 %6010 }
 0x821   : > { %6072 = vst.msk [vmem:[#allocation2 + $0x30] sm:$0xff] %vm1950_vm5, %v6011_v56 }
 0x822   : > { %v6013_v31 = vpop.permute.xlu1 %6012 }
 0x823   : > { %6074 = vst.msk [vmem:[#allocation2 + $0x40] sm:$0xff] %vm403_vm0, %v6013_v31  ;;  %v6036_v8 = vsel %vm403_vm0, %v6011_v56, %v6013_v31 }
 0x828   : > { %v6019_v32 = vpop.permute.xlu0 %6018  ;;  %v6094_v15 = vld [vmem:[#allocation2 + $0x30] sm:$0xff] }
 0x829   : > { %6078 = vst.msk [vmem:[#allocation2 + $0x60] sm:$0xff] %vm1950_vm5, %v6019_v32 }
 0x82a   : > { %v6021_v60 = vpop.permute.xlu1 %6020  ;;  %v6140_v62 = vld [vmem:[#allocation2 + $0x40] sm:$0xff] }
 0x82b   : > { %6080 = vst.msk [vmem:[#allocation2 + $0x70] sm:$0xff] %vm403_vm0, %v6021_v60  ;;  %v6038_v39 = vsel %vm403_vm0, %v6019_v32, %v6021_v60  ;;  %v14987_v54 = vpack.i.bf16 %v6140_v62, %v6036_v8  ;;  %v11851_v32 = vld [vmem:[#allocation3] sm:$0xff]   ;;  %v16982_v60 = vmov 0  }
 0x82c   : > { %v6023_v9 = vpop.permute.xlu0 %6022 }
 0x82d   : > { %6081 = vst.msk [vmem:[#allocation2 + $0x78] sm:$0xff] %vm1950_vm5, %v6023_v9 }
 0x82e   : > { %v6025_v51 = vpop.permute.xlu1 %6024 }
 0x82f   : > { %6083 = vst.msk [vmem:[#allocation2 + $0x88] sm:$0xff] %vm403_vm0, %v6025_v51  ;;  %v14915_v19 = vsel %vm403_vm0, %v6023_v9, %v6025_v51  ;;  %v11854_v9 = vld [vmem:[#allocation3 + $0x8] sm:$0xff]   ;;  %v11856_v51 = vld [vmem:[#allocation3 + $0x10] sm:$0xff]  }
 0x830   : > { %v6027_v0 = vpop.permute.xlu0 %6026  ;;  %v14929_v11 = vpack.c.bf16 %v14915_v19, %v6038_v39  ;;  %v6098_v28 = vld [vmem:[#allocation2 + $0x60] sm:$0xff] }
 0x831   : > { %6084 = vst.msk [vmem:[#allocation2 + $0x90] sm:$0xff] %vm1950_vm5, %v6027_v0 }
 0x832   : > { %v6029_v49 = vpop.permute.xlu1 %6028  ;;  %v6142_v13 = vld [vmem:[#allocation2 + $0x70] sm:$0xff] }
 0x833   : > { %6086 = vst.msk [vmem:[#allocation2 + $0xa0] sm:$0xff] %vm403_vm0, %v6029_v49  ;;  %v14900_v1 = vsel %vm403_vm0, %v6027_v0, %v6029_v49  ;;  %v15007_v43 = vpack.i.bf16 %v6142_v13, %v6038_v39  ;;  %v11858_v0 = vld [vmem:[#allocation3 + $0x18] sm:$0xff]  }
 0x834   : > { %v6031_v29 = vpop.permute.xlu0 %6030  ;;  %v6100_v21 = vld [vmem:[#allocation2 + $0x78] sm:$0xff] }
 0x835   : > { %6087 = vst.msk [vmem:[#allocation2 + $0xa8] sm:$0xff] %vm1950_vm5, %v6031_v29  ;;  %v14941_v57 = vpack.c.bf16 %v6100_v21, %v6098_v28  ;;  %v15016_v25 = vpack.i.bf16 %v6100_v21, %v6098_v28 }
 0x836   : > { %v6033_v30 = vpop.permute.xlu1 %6032  ;;  %v6143_v42 = vld [vmem:[#allocation2 + $0x88] sm:$0xff] }
 0x837   : > { %v14903_v14 = vsel %vm403_vm0, %v6031_v29, %v6033_v30  ;;  %6089 = vst.msk [vmem:[#allocation2 + $0xb8] sm:$0xff] %vm403_vm0, %v6033_v30  ;;  %v15014_v20 = vpack.i.bf16 %v6143_v42, %v14915_v19  ;;  %v15022_v61 = vpack.c.bf16 %v6143_v42, %v6142_v13 }
 0x838   : > { %v6015_v45 = vpop.permute.xlu0 %6014  ;;  %v14908_v44 = vpack.c.bf16 %v14903_v14, %v14900_v1  ;;  %v14918_v50 = vld [vmem:[#allocation2 + $0x90] sm:$0xff] }
 0x839   : > { %6075 = vst.msk [vmem:[#allocation2 + $0x48] sm:$0xff] %vm1950_vm5, %v6015_v45 }
 0x83a   : > { %v6017_v36 = vpop.permute.xlu1 %6016  ;;  %10113 = vmatprep.subr.msk.bf16.mxu0 %vm12654_vm8, %v14908_v44  ;;  %v6144_v3 = vld [vmem:[#allocation2 + $0xa0] sm:$0xff] }
 0x83b   : > { %6077 = vst.msk [vmem:[#allocation2 + $0x58] sm:$0xff] %vm403_vm0, %v6017_v36  ;;  %v6037_v7 = vsel %vm403_vm0, %v6015_v45, %v6017_v36  ;;  %v15029_v37 = vpack.i.bf16 %v6144_v3, %v14900_v1 }
 0x83c   : > { %v6003_v17 = vpop.permute.xlu0 %6002  ;;  %v14920_v12 = vld [vmem:[#allocation2 + $0xa8] sm:$0xff]  ;;  %v14943_v35 = vpack.c.bf16 %v6037_v7, %v6036_v8 }
 0x83d   : > { %6066 = vst.msk [vmem:[#allocation2] sm:$0xff] %vm1950_vm5, %v6003_v17  ;;  %v14926_v26 = vpack.c.bf16 %v14920_v12, %v14918_v50  ;;  %v15044_v56 = vpack.i.bf16 %v14920_v12, %v14918_v50 }
 0x83e   : > { %v6005_v41 = vpop.permute.xlu1 %6004  ;;  %v6145_v16 = vld [vmem:[#allocation2 + $0xb8] sm:$0xff] }
 0x83f   : > { %6068 = vst.msk [vmem:[#allocation2 + $0x10] sm:$0xff] %vm403_vm0, %v6005_v41  ;;  %10116 = vmatpush1.bf16.msk.msra.mxu0 %vm12680_vm4, %v14926_v26  ;;  %v6034_v22 = vsel %vm403_vm0, %v6003_v17, %v6005_v41  ;;  %v15036_v38 = vpack.i.bf16 %v6145_v16, %v14903_v14  ;;  %v15050_v31 = vpack.c.bf16 %v6145_v16, %v6144_v3 }
 0x840   : > { %v6007_v23 = vpop.permute.xlu0 %6006  ;;  %10119 = vmatprep.subr.msk.bf16.mxu0 %vm12654_vm8, %v14929_v11  ;;  %v6096_v2 = vld [vmem:[#allocation2 + $0x48] sm:$0xff] }
 0x841   : > { %6069 = vst.msk [vmem:[#allocation2 + $0x18] sm:$0xff] %vm1950_vm5, %v6007_v23  ;;  %v14954_v59 = vpack.c.bf16 %v6096_v2, %v6094_v15  ;;  %v14993_v53 = vpack.i.bf16 %v6096_v2, %v6094_v15 }
 0x842   : > { %v6009_v6 = vpop.permute.xlu1 %6008  ;;  %v6141_v63 = vld [vmem:[#allocation2 + $0x58] sm:$0xff] }
 0x843   : > { %v6035_v47 = vsel %vm403_vm0, %v6007_v23, %v6009_v6  ;;  %6071 = vst.msk [vmem:[#allocation2 + $0x28] sm:$0xff] %vm403_vm0, %v6009_v6  ;;  %10122 = vmatpush1.bf16.msk.msra.mxu0 %vm12680_vm4, %v14941_v57  ;;  %v14995_v10 = vpack.i.bf16 %v6141_v63, %v6037_v7  ;;  %v15001_v34 = vpack.c.bf16 %v6141_v63, %v6140_v62 }
 0x844   : > { %10125 = vmatprep.subr.msk.bf16.mxu0 %vm12654_vm8, %v14943_v35  ;;  %v14956_v40 = vpack.c.bf16 %v6035_v47, %v6034_v22  ;;  %v6090_v33 = vld [vmem:[#allocation2] sm:$0xff] }
 0x846   : > { %v6138_v5 = vld [vmem:[#allocation2 + $0x10] sm:$0xff] }
 0x847   : > { %v14958_v46 = vpack.i.bf16 %v6138_v5, %v6034_v22  ;;  %10128 = vmatpush1.bf16.msk.msra.mxu0 %vm12680_vm4, %v14954_v59 }
 0x848   : > { %v6092_v4 = vld [vmem:[#allocation2 + $0x18] sm:$0xff]  ;;  %10131 = vmatprep.subr.msk.bf16.mxu0 %vm12654_vm8, %v14956_v40 }
 0x849   : > { %11143 = vrot.lane.b32.xlu1 %v14958_v46, %s11932_s14  ;;  %v14968_v58 = vpack.c.bf16 %v6092_v4, %v6090_v33  ;;  %v14970_v52 = vpack.i.bf16 %v6092_v4, %v6090_v33 }
 0x84a   : > { %v6139_v18 = vld [vmem:[#allocation2 + $0x28] sm:$0xff] }
 0x84b   : > { %v14972_v55 = vpack.i.bf16 %v6139_v18, %v6035_v47  ;;  %10134 = vmatpush1.bf16.msk.msra.mxu0 %vm12680_vm4, %v14968_v58  ;;  %v14981_v27 = vpack.c.bf16 %v6139_v18, %v6138_v5 }
 0x84d   : > { %11148 = vrot.lane.b32.xlu1 %v14970_v52, %s11932_s14  ;;  %11153 = vrot.lane.b32.xlu0 %v14972_v55, %s11932_s14 }
 0x84e   : > { %10135 = vmatmul.mubr.msk.bf16.vlgmr.msra.gmra.mxu0 %vm2124_vm6, %v11851_v32 }
 0x84f   : > { %6398 = vmatprep.mubr.bf16.mxu0 %v16982_v60 }
 0x851   : > { %6199 = vrot.lane.b32.xlu1 %v14968_v58, %s11930_s13  ;;  %6203 = vrot.lane.b32.xlu0 %v14981_v27, %s11930_s13 }
 0x855   : > { %11158 = vrot.lane.b32.xlu0 %v14987_v54, %s11932_s14  ;;  %6201 = vrot.lane.b32.xlu1 %v14956_v40, %s11930_s13 }
 0x856   : > { %10136 = vmatmul.mubr.msk.bf16.gmra.mxu0 %vm2124_vm6, %v11854_v9 }
 0x857   : > { %6408 = vmatprep.mubr.bf16.mxu0 %v16982_v60 }
 0x859   : > { %11163 = vrot.lane.b32.xlu0 %v14993_v53, %s11932_s14  ;;  %11168 = vrot.lane.b32.xlu1 %v14995_v10, %s11932_s14 }
 0x85d   : > { %6205 = vrot.lane.b32.xlu0 %v14954_v59, %s11930_s13  ;;  %6209 = vrot.lane.b32.xlu1 %v15001_v34, %s11930_s13 }
 0x85e   : > { %10137 = vmatmul.mubr.msk.bf16.gmra.mxu0 %vm2124_vm6, %v11856_v51 }
 0x85f   : > { %6418 = vmatprep.mubr.bf16.mxu0 %v16982_v60 }
 0x861   : > { %6207 = vrot.lane.b32.xlu0 %v14943_v35, %s11930_s13  ;;  %11173 = vrot.lane.b32.xlu1 %v15007_v43, %s11932_s14 }
 0x865   : > { %11183 = vrot.lane.b32.xlu0 %v15014_v20, %s11932_s14  ;;  %11178 = vrot.lane.b32.xlu1 %v15016_v25, %s11932_s14 }
 0x866   : > { %10138 = vmatmul.mubr.msk.bf16.gmra.mxu0 %vm2124_vm6, %v11858_v0 }
 0x867   : > { %6864 = vmatprep.mubr.bf16.mxu0 %v16982_v60 }
 0x869   : > { %6215 = vrot.lane.b32.xlu0 %v15022_v61, %s11930_s13  ;;  %6211 = vrot.lane.b32.xlu1 %v14941_v57, %s11930_s13 }
 0x86d   : > { %11188 = vrot.lane.b32.xlu0 %v15029_v37, %s11932_s14  ;;  %6213 = vrot.lane.b32.xlu1 %v14929_v11, %s11930_s13 }
 0x871   : > { %11193 = vrot.lane.b32.xlu0 %v15029_v37, %s11933_s15  ;;  %11203 = vrot.lane.b32.xlu1 %v15036_v38, %s11932_s14 }
 0x875   : > { %11198 = vrot.lane.b32.xlu0 %v15044_v56, %s11932_s14  ;;  %11208 = vrot.lane.b32.xlu1 %v15036_v38, %s11933_s15 }
 0x879   : > { %6217 = vrot.lane.b32.xlu0 %v14926_v26, %s11930_s13  ;;  %6221 = vrot.lane.b32.xlu1 %v15050_v31, %s11930_s13 }
 0x87d   : > { %6219 = vrot.lane.b32.xlu0 %v14908_v44, %s11930_s13  ;;  %11218 = vrot.lane.b32.xlu1 %v15007_v43, %s11933_s15 }
 0x881   : > { %11213 = vrot.lane.b32.xlu0 %v15044_v56, %s11933_s15  ;;  %11228 = vrot.lane.b32.xlu1 %v15016_v25, %s11933_s15 }
 0x885   : > { %11223 = vrot.lane.b32.xlu0 %v15014_v20, %s11933_s15  ;;  %11233 = vrot.lane.b32.xlu1 %v14987_v54, %s11933_s15 }
 0x889   : > { %6972 = vrot.lane.b32.xlu0 %v15050_v31, %s11934_s16  ;;  %6964 = vrot.lane.b32.xlu1 %v14929_v11, %s11934_s16 }
 0x88d   : > { %6968 = vrot.lane.b32.xlu0 %v14926_v26, %s11934_s16  ;;  %11243 = vrot.lane.b32.xlu1 %v14993_v53, %s11933_s15 }
 0x891   : > { %11238 = vrot.lane.b32.xlu0 %v14995_v10, %s11933_s15  ;;  %11248 = vrot.lane.b32.xlu1 %v14958_v46, %s11933_s15 }
 0x895   : > { %6966 = vrot.lane.b32.xlu0 %v15022_v61, %s11934_s16  ;;  %6958 = vrot.lane.b32.xlu1 %v14943_v35, %s11934_s16 }
 0x899   : > { %6962 = vrot.lane.b32.xlu0 %v14941_v57, %s11934_s16  ;;  %11258 = vrot.lane.b32.xlu1 %v14970_v52, %s11933_s15 }
 0x89d   : > { %11253 = vrot.lane.b32.xlu0 %v14972_v55, %s11933_s15  ;;  %6952 = vrot.lane.b32.xlu1 %v14956_v40, %s11934_s16 }
 0x8a1   : > { %6960 = vrot.lane.b32.xlu0 %v15001_v34, %s11934_s16  ;;  %6950 = vrot.lane.b32.xlu1 %v14968_v58, %s11934_s16 }
 0x8a5   : > { %6956 = vrot.lane.b32.xlu0 %v14954_v59, %s11934_s16  ;;  %11268 = vrot.lane.b32.xlu1 %v15036_v38, %s11935_s19 }
 0x8a9   : > { %6954 = vrot.lane.b32.xlu0 %v14981_v27, %s11934_s16  ;;  %11278 = vrot.lane.b32.xlu1 %v15029_v37, %s11936_s20 }
 0x8ad   : > { %11263 = vrot.lane.b32.xlu0 %v15029_v37, %s11935_s19  ;;  %11288 = vrot.lane.b32.xlu1 %v15044_v56, %s11936_s20 }
 0x8b1   : > { %11273 = vrot.lane.b32.xlu0 %v15044_v56, %s11935_s19  ;;  %11298 = vrot.lane.b32.xlu1 %v15014_v20, %s11935_s19 }
 0x8b5   : > { %11283 = vrot.lane.b32.xlu0 %v15036_v38, %s11936_s20  ;;  %11308 = vrot.lane.b32.xlu1 %v15007_v43, %s11936_s20 }
 0x8b9   : > { %11293 = vrot.lane.b32.xlu0 %v15007_v43, %s11935_s19  ;;  %6970 = vrot.lane.b32.xlu1 %v14908_v44, %s11934_s16 }
 0x8bb   : > { %v15128_v49 = vpop.permute.xlu1 %11143 }
 0x8bd   : > { %11303 = vrot.lane.b32.xlu0 %v15016_v25, %s11935_s19  ;;  %11318 = vrot.lane.b32.xlu1 %v15016_v25, %s11936_s20 }
 0x8bf   : > { %v15134_v29 = vpop.permute.xlu1 %11148  ;;  %v15136_v30 = vpop.permute.xlu0 %11153 }
 0x8c1   : > { %11313 = vrot.lane.b32.xlu0 %v15014_v20, %s11936_s20  ;;  %11328 = vrot.lane.b32.xlu1 %v14995_v10, %s11935_s19 }
 0x8c3   : > { %v15142_v1 = vpop.permute.xlu1 %6199  ;;  %v15144_v14 = vpop.permute.xlu0 %6203 }
 0x8c5   : > { %11323 = vrot.lane.b32.xlu0 %v14987_v54, %s11935_s19  ;;  %11338 = vrot.lane.b32.xlu1 %v14987_v54, %s11936_s20 }
 0x8c7   : > { %v15150_v45 = vpop.permute.xlu0 %11158  ;;  %v15152_v36 = vpop.permute.xlu1 %6201 }
 0x8c9   : > { %11333 = vrot.lane.b32.xlu0 %v14993_v53, %s11935_s19  ;;  %11348 = vrot.lane.b32.xlu1 %v14993_v53, %s11936_s20 }
 0x8cb   : > { %v15158_v19 = vpop.permute.xlu0 %11163  ;;  %v15160_v17 = vpop.permute.xlu1 %11168 }
 0x8cd   : > { %11343 = vrot.lane.b32.xlu0 %v14995_v10, %s11936_s20  ;;  %11358 = vrot.lane.b32.xlu1 %v14972_v55, %s11935_s19 }
 0x8cf   : > { %v15166_v50 = vpop.permute.xlu0 %6205  ;;  %v6210_v12 = vpop.permute.xlu1 %6209 }
 0x8d1   : > { %11353 = vrot.lane.b32.xlu0 %v14958_v46, %s11935_s19  ;;  %11368 = vrot.lane.b32.xlu1 %v14958_v46, %s11936_s20 }
 0x8d3   : > { %v15172_v39 = vpop.permute.xlu0 %6207  ;;  %v15174_v41 = vpop.permute.xlu1 %11173 }
 0x8d5   : > { %11363 = vrot.lane.b32.xlu0 %v14970_v52, %s11935_s19  ;;  %11378 = vrot.lane.b32.xlu1 %v14970_v52, %s11936_s20 }
 0x8d7   : > { %v15180_v21 = vpop.permute.xlu0 %11183  ;;  %v15182_v7 = vpop.permute.xlu1 %11178 }
 0x8d9   : > { %11373 = vrot.lane.b32.xlu0 %v14972_v55, %s11936_s20  ;;  %7610 = vrot.lane.b32.xlu1 %v15050_v31, %s11938_s22 }
 0x8db   : > { %v6216_v23 = vpop.permute.xlu0 %6215  ;;  %v6212_v28 = vpop.permute.xlu1 %6211 }
 0x8dd   : > { %11383 = vrot.lane.b32.xlu0 %v15029_v37, %s11937_s21  ;;  %11388 = vrot.lane.b32.xlu1 %v15036_v38, %s11937_s21 }
 0x8df   : > { %v15192_v8 = vpop.permute.xlu0 %11188  ;;  %v6214_v6 = vpop.permute.xlu1 %6213 }
 0x8e1   : > { %7606 = vrot.lane.b32.xlu0 %v14926_v26, %s11938_s22  ;;  %11393 = vrot.lane.b32.xlu1 %v15044_v56, %s11937_s21  ;;  %v6224_v56 = vsel %vm528_vm7, %v15152_v36, %v15144_v14  ;;  %v11186_v14 = vunpack.i.h.bf16 %v15180_v21 }
 0x8e3   : > { %v11194_v2 = vpop.permute.xlu0 %11193  ;;  %v15198_v47 = vpop.permute.xlu1 %11203 }
 0x8e4   : > { %v11196_v15 = vunpack.i.h.bf16 %v11194_v2  ;;  %v11195_v22 = vunpack.i.l.bf16 %v11194_v2  ;;  %v11205_v0 = vunpack.i.l.bf16 %v15198_v47 }
 0x8e5   : > { %7602 = vrot.lane.b32.xlu0 %v14929_v11, %s11938_s22  ;;  %7604 = vrot.lane.b32.xlu1 %v15022_v61, %s11938_s22 }
 0x8e6   : > { %v6748_v26 = vsel %vm902_vm13, %v11195_v22, %v11196_v15 }
 0x8e7   : > { %v15204_v5 = vpop.permute.xlu0 %11198  ;;  %v11209_v33 = vpop.permute.xlu1 %11208 }
 0x8e8   : > { %v11211_v4 = vunpack.i.h.bf16 %v11209_v33  ;;  %v11210_v18 = vunpack.i.l.bf16 %v11209_v33  ;;  %v11190_v33 = vunpack.i.l.bf16 %v15192_v8 }
 0x8e9   : > { %11398 = vrot.lane.b32.xlu0 %v15007_v43, %s11937_s21  ;;  %11403 = vrot.lane.b32.xlu1 %v15014_v20, %s11937_s21 }
 0x8ea   : > { %v6750_v11 = vsel %vm902_vm13, %v11210_v18, %v11211_v4  ;;  %v11200_v4 = vunpack.i.l.bf16 %v15204_v5 }
 0x8eb   : > { %v6218_v62 = vpop.permute.xlu0 %6217  ;;  %v6222_v63 = vpop.permute.xlu1 %6221  ;;  %v10176_v13 = vpack.c.bf16 %v6750_v11, %v6748_v26 }
 0x8ed   : > { %7600 = vrot.lane.b32.xlu0 %v14941_v57, %s11938_s22  ;;  %11408 = vrot.lane.b32.xlu1 %v15016_v25, %s11937_s21  ;;  %v6228_v25 = vsel %vm528_vm7, %v6214_v6, %v6216_v23 }
 0x8ee   : > { %10177 = vmatprep.subr.msk.bf16.mxu0 %vm12654_vm8, %v10176_v13  ;;  %v11170_v13 = vunpack.i.l.bf16 %v15160_v17 }
 0x8ef   : > { %v6220_v43 = vpop.permute.xlu0 %6219  ;;  %v11219_v42 = vpop.permute.xlu1 %11218 }
 0x8f0   : > { %v6230_v20 = vsel %vm528_vm7, %v6220_v43, %v6222_v63  ;;  %v6229_v61 = vsel %vm528_vm7, %v6218_v62, %v6220_v43  ;;  %v11221_v38 = vunpack.i.h.bf16 %v11219_v42  ;;  %v11220_v31 = vunpack.i.l.bf16 %v11219_v42 }
 0x8f1   : > { %7596 = vrot.lane.b32.xlu0 %v14943_v35, %s11938_s22  ;;  %7598 = vrot.lane.b32.xlu1 %v15001_v34, %s11938_s22  ;;  %v6227_v35 = vsel %vm528_vm7, %v6212_v28, %v6214_v6  ;;  %v6226_v34 = vsel %vm528_vm7, %v15172_v39, %v6210_v12  ;;  %v6225_v12 = vsel %vm528_vm7, %v15166_v50, %v15172_v39  ;;  %v11171_v63 = vunpack.i.h.bf16 %v15160_v17 }
 0x8f2   : > { %6259 = vmatprep.subr.bf16.mxu1 %v6230_v20  ;;  %v6744_v50 = vsel %vm902_vm13, %v11220_v31, %v11221_v38  ;;  %v11176_v43 = vunpack.i.h.bf16 %v15174_v41  ;;  %v11175_v42 = vunpack.i.l.bf16 %v15174_v41  ;;  %v11180_v20 = vunpack.i.l.bf16 %v15182_v7 }
 0x8f3   : > { %6260 = vmatpush1.bf16.msra.mxu1 %v6229_v61  ;;  %v11214_v57 = vpop.permute.xlu0 %11213  ;;  %v11229_v3 = vpop.permute.xlu1 %11228  ;;  %v6223_v41 = vsel %vm528_vm7, %v15142_v1, %v15152_v36  ;;  %v11165_v1 = vunpack.i.l.bf16 %v15158_v19  ;;  %v6508_v36 = vsel %vm751_vm10, %v11170_v13, %v11171_v63 }
 0x8f4   : > { %v11216_v37 = vunpack.i.h.bf16 %v11214_v57  ;;  %v11215_v16 = vunpack.i.l.bf16 %v11214_v57  ;;  %6261 = vmatprep.subr.bf16.mxu1 %v6228_v25  ;;  %v11230_v51 = vunpack.i.l.bf16 %v11229_v3  ;;  %v11231_v6 = vunpack.i.h.bf16 %v11229_v3  ;;  %v11852_v25 = vld [vmem:[#allocation3 + $0x20] sm:$0xff]  }
 0x8f5   : > { %11413 = vrot.lane.b32.xlu0 %v14987_v54, %s11937_s21  ;;  %11418 = vrot.lane.b32.xlu1 %v14995_v10, %s11937_s21  ;;  %v11206_v54 = vunpack.i.h.bf16 %v15198_v47  ;;  %v11201_v47 = vunpack.i.h.bf16 %v15204_v5  ;;  %v6513_v57 = vsel %vm751_vm10, %v11200_v4, %v11190_v33  ;;  %v11146_v3 = vunpack.i.h.bf16 %v15128_v49 }
 0x8f6   : > { %v6747_v32 = vsel %vm902_vm13, %v11215_v16, %v11195_v22  ;;  %v6749_v9 = vsel %vm902_vm13, %v11216_v37, %v11210_v18  ;;  %v11191_v22 = vunpack.i.h.bf16 %v15192_v8  ;;  %v6743_v39 = vsel %vm902_vm13, %v11230_v51, %v11220_v31 }
 0x8f7   : > { %v10179_v10 = vpack.c.bf16 %v6749_v9, %v6747_v32  ;;  %6262 = vmatpush1.bf16.msra.mxu1 %v6227_v35  ;;  %v11224_v23 = vpop.permute.xlu0 %11223  ;;  %v15239_v28 = vpop.permute.xlu1 %11233  ;;  %v11185_v8 = vunpack.i.l.bf16 %v15180_v21  ;;  %v6516_v5 = vsel %vm751_vm10, %v11205_v0, %v11206_v54  ;;  %v11181_v21 = vunpack.i.h.bf16 %v15182_v7 }
 0x8f8   : > { %v11226_v2 = vunpack.i.h.bf16 %v11224_v23  ;;  %v11225_v15 = vunpack.i.l.bf16 %v11224_v23  ;;  %6263 = vmatprep.subr.bf16.mxu1 %v6226_v34  ;;  %v6514_v61 = vsel %vm751_vm10, %v11190_v33, %v11191_v22  ;;  %v6515_v17 = vsel %vm751_vm10, %v11201_v47, %v11205_v0 }
 0x8f9   : > { %7608 = vrot.lane.b32.xlu0 %v14908_v44, %s11938_s22  ;;  %11423 = vrot.lane.b32.xlu1 %v14993_v53, %s11937_s21  ;;  %v10144_v7 = vpack.c.bf16 %v6516_v5, %v6514_v61  ;;  %v11160_v37 = vunpack.i.l.bf16 %v15150_v45  ;;  %v11145_v35 = vunpack.i.l.bf16 %v15128_v49  ;;  %v6510_v34 = vsel %vm751_vm10, %v11175_v42, %v11176_v43 }
 0x8fa   : > { %v6745_v18 = vsel %vm902_vm13, %v11231_v6, %v11225_v15  ;;  %v6746_v26 = vsel %vm902_vm13, %v11225_v15, %v11226_v2  ;;  %10180 = vmatpush1.bf16.msk.msra.mxu0 %vm12680_vm4, %v10179_v10  ;;  %v6511_v31 = vsel %vm751_vm10, %v11181_v21, %v11185_v8  ;;  %v6509_v32 = vsel %vm751_vm10, %v11180_v20, %v11175_v42  ;;  %v7969_v21 = vld [vmem:[%s16731_s8 + $0x30] sm:$0xff]  ;;  %v7968_v20 = vld [vmem:[%s16731_s8 + $0x28] sm:$0xff] }
 0x8fb   : > { %v10185_v11 = vpack.c.bf16 %v6745_v18, %v6743_v39  ;;  %6264 = vmatpush1.bf16.msra.mxu1 %v6225_v12  ;;  %v15261_v44 = vpop.permute.xlu0 %6972  ;;  %v15263_v53 = vpop.permute.xlu1 %6964  ;;  %v10182_v62 = vpack.c.bf16 %v6746_v26, %v6744_v50  ;;  %v10147_v9 = vpack.c.bf16 %v6515_v17, %v6513_v57  ;;  %v11236_v49 = vunpack.i.h.bf16 %v15239_v28  ;;  %v11853_v26 = vld [vmem:[#allocation3 + $0x28] sm:$0xff]  }
 0x8fc   : > { %6265 = vmatprep.subr.bf16.mxu1 %v6224_v56  ;;  %v11235_v51 = vunpack.i.l.bf16 %v15239_v28  ;;  %v11156_v10 = vunpack.i.h.bf16 %v15136_v30  ;;  %v11155_v23 = vunpack.i.l.bf16 %v15136_v30  ;;  %v6505_v28 = vsel %vm751_vm10, %v11165_v1, %v11160_v37 }
 0x8fd   : > { %7594 = vrot.lane.b32.xlu0 %v14954_v59, %s11938_s22  ;;  %7592 = vrot.lane.b32.xlu1 %v14981_v27, %s11938_s22  ;;  %v11161_v59 = vunpack.i.h.bf16 %v15150_v45  ;;  %v6512_v27 = vsel %vm751_vm10, %v11185_v8, %v11186_v14  ;;  %v11166_v45 = vunpack.i.h.bf16 %v15158_v19  ;;  %v11151_v19 = vunpack.i.h.bf16 %v15134_v29 }
 0x8fe   : > { %10183 = vmatprep.subr.msk.bf16.mxu0 %vm12654_vm8, %v10182_v62  ;;  %v10150_v0 = vpack.c.bf16 %v6512_v27, %v6510_v34  ;;  %v11150_v30 = vunpack.i.l.bf16 %v15134_v29  ;;  %v10153_v33 = vpack.c.bf16 %v6511_v31, %v6509_v32  ;;  %v6740_v4 = vsel %vm902_vm13, %v11235_v51, %v11236_v49  ;;  %v7970_v29 = vld [vmem:[%s16731_s8 + $0x38] sm:$0xff]  ;;  %v7965_v32 = vld [vmem:[%s16731_s8 + $0x10] sm:$0xff] }
 0x8ff   : > { %6266 = vmatpush1.bf16.msra.mxu1 %v6223_v41  ;;  %10186 = vmatpush1.bf16.msk.msra.mxu0 %vm12680_vm4, %v10185_v11  ;;  %v15289_v16 = vpop.permute.xlu0 %6968  ;;  %v11244_v38 = vpop.permute.xlu1 %11243  ;;  %v6506_v12 = vsel %vm751_vm10, %v11160_v37, %v11161_v59  ;;  %v6507_v22 = vsel %vm751_vm10, %v11166_v45, %v11170_v13  ;;  %v6504_v8 = vsel %vm751_vm10, %v11155_v23, %v11156_v10  ;;  %v11855_v59 = vld [vmem:[#allocation3 + $0x30] sm:$0xff]   ;;  %v11857_v10 = vld [vmem:[#allocation3 + $0x38] sm:$0xff]  }
 0x900   : > { %10145 = vmatprep.subr.msk.bf16.mxu1 %vm13050_vm11, %v10144_v7  ;;  %v11245_v54 = vunpack.i.l.bf16 %v11244_v38  ;;  %v11246_v6 = vunpack.i.h.bf16 %v11244_v38  ;;  %v10156_v47 = vpack.c.bf16 %v6508_v36, %v6506_v12  ;;  %v6502_v62 = vsel %vm751_vm10, %v11145_v35, %v11146_v3  ;;  %v7966_v3 = vld [vmem:[%s16731_s8 + $0x18] sm:$0xff] }
 0x901   : > { %7590 = vrot.lane.b32.xlu0 %v14956_v40, %s11938_s22  ;;  %11433 = vrot.lane.b32.xlu1 %v14972_v55, %s11937_s21  ;;  %v10159_v63 = vpack.c.bf16 %v6507_v22, %v6505_v28  ;;  %v6501_v13 = vsel %vm751_vm10, %v11150_v30, %v11145_v35  ;;  %v6503_v43 = vsel %vm751_vm10, %v11151_v19, %v11155_v23  ;;  %v7963_v19 = vld [vmem:[%s16731_s8] sm:$0xff]  ;;  %v11862_v30 = vld [vmem:[#allocation3 + $0x68] sm:$0xff]  }
 0x902   : > { %10103 = vmatmul.mubr.msk.bf16.vlgmr.msra.gmra.mxu1 %vm2124_vm6, %v11852_v25  ;;  %v6739_v50 = vsel %vm902_vm13, %v11245_v54, %v11235_v51  ;;  %v10162_v42 = vpack.c.bf16 %v6504_v8, %v6502_v62  ;;  %v10165_v57 = vpack.c.bf16 %v6503_v43, %v6501_v13  ;;  %v7967_v25 = vld [vmem:[%s16731_s8 + $0x20] sm:$0xff]  ;;  %v11864_v13 = vld [vmem:[#allocation3 + $0x70] sm:$0xff]  }
 0x903   : > { %10148 = vmatpush1.bf16.msk.msra.mxu1 %vm13082_vm12, %v10147_v9  ;;  %v11239_v55 = vpop.permute.xlu0 %11238  ;;  %v15313_v14 = vpop.permute.xlu1 %11248  ;;  %6293 = vmatprep.mubr.bf16.mxu1 %v16982_v60  ;;  %v7964_v9 = vld [vmem:[%s16731_s8 + $0x8] sm:$0xff]  ;;  %v11860_v23 = vld [vmem:[#allocation3 + $0x60] sm:$0xff]  }
 0x904   : > { %v11241_v2 = vunpack.i.h.bf16 %v11239_v55  ;;  %v11240_v15 = vunpack.i.l.bf16 %v11239_v55  ;;  %10151 = vmatprep.subr.msk.bf16.mxu1 %vm13050_vm11, %v10150_v0  ;;  %v11251_v17 = vunpack.i.h.bf16 %v15313_v14  ;;  %v11250_v41 = vunpack.i.l.bf16 %v15313_v14 }
 0x905   : > { %11428 = vrot.lane.b32.xlu0 %v14958_v46, %s11937_s21  ;;  %11438 = vrot.lane.b32.xlu1 %v14970_v52, %s11937_s21 }
 0x906   : > { %v6741_v39 = vsel %vm902_vm13, %v11246_v6, %v11240_v15  ;;  %v6742_v18 = vsel %vm902_vm13, %v11240_v15, %v11241_v2  ;;  %v6736_v36 = vsel %vm902_vm13, %v11250_v41, %v11251_v17  ;;  %v11859_v15 = vld [vmem:[#allocation3 + $0x40] sm:$0xff]  }
 0x907   : > { %v10191_v46 = vpack.c.bf16 %v6741_v39, %v6739_v50  ;;  %10154 = vmatpush1.bf16.msk.msra.mxu1 %vm13082_vm12, %v10153_v33  ;;  %v15335_v52 = vpop.permute.xlu0 %6966  ;;  %v15337_v5 = vpop.permute.xlu1 %6958  ;;  %v10188_v11 = vpack.c.bf16 %v6742_v18, %v6740_v4 }
 0x908   : > { %10157 = vmatprep.subr.msk.bf16.mxu1 %vm13050_vm11, %v10156_v47 }
 0x909   : > { %7588 = vrot.lane.b32.xlu0 %v14968_v58, %s11938_s22  ;;  %8008 = vperm.xlu1 %10540, %v7970_v29  }
 0x90a   : > { %10104 = vmatmul.mubr.msk.bf16.gmra.mxu1 %vm2124_vm6, %v11853_v26  ;;  %10189 = vmatprep.subr.msk.bf16.mxu0 %vm12654_vm8, %v10188_v11 }
 0x90b   : > { %10160 = vmatpush1.bf16.msk.msra.mxu1 %vm13082_vm12, %v10159_v63  ;;  %10192 = vmatpush1.bf16.msk.msra.mxu0 %vm12680_vm4, %v10191_v46  ;;  %v15359_v58 = vpop.permute.xlu0 %6962  ;;  %v11259_v61 = vpop.permute.xlu1 %11258  ;;  %v11861_v63 = vld [vmem:[#allocation3 + $0x48] sm:$0xff]  }
 0x90c   : > { %10163 = vmatprep.subr.msk.bf16.mxu1 %vm13050_vm11, %v10162_v42  ;;  %6303 = vmatprep.mubr.bf16.mxu1 %v16982_v60  ;;  %v11260_v7 = vunpack.i.l.bf16 %v11259_v61  ;;  %v11261_v38 = vunpack.i.h.bf16 %v11259_v61 }
 0x90d   : > { %8003 = vperm.xlu0 %10541, %v7969_v21   ;;  %7998 = vperm.xlu1 %10540, %v7968_v20  }
 0x90e   : > { %v6735_v34 = vsel %vm902_vm13, %v11260_v7, %v11250_v41 }
 0x90f   : > { %10166 = vmatpush1.bf16.msk.msra.mxu1 %vm13082_vm12, %v10165_v57  ;;  %v11254_v37 = vpop.permute.xlu0 %11253  ;;  %v15374_v27 = vpop.permute.xlu1 %6952 }
 0x910   : > { %v11256_v35 = vunpack.i.h.bf16 %v11254_v37  ;;  %v11255_v1 = vunpack.i.l.bf16 %v11254_v37 }
 0x911   : > { %7993 = vperm.xlu0 %10541, %v7967_v25   ;;  %7988 = vperm.xlu1 %10540, %v7966_v3  }
 0x912   : > { %v6737_v45 = vsel %vm902_vm13, %v11261_v38, %v11255_v1  ;;  %v6738_v31 = vsel %vm902_vm13, %v11255_v1, %v11256_v35  ;;  %10105 = vmatmul.mubr.msk.bf16.gmra.mxu1 %vm2124_vm6, %v11855_v59  ;;  %v6979_v38 = vsel %vm1082_vm15, %v15263_v53, %v15335_v52  ;;  %v11863_v35 = vld [vmem:[#allocation3 + $0x50] sm:$0xff]   ;;  %v11866_v1 = vld [vmem:[#allocation3 + $0x78] sm:$0xff]  }
 0x913   : > { %v10197_v49 = vpack.c.bf16 %v6737_v45, %v6735_v34  ;;  %v15387_v51 = vpop.permute.xlu0 %6960  ;;  %v15389_v54 = vpop.permute.xlu1 %6950  ;;  %v10194_v0 = vpack.c.bf16 %v6738_v31, %v6736_v36  ;;  %6313 = vmatprep.mubr.bf16.mxu1 %v16982_v60 }
 0x915   : > { %7983 = vperm.xlu0 %10541, %v7965_v32   ;;  %7978 = vperm.xlu1 %10540, %v7964_v9  }
 0x916   : > { %10195 = vmatprep.subr.msk.bf16.mxu0 %vm12654_vm8, %v10194_v0 }
 0x917   : > { %10198 = vmatpush1.bf16.msk.msra.mxu0 %vm12680_vm4, %v10197_v49  ;;  %v15399_v12 = vpop.permute.xlu0 %6956  ;;  %v11269_v55 = vpop.permute.xlu1 %11268 }
 0x918   : > { %v11271_v6 = vunpack.i.h.bf16 %v11269_v55  ;;  %v11270_v2 = vunpack.i.l.bf16 %v11269_v55  ;;  %v6976_v55 = vsel %vm1082_vm15, %v15399_v12, %v15337_v5 }
 0x919   : > { %7973 = vperm.xlu0 %10541, %v7963_v19  }
 0x91a   : > { %10106 = vmatmul.mubr.msk.bf16.gmra.mxu1 %vm2124_vm6, %v11857_v10  ;;  %10199 = vmatmul.mubr.msk.bf16.vlgmr.msra.gmra.mxu0 %vm2124_vm6, %v11860_v23  ;;  %v7154_v50 = vsel %vm1198_vm14, %v11270_v2, %v11271_v6 }
 0x91b   : > { %v15403_v14 = vpop.permute.xlu0 %6954  ;;  %v15405_v28 = vpop.permute.xlu1 %11278  ;;  %6630 = vmatprep.mubr.bf16.mxu1 %v16982_v60  ;;  %6874 = vmatprep.mubr.bf16.mxu0 %v16982_v60 }
 0x91c   : > { %v11280_v23 = vunpack.i.l.bf16 %v15405_v28 }
 0x91f   : > { %v11264_v22 = vpop.permute.xlu0 %11263  ;;  %v15409_v33 = vpop.permute.xlu1 %11288 }
 0x920   : > { %v11266_v47 = vunpack.i.h.bf16 %v11264_v22  ;;  %v11265_v4 = vunpack.i.l.bf16 %v11264_v22 }
 0x922   : > { %v7152_v39 = vsel %vm1198_vm14, %v11265_v4, %v11266_v47  ;;  %10167 = vmatmul.mubr.msk.bf16.vlgmr.msra.gmra.mxu1 %vm2124_vm6, %v11859_v15  ;;  %10200 = vmatmul.mubr.msk.bf16.gmra.mxu0 %vm2124_vm6, %v11862_v30  ;;  %v11865_v15 = vld [vmem:[#allocation3 + $0x58] sm:$0xff]  }
 0x923   : > { %v11274_v18 = vpop.permute.xlu0 %11273  ;;  %v11299_v29 = vpop.permute.xlu1 %11298  ;;  %v10216_v26 = vpack.c.bf16 %v7154_v50, %v7152_v39  ;;  %6640 = vmatprep.mubr.bf16.mxu1 %v16982_v60  ;;  %6884 = vmatprep.mubr.bf16.mxu0 %v16982_v60 }
 0x924   : > { %v11276_v8 = vunpack.i.h.bf16 %v11274_v18  ;;  %v11275_v46 = vunpack.i.l.bf16 %v11274_v18  ;;  %v11301_v20 = vunpack.i.h.bf16 %v11299_v29  ;;  %v11300_v61 = vunpack.i.l.bf16 %v11299_v29 }
 0x925   : > { %10217 = vmatprep.subr.msk.bf16.mxu0 %vm13050_vm11, %v10216_v26  ;;  %v11291_v29 = vunpack.i.h.bf16 %v15409_v33 }
 0x926   : > { %v7151_v11 = vsel %vm1198_vm14, %v11275_v46, %v11265_v4  ;;  %v7153_v62 = vsel %vm1198_vm14, %v11276_v8, %v11270_v2  ;;  %v7150_v59 = vsel %vm1198_vm14, %v11300_v61, %v11301_v20 }
 0x927   : > { %v10219_v43 = vpack.c.bf16 %v7153_v62, %v7151_v11  ;;  %v15421_v42 = vpop.permute.xlu0 %11283  ;;  %v15423_v21 = vpop.permute.xlu1 %11308  ;;  %v11290_v62 = vunpack.i.l.bf16 %v15409_v33 }
 0x928   : > { %v11286_v9 = vunpack.i.h.bf16 %v15421_v42  ;;  %v11285_v49 = vunpack.i.l.bf16 %v15421_v42 }
 0x929   : > { %10220 = vmatpush1.bf16.msk.msra.mxu0 %vm13082_vm12, %v10219_v43  ;;  %v11310_v43 = vunpack.i.l.bf16 %v15423_v21 }
 0x92a   : > { %10168 = vmatmul.mubr.msk.bf16.gmra.mxu1 %vm2124_vm6, %v11861_v63  ;;  %10201 = vmatmul.mubr.msk.bf16.gmra.mxu0 %vm2124_vm6, %v11864_v13  ;;  %v7387_v63 = vsel %vm1349_vm1, %v11291_v29, %v11285_v49  ;;  %v11311_v13 = vunpack.i.h.bf16 %v15423_v21 }
 0x92b   : > { %v11294_v57 = vpop.permute.xlu0 %11293  ;;  %v6971_v17 = vpop.permute.xlu1 %6970  ;;  %6650 = vmatprep.mubr.bf16.mxu1 %v16982_v60  ;;  %6894 = vmatprep.mubr.bf16.mxu0 %v16982_v60 }
 0x92c   : > { %v11296_v41 = vunpack.i.h.bf16 %v11294_v57  ;;  %v11295_v7 = vunpack.i.l.bf16 %v11294_v57  ;;  %v6981_v25 = vsel %vm1082_vm15, %v6971_v17, %v15261_v44  ;;  %v6980_v3 = vsel %vm1082_vm15, %v15289_v16, %v6971_v17  ;;  %v11867_v57 = vld [vmem:[#allocation3 + $0x80] sm:$0xff]  }
 0x92d   : > { %7010 = vmatprep.subr.bf16.mxu1 %v6981_v25  ;;  %v6978_v16 = vsel %vm1082_vm15, %v15359_v58, %v15263_v53  ;;  %v6977_v53 = vsel %vm1082_vm15, %v15337_v5, %v15387_v51  ;;  %v11281_v58 = vunpack.i.h.bf16 %v15405_v28  ;;  %v7388_v51 = vsel %vm1349_vm1, %v11285_v49, %v11286_v9 }
 0x92e   : > { %v7148_v37 = vsel %vm1198_vm14, %v11295_v7, %v11296_v41  ;;  %7011 = vmatpush1.bf16.msra.mxu1 %v6980_v3  ;;  %v6975_v28 = vsel %vm1082_vm15, %v15374_v27, %v15403_v14  ;;  %v6974_v5 = vsel %vm1082_vm15, %v15389_v54, %v15374_v27 }
 0x92f   : > { %v11304_v36 = vpop.permute.xlu0 %11303  ;;  %v15440_v34 = vpop.permute.xlu1 %11318  ;;  %7012 = vmatprep.subr.bf16.mxu1 %v6979_v38  ;;  %v10222_v44 = vpack.c.bf16 %v7150_v59, %v7148_v37  ;;  %v7386_v50 = vsel %vm1349_vm1, %v11280_v23, %v11281_v58  ;;  %v7385_v59 = vsel %vm1349_vm1, %v11290_v62, %v11280_v23  ;;  %v11869_v62 = vld [vmem:[#allocation3 + $0xa0] sm:$0xff]  }
 0x930   : > { %v11306_v45 = vunpack.i.h.bf16 %v11304_v36  ;;  %v11305_v31 = vunpack.i.l.bf16 %v11304_v36  ;;  %v10248_v18 = vpack.c.bf16 %v7388_v51, %v7386_v50  ;;  %v11321_v42 = vunpack.i.h.bf16 %v15440_v34 }
 0x931   : > { %10223 = vmatprep.subr.msk.bf16.mxu0 %vm13050_vm11, %v10222_v44  ;;  %v11320_v20 = vunpack.i.l.bf16 %v15440_v34 }
 0x932   : > { %v7147_v32 = vsel %vm1198_vm14, %v11305_v31, %v11295_v7  ;;  %v7149_v52 = vsel %vm1198_vm14, %v11306_v45, %v11300_v61  ;;  %10169 = vmatmul.mubr.msk.bf16.gmra.mxu1 %vm2124_vm6, %v11863_v35  ;;  %10202 = vmatmul.mubr.msk.bf16.gmra.mxu0 %vm2124_vm6, %v11866_v1  ;;  %v10251_v35 = vpack.c.bf16 %v7387_v63, %v7385_v59 }
 0x933   : > { %v10225_v0 = vpack.c.bf16 %v7149_v52, %v7147_v32  ;;  %7013 = vmatpush1.bf16.msra.mxu1 %v6978_v16  ;;  %v11314_v19 = vpop.permute.xlu0 %11313  ;;  %v11329_v10 = vpop.permute.xlu1 %11328  ;;  %6660 = vmatprep.mubr.bf16.mxu1 %v16982_v60  ;;  %v7382_v1 = vsel %vm1349_vm1, %v11310_v43, %v11311_v13  ;;  %v7381_v16 = vsel %vm1349_vm1, %v11320_v20, %v11310_v43  ;;  %v11870_v43 = vld [vmem:[#allocation3 + $0x90] sm:$0xff]  }
 0x934   : > { %7014 = vmatprep.subr.bf16.mxu1 %v6977_v53  ;;  %7268 = vmatprep.mubr.bf16.mxu0 %v16982_v60  ;;  %v11331_v6 = vunpack.i.h.bf16 %v11329_v10  ;;  %v11330_v2 = vunpack.i.l.bf16 %v11329_v10  ;;  %v11316_v26 = vunpack.i.h.bf16 %v11314_v19  ;;  %v11315_v14 = vunpack.i.l.bf16 %v11314_v19 }
 0x935   : > { %10226 = vmatpush1.bf16.msk.msra.mxu0 %vm13082_vm12, %v10225_v0 }
 0x936   : > { %v7146_v12 = vsel %vm1198_vm14, %v11330_v2, %v11331_v6  ;;  %v7384_v17 = vsel %vm1349_vm1, %v11315_v14, %v11316_v26  ;;  %v7383_v36 = vsel %vm1349_vm1, %v11321_v42, %v11315_v14 }
 0x937   : > { %7015 = vmatpush1.bf16.msra.mxu1 %v6976_v55  ;;  %v11324_v30 = vpop.permute.xlu0 %11323  ;;  %v15466_v22 = vpop.permute.xlu1 %11338  ;;  %v10254_v31 = vpack.c.bf16 %v7384_v17, %v7382_v1  ;;  %v10257_v58 = vpack.c.bf16 %v7383_v36, %v7381_v16 }
 0x938   : > { %v11326_v47 = vunpack.i.h.bf16 %v11324_v30  ;;  %v11325_v4 = vunpack.i.l.bf16 %v11324_v30  ;;  %7016 = vmatprep.subr.bf16.mxu1 %v6975_v28  ;;  %v11341_v41 = vunpack.i.h.bf16 %v15466_v22  ;;  %v11340_v7 = vunpack.i.l.bf16 %v15466_v22 }
 0x93a   : > { %v7144_v39 = vsel %vm1198_vm14, %v11325_v4, %v11326_v47  ;;  %10170 = vmatmul.mubr.msk.bf16.gmra.mxu1 %vm2124_vm6, %v11865_v15  ;;  %v7378_v32 = vsel %vm1349_vm1, %v11340_v7, %v11341_v41 }
 0x93b   : > { %7017 = vmatpush1.bf16.msra.mxu1 %v6974_v5  ;;  %v11334_v8 = vpop.permute.xlu0 %11333  ;;  %v11349_v46 = vpop.permute.xlu1 %11348  ;;  %v10228_v11 = vpack.c.bf16 %v7146_v12, %v7144_v39  ;;  %7034 = vmatprep.mubr.bf16.mxu1 %v16982_v60 }
 0x93c   : > { %v11336_v27 = vunpack.i.h.bf16 %v11334_v8  ;;  %v11335_v54 = vunpack.i.l.bf16 %v11334_v8  ;;  %10249 = vmatprep.subr.msk.bf16.mxu1 %vm12654_vm8, %v10248_v18  ;;  %v11351_v52 = vunpack.i.h.bf16 %v11349_v46  ;;  %v11350_v0 = vunpack.i.l.bf16 %v11349_v46 }
 0x93d   : > { %10229 = vmatprep.subr.msk.bf16.mxu0 %vm13050_vm11, %v10228_v11 }
 0x93e   : > { %v7143_v33 = vsel %vm1198_vm14, %v11335_v54, %v11325_v4  ;;  %v7145_v61 = vsel %vm1198_vm14, %v11336_v27, %v11330_v2  ;;  %v11868_v2 = vld [vmem:[#allocation3 + $0x88] sm:$0xff]   ;;  %v7377_v22 = vsel %vm1349_vm1, %v11350_v0, %v11340_v7 }
 0x93f   : > { %v10231_v25 = vpack.c.bf16 %v7145_v61, %v7143_v33  ;;  %v11344_v21 = vpop.permute.xlu0 %11343  ;;  %v11359_v3 = vpop.permute.xlu1 %11358 }
 0x940   : > { %v11346_v37 = vunpack.i.h.bf16 %v11344_v21  ;;  %v11345_v38 = vunpack.i.l.bf16 %v11344_v21  ;;  %v11361_v44 = vunpack.i.h.bf16 %v11359_v3  ;;  %v11360_v45 = vunpack.i.l.bf16 %v11359_v3 }
 0x941   : > { %10232 = vmatpush1.bf16.msk.msra.mxu0 %vm13082_vm12, %v10231_v25 }
 0x942   : > { %v7380_v34 = vsel %vm1349_vm1, %v11345_v38, %v11346_v37  ;;  %10207 = vmatmul.mubr.msk.bf16.vlgmr.msra.gmra.mxu1 %vm2124_vm6, %v11867_v57  ;;  %v7379_v23 = vsel %vm1349_vm1, %v11351_v52, %v11345_v38  ;;  %v7142_v55 = vsel %vm1198_vm14, %v11360_v45, %v11361_v44  ;;  %v11871_v38 = vld [vmem:[#allocation3 + $0xa8] sm:$0xff]  }
 0x943   : > { %10252 = vmatpush1.bf16.msk.msra.mxu1 %vm12680_vm4, %v10251_v35  ;;  %v11354_v9 = vpop.permute.xlu0 %11353  ;;  %v11369_v49 = vpop.permute.xlu1 %11368  ;;  %7044 = vmatprep.mubr.bf16.mxu1 %v16982_v60  ;;  %v10260_v53 = vpack.c.bf16 %v7380_v34, %v7378_v32  ;;  %v10263_v4 = vpack.c.bf16 %v7379_v23, %v7377_v22  ;;  %v11872_v35 = vld [vmem:[#allocation3 + $0x98] sm:$0xff]  }
 0x944   : > { %10255 = vmatprep.subr.msk.bf16.mxu1 %vm12654_vm8, %v10254_v31  ;;  %v11356_v19 = vunpack.i.h.bf16 %v11354_v9  ;;  %v11355_v10 = vunpack.i.l.bf16 %v11354_v9  ;;  %v11371_v50 = vunpack.i.h.bf16 %v11369_v49  ;;  %v11370_v5 = vunpack.i.l.bf16 %v11369_v49  ;;  %v11873_v49 = vld [vmem:[#allocation3 + $0xb0] sm:$0xff]  }
 0x946   : > { %v7140_v6 = vsel %vm1198_vm14, %v11355_v10, %v11356_v19  ;;  %v7374_v27 = vsel %vm1349_vm1, %v11370_v5, %v11371_v50  ;;  %v11875_v50 = vld [vmem:[#allocation3 + $0xb8] sm:$0xff]  }
 0x947   : > { %10258 = vmatpush1.bf16.msk.msra.mxu1 %vm12680_vm4, %v10257_v58  ;;  %v11364_v15 = vpop.permute.xlu0 %11363  ;;  %v11379_v51 = vpop.permute.xlu1 %11378  ;;  %v10234_v30 = vpack.c.bf16 %v7142_v55, %v7140_v6  ;;  %v11874_v58 = vld [vmem:[#allocation3 + $0xc0] sm:$0xff]  }
 0x948   : > { %10261 = vmatprep.subr.msk.bf16.mxu1 %vm12654_vm8, %v10260_v53  ;;  %v11366_v28 = vunpack.i.h.bf16 %v11364_v15  ;;  %v11365_v47 = vunpack.i.l.bf16 %v11364_v15  ;;  %v11380_v18 = vunpack.i.l.bf16 %v11379_v51  ;;  %v11381_v8 = vunpack.i.h.bf16 %v11379_v51 }
 0x949   : > { %10235 = vmatprep.subr.msk.bf16.mxu0 %vm13050_vm11, %v10234_v30 }
 0x94a   : > { %v7139_v12 = vsel %vm1198_vm14, %v11365_v47, %v11355_v10  ;;  %v7141_v39 = vsel %vm1198_vm14, %v11366_v28, %v11360_v45  ;;  %10208 = vmatmul.mubr.msk.bf16.gmra.mxu1 %vm2124_vm6, %v11868_v2  ;;  %v7373_v54 = vsel %vm1349_vm1, %v11380_v18, %v11370_v5  ;;  %v11876_v5 = vld [vmem:[#allocation3 + $0xc8] sm:$0xff]  }
 0x94b   : > { %v10237_v29 = vpack.c.bf16 %v7141_v39, %v7139_v12  ;;  %10264 = vmatpush1.bf16.msk.msra.mxu1 %vm12680_vm4, %v10263_v4  ;;  %v11374_v26 = vpop.permute.xlu0 %11373  ;;  %v15524_v14 = vpop.permute.xlu1 %7610  ;;  %7054 = vmatprep.mubr.bf16.mxu1 %v16982_v60 }
 0x94c   : > { %v11376_v46 = vunpack.i.h.bf16 %v11374_v26  ;;  %v11375_v11 = vunpack.i.l.bf16 %v11374_v26 }
 0x94d   : > { %10238 = vmatpush1.bf16.msk.msra.mxu0 %vm13082_vm12, %v10237_v29 }
 0x94e   : > { %v7375_v63 = vsel %vm1349_vm1, %v11381_v8, %v11375_v11  ;;  %v7376_v13 = vsel %vm1349_vm1, %v11375_v11, %v11376_v46 }
 0x94f   : > { %v10269_v42 = vpack.c.bf16 %v7375_v63, %v7373_v54  ;;  %v11384_v20 = vpop.permute.xlu0 %11383  ;;  %v11389_v33 = vpop.permute.xlu1 %11388  ;;  %v10266_v61 = vpack.c.bf16 %v7376_v13, %v7374_v27 }
 0x950   : > { %v11386_v57 = vunpack.i.h.bf16 %v11384_v20  ;;  %v11385_v17 = vunpack.i.l.bf16 %v11384_v20  ;;  %v11391_v41 = vunpack.i.h.bf16 %v11389_v33  ;;  %v11390_v7 = vunpack.i.l.bf16 %v11389_v33  ;;  %10239 = vmatmul.mubr.msk.bf16.vlgmr.msra.gmra.mxu0 %vm2124_vm6, %v11869_v62 }
 0x951   : > { %10267 = vmatprep.subr.msk.bf16.mxu1 %vm12654_vm8, %v10266_v61  ;;  %7278 = vmatprep.mubr.bf16.mxu0 %v16982_v60 }
 0x952   : > { %v7790_v25 = vsel %vm1645_vm3, %v11385_v17, %v11386_v57  ;;  %v7792_v21 = vsel %vm1645_vm3, %v11390_v7, %v11391_v41  ;;  %10209 = vmatmul.mubr.msk.bf16.gmra.mxu1 %vm2124_vm6, %v11870_v43  ;;  %v11877_v57 = vld [vmem:[#allocation3 + $0xd0] sm:$0xff]  }
 0x953   : > { %10270 = vmatpush1.bf16.msk.msra.mxu1 %vm12680_vm4, %v10269_v42  ;;  %v15542_v3 = vpop.permute.xlu0 %7606  ;;  %v11394_v59 = vpop.permute.xlu1 %11393  ;;  %v10288_v37 = vpack.c.bf16 %v7792_v21, %v7790_v25  ;;  %7064 = vmatprep.mubr.bf16.mxu1 %v16982_v60 }
 0x954   : > { %v11396_v34 = vunpack.i.h.bf16 %v11394_v59  ;;  %v11395_v44 = vunpack.i.l.bf16 %v11394_v59 }
 0x955   : > { %10289 = vmatprep.subr.msk.bf16.mxu1 %vm13050_vm11, %v10288_v37 }
 0x956   : > { %v7789_v0 = vsel %vm1645_vm3, %v11395_v44, %v11385_v17  ;;  %v7791_v19 = vsel %vm1645_vm3, %v11396_v34, %v11390_v7 }
 0x957   : > { %v15547_v1 = vpop.permute.xlu0 %7602  ;;  %v15549_v36 = vpop.permute.xlu1 %7604  ;;  %v10291_v51 = vpack.c.bf16 %v7791_v19, %v7789_v0 }
 0x958   : > { %10240 = vmatmul.mubr.msk.bf16.gmra.mxu0 %vm2124_vm6, %v11871_v38  ;;  %v7617_v61 = vsel %vm1529_vm2, %v15547_v1, %v15549_v36 }
 0x959   : > { %7288 = vmatprep.mubr.bf16.mxu0 %v16982_v60 }
 0x95a   : > { %10210 = vmatmul.mubr.msk.bf16.gmra.mxu1 %vm2124_vm6, %v11872_v35 }
 0x95b   : > { %v11399_v45 = vpop.permute.xlu0 %11398  ;;  %v11404_v31 = vpop.permute.xlu1 %11403  ;;  %7502 = vmatprep.mubr.bf16.mxu1 %v16982_v60 }
 0x95c   : > { %v11401_v16 = vunpack.i.h.bf16 %v11399_v45  ;;  %v11400_v32 = vunpack.i.l.bf16 %v11399_v45  ;;  %v11406_v52 = vunpack.i.h.bf16 %v11404_v31  ;;  %v11405_v9 = vunpack.i.l.bf16 %v11404_v31 }
 0x95e   : > { %v7786_v10 = vsel %vm1645_vm3, %v11400_v32, %v11401_v16  ;;  %v7788_v53 = vsel %vm1645_vm3, %v11405_v9, %v11406_v52 }
 0x95f   : > { %v7601_v23 = vpop.permute.xlu0 %7600  ;;  %v11409_v55 = vpop.permute.xlu1 %11408  ;;  %v10294_v15 = vpack.c.bf16 %v7788_v53, %v7786_v10 }
 0x960   : > { %v11411_v6 = vunpack.i.h.bf16 %v11409_v55  ;;  %v11410_v2 = vunpack.i.l.bf16 %v11409_v55  ;;  %10241 = vmatmul.mubr.msk.bf16.gmra.mxu0 %vm2124_vm6, %v11873_v49  ;;  %v7616_v7 = vsel %vm1529_vm2, %v7601_v23, %v15547_v1  ;;  %v11878_v1 = vld [vmem:[#allocation3 + $0xd8] sm:$0xff]   ;;  %v11880_v23 = vld [vmem:[#allocation3 + $0x100] sm:$0xff]   ;;  %v11881_v55 = vld [vmem:[#allocation3 + $0xe8] sm:$0xff]  }
 0x961   : > { %7298 = vmatprep.mubr.bf16.mxu0 %v16982_v60 }
 0x962   : > { %v7785_v30 = vsel %vm1645_vm3, %v11410_v2, %v11400_v32  ;;  %v7787_v22 = vsel %vm1645_vm3, %v11411_v6, %v11405_v9  ;;  %10271 = vmatmul.mubr.msk.bf16.vlgmr.msra.gmra.mxu1 %vm2124_vm6, %v11874_v58  ;;  %v11879_v58 = vld [vmem:[#allocation3 + $0xe0] sm:$0xff]   ;;  %v11882_v6 = vld [vmem:[#allocation3 + $0x108] sm:$0xff]   ;;  %v11883_v2 = vld [vmem:[#allocation3 + $0xf0] sm:$0xff]  }
 0x963   : > { %v10297_v28 = vpack.c.bf16 %v7787_v22, %v7785_v30  ;;  %10292 = vmatpush1.bf16.msk.msra.mxu1 %vm13082_vm12, %v10291_v51  ;;  %v7597_v47 = vpop.permute.xlu0 %7596  ;;  %v7599_v4 = vpop.permute.xlu1 %7598  ;;  %7512 = vmatprep.mubr.bf16.mxu1 %v16982_v60  ;;  %v11885_v51 = vld [vmem:[#allocation3 + $0xf8] sm:$0xff]  }
 0x964   : > { %10295 = vmatprep.subr.msk.bf16.mxu1 %vm13050_vm11, %v10294_v15  ;;  %v7615_v25 = vsel %vm1529_vm2, %v7597_v47, %v7599_v4  ;;  %v11884_v15 = vld [vmem:[#allocation3 + $0x110] sm:$0xff]   ;;  %v11886_v30 = vld [vmem:[#allocation3 + $0x118] sm:$0xff]   ;;  %v6390_v22 = vpop.f32.mrf.mxu0 }
 0x967   : > { %10298 = vmatpush1.bf16.msk.msra.mxu1 %vm13082_vm12, %v10297_v28  ;;  %v11414_v12 = vpop.permute.xlu0 %11413  ;;  %v11419_v39 = vpop.permute.xlu1 %11418 }
 0x968   : > { %v11416_v18 = vunpack.i.h.bf16 %v11414_v12  ;;  %v11415_v29 = vunpack.i.l.bf16 %v11414_v12  ;;  %v11421_v26 = vunpack.i.h.bf16 %v11419_v39  ;;  %v11420_v8 = vunpack.i.l.bf16 %v11419_v39  ;;  %10242 = vmatmul.mubr.msk.bf16.gmra.mxu0 %vm2124_vm6, %v11875_v50  ;;  %v6392_v28 = vpop.f32.mrf.mxu0 }
 0x969   : > { %7672 = vmatprep.mubr.bf16.mxu0 %v16982_v60 }
 0x96a   : > { %v7782_v46 = vsel %vm1645_vm3, %v11415_v29, %v11416_v18  ;;  %v7784_v11 = vsel %vm1645_vm3, %v11420_v8, %v11421_v26  ;;  %10272 = vmatmul.mubr.msk.bf16.gmra.mxu1 %vm2124_vm6, %v11876_v5 }
 0x96b   : > { %v7609_v62 = vpop.permute.xlu0 %7608  ;;  %v11424_v27 = vpop.permute.xlu1 %11423  ;;  %v10300_v54 = vpack.c.bf16 %v7784_v11, %v7782_v46  ;;  %7522 = vmatprep.mubr.bf16.mxu1 %v16982_v60 }
 0x96c   : > { %v11426_v63 = vunpack.i.h.bf16 %v11424_v27  ;;  %v11425_v13 = vunpack.i.l.bf16 %v11424_v27  ;;  %v7619_v43 = vsel %vm1529_vm2, %v7609_v62, %v15524_v14  ;;  %v7618_v42 = vsel %vm1529_vm2, %v15542_v3, %v7609_v62 }
 0x96d   : > { %7648 = vmatprep.subr.bf16.mxu0 %v7619_v43  ;;  %10301 = vmatprep.subr.msk.bf16.mxu1 %vm13050_vm11, %v10300_v54 }
 0x96e   : > { %v7781_v20 = vsel %vm1645_vm3, %v11425_v13, %v11415_v29  ;;  %v7783_v33 = vsel %vm1645_vm3, %v11426_v63, %v11420_v8  ;;  %7649 = vmatpush1.bf16.msra.mxu0 %v7618_v42 }
 0x96f   : > { %v10303_v17 = vpack.c.bf16 %v7783_v33, %v7781_v20  ;;  %v7595_v41 = vpop.permute.xlu0 %7594  ;;  %v7593_v14 = vpop.permute.xlu1 %7592  ;;  %7650 = vmatprep.subr.bf16.mxu0 %v7617_v61 }
 0x970   : > { %v7614_v59 = vsel %vm1529_vm2, %v7595_v41, %v7597_v47  ;;  %v6394_v47 = vpop.f32.mrf.mxu0 }
 0x971   : > { %10304 = vmatpush1.bf16.msk.msra.mxu1 %vm13082_vm12, %v10303_v17 }
 0x972   : > { %10273 = vmatmul.mubr.msk.bf16.gmra.mxu1 %vm2124_vm6, %v11877_v57  ;;  %7651 = vmatpush1.bf16.msra.mxu0 %v7616_v7  ;;  %v6396_v4 = vpop.f32.mrf.mxu0 }
 0x973   : > { %v7591_v21 = vpop.permute.xlu0 %7590  ;;  %v11434_v3 = vpop.permute.xlu1 %11433  ;;  %7652 = vmatprep.subr.bf16.mxu0 %v7615_v25  ;;  %7532 = vmatprep.mubr.bf16.mxu1 %v16982_v60 }
 0x974   : > { %v11436_v37 = vunpack.i.h.bf16 %v11434_v3  ;;  %v11435_v38 = vunpack.i.l.bf16 %v11434_v3  ;;  %v7613_v35 = vsel %vm1529_vm2, %v7591_v21, %v7593_v14  ;;  %v6400_v50 = vpop.f32.mrf.mxu0 }
 0x976   : > { %7653 = vmatpush1.bf16.msra.mxu0 %v7614_v59  ;;  %v7780_v32 = vsel %vm1645_vm3, %v11435_v38, %v11436_v37  ;;  %v6402_v5 = vpop.f32.mrf.mxu0 }
 0x977   : > { %v11429_v36 = vpop.permute.xlu0 %11428  ;;  %v11439_v34 = vpop.permute.xlu1 %11438  ;;  %7654 = vmatprep.subr.bf16.mxu0 %v7613_v35 }
 0x978   : > { %v11431_v44 = vunpack.i.h.bf16 %v11429_v36  ;;  %v11430_v45 = vunpack.i.l.bf16 %v11429_v36  ;;  %v11441_v31 = vunpack.i.h.bf16 %v11439_v34  ;;  %v11440_v16 = vunpack.i.l.bf16 %v11439_v34  ;;  %v6404_v12 = vpop.f32.mrf.mxu0 }
 0x97a   : > { %v7778_v52 = vsel %vm1645_vm3, %v11430_v45, %v11431_v44  ;;  %v7777_v9 = vsel %vm1645_vm3, %v11440_v16, %v11430_v45  ;;  %v7779_v49 = vsel %vm1645_vm3, %v11441_v31, %v11435_v38  ;;  %10274 = vmatmul.mubr.msk.bf16.gmra.mxu1 %vm2124_vm6, %v11878_v1  ;;  %v6406_v39 = vpop.f32.mrf.mxu0 }
 0x97b   : > { %v10309_v0 = vpack.c.bf16 %v7779_v49, %v7777_v9  ;;  %v7589_v19 = vpop.permute.xlu0 %7588  ;;  %v10306_v10 = vpack.c.bf16 %v7780_v32, %v7778_v52  ;;  %7906 = vmatprep.mubr.bf16.mxu1 %v16982_v60 }
 0x97c   : > { %v7612_v53 = vsel %vm1529_vm2, %v7589_v19, %v7591_v21  ;;  %v6410_v18 = vpop.f32.mrf.mxu0 }
 0x97d   : > { %7655 = vmatpush1.bf16.msra.mxu0 %v7612_v53  ;;  %10307 = vmatprep.subr.msk.bf16.mxu1 %vm13050_vm11, %v10306_v10 }
 0x97e   : > { %10310 = vmatpush1.bf16.msk.msra.mxu1 %vm13082_vm12, %v10309_v0  ;;  %v6412_v29 = vpop.f32.mrf.mxu0 }
 0x980   : > { %10279 = vmatmul.mubr.msk.bf16.vlgmr.msra.gmra.mxu0 %vm2124_vm6, %v11879_v58  ;;  %v6414_v46 = vpop.f32.mrf.mxu0 }
 0x981   : > { %7682 = vmatprep.mubr.bf16.mxu0 %v16982_v60 }
 0x982   : > { %10311 = vmatmul.mubr.msk.bf16.vlgmr.msra.gmra.mxu1 %vm2124_vm6, %v11880_v23  ;;  %v6416_v27 = vpop.f32.mrf.mxu0 }
 0x983   : > { %7916 = vmatprep.mubr.bf16.mxu1 %v16982_v60 }
 0x984   : > { %v6420_v13 = vpop.f32.mrf.mxu0 }
 0x986   : > { %v6422_v20 = vpop.f32.mrf.mxu0 }
 0x988   : > { %10280 = vmatmul.mubr.msk.bf16.gmra.mxu0 %vm2124_vm6, %v11881_v55  ;;  %v6424_v57 = vpop.f32.mrf.mxu0 }
 0x989   : > { %7692 = vmatprep.mubr.bf16.mxu0 %v16982_v60 }
 0x98a   : > { %10312 = vmatmul.mubr.msk.bf16.gmra.mxu1 %vm2124_vm6, %v11882_v6  ;;  %v6426_v14 = vpop.f32.mrf.mxu0 }
 0x98b   : > { %7926 = vmatprep.mubr.bf16.mxu1 %v16982_v60 }
 0x990   : > { %10281 = vmatmul.mubr.msk.bf16.gmra.mxu0 %vm2124_vm6, %v11883_v2 }
 0x991   : > { %7702 = vmatprep.mubr.bf16.mxu0 %v16982_v60 }
 0x992   : > { %10313 = vmatmul.mubr.msk.bf16.gmra.mxu1 %vm2124_vm6, %v11884_v15 }
 0x993   : > { %7936 = vmatprep.mubr.bf16.mxu1 %v16982_v60 }
 0x998   : > { %10282 = vmatmul.mubr.msk.bf16.gmra.mxu0 %vm2124_vm6, %v11885_v51 }
 0x999   : > { %8297 = vmatprep.mubr.bf16.mxu0 %v16982_v60 }
 0x99a   : > { %10314 = vmatmul.mubr.msk.bf16.gmra.mxu1 %vm2124_vm6, %v11886_v30 }
 0x99b   : > { %8341 = vmatprep.mubr.bf16.mxu1 %v16982_v60 }
 0x9c2   : > { %v6285_v26 = vpop.f32.mrf.mxu1 }
 0x9c3   : > { %v6391_v1 = vadd.f32 %v6390_v22, %v6285_v26 }
 0x9c4   : > { %v6287_v8 = vpop.f32.mrf.mxu1 }
 0x9c5   : > { %v6393_v45 = vadd.f32 %v6392_v28, %v6287_v8 }
 0x9c6   : > { %v6289_v11 = vpop.f32.mrf.mxu1 }
 0x9c7   : > { %v6395_v32 = vadd.f32 %v6394_v47, %v6289_v11 }
 0x9c8   : > { %v6291_v62 = vpop.f32.mrf.mxu1 }
 0x9c9   : > { %v6397_v0 = vadd.f32 %v6396_v4, %v6291_v62 }
 0x9ca   : > { %v6295_v54 = vpop.f32.mrf.mxu1 }
 0x9cb   : > { %v6401_v53 = vadd.f32 %v6400_v50, %v6295_v54 }
 0x9cc   : > { %v6297_v63 = vpop.f32.mrf.mxu1 }
 0x9cd   : > { %v6403_v6 = vadd.f32 %v6402_v5, %v6297_v63 }
 0x9ce   : > { %v6299_v43 = vpop.f32.mrf.mxu1 }
 0x9cf   : > { %v6405_v51 = vadd.f32 %v6404_v12, %v6299_v43 }
 0x9d0   : > { %v6301_v42 = vpop.f32.mrf.mxu1 }
 0x9d1   : > { %v6407_v47 = vadd.f32 %v6406_v39, %v6301_v42 }
 0x9d2   : > { %v6305_v33 = vpop.f32.mrf.mxu1 }
 0x9d3   : > { %v6411_v50 = vadd.f32 %v6410_v18, %v6305_v33 }
 0x9d4   : > { %v6307_v61 = vpop.f32.mrf.mxu1 }
 0x9d5   : > { %v6413_v5 = vadd.f32 %v6412_v29, %v6307_v61 }
 0x9d6   : > { %v6309_v17 = vpop.f32.mrf.mxu1 }
 0x9d7   : > { %v6415_v12 = vadd.f32 %v6414_v46, %v6309_v17 }
 0x9d8   : > { %v6311_v41 = vpop.f32.mrf.mxu1 }
 0x9d9   : > { %v6417_v39 = vadd.f32 %v6416_v27, %v6311_v41 }
 0x9da   : > { %v6315_v7 = vpop.f32.mrf.mxu1  ;;  %v15624_v25 = vpop.f32.mrf.mxu0 }
 0x9db   : > { %v6421_v18 = vadd.f32 %v6420_v13, %v6315_v7 }
 0x9dc   : > { %v6317_v21 = vpop.f32.mrf.mxu1  ;;  %v15626_v3 = vpop.f32.mrf.mxu0 }
 0x9dd   : > { %v6423_v29 = vadd.f32 %v6422_v20, %v6317_v21 }
 0x9de   : > { %v6319_v59 = vpop.f32.mrf.mxu1  ;;  %v15628_v37 = vpop.f32.mrf.mxu0 }
 0x9df   : > { %v6425_v46 = vadd.f32 %v6424_v57, %v6319_v59 }
 0x9e0   : > { %v6321_v38 = vpop.f32.mrf.mxu1  ;;  %v15630_v35 = vpop.f32.mrf.mxu0 }
 0x9e1   : > { %v6427_v36 = vadd.f32 %v6426_v14, %v6321_v38 }
 0x9e2   : > { %v6632_v34 = vpop.f32.mrf.mxu1  ;;  %v15632_v44 = vpop.f32.mrf.mxu0 }
 0x9e3   : > { %v15634_v31 = vadd.f32 %v6632_v34, %v6391_v1 }
 0x9e4   : > { %v6634_v16 = vpop.f32.mrf.mxu1  ;;  %v15638_v49 = vpop.f32.mrf.mxu0 }
 0x9e5   : > { %v15636_v52 = vadd.f32 %v6634_v16, %v6393_v45 }
 0x9e6   : > { %v6636_v9 = vpop.f32.mrf.mxu1  ;;  %v15644_v55 = vpop.f32.mrf.mxu0 }
 0x9e7   : > { %v15640_v19 = vadd.f32 %v6636_v9, %v6395_v32 }
 0x9e8   : > { %v6638_v10 = vpop.f32.mrf.mxu1  ;;  %v15650_v28 = vpop.f32.mrf.mxu0 }
 0x9e9   : > { %v15642_v58 = vadd.f32 %v6638_v10, %v6397_v0 }
 0x9ea   : > { %v6642_v23 = vpop.f32.mrf.mxu1  ;;  %v15656_v62 = vpop.f32.mrf.mxu0 }
 0x9eb   : > { %v15646_v2 = vadd.f32 %v6642_v23, %v6401_v53 }
 0x9ec   : > { %v6644_v15 = vpop.f32.mrf.mxu1  ;;  %v15662_v38 = vpop.f32.mrf.mxu0 }
 0x9ed   : > { %v15648_v30 = vadd.f32 %v6644_v15, %v6403_v6 }
 0x9ee   : > { %v6646_v22 = vpop.f32.mrf.mxu1  ;;  %v15668_v34 = vpop.f32.mrf.mxu0 }
 0x9ef   : > { %v15652_v4 = vadd.f32 %v6646_v22, %v6405_v51 }
 0x9f0   : > { %v6648_v26 = vpop.f32.mrf.mxu1  ;;  %v15674_v32 = vpop.f32.mrf.mxu0 }
 0x9f1   : > { %v15654_v8 = vadd.f32 %v6648_v26, %v6407_v47 }
 0x9f2   : > { %v6652_v11 = vpop.f32.mrf.mxu1  ;;  %v15680_v13 = vpop.f32.mrf.mxu0 }
 0x9f3   : > { %v15658_v54 = vadd.f32 %v6652_v11, %v6411_v50  ;;  %16989 = vst [vmem:[#allocation22_spill] sm:$0xff] %v15680_v13  ;;  %v6905_v13 = vadd.f32 %v15624_v25, %v15634_v31 }
 0x9f4   : > { %v6654_v63 = vpop.f32.mrf.mxu1  ;;  %v15682_v53 = vpop.f32.mrf.mxu0 }
 0x9f5   : > { %v15660_v43 = vadd.f32 %v6654_v63, %v6413_v5  ;;  %16990 = vst [vmem:[#allocation28_spill] sm:$0xff] %v15682_v53  ;;  %v15744_v53 = vpop.permute.xlu1 %8008 }
 0x9f6   : > { %v6656_v14 = vpop.f32.mrf.mxu1  ;;  %v15686_v57 = vpop.f32.mrf.mxu0  ;;  %17004 = vst [vmem:[#allocation25_spill] sm:$0xff] %v15744_v53  ;;  %v6906_v53 = vadd.f32 %v15626_v3, %v15636_v52  ;;  %v6909_v52 = vadd.f32 %v15632_v44, %v15646_v2 }
 0x9f7   : > { %v15664_v42 = vadd.f32 %v6656_v14, %v6415_v12  ;;  %16991 = vst [vmem:[#allocation7_spill] sm:$0xff] %v15686_v57 }
 0x9f8   : > { %v6658_v1 = vpop.f32.mrf.mxu1  ;;  %v15692_v6 = vpop.f32.mrf.mxu0 }
 0x9f9   : > { %v15666_v33 = vadd.f32 %v6658_v1, %v6417_v39  ;;  %16992 = vst [vmem:[#allocation36_spill] sm:$0xff] %v15692_v6 }
 0x9fa   : > { %v6662_v45 = vpop.f32.mrf.mxu1 }
 0x9fb   : > { %v15670_v61 = vadd.f32 %v6662_v45, %v6421_v18 }
 0x9fc   : > { %v6664_v16 = vpop.f32.mrf.mxu1 }
 0x9fd   : > { %16985 = vst [vmem:[#allocation13_spill] sm:$0xff] %v15670_v61  ;;  %v15672_v17 = vadd.f32 %v6664_v16, %v6423_v29  ;;  %v15760_v61 = vpop.permute.xlu1 %7998 }
 0x9fe   : > { %v6666_v9 = vpop.f32.mrf.mxu1  ;;  %17011 = vst [vmem:[#allocation6_spill] sm:$0xff] %v15760_v61  ;;  %v6908_v61 = vadd.f32 %v15630_v35, %v15642_v58 }
 0x9ff   : > { %16986 = vst [vmem:[#allocation27_spill] sm:$0xff] %v15672_v17  ;;  %v15676_v27 = vadd.f32 %v6666_v9, %v6425_v46 }
 0xa00   : > { %v6668_v41 = vpop.f32.mrf.mxu1 }
 0xa01   : > { %16987 = vst [vmem:[#allocation32_spill] sm:$0xff] %v15676_v27  ;;  %v15678_v0 = vadd.f32 %v6668_v41, %v6427_v36 }
 0xa02   : > { %v7036_v7 = vpop.f32.mrf.mxu1 }
 0xa03   : > { %16988 = vst [vmem:[#allocation37_spill] sm:$0xff] %v15678_v0 }
 0xa04   : > { %v7038_v10 = vpop.f32.mrf.mxu1 }
 0xa06   : > { %v7040_v20 = vpop.f32.mrf.mxu1 }
 0xa08   : > { %v15684_v21 = vpop.f32.mrf.mxu1 }
 0xa0a   : > { %v15688_v59 = vpop.f32.mrf.mxu1 }
 0xa0b   : > { %v7079_v35 = vadd.f32 %v15688_v59, %v6909_v52 }
 0xa0c   : > { %v15690_v23 = vpop.f32.mrf.mxu1 }
 0xa0e   : > { %v15694_v15 = vpop.f32.mrf.mxu1 }
 0xa10   : > { %v15696_v36 = vpop.f32.mrf.mxu1  ;;  %v7270_v51 = vpop.f32.mrf.mxu0 }
 0xa12   : > { %v15698_v22 = vpop.f32.mrf.mxu1  ;;  %v7272_v47 = vpop.f32.mrf.mxu0 }
 0xa14   : > { %v15700_v26 = vpop.f32.mrf.mxu1  ;;  %v7274_v50 = vpop.f32.mrf.mxu0 }
 0xa16   : > { %v15702_v11 = vpop.f32.mrf.mxu1  ;;  %v7276_v5 = vpop.f32.mrf.mxu0 }
 0xa18   : > { %v15704_v63 = vpop.f32.mrf.mxu1  ;;  %v15706_v12 = vpop.f32.mrf.mxu0 }
 0xa19   : > { %16993 = vst [vmem:[#allocation10_spill] sm:$0xff] %v15704_v63 }
 0xa1a   : > { %v15708_v14 = vpop.f32.mrf.mxu1  ;;  %v15710_v39 = vpop.f32.mrf.mxu0 }
 0xa1b   : > { %16994 = vst [vmem:[#allocation9_spill] sm:$0xff] %v15708_v14 }
 0xa1c   : > { %v15712_v1 = vpop.f32.mrf.mxu1  ;;  %v15714_v18 = vpop.f32.mrf.mxu0 }
 0xa1d   : > { %16995 = vst [vmem:[#allocation8_spill] sm:$0xff] %v15712_v1 }
 0xa1e   : > { %v15716_v45 = vpop.f32.mrf.mxu1  ;;  %v15718_v29 = vpop.f32.mrf.mxu0 }
 0xa1f   : > { %16996 = vst [vmem:[#allocation40_spill] sm:$0xff] %v15716_v45 }
 0xa20   : > { %v15720_v16 = vpop.f32.mrf.mxu1  ;;  %v15722_v46 = vpop.f32.mrf.mxu0 }
 0xa21   : > { %16997 = vst [vmem:[#allocation30_spill] sm:$0xff] %v15720_v16  ;;  %v15736_v16 = vpop.permute.xlu0 %8003 }
 0xa22   : > { %v7504_v9 = vpop.f32.mrf.mxu1  ;;  %v15724_v40 = vpop.f32.mrf.mxu0  ;;  %17000 = vst [vmem:[#allocation39_spill] sm:$0xff] %v15736_v16 }
 0xa24   : > { %v7506_v41 = vpop.f32.mrf.mxu1  ;;  %v15726_v48 = vpop.f32.mrf.mxu0 }
 0xa25   : > { %16998 = vst [vmem:[#allocation17_spill] sm:$0xff] %v15726_v48  ;;  %v15750_v63 = vpop.permute.xlu0 %7993 }
 0xa26   : > { %v7508_v56 = vpop.f32.mrf.mxu1  ;;  %v15730_v0 = vpop.f32.mrf.mxu0  ;;  %17007 = vst [vmem:[#allocation31_spill] sm:$0xff] %v15750_v63  ;;  %v6907_v63 = vadd.f32 %v15628_v37, %v15640_v19  ;;  %v7078_v37 = vadd.f32 %v15684_v21, %v6908_v61  ;;  %v7313_v21 = vadd.f32 %v15706_v12, %v7079_v35 }
 0xa27   : > { %16999 = vst [vmem:[#allocation20_spill] sm:$0xff] %v15730_v0 }
 0xa28   : > { %v7510_v60 = vpop.f32.mrf.mxu1  ;;  %v15738_v57 = vpop.f32.mrf.mxu0 }
 0xa29   : > { %17001 = vst [vmem:[#allocation29_spill] sm:$0xff] %v15738_v57 }
 0xa2a   : > { %v7514_v24 = vpop.f32.mrf.mxu1  ;;  %v15746_v17 = vpop.f32.mrf.mxu0 }
 0xa2b   : > { %17005 = vst [vmem:[#allocation41_spill] sm:$0xff] %v15746_v17 }
 0xa2c   : > { %v15728_v6 = vpop.f32.mrf.mxu1  ;;  %v15756_v16 = vpop.f32.mrf.mxu0 }
 0xa2d   : > { %17009 = vst [vmem:[#allocation38_spill] sm:$0xff] %v15756_v16  ;;  %v7077_v16 = vadd.f32 %v7040_v20, %v6907_v63  ;;  %v7312_v20 = vadd.f32 %v7276_v5, %v7078_v37  ;;  %v6911_v63 = vadd.f32 %v15644_v55, %v15652_v4 }
 0xa2e   : > { %v15732_v45 = vpop.f32.mrf.mxu1  ;;  %v15770_v25 = vpop.f32.mrf.mxu0 }
 0xa2f   : > { %v7311_v19 = vadd.f32 %v7274_v50, %v7077_v16  ;;  %v6912_v16 = vadd.f32 %v15650_v28, %v15654_v8 }
 0xa30   : > { %v15734_v1 = vpop.f32.mrf.mxu1 }
 0xa31   : > { %v7545_v44 = vadd.f32 %v7508_v56, %v7311_v19  ;;  %v7081_v56 = vadd.f32 %v15694_v15, %v6911_v63  ;;  %v6916_v63 = vadd.f32 %v15674_v32, %v15666_v33  ;;  %v17017_v32 = vld [vmem:[#allocation17_spill] sm:$0xff] }
 0xa32   : > { %v15740_v27 = vpop.f32.mrf.mxu1 }
 0xa33   : > { %17002 = vst [vmem:[#allocation15_spill] sm:$0xff] %v15740_v27  ;;  %v7315_v37 = vadd.f32 %v15714_v18, %v7081_v56 }
 0xa34   : > { %v15742_v14 = vpop.f32.mrf.mxu1 }
 0xa35   : > { %17003 = vst [vmem:[#allocation12_spill] sm:$0xff] %v15742_v14  ;;  %v7075_v14 = vadd.f32 %v7036_v7, %v6905_v13 }
 0xa36   : > { %v15748_v48 = vpop.f32.mrf.mxu1 }
 0xa37   : > { %17006 = vst [vmem:[#allocation21_spill] sm:$0xff] %v15748_v48  ;;  %v15766_v48 = vpop.permute.xlu0 %7983  ;;  %v7309_v27 = vadd.f32 %v7270_v51, %v7075_v14  ;;  %v6910_v51 = vadd.f32 %v15638_v49, %v15648_v30  ;;  %v7546_v14 = vadd.f32 %v7510_v60, %v7312_v20  ;;  %v6913_v60 = vadd.f32 %v15656_v62, %v15658_v54 }
 0xa38   : > { %v15752_v0 = vpop.f32.mrf.mxu1  ;;  %v7549_v54 = vadd.f32 %v15732_v45, %v7315_v37 }
 0xa39   : > { %17008 = vst [vmem:[#allocation34_spill] sm:$0xff] %v15752_v0  ;;  %v7076_v0 = vadd.f32 %v7038_v10, %v6906_v53  ;;  %v7543_v3 = vadd.f32 %v7504_v9, %v7309_v27  ;;  %v7080_v61 = vadd.f32 %v15690_v23, %v6910_v51  ;;  %v7547_v9 = vadd.f32 %v7514_v24, %v7313_v21 }
 0xa3a   : > { %v15758_v57 = vpop.f32.mrf.mxu1  ;;  %v7083_v51 = vadd.f32 %v15698_v22, %v6913_v60 }
 0xa3b   : > { %17010 = vst [vmem:[#allocation35_spill] sm:$0xff] %v15758_v57  ;;  %v7310_v57 = vadd.f32 %v7272_v47, %v7076_v0  ;;  %v7974_v0 = vpop.permute.xlu0 %7973  ;;  %v7314_v5 = vadd.f32 %v15710_v39, %v7080_v61 }
 0xa3c   : > { %v15764_v17 = vpop.f32.mrf.mxu1  ;;  %v17018_v56 = vld [vmem:[#allocation12_spill] sm:$0xff] }
 0xa3d   : > { %17012 = vst [vmem:[#allocation11_spill] sm:$0xff] %v15764_v17  ;;  %v15780_v17 = vpop.permute.xlu1 %7988  ;;  %v7544_v10 = vadd.f32 %v7506_v41, %v7310_v57  ;;  %v7548_v28 = vadd.f32 %v15728_v6, %v7314_v5 }
 0xa3e   : > { %v15772_v31 = vpop.f32.mrf.mxu1 }
 0xa40   : > { %v15778_v13 = vpop.f32.mrf.mxu1  ;;  %v7674_v7 = vpop.f32.mrf.mxu0 }
 0xa41   : > { %v7713_v53 = vadd.f32 %v7674_v7, %v7543_v3  ;;  %v7979_v4 = vpop.permute.xlu1 %7978  ;;  %v7082_v7 = vadd.f32 %v15696_v36, %v6912_v16  ;;  %v17016_v16 = vld [vmem:[#allocation10_spill] sm:$0xff] }
 0xa42   : > { %v7908_v58 = vpop.f32.mrf.mxu1  ;;  %v7676_v27 = vpop.f32.mrf.mxu0  ;;  %v7086_v33 = vadd.f32 %v17016_v16, %v6916_v63 }
 0xa43   : > { %v7947_v2 = vadd.f32 %v7908_v58, %v7713_v53  ;;  %v7714_v47 = vadd.f32 %v7676_v27, %v7544_v10  ;;  %v6914_v53 = vadd.f32 %v15662_v38, %v15660_v43  ;;  %v7316_v62 = vadd.f32 %v15718_v29, %v7082_v7  ;;  %v17022_v7 = vld [vmem:[#allocation20_spill] sm:$0xff] }
 0xa44   : > { %v7910_v57 = vpop.f32.mrf.mxu1  ;;  %v7678_v50 = vpop.f32.mrf.mxu0  ;;  %v7317_v43 = vadd.f32 %v15722_v46, %v7083_v51  ;;  %v7320_v37 = vadd.f32 %v17022_v7, %v7086_v33  ;;  %v17024_v51 = vld [vmem:[#allocation32_spill] sm:$0xff]  ;;  %v17037_v33 = vld [vmem:[#allocation11_spill] sm:$0xff] }
 0xa45   : > { %v8011_v49 = vadd.f32 %v7974_v0, %v7947_v2  ;;  %v7948_v30 = vadd.f32 %v7910_v57, %v7714_v47  ;;  %v7715_v59 = vadd.f32 %v7678_v50, %v7545_v44  ;;  %v7084_v20 = vadd.f32 %v15700_v26, %v6914_v53  ;;  %v17013_v26 = vld [vmem:[#allocation15_spill] sm:$0xff] }
 0xa46   : > { %v7912_v41 = vpop.f32.mrf.mxu1  ;;  %v7680_v55 = vpop.f32.mrf.mxu0  ;;  %v7550_v38 = vadd.f32 %v15734_v1, %v7316_v62  ;;  %v7551_v46 = vadd.f32 %v17013_v26, %v7317_v43  ;;  %v17025_v62 = vld [vmem:[#allocation7_spill] sm:$0xff] }
 0xa47   : > { %v8027_v23 = vmax.f32 %v8011_v49, 0.0  ;;  %v8012_v3 = vadd.f32 %v7974_v0, %v7948_v30  ;;  %v7949_v12 = vadd.f32 %v7912_v41, %v7715_v59  ;;  %v7716_v52 = vadd.f32 %v7680_v55, %v7546_v14  ;;  %v17014_v49 = vld [vmem:[#allocation13_spill] sm:$0xff]  ;;  %v17015_v30 = vld [vmem:[#allocation22_spill] sm:$0xff]  ;;  %v17034_v26 = vld [vmem:[#allocation35_spill] sm:$0xff] }
 0xa48   : > { %v7914_v8 = vpop.f32.mrf.mxu1  ;;  %v7684_v15 = vpop.f32.mrf.mxu0  ;;  %v6915_v0 = vadd.f32 %v15668_v34, %v15664_v42  ;;  %v7318_v34 = vadd.f32 %v15724_v40, %v7084_v20  ;;  %v6917_v59 = vadd.f32 %v17015_v30, %v17014_v49  ;;  %v17035_v49 = vld [vmem:[#allocation30_spill] sm:$0xff] }
 0xa49   : > { %v8028_v39 = vmax.f32 %v8012_v3, 0.0  ;;  %v8013_v24 = vadd.f32 %v7979_v4, %v7949_v12  ;;  %v7950_v19 = vadd.f32 %v7914_v8, %v7716_v52  ;;  %v7717_v10 = vadd.f32 %v7684_v15, %v7547_v9  ;;  %8059 = vrot.lane.b32.xlu0 %v8027_v23, %s11929_s12  ;;  %v17019_v23 = vld [vmem:[#allocation27_spill] sm:$0xff]  ;;  %v17020_v3 = vld [vmem:[#allocation28_spill] sm:$0xff]  ;;  %v17021_v52 = vld [vmem:[#allocation9_spill] sm:$0xff] }
 0xa4a   : > { %v7686_v36 = vpop.f32.mrf.mxu0  ;;  %v7918_v18 = vpop.f32.mrf.mxu1  ;;  %v7085_v42 = vadd.f32 %v15702_v11, %v6915_v0  ;;  %v7552_v40 = vadd.f32 %v17018_v56, %v7318_v34  ;;  %v6918_v12 = vadd.f32 %v17020_v3, %v17019_v23  ;;  %v7087_v60 = vadd.f32 %v17021_v52, %v6917_v59  ;;  %v17036_v59 = vld [vmem:[#allocation38_spill] sm:$0xff] }
 0xa4b   : > { %v8029_v6 = vmax.f32 %v8013_v24, 0.0  ;;  %v8014_v35 = vadd.f32 %v7979_v4, %v7950_v19  ;;  %v7718_v58 = vadd.f32 %v7686_v36, %v7548_v28  ;;  %v7951_v27 = vadd.f32 %v7918_v18, %v7717_v10  ;;  %8061 = vrot.lane.b32.xlu1 %v8028_v39, %s11929_s12  ;;  %v17023_v28 = vld [vmem:[#allocation21_spill] sm:$0xff]  ;;  %v17026_v36 = vld [vmem:[#allocation8_spill] sm:$0xff] }
 0xa4c   : > { %v7688_v22 = vpop.f32.mrf.mxu0  ;;  %v7920_v29 = vpop.f32.mrf.mxu1  ;;  %v7319_v11 = vadd.f32 %v17017_v32, %v7085_v42  ;;  %v7088_v18 = vadd.f32 %v17026_v36, %v6918_v12  ;;  %v17033_v42 = vld [vmem:[#allocation41_spill] sm:$0xff] }
 0xa4d   : > { %v8030_v45 = vmax.f32 %v8014_v35, 0.0  ;;  %v8015_v44 = vadd.f32 %v15766_v48, %v7951_v27  ;;  %v7719_v2 = vadd.f32 %v7688_v22, %v7549_v54  ;;  %v7952_v47 = vadd.f32 %v7920_v29, %v7718_v58  ;;  %8063 = vrot.lane.b32.xlu0 %v8029_v6, %s11929_s12  ;;  %v17027_v6 = vld [vmem:[#allocation29_spill] sm:$0xff]  ;;  %v17028_v58 = vld [vmem:[#allocation34_spill] sm:$0xff] }
 0xa4e   : > { %v7690_v61 = vpop.f32.mrf.mxu0  ;;  %v7922_v1 = vpop.f32.mrf.mxu1  ;;  %v7553_v8 = vadd.f32 %v17023_v28, %v7319_v11  ;;  %v6919_v54 = vadd.f32 %v17025_v62, %v17024_v51  ;;  %v7321_v35 = vadd.f32 %v17027_v6, %v7087_v60  ;;  %v7554_v27 = vadd.f32 %v17028_v58, %v7320_v37 }
 0xa4f   : > { %v8031_v21 = vmax.f32 %v8015_v44, 0.0  ;;  %v8016_v57 = vadd.f32 %v15766_v48, %v7952_v47  ;;  %v7720_v50 = vadd.f32 %v7690_v61, %v7550_v38  ;;  %v7953_v14 = vadd.f32 %v7922_v1, %v7719_v2  ;;  %8065 = vrot.lane.b32.xlu1 %v8030_v45, %s11929_s12  ;;  %v17029_v38 = vld [vmem:[#allocation31_spill] sm:$0xff]  ;;  %v17030_v45 = vld [vmem:[#allocation37_spill] sm:$0xff]  ;;  %v17031_v44 = vld [vmem:[#allocation36_spill] sm:$0xff] }
 0xa50   : > { %v7694_v5 = vpop.f32.mrf.mxu0  ;;  %v7924_v9 = vpop.f32.mrf.mxu1  ;;  %v6920_v2 = vadd.f32 %v17031_v44, %v17030_v45  ;;  %v17032_v47 = vld [vmem:[#allocation40_spill] sm:$0xff]  ;;  %v7322_v34 = vadd.f32 %v17033_v42, %v7088_v18  ;;  %v17040_v18 = vld [vmem:[#allocation25_spill] sm:$0xff] }
 0xa51   : > { %v8032_v41 = vmax.f32 %v8016_v57, 0.0  ;;  %v8017_v55 = vadd.f32 %v15780_v17, %v7953_v14  ;;  %v7721_v4 = vadd.f32 %v7694_v5, %v7551_v46  ;;  %v7954_v48 = vadd.f32 %v7924_v9, %v7720_v50  ;;  %8067 = vrot.lane.b32.xlu0 %v8031_v21, %s11929_s12  ;;  %v17038_v5 = vld [vmem:[#allocation6_spill] sm:$0xff] }
 0xa52   : > { %v7696_v15 = vpop.f32.mrf.mxu0  ;;  %v7928_v39 = vpop.f32.mrf.mxu1  ;;  %v7089_v63 = vadd.f32 %v17032_v47, %v6919_v54  ;;  %v7555_v46 = vadd.f32 %v17034_v26, %v7321_v35  ;;  %v7090_v30 = vadd.f32 %v17035_v49, %v6920_v2  ;;  %v7556_v32 = vadd.f32 %v17037_v33, %v7322_v34 }
 0xa53   : > { %v8033_v24 = vmax.f32 %v8017_v55, 0.0  ;;  %v8018_v19 = vadd.f32 %v15780_v17, %v7954_v48  ;;  %v7722_v10 = vadd.f32 %v7696_v15, %v7552_v40  ;;  %v7955_v53 = vadd.f32 %v7928_v39, %v7721_v4  ;;  %8069 = vrot.lane.b32.xlu1 %v8032_v41, %s11929_s12  ;;  %v17039_v39 = vld [vmem:[#allocation39_spill] sm:$0xff] }
 0xa54   : > { %v7698_v0 = vpop.f32.mrf.mxu0  ;;  %v7930_v20 = vpop.f32.mrf.mxu1  ;;  %v7323_v16 = vadd.f32 %v17036_v59, %v7089_v63  ;;  %v7324_v4 = vadd.f32 %v15770_v25, %v7090_v30 }
 0xa55   : > { %v8034_v43 = vmax.f32 %v8018_v19, 0.0  ;;  %v8019_v22 = vadd.f32 %v17029_v38, %v7955_v53  ;;  %v7723_v29 = vadd.f32 %v7698_v0, %v7553_v8  ;;  %v7956_v17 = vadd.f32 %v7930_v20, %v7722_v10  ;;  %8071 = vrot.lane.b32.xlu0 %v8033_v24, %s11929_s12 }
 0xa56   : > { %v7700_v61 = vpop.f32.mrf.mxu0  ;;  %v7932_v1 = vpop.f32.mrf.mxu1  ;;  %v7557_v48 = vadd.f32 %v15772_v31, %v7323_v16  ;;  %v7558_v37 = vadd.f32 %v15778_v13, %v7324_v4 }
 0xa57   : > { %v8035_v21 = vmax.f32 %v8019_v22, 0.0  ;;  %v8020_v57 = vadd.f32 %v17029_v38, %v7956_v17  ;;  %v7724_v50 = vadd.f32 %v7700_v61, %v7554_v27  ;;  %v7957_v14 = vadd.f32 %v7932_v1, %v7723_v29  ;;  %8073 = vrot.lane.b32.xlu1 %v8034_v43, %s11929_s12 }
 0xa58   : > { %v7704_v11 = vpop.f32.mrf.mxu0  ;;  %v7934_v56 = vpop.f32.mrf.mxu1 }
 0xa59   : > { %v8036_v40 = vmax.f32 %v8020_v57, 0.0  ;;  %v8021_v9 = vadd.f32 %v17038_v5, %v7957_v14  ;;  %v7725_v41 = vadd.f32 %v7704_v11, %v7555_v46  ;;  %v7958_v55 = vadd.f32 %v7934_v56, %v7724_v50  ;;  %8075 = vrot.lane.b32.xlu0 %v8035_v21, %s11929_s12 }
 0xa5a   : > { %v7706_v23 = vpop.f32.mrf.mxu0  ;;  %v7938_v3 = vpop.f32.mrf.mxu1 }
 0xa5b   : > { %v8037_v12 = vmax.f32 %v8021_v9, 0.0  ;;  %v8022_v52 = vadd.f32 %v17038_v5, %v7958_v55  ;;  %v7726_v60 = vadd.f32 %v7706_v23, %v7556_v32  ;;  %v7959_v7 = vadd.f32 %v7938_v3, %v7725_v41  ;;  %8077 = vrot.lane.b32.xlu1 %v8036_v40, %s11929_s12 }
 0xa5c   : > { %v7708_v28 = vpop.f32.mrf.mxu0  ;;  %v7940_v8 = vpop.f32.mrf.mxu1 }
 0xa5d   : > { %v8038_v15 = vmax.f32 %v8022_v52, 0.0  ;;  %v8023_v24 = vadd.f32 %v17039_v39, %v7959_v7  ;;  %v7727_v19 = vadd.f32 %v7708_v28, %v7557_v48  ;;  %v7960_v25 = vadd.f32 %v7940_v8, %v7726_v60  ;;  %8079 = vrot.lane.b32.xlu0 %v8037_v12, %s11929_s12 }
 0xa5e   : > { %v7710_v31 = vpop.f32.mrf.mxu0  ;;  %v7942_v10 = vpop.f32.mrf.mxu1 }
 0xa5f   : > { %v8039_v53 = vmax.f32 %v8023_v24, 0.0  ;;  %v8024_v51 = vadd.f32 %v17039_v39, %v7960_v25  ;;  %v7728_v62 = vadd.f32 %v7710_v31, %v7558_v37  ;;  %v7961_v54 = vadd.f32 %v7942_v10, %v7727_v19  ;;  %8081 = vrot.lane.b32.xlu1 %v8038_v15, %s11929_s12 }
 0xa60   : > { %v7944_v36 = vpop.f32.mrf.mxu1 }
 0xa61   : > { %v8040_v13 = vmax.f32 %v8024_v51, 0.0  ;;  %v8025_v6 = vadd.f32 %v17040_v18, %v7961_v54  ;;  %v7962_v35 = vadd.f32 %v7944_v36, %v7728_v62  ;;  %8083 = vrot.lane.b32.xlu0 %v8039_v53, %s11929_s12 }
 0xa63   : > { %v8041_v58 = vmax.f32 %v8025_v6, 0.0  ;;  %v8026_v27 = vadd.f32 %v17040_v18, %v7962_v35  ;;  %8085 = vrot.lane.b32.xlu1 %v8040_v13, %s11929_s12 }
 0xa65   : > { %v8042_v0 = vmax.f32 %v8026_v27, 0.0  ;;  %8087 = vrot.lane.b32.xlu0 %v8041_v58, %s11929_s12 }
 0xa67   : > { %8089 = vrot.lane.b32.xlu1 %v8042_v0, %s11929_s12 }
 0xabb   : > { %v8060_v20 = vpop.permute.xlu0 %8059 }
 0xabc   : > { %8123 = vst.msk [vmem:[#allocation2] sm:$0xff] %vm1950_vm5, %v8060_v20 }
 0xabd   : > { %v8062_v43 = vpop.permute.xlu1 %8061 }
 0xabe   : > { %v15870_v38 = vsel %vm403_vm0, %v8060_v20, %v8062_v43  ;;  %8125 = vst.msk [vmem:[#allocation2 + $0x10] sm:$0xff] %vm403_vm0, %v8062_v43  ;;  %v8179_v43 = vld [vmem:[%s16732_s9] sm:$0x3] }
 0xabf   : > { %8124 = vst [vmem:[#allocation2 + $0x8] sm:$0xff] %v15870_v38  ;;  %v8064_v22 = vpop.permute.xlu0 %8063 }
 0xac0   : > { %8126 = vst.msk [vmem:[#allocation2 + $0x18] sm:$0xff] %vm1950_vm5, %v8064_v22 }
 0xac1   : > { %v8066_v29 = vpop.permute.xlu1 %8065 }
 0xac2   : > { %v8092_v17 = vsel %vm403_vm0, %v8064_v22, %v8066_v29  ;;  %8128 = vst.msk [vmem:[#allocation2 + $0x28] sm:$0xff] %vm403_vm0, %v8066_v29 }
 0xac3   : > { %v8068_v45 = vpop.permute.xlu0 %8067  ;;  %v8147_v34 = vld [vmem:[#allocation2] sm:$0xff]  ;;  %v15955_v28 = vpack.c.bf16 %v8092_v17, %v15870_v38 }
 0xac4   : > { %8129 = vst.msk [vmem:[#allocation2 + $0x30] sm:$0xff] %vm1950_vm5, %v8068_v45 }
 0xac5   : > { %v8070_v44 = vpop.permute.xlu1 %8069  ;;  %v8188_v2 = vld [vmem:[#allocation2 + $0x10] sm:$0xff] }
 0xac6   : > { %v15879_v47 = vsel %vm403_vm0, %v8068_v45, %v8070_v44  ;;  %8131 = vst.msk [vmem:[#allocation2 + $0x40] sm:$0xff] %vm403_vm0, %v8070_v44  ;;  %v15883_v63 = vpack.i.bf16 %v8188_v2, %v15870_v38  ;;  %v17043_v38 = vmov 0  }
 0xac7   : > { %v8072_v42 = vpop.permute.xlu0 %8071  ;;  %v8149_v26 = vld [vmem:[#allocation2 + $0x18] sm:$0xff] }
 0xac8   : > { %8132 = vst.msk [vmem:[#allocation2 + $0x48] sm:$0xff] %vm1950_vm5, %v8072_v42  ;;  %11443 = vrot.lane.b32.xlu1 %v15883_v63, %s11932_s14  ;;  %v15888_v46 = vpack.i.bf16 %v8149_v26, %v8147_v34  ;;  %v15927_v41 = vpack.c.bf16 %v8149_v26, %v8147_v34 }
 0xac9   : > { %v8074_v61 = vpop.permute.xlu1 %8073  ;;  %v8189_v1 = vld [vmem:[#allocation2 + $0x28] sm:$0xff] }
 0xaca   : > { %v15891_v21 = vsel %vm403_vm0, %v8072_v42, %v8074_v61  ;;  %8134 = vst.msk [vmem:[#allocation2 + $0x58] sm:$0xff] %vm403_vm0, %v8074_v61  ;;  %v15894_v57 = vpack.i.bf16 %v8189_v1, %v8092_v17  ;;  %v15916_v56 = vpack.c.bf16 %v8189_v1, %v8188_v2 }
 0xacb   : > { %v8076_v50 = vpop.permute.xlu0 %8075  ;;  %v8151_v16 = vld [vmem:[#allocation2 + $0x30] sm:$0xff]  ;;  %v15985_v53 = vpack.c.bf16 %v15891_v21, %v15879_v47 }
 0xacc   : > { %8135 = vst.msk [vmem:[#allocation2 + $0x60] sm:$0xff] %vm1950_vm5, %v8076_v50  ;;  %11448 = vrot.lane.b32.xlu1 %v15883_v63, %s11933_s15  ;;  %11463 = vrot.lane.b32.xlu0 %v15894_v57, %s11932_s14 }
 0xacd   : > { %v8078_v14 = vpop.permute.xlu1 %8077  ;;  %v8190_v4 = vld [vmem:[#allocation2 + $0x40] sm:$0xff] }
 0xace   : > { %v15902_v49 = vsel %vm403_vm0, %v8076_v50, %v8078_v14  ;;  %8137 = vst.msk [vmem:[#allocation2 + $0x70] sm:$0xff] %vm403_vm0, %v8078_v14  ;;  %v15941_v60 = vpack.i.bf16 %v8190_v4, %v15879_v47 }
 0xacf   : > { %v8080_v30 = vpop.permute.xlu0 %8079  ;;  %v8153_v59 = vld [vmem:[#allocation2 + $0x48] sm:$0xff] }
 0xad0   : > { %8138 = vst.msk [vmem:[#allocation2 + $0x78] sm:$0xff] %vm1950_vm5, %v8080_v30  ;;  %11453 = vrot.lane.b32.xlu1 %v15888_v46, %s11932_s14  ;;  %11468 = vrot.lane.b32.xlu0 %v15894_v57, %s11933_s15  ;;  %v15910_v32 = vpack.i.bf16 %v8153_v59, %v8151_v16  ;;  %v15969_v25 = vpack.c.bf16 %v8153_v59, %v8151_v16 }
 0xad1   : > { %v8082_v33 = vpop.permute.xlu1 %8081  ;;  %v8191_v51 = vld [vmem:[#allocation2 + $0x58] sm:$0xff] }
 0xad2   : > { %v15913_v11 = vsel %vm403_vm0, %v8080_v30, %v8082_v33  ;;  %8140 = vst.msk [vmem:[#allocation2 + $0x88] sm:$0xff] %vm403_vm0, %v8082_v33  ;;  %v15998_v62 = vpack.i.bf16 %v8191_v51, %v15891_v21  ;;  %v16010_v54 = vpack.c.bf16 %v8191_v51, %v8190_v4 }
 0xad3   : > { %v8084_v40 = vpop.permute.xlu0 %8083  ;;  %v8155_v23 = vld [vmem:[#allocation2 + $0x60] sm:$0xff]  ;;  %v15965_v24 = vpack.c.bf16 %v15913_v11, %v15902_v49 }
 0xad4   : > { %8141 = vst.msk [vmem:[#allocation2 + $0x90] sm:$0xff] %vm1950_vm5, %v8084_v40  ;;  %11458 = vrot.lane.b32.xlu1 %v15888_v46, %s11933_s15  ;;  %8226 = vrot.lane.b32.xlu0 %v15916_v56, %s11930_s13 }
 0xad5   : > { %v8086_v5 = vpop.permute.xlu1 %8085  ;;  %v8192_v36 = vld [vmem:[#allocation2 + $0x70] sm:$0xff] }
 0xad6   : > { %v15924_v9 = vsel %vm403_vm0, %v8084_v40, %v8086_v5  ;;  %8143 = vst.msk [vmem:[#allocation2 + $0xa0] sm:$0xff] %vm403_vm0, %v8086_v5  ;;  %v16024_v13 = vpack.i.bf16 %v8192_v36, %v15902_v49 }
 0xad7   : > { %v8088_v55 = vpop.permute.xlu0 %8087  ;;  %v8157_v48 = vld [vmem:[#allocation2 + $0x78] sm:$0xff] }
 0xad8   : > { %8144 = vst.msk [vmem:[#allocation2 + $0xa8] sm:$0xff] %vm1950_vm5, %v8088_v55  ;;  %8222 = vrot.lane.b32.xlu1 %v15927_v41, %s11930_s13  ;;  %8684 = vrot.lane.b32.xlu0 %v15916_v56, %s11934_s16  ;;  %v15934_v12 = vpack.i.bf16 %v8157_v48, %v8155_v23  ;;  %v15981_v10 = vpack.c.bf16 %v8157_v48, %v8155_v23 }
 0xad9   : > { %v8090_v3 = vpop.permute.xlu1 %8089  ;;  %v8193_v18 = vld [vmem:[#allocation2 + $0x88] sm:$0xff] }
 0xada   : > { %v15937_v52 = vsel %vm403_vm0, %v8088_v55, %v8090_v3  ;;  %8146 = vst.msk [vmem:[#allocation2 + $0xb8] sm:$0xff] %vm403_vm0, %v8090_v3  ;;  %v16039_v6 = vpack.i.bf16 %v8193_v18, %v15913_v11  ;;  %v16049_v35 = vpack.c.bf16 %v8193_v18, %v8192_v36 }
 0xadb   : > { %v15945_v7 = vpack.c.bf16 %v15937_v52, %v15924_v9  ;;  %v8159_v8 = vld [vmem:[#allocation2 + $0x90] sm:$0xff] }
 0xadc   : > { %8680 = vrot.lane.b32.xlu1 %v15927_v41, %s11934_s16  ;;  %11473 = vrot.lane.b32.xlu0 %v15941_v60, %s11932_s14 }
 0xadd   : > { %10319 = vmatprep.subr.msk.bf16.mxu1 %vm12654_vm8, %v15945_v7  ;;  %v8194_v58 = vld [vmem:[#allocation2 + $0xa0] sm:$0xff] }
 0xade   : > { %v16060_v27 = vpack.i.bf16 %v8194_v58, %v15924_v9 }
 0xadf   : > { %v8161_v15 = vld [vmem:[#allocation2 + $0xa8] sm:$0xff] }
 0xae0   : > { %8224 = vrot.lane.b32.xlu1 %v15955_v28, %s11930_s13  ;;  %11483 = vrot.lane.b32.xlu0 %v15910_v32, %s11932_s14  ;;  %v15961_v39 = vpack.c.bf16 %v8161_v15, %v8159_v8  ;;  %v15967_v19 = vpack.i.bf16 %v8161_v15, %v8159_v8 }
 0xae1   : > { %v8195_v0 = vld [vmem:[#allocation2 + $0xb8] sm:$0xff] }
 0xae2   : > { %10322 = vmatpush1.bf16.msk.msra.mxu1 %vm12680_vm4, %v15961_v39  ;;  %v16087_v20 = vpack.i.bf16 %v8195_v0, %v15937_v52  ;;  %v8209_v22 = vpack.c.bf16 %v8195_v0, %v8194_v58 }
 0xae3   : > { %10325 = vmatprep.subr.msk.bf16.mxu1 %vm12654_vm8, %v15965_v24 }
 0xae4   : > { %8682 = vrot.lane.b32.xlu1 %v15955_v28, %s11934_s16  ;;  %8228 = vrot.lane.b32.xlu0 %v15969_v25, %s11930_s13 }
 0xae6   : > { %10328 = vmatpush1.bf16.msk.msra.mxu1 %vm12680_vm4, %v15981_v10 }
 0xae7   : > { %10331 = vmatprep.subr.msk.bf16.mxu1 %vm12654_vm8, %v15985_v53 }
 0xae8   : > { %11478 = vrot.lane.b32.xlu1 %v15941_v60, %s11933_s15  ;;  %8686 = vrot.lane.b32.xlu0 %v15969_v25, %s11934_s16 }
 0xaea   : > { %10334 = vmatpush1.bf16.msk.msra.mxu1 %vm12680_vm4, %v15969_v25 }
 0xaeb   : > { %10337 = vmatprep.subr.msk.bf16.mxu1 %vm12654_vm8, %v15955_v28 }
 0xaec   : > { %11488 = vrot.lane.b32.xlu1 %v15910_v32, %s11933_s15  ;;  %11498 = vrot.lane.b32.xlu0 %v15998_v62, %s11933_s15 }
 0xaee   : > { %10340 = vmatpush1.bf16.msk.msra.mxu1 %vm12680_vm4, %v15927_v41 }
 0xaf0   : > { %8690 = vrot.lane.b32.xlu0 %v16010_v54, %s11934_s16  ;;  %11493 = vrot.lane.b32.xlu1 %v15998_v62, %s11932_s14 }
 0xaf1   : > { %10341 = vmatmul.mubr.msk.bf16.vlgmr.msra.gmra.mxu1 %vm2124_vm6, %v8179_v43 }
 0xaf2   : > { %8667 = vmatprep.mubr.bf16.mxu1 %v17043_v38 }
 0xaf4   : > { %8232 = vrot.lane.b32.xlu1 %v16010_v54, %s11930_s13  ;;  %8230 = vrot.lane.b32.xlu0 %v15985_v53, %s11930_s13 }
 0xaf8   : > { %8688 = vrot.lane.b32.xlu1 %v15985_v53, %s11934_s16  ;;  %11513 = vrot.lane.b32.xlu0 %v16024_v13, %s11935_s19 }
 0xafc   : > { %11503 = vrot.lane.b32.xlu1 %v16024_v13, %s11932_s14  ;;  %11533 = vrot.lane.b32.xlu0 %v15934_v12, %s11935_s19 }
 0xb00   : > { %11508 = vrot.lane.b32.xlu1 %v16024_v13, %s11933_s15  ;;  %8692 = vrot.lane.b32.xlu0 %v15981_v10, %s11934_s16 }
 0xb04   : > { %11518 = vrot.lane.b32.xlu1 %v16024_v13, %s11936_s20  ;;  %11538 = vrot.lane.b32.xlu0 %v16039_v6, %s11932_s14 }
 0xb08   : > { %11523 = vrot.lane.b32.xlu1 %v15934_v12, %s11932_s14  ;;  %11543 = vrot.lane.b32.xlu0 %v16039_v6, %s11933_s15 }
 0xb0c   : > { %11528 = vrot.lane.b32.xlu1 %v15934_v12, %s11933_s15  ;;  %8238 = vrot.lane.b32.xlu0 %v16049_v35, %s11930_s13 }
 0xb10   : > { %8234 = vrot.lane.b32.xlu1 %v15981_v10, %s11930_s13  ;;  %8696 = vrot.lane.b32.xlu0 %v16049_v35, %s11934_s16 }
 0xb14   : > { %11548 = vrot.lane.b32.xlu1 %v16039_v6, %s11935_s19  ;;  %11553 = vrot.lane.b32.xlu0 %v16060_v27, %s11932_s14 }
 0xb18   : > { %8236 = vrot.lane.b32.xlu1 %v15965_v24, %s11930_s13  ;;  %11558 = vrot.lane.b32.xlu0 %v16060_v27, %s11933_s15 }
 0xb1c   : > { %8694 = vrot.lane.b32.xlu1 %v15965_v24, %s11934_s16  ;;  %11573 = vrot.lane.b32.xlu0 %v15967_v19, %s11932_s14 }
 0xb20   : > { %11563 = vrot.lane.b32.xlu1 %v16060_v27, %s11935_s19  ;;  %11578 = vrot.lane.b32.xlu0 %v15967_v19, %s11933_s15 }
 0xb24   : > { %11568 = vrot.lane.b32.xlu1 %v16060_v27, %s11936_s20  ;;  %11583 = vrot.lane.b32.xlu0 %v15967_v19, %s11935_s19 }
 0xb28   : > { %11588 = vrot.lane.b32.xlu1 %v15967_v19, %s11936_s20  ;;  %8240 = vrot.lane.b32.xlu0 %v15961_v39, %s11930_s13 }
 0xb2c   : > { %8698 = vrot.lane.b32.xlu0 %v15961_v39, %s11934_s16  ;;  %11593 = vrot.lane.b32.xlu1 %v16087_v20, %s11932_s14  ;;  %s17086_s14 = sshll.u32 %s17088_s18, 3 }
 0xb30   : > { %11603 = vrot.lane.b32.xlu0 %v16087_v20, %s11935_s19  ;;  %11598 = vrot.lane.b32.xlu1 %v16087_v20, %s11933_s15 }
 0xb34   : > { %11608 = vrot.lane.b32.xlu0 %v16087_v20, %s11936_s20  ;;  %8244 = vrot.lane.b32.xlu1 %v8209_v22, %s11930_s13 }
 0xb38   : > { %8702 = vrot.lane.b32.xlu0 %v8209_v22, %s11934_s16  ;;  %11618 = vrot.lane.b32.xlu1 %v15934_v12, %s11936_s20 }
 0xb3a   : > { %v11444_v29 = vpop.permute.xlu1 %11443 }
 0xb3b   : > { %v11446_v17 = vunpack.i.h.bf16 %v11444_v29  ;;  %v11445_v45 = vunpack.i.l.bf16 %v11444_v29 }
 0xb3c   : > { %11628 = vrot.lane.b32.xlu1 %v15998_v62, %s11935_s19  ;;  %8242 = vrot.lane.b32.xlu0 %v15945_v7, %s11930_s13 }
 0xb3d   : > { %v16117_v34 = vsel %vm751_vm10, %v11445_v45, %v11446_v17 }
 0xb3e   : > { %v11449_v44 = vpop.permute.xlu1 %11448  ;;  %v11464_v2 = vpop.permute.xlu0 %11463  ;;  %17044 = vst [vmem:[#allocation23_spill] sm:$0xff] %v16117_v34 }
 0xb3f   : > { %v11466_v47 = vunpack.i.h.bf16 %v11464_v2  ;;  %v11465_v42 = vunpack.i.l.bf16 %v11464_v2  ;;  %v11451_v26 = vunpack.i.h.bf16 %v11449_v44  ;;  %v11450_v61 = vunpack.i.l.bf16 %v11449_v44 }
 0xb40   : > { %11638 = vrot.lane.b32.xlu1 %v15941_v60, %s11936_s20  ;;  %11613 = vrot.lane.b32.xlu0 %v16039_v6, %s11936_s20 }
 0xb41   : > { %v16120_v1 = vsel %vm751_vm10, %v11465_v42, %v11466_v47  ;;  %v16129_v33 = vsel %vm902_vm13, %v11450_v61, %v11451_v26 }
 0xb42   : > { %17045 = vst [vmem:[#allocation26_spill] sm:$0xff] %v16120_v1  ;;  %v11454_v50 = vpop.permute.xlu1 %11453  ;;  %v11469_v14 = vpop.permute.xlu0 %11468 }
 0xb43   : > { %v11456_v49 = vunpack.i.h.bf16 %v11454_v50  ;;  %v11455_v30 = vunpack.i.l.bf16 %v11454_v50  ;;  %v11471_v59 = vunpack.i.h.bf16 %v11469_v14  ;;  %v11470_v16 = vunpack.i.l.bf16 %v11469_v14 }
 0xb44   : > { %11648 = vrot.lane.b32.xlu1 %v15910_v32, %s11936_s20  ;;  %11623 = vrot.lane.b32.xlu0 %v15941_v60, %s11935_s19 }
 0xb45   : > { %v16132_v11 = vsel %vm751_vm10, %v11455_v30, %v11445_v45  ;;  %v16135_v40 = vsel %vm751_vm10, %v11456_v49, %v11465_v42  ;;  %v16138_v5 = vsel %vm902_vm13, %v11470_v16, %v11471_v59 }
 0xb46   : > { %17046 = vst [vmem:[#allocation19_spill] sm:$0xff] %v16132_v11  ;;  %17047 = vst [vmem:[#allocation18_spill] sm:$0xff] %v16135_v40  ;;  %v11459_v4 = vpop.permute.xlu1 %11458  ;;  %v8227_v48 = vpop.permute.xlu0 %8226 }
 0xb47   : > { %v11461_v23 = vunpack.i.h.bf16 %v11459_v4  ;;  %v11460_v3 = vunpack.i.l.bf16 %v11459_v4 }
 0xb48   : > { %11658 = vrot.lane.b32.xlu1 %v15894_v57, %s11935_s19  ;;  %11633 = vrot.lane.b32.xlu0 %v15910_v32, %s11935_s19 }
 0xb49   : > { %v16149_v52 = vsel %vm902_vm13, %v11460_v3, %v11450_v61  ;;  %v16152_v8 = vsel %vm902_vm13, %v11461_v23, %v11470_v16 }
 0xb4a   : > { %v8223_v51 = vpop.permute.xlu1 %8222  ;;  %v8685_v36 = vpop.permute.xlu0 %8684 }
 0xb4c   : > { %11668 = vrot.lane.b32.xlu1 %v15883_v63, %s11936_s20  ;;  %11643 = vrot.lane.b32.xlu0 %v15998_v62, %s11936_s20 }
 0xb4e   : > { %v8681_v18 = vpop.permute.xlu1 %8680  ;;  %v11474_v58 = vpop.permute.xlu0 %11473 }
 0xb4f   : > { %v11475_v29 = vunpack.i.l.bf16 %v11474_v58  ;;  %v11476_v3 = vunpack.i.h.bf16 %v11474_v58 }
 0xb50   : > { %11678 = vrot.lane.b32.xlu1 %v15888_v46, %s11936_s20  ;;  %11653 = vrot.lane.b32.xlu0 %v15883_v63, %s11935_s19 }
 0xb52   : > { %v8225_v0 = vpop.permute.xlu1 %8224  ;;  %v11484_v43 = vpop.permute.xlu0 %11483 }
 0xb53   : > { %v16165_v17 = vsel %vm528_vm7, %v8223_v51, %v8225_v0  ;;  %v11485_v45 = vunpack.i.l.bf16 %v11484_v43  ;;  %v16168_v44 = vsel %vm528_vm7, %v8225_v0, %v8227_v48  ;;  %v11486_v0 = vunpack.i.h.bf16 %v11484_v43 }
 0xb54   : > { %9094 = vrot.lane.b32.xlu1 %v8209_v22, %s11938_s22  ;;  %11663 = vrot.lane.b32.xlu0 %v15888_v46, %s11935_s19  ;;  %s401_s19 = scalar_lea.vmem %s16734_s11, %s17086_s14 }
 0xb55   : > { %v16174_v2 = vsel %vm751_vm10, %v11485_v45, %v11475_v29 }
 0xb56   : > { %v8683_v47 = vpop.permute.xlu1 %8682  ;;  %v8229_v42 = vpop.permute.xlu0 %8228 }
 0xb57   : > { %v16177_v26 = vsel %vm1082_vm15, %v8681_v18, %v8683_v47  ;;  %v16180_v61 = vsel %vm1082_vm15, %v8683_v47, %v8685_v36 }
 0xb58   : > { %17048 = vst [vmem:[#allocation15_spill] sm:$0xff] %v16177_v26  ;;  %17049 = vst [vmem:[#allocation13_spill] sm:$0xff] %v16180_v61  ;;  %8700 = vrot.lane.b32.xlu1 %v15945_v7, %s11934_s16  ;;  %11673 = vrot.lane.b32.xlu0 %v15894_v57, %s11936_s20 }
 0xb5a   : > { %v11479_v22 = vpop.permute.xlu1 %11478  ;;  %v8687_v50 = vpop.permute.xlu0 %8686 }
 0xb5b   : > { %v11481_v14 = vunpack.i.h.bf16 %v11479_v22  ;;  %v11480_v49 = vunpack.i.l.bf16 %v11479_v22  ;;  %v16215_v22 = vsel %vm751_vm10, %v11475_v29, %v11476_v3 }
 0xb5c   : > { %11688 = vrot.lane.b32.xlu1 %v16087_v20, %s11937_s21  ;;  %11683 = vrot.lane.b32.xlu0 %v16060_v27, %s11937_s21 }
 0xb5d   : > { %v16195_v20 = vsel %vm902_vm13, %v11480_v49, %v11481_v14 }
 0xb5e   : > { %v11489_v30 = vpop.permute.xlu1 %11488  ;;  %v11499_v59 = vpop.permute.xlu0 %11498 }
 0xb5f   : > { %v11491_v16 = vunpack.i.h.bf16 %v11489_v30  ;;  %v11490_v4 = vunpack.i.l.bf16 %v11489_v30  ;;  %v11501_v48 = vunpack.i.h.bf16 %v11499_v59  ;;  %v11500_v23 = vunpack.i.l.bf16 %v11499_v59 }
 0xb60   : > { %11693 = vrot.lane.b32.xlu1 %v15967_v19, %s11937_s21  ;;  %9090 = vrot.lane.b32.xlu0 %v15961_v39, %s11938_s22 }
 0xb61   : > { %v16198_v27 = vsel %vm902_vm13, %v11490_v4, %v11480_v49  ;;  %v16201_v51 = vsel %vm902_vm13, %v11491_v16, %v11500_v23  ;;  %v16204_v36 = vsel %vm902_vm13, %v11500_v23, %v11501_v48 }
 0xb62   : > { %v11494_v58 = vpop.permute.xlu1 %11493  ;;  %v8691_v39 = vpop.permute.xlu0 %8690 }
 0xb63   : > { %v11496_v45 = vunpack.i.h.bf16 %v11494_v58  ;;  %v11495_v47 = vunpack.i.l.bf16 %v11494_v58 }
 0xb64   : > { %9088 = vrot.lane.b32.xlu1 %v16049_v35, %s11938_s22  ;;  %9086 = vrot.lane.b32.xlu0 %v15965_v24, %s11938_s22 }
 0xb65   : > { %v16218_v14 = vsel %vm751_vm10, %v11486_v0, %v11495_v47  ;;  %v16221_v49 = vsel %vm751_vm10, %v11495_v47, %v11496_v45 }
 0xb66   : > { %v8233_v59 = vpop.permute.xlu1 %8232  ;;  %v8231_v35 = vpop.permute.xlu0 %8230 }
 0xb67   : > { %v16228_v16 = vsel %vm528_vm7, %v8229_v42, %v8231_v35  ;;  %v16231_v24 = vsel %vm528_vm7, %v8231_v35, %v8233_v59 }
 0xb68   : > { %11703 = vrot.lane.b32.xlu1 %v16039_v6, %s11937_s21  ;;  %11698 = vrot.lane.b32.xlu0 %v16024_v13, %s11937_s21 }
 0xb6a   : > { %v8689_v29 = vpop.permute.xlu1 %8688  ;;  %v16237_v4 = vpop.permute.xlu0 %11513 }
 0xb6b   : > { %v16240_v48 = vsel %vm1082_vm15, %v8687_v50, %v8689_v29  ;;  %v16243_v23 = vsel %vm1082_vm15, %v8689_v29, %v8691_v39  ;;  %v16767_v3 = vunpack.i.l.bf16 %v16237_v4 }
 0xb6c   : > { %17050 = vst [vmem:[#allocation22_spill] sm:$0xff] %v16240_v48  ;;  %17051 = vst [vmem:[#allocation10_spill] sm:$0xff] %v16243_v23  ;;  %11708 = vrot.lane.b32.xlu1 %v15934_v12, %s11937_s21  ;;  %9084 = vrot.lane.b32.xlu0 %v15981_v10, %s11938_s22 }
 0xb6e   : > { %v11504_v42 = vpop.permute.xlu1 %11503  ;;  %v11534_v6 = vpop.permute.xlu0 %11533 }
 0xb6f   : > { %v11535_v13 = vunpack.i.l.bf16 %v11534_v6  ;;  %v11506_v10 = vunpack.i.h.bf16 %v11504_v42  ;;  %v11505_v39 = vunpack.i.l.bf16 %v11504_v42 }
 0xb70   : > { %9082 = vrot.lane.b32.xlu1 %v16010_v54, %s11938_s22  ;;  %9080 = vrot.lane.b32.xlu0 %v15985_v53, %s11938_s22 }
 0xb71   : > { %v16257_v50 = vsel %vm1198_vm14, %v11535_v13, %v16767_v3  ;;  %v16272_v47 = vsel %vm751_vm10, %v11505_v39, %v11506_v10 }
 0xb72   : > { %v16259_v12 = vpop.permute.xlu1 %11508  ;;  %v8693_v58 = vpop.permute.xlu0 %8692 }
 0xb73   : > { %v11511_v18 = vunpack.i.h.bf16 %v16259_v12  ;;  %v11510_v61 = vunpack.i.l.bf16 %v16259_v12 }
 0xb74   : > { %11718 = vrot.lane.b32.xlu1 %v15998_v62, %s11937_s21  ;;  %11713 = vrot.lane.b32.xlu0 %v15941_v60, %s11937_s21 }
 0xb76   : > { %v16265_v54 = vpop.permute.xlu1 %11518  ;;  %v11539_v0 = vpop.permute.xlu0 %11538 }
 0xb77   : > { %17052 = vst [vmem:[#allocation17_spill] sm:$0xff] %v16265_v54  ;;  %v11541_v53 = vunpack.i.h.bf16 %v11539_v0  ;;  %v11540_v45 = vunpack.i.l.bf16 %v11539_v0 }
 0xb78   : > { %11723 = vrot.lane.b32.xlu1 %v15910_v32, %s11937_s21  ;;  %9092 = vrot.lane.b32.xlu0 %v15945_v7, %s11938_s22 }
 0xb79   : > { %v16275_v62 = vsel %vm751_vm10, %v11540_v45, %v11541_v53 }
 0xb7a   : > { %v11524_v59 = vpop.permute.xlu1 %11523  ;;  %v16279_v35 = vpop.permute.xlu0 %11543 }
 0xb7b   : > { %v11526_v29 = vunpack.i.h.bf16 %v11524_v59  ;;  %v11525_v42 = vunpack.i.l.bf16 %v11524_v59  ;;  %v11545_v15 = vunpack.i.l.bf16 %v16279_v35 }
 0xb7c   : > { %9076 = vrot.lane.b32.xlu1 %v15916_v56, %s11938_s22  ;;  %9078 = vrot.lane.b32.xlu0 %v15969_v25, %s11938_s22 }
 0xb7d   : > { %v16286_v32 = vsel %vm751_vm10, %v11525_v42, %v11505_v39  ;;  %v16289_v7 = vsel %vm751_vm10, %v11526_v29, %v11540_v45  ;;  %v11536_v45 = vunpack.i.h.bf16 %v11534_v6 }
 0xb7e   : > { %v16293_v10 = vpop.permute.xlu1 %11528  ;;  %v16295_v0 = vpop.permute.xlu0 %8238 }
 0xb7f   : > { %v11531_v23 = vunpack.i.h.bf16 %v16293_v10 }
 0xb80   : > { %11733 = vrot.lane.b32.xlu1 %v15894_v57, %s11937_s21  ;;  %9074 = vrot.lane.b32.xlu0 %v15955_v28, %s11938_s22 }
 0xb82   : > { %v16301_v56 = vpop.permute.xlu1 %8234  ;;  %v8697_v25 = vpop.permute.xlu0 %8696 }
 0xb84   : > { %11738 = vrot.lane.b32.xlu1 %v15888_v46, %s11937_s21  ;;  %11728 = vrot.lane.b32.xlu0 %v15883_v63, %s11937_s21  ;;  %v9310_v46 = vld [vmem:[%s16733_s10] sm:$0x7] }
 0xb86   : > { %v16307_v39 = vpop.permute.xlu1 %11548  ;;  %v16309_v53 = vpop.permute.xlu0 %11553 }
 0xb87   : > { %v16768_v59 = vunpack.i.l.bf16 %v16307_v39 }
 0xb88   : > { %9072 = vrot.lane.b32.xlu0 %v15927_v41, %s11938_s22 }
 0xb89   : > { %v16317_v57 = vsel %vm1198_vm14, %v11536_v45, %v16768_v59 }
 0xb8a   : > { %v16324_v28 = vpop.permute.xlu1 %8236  ;;  %v11559_v6 = vpop.permute.xlu0 %11558 }
 0xb8b   : > { %v11561_v59 = vunpack.i.h.bf16 %v11559_v6  ;;  %v11560_v55 = vunpack.i.l.bf16 %v11559_v6 }
 0xb8c   : > { %9313 = vperm.xlu0 %10541, %v9310_v46  }
 0xb8e   : > { %v8695_v29 = vpop.permute.xlu1 %8694  ;;  %v16326_v42 = vpop.permute.xlu0 %11573 }
 0xb8f   : > { %v16329_v41 = vsel %vm1082_vm15, %v8693_v58, %v8695_v29  ;;  %v16332_v45 = vsel %vm1082_vm15, %v8695_v29, %v8697_v25  ;;  %v11546_v29 = vunpack.i.h.bf16 %v16279_v35  ;;  %v8587_v35 = vsel %vm902_vm13, %v11560_v55, %v11561_v59 }
 0xb90   : > { %17053 = vst [vmem:[#allocation12_spill] sm:$0xff] %v16329_v41  ;;  %17054 = vst [vmem:[#allocation27_spill] sm:$0xff] %v16332_v45  ;;  %v11530_v41 = vunpack.i.l.bf16 %v16293_v10  ;;  %v8584_v59 = vsel %vm902_vm13, %v11531_v23, %v11545_v15 }
 0xb92   : > { %v16334_v9 = vpop.permute.xlu1 %11563  ;;  %v11579_v21 = vpop.permute.xlu0 %11578  ;;  %v8582_v10 = vsel %vm902_vm13, %v11530_v41, %v11510_v61 }
 0xb93   : > { %v11580_v19 = vunpack.i.l.bf16 %v11579_v21  ;;  %v11581_v48 = vunpack.i.h.bf16 %v11579_v21  ;;  %v11565_v41 = vunpack.i.l.bf16 %v16334_v9 }
 0xb95   : > { %v8586_v6 = vsel %vm902_vm13, %v11580_v19, %v11560_v55 }
 0xb96   : > { %v16336_v30 = vpop.permute.xlu1 %11568  ;;  %v16338_v43 = vpop.permute.xlu0 %11583 }
 0xb97   : > { %17055 = vst [vmem:[#allocation28_spill] sm:$0xff] %v16336_v30  ;;  %v16770_v46 = vunpack.i.l.bf16 %v16336_v30  ;;  %v8585_v30 = vsel %vm902_vm13, %v11545_v15, %v11546_v29  ;;  %v10379_v15 = vpack.c.bf16 %v8584_v59, %v8582_v10  ;;  %v17061_v10 = vpack.c.bf16 %v16152_v8, %v16149_v52 }
 0xb98   : > { %v11556_v59 = vunpack.i.h.bf16 %v16309_v53 }
 0xb9a   : > { %v11589_v13 = vpop.permute.xlu1 %11588  ;;  %v8241_v60 = vpop.permute.xlu0 %8240 }
 0xb9b   : > { %v11590_v63 = vunpack.i.l.bf16 %v11589_v13  ;;  %v11591_v29 = vunpack.i.h.bf16 %v11589_v13  ;;  %v11566_v13 = vunpack.i.h.bf16 %v16334_v9  ;;  %v8251_v9 = vsel %vm528_vm7, %v16324_v28, %v16295_v0 }
 0xb9c   : > { %v8250_v0 = vsel %vm528_vm7, %v16301_v56, %v16324_v28  ;;  %v10368_v56 = vld [vmem:[%s16732_s9 + $0x6] sm:$0x3] }
 0xb9d   : > { %v16344_v58 = vsel %vm1349_vm1, %v11590_v63, %v16770_v46 }
 0xb9e   : > { %v16346_v3 = vpop.permute.xlu1 %11593  ;;  %v16348_v25 = vpop.permute.xlu0 %8698 }
 0xb9f   : > { %17056 = vst [vmem:[#allocation9_spill] sm:$0xff] %v16348_v25 }
 0xba2   : > { %v11599_v26 = vpop.permute.xlu1 %11598  ;;  %v11604_v54 = vpop.permute.xlu0 %11603 }
 0xba3   : > { %v11601_v63 = vunpack.i.h.bf16 %v11599_v26  ;;  %v11600_v46 = vunpack.i.l.bf16 %v11599_v26  ;;  %v8583_v26 = vsel %vm902_vm13, %v11510_v61, %v11511_v18  ;;  %v11605_v61 = vunpack.i.l.bf16 %v11604_v54 }
 0xba4   : > { %v10376_v1 = vpack.c.bf16 %v8585_v30, %v8583_v26 }
 0xba5   : > { %v8588_v45 = vsel %vm902_vm13, %v11581_v48, %v11600_v46  ;;  %v8589_v25 = vsel %vm902_vm13, %v11600_v46, %v11601_v63  ;;  %v11586_v46 = vunpack.i.h.bf16 %v16338_v43 }
 0xba6   : > { %v10370_v11 = vpack.c.bf16 %v8589_v25, %v8587_v35  ;;  %v10373_v40 = vpack.c.bf16 %v8588_v45, %v8586_v6  ;;  %v8245_v12 = vpop.permute.xlu1 %8244  ;;  %v16361_v21 = vpop.permute.xlu0 %11608  ;;  %v11551_v45 = vunpack.i.h.bf16 %v16307_v39  ;;  %v11585_v25 = vunpack.i.l.bf16 %v16338_v43 }
 0xba7   : > { %v11610_v34 = vunpack.i.l.bf16 %v16361_v21  ;;  %v17059_v43 = vpack.c.bf16 %v16138_v5, %v16129_v33  ;;  %v11596_v33 = vunpack.i.h.bf16 %v16346_v3  ;;  %v11595_v5 = vunpack.i.l.bf16 %v16346_v3 }
 0xba8   : > { %10371 = vmatprep.subr.msk.bf16.mxu1 %vm12654_vm8, %v10370_v11  ;;  %v11606_v11 = vunpack.i.h.bf16 %v11604_v54 }
 0xba9   : > { %v16372_v55 = vsel %vm1349_vm1, %v11591_v29, %v11610_v34  ;;  %10374 = vmatpush1.bf16.msk.msra.mxu1 %vm12680_vm4, %v10373_v40  ;;  %v17057_v40 = vpack.c.bf16 %v16204_v36, %v16195_v20  ;;  %v17058_v36 = vpack.c.bf16 %v16201_v51, %v16198_v27  ;;  %v8827_v27 = vsel %vm1198_vm14, %v11565_v41, %v11566_v13 }
 0xbaa   : > { %v10427_v18 = vpack.c.bf16 %v16372_v55, %v16344_v58  ;;  %v16378_v19 = vpop.permute.xlu1 %11618  ;;  %v16380_v30 = vpop.permute.xlu0 %8702  ;;  %10377 = vmatprep.subr.msk.bf16.mxu1 %vm12654_vm8, %v10376_v1  ;;  %v8829_v20 = vsel %vm1198_vm14, %v11605_v61, %v11606_v11  ;;  %v8828_v51 = vsel %vm1198_vm14, %v11586_v46, %v11605_v61  ;;  %v8826_v29 = vsel %vm1198_vm14, %v11585_v25, %v11565_v41 }
 0xbab   : > { %v10398_v6 = vpack.c.bf16 %v8829_v20, %v8827_v27  ;;  %v10401_v3 = vpack.c.bf16 %v8828_v51, %v8826_v29  ;;  %v10315_v27 = vld [vmem:[%s16732_s9 + $0x2] sm:$0x3] }
 0xbad   : > { %10380 = vmatpush1.bf16.msk.msra.mxu1 %vm12680_vm4, %v10379_v15  ;;  %v11555_v15 = vunpack.i.l.bf16 %v16309_v53  ;;  %v8437_v53 = vsel %vm751_vm10, %v11595_v5, %v11596_v33  ;;  %v17066_v33 = vpack.c.bf16 %v16275_v62, %v16272_v47  ;;  %v17068_v62 = vpack.c.bf16 %v16221_v49, %v16215_v22 }
 0xbae   : > { %v16386_v48 = vpop.permute.xlu1 %11628  ;;  %v8243_v23 = vpop.permute.xlu0 %8242  ;;  %10383 = vmatprep.subr.msk.bf16.mxu1 %vm12654_vm8, %v17057_v40 }
 0xbaf   : > { %v8252_v1 = vsel %vm528_vm7, %v8241_v60, %v8243_v23  ;;  %v8253_v54 = vsel %vm528_vm7, %v8243_v23, %v8245_v12  ;;  %v11516_v60 = vunpack.i.h.bf16 %v16237_v4  ;;  %v17060_v12 = vunpack.i.l.bf16 %v16307_v39 }
 0xbb0   : > { %8273 = vmatprep.subr.bf16.mxu0 %v8253_v54  ;;  %v17062_v39 = vunpack.i.l.bf16 %v16237_v4  ;;  %v11631_v61 = vunpack.i.h.bf16 %v16386_v48  ;;  %v11630_v23 = vunpack.i.l.bf16 %v16386_v48  ;;  %v11575_v54 = vunpack.i.l.bf16 %v16326_v42 }
 0xbb1   : > { %8274 = vmatpush1.bf16.msra.mxu0 %v8252_v1  ;;  %10386 = vmatpush1.bf16.msk.msra.mxu1 %vm12680_vm4, %v17058_v36  ;;  %v8825_v26 = vsel %vm1198_vm14, %v17060_v12, %v11551_v45  ;;  %v11576_v1 = vunpack.i.h.bf16 %v16326_v42  ;;  %v8435_v46 = vsel %vm751_vm10, %v11555_v15, %v11556_v59 }
 0xbb2   : > { %v16410_v63 = vpop.permute.xlu1 %11638  ;;  %8275 = vmatprep.subr.bf16.mxu0 %v8251_v9  ;;  %v16412_v35 = vpop.permute.xlu0 %11613  ;;  %10389 = vmatprep.subr.msk.bf16.mxu1 %vm12654_vm8, %v17059_v43  ;;  %v8823_v28 = vsel %vm1198_vm14, %v17062_v39, %v11516_v60  ;;  %v8821_v25 = vsel %vm1198_vm14, %v11630_v23, %v11631_v61  ;;  %v10344_v9 = vpack.c.bf16 %v8437_v53, %v8435_v46  ;;  %v17074_v53 = vld [vmem:[#allocation19_spill] sm:$0xff]  ;;  %v17076_v46 = vld [vmem:[#allocation9_spill] sm:$0xff] }
 0xbb3   : > { %v10404_v13 = vpack.c.bf16 %v8825_v26, %v8823_v28  ;;  %v8436_v36 = vsel %vm751_vm10, %v11576_v1, %v11595_v5  ;;  %v17065_v43 = vpack.c.bf16 %v16317_v57, %v16257_v50  ;;  %v8434_v51 = vsel %vm751_vm10, %v11575_v54, %v11555_v15  ;;  %v10342_v54 = vld [vmem:[%s16732_s9 + $0x4] sm:$0x3] }
 0xbb4   : > { %v17067_v28 = vpack.c.bf16 %v16289_v7, %v16286_v32  ;;  %v17069_v61 = vpack.c.bf16 %v16218_v14, %v16174_v2  ;;  %v10396_v2 = vld [vmem:[%s16732_s9 + $0xa] sm:$0x3]  ;;  %v17073_v14 = vld [vmem:[#allocation18_spill] sm:$0xff] }
 0xbb5   : > { %8276 = vmatpush1.bf16.msra.mxu0 %v8250_v0  ;;  %10392 = vmatpush1.bf16.msk.msra.mxu1 %vm12680_vm4, %v17061_v10 }
 0xbb6   : > { %v16443_v11 = vpop.permute.xlu1 %11648  ;;  %8277 = vmatprep.subr.bf16.mxu0 %v16231_v24  ;;  %v11624_v52 = vpop.permute.xlu0 %11623  ;;  %10399 = vmatprep.subr.msk.bf16.mxu1 %vm13050_vm11, %v10398_v6 }
 0xbb7   : > { %v11626_v4 = vunpack.i.h.bf16 %v11624_v52  ;;  %v11625_v40 = vunpack.i.l.bf16 %v11624_v52 }
 0xbb8   : > { %10393 = vmatmul.mubr.msk.bf16.vlgmr.msra.gmra.mxu1 %vm2124_vm6, %v10368_v56 }
 0xbb9   : > { %v8819_v41 = vsel %vm1198_vm14, %v11625_v40, %v11626_v4  ;;  %8278 = vmatpush1.bf16.msra.mxu0 %v16228_v16  ;;  %10402 = vmatpush1.bf16.msk.msra.mxu1 %vm13082_vm12, %v10401_v3  ;;  %v17070_v4 = vld [vmem:[#allocation26_spill] sm:$0xff] }
 0xbba   : > { %v11659_v45 = vpop.permute.xlu1 %11658  ;;  %8279 = vmatprep.subr.bf16.mxu0 %v16168_v44  ;;  %v11634_v48 = vpop.permute.xlu0 %11633  ;;  %10405 = vmatprep.subr.msk.bf16.mxu1 %vm13050_vm11, %v10404_v13  ;;  %v10410_v60 = vpack.c.bf16 %v8821_v25, %v8819_v41  ;;  %v17075_v41 = vpack.c.bf16 %v17073_v14, %v17074_v53  ;;  %v11650_v14 = vunpack.i.l.bf16 %v16443_v11 }
 0xbbb   : > { %v11636_v20 = vunpack.i.h.bf16 %v11634_v48  ;;  %v11635_v16 = vunpack.i.l.bf16 %v11634_v48  ;;  %8907 = vmatprep.mubr.bf16.mxu1 %v17043_v38  ;;  %v11661_v50 = vunpack.i.h.bf16 %v11659_v45  ;;  %v11660_v57 = vunpack.i.l.bf16 %v11659_v45 }
 0xbbd   : > { %v8820_v42 = vsel %vm1198_vm14, %v11636_v20, %v11630_v23  ;;  %v8818_v44 = vsel %vm1198_vm14, %v11635_v16, %v11625_v40  ;;  %8280 = vmatpush1.bf16.msra.mxu0 %v16165_v17  ;;  %10408 = vmatpush1.bf16.msk.msra.mxu1 %vm13082_vm12, %v17065_v43  ;;  %v10347_v17 = vpack.c.bf16 %v8436_v36, %v8434_v51  ;;  %v17071_v40 = vld [vmem:[#allocation23_spill] sm:$0xff]  ;;  %v11611_v36 = vunpack.i.h.bf16 %v16361_v21  ;;  %v17080_v43 = vld [vmem:[#allocation28_spill] sm:$0xff] }
 0xbbe   : > { %v10413_v0 = vpack.c.bf16 %v8820_v42, %v8818_v44  ;;  %v16477_v6 = vpop.permute.xlu1 %11668  ;;  %v16479_v12 = vpop.permute.xlu0 %11643  ;;  %10345 = vmatprep.subr.msk.bf16.mxu0 %vm13050_vm11, %v10344_v9  ;;  %10411 = vmatprep.subr.msk.bf16.mxu1 %vm13050_vm11, %v10410_v60  ;;  %v8817_v56 = vsel %vm1198_vm14, %v11660_v57, %v11661_v50  ;;  %v17072_v13 = vpack.c.bf16 %v17070_v4, %v17071_v40  ;;  %v17077_v16 = vld [vmem:[#allocation27_spill] sm:$0xff]  ;;  %v17078_v9 = vld [vmem:[#allocation12_spill] sm:$0xff]  ;;  %v17079_v44 = vld [vmem:[#allocation10_spill] sm:$0xff]  ;;  %v17084_v21 = vunpack.i.l.bf16 %v17080_v43 }
 0xbbf   : > { %v8981_v51 = vsel %vm1349_vm1, %v11610_v34, %v11611_v36  ;;  %v17081_v50 = vld [vmem:[#allocation22_spill] sm:$0xff] }
 0xbc0   : > { %10316 = vmatmul.mubr.msk.bf16.vlgmr.msra.gmra.mxu0 %vm2124_vm6, %v10315_v27  ;;  %v11571_v27 = vunpack.i.h.bf16 %v17080_v43 }
 0xbc1   : > { %10348 = vmatpush1.bf16.msk.msra.mxu0 %vm13082_vm12, %v10347_v17  ;;  %10414 = vmatpush1.bf16.msk.msra.mxu1 %vm13082_vm12, %v10413_v0  ;;  %v11616_v0 = vunpack.i.h.bf16 %v16412_v35  ;;  %v11615_v17 = vunpack.i.l.bf16 %v16412_v35  ;;  %v11620_v35 = vunpack.i.l.bf16 %v16378_v19 }
 0xbc2   : > { %v16490_v26 = vpop.permute.xlu1 %11678  ;;  %v11654_v29 = vpop.permute.xlu0 %11653  ;;  %10351 = vmatprep.subr.msk.bf16.mxu0 %vm13050_vm11, %v17066_v33  ;;  %8515 = vmatprep.mubr.bf16.mxu0 %v17043_v38  ;;  %v17082_v33 = vld [vmem:[#allocation13_spill] sm:$0xff]  ;;  %v8979_v34 = vsel %vm1349_vm1, %v17084_v21, %v11571_v27 }
 0xbc3   : > { %v11656_v5 = vunpack.i.h.bf16 %v11654_v29  ;;  %v11655_v10 = vunpack.i.l.bf16 %v11654_v29 }
 0xbc5   : > { %v8815_v39 = vsel %vm1198_vm14, %v11655_v10, %v11656_v5  ;;  %10354 = vmatpush1.bf16.msk.msra.mxu0 %vm13082_vm12, %v17067_v28  ;;  %v17083_v5 = vld [vmem:[#allocation17_spill] sm:$0xff]  ;;  %v11621_v28 = vunpack.i.h.bf16 %v16378_v19 }
 0xbc6   : > { %v10416_v59 = vpack.c.bf16 %v8817_v56, %v8815_v39  ;;  %v16505_v15 = vpop.permute.xlu1 %9094  ;;  %v11664_v47 = vpop.permute.xlu0 %11663  ;;  %10357 = vmatprep.subr.msk.bf16.mxu0 %vm13050_vm11, %v17068_v62  ;;  %v11520_v56 = vunpack.i.l.bf16 %v17083_v5  ;;  %v10424_v39 = vpack.c.bf16 %v8981_v51, %v8979_v34  ;;  %v8977_v62 = vsel %vm1349_vm1, %v11615_v17, %v11616_v0 }
 0xbc7   : > { %v11666_v3 = vunpack.i.h.bf16 %v11664_v47  ;;  %v11665_v52 = vunpack.i.l.bf16 %v11664_v47  ;;  %v11640_v47 = vunpack.i.l.bf16 %v16410_v63 }
 0xbc8   : > { %10417 = vmatprep.subr.msk.bf16.mxu1 %vm13050_vm11, %v10416_v59  ;;  %v11641_v59 = vunpack.i.h.bf16 %v16410_v63  ;;  %v8976_v63 = vsel %vm1349_vm1, %v11621_v28, %v11615_v17 }
 0xbc9   : > { %v8816_v32 = vsel %vm1198_vm14, %v11666_v3, %v11660_v57  ;;  %v8814_v7 = vsel %vm1198_vm14, %v11665_v52, %v11655_v10  ;;  %10360 = vmatpush1.bf16.msk.msra.mxu0 %vm13082_vm12, %v17069_v61  ;;  %v11521_v10 = vunpack.i.h.bf16 %v17083_v5  ;;  %v11646_v3 = vunpack.i.h.bf16 %v16479_v12 }
 0xbca   : > { %v10419_v23 = vpack.c.bf16 %v8816_v32, %v8814_v7  ;;  %v8701_v22 = vpop.permute.xlu1 %8700  ;;  %v16521_v49 = vpop.permute.xlu0 %11673  ;;  %10363 = vmatprep.subr.msk.bf16.mxu0 %vm13050_vm11, %v17072_v13  ;;  %v11645_v52 = vunpack.i.l.bf16 %v16479_v12  ;;  %v17085_v32 = vld [vmem:[#allocation15_spill] sm:$0xff]  ;;  %v11651_v12 = vunpack.i.h.bf16 %v16443_v11  ;;  %v8974_v13 = vsel %vm1349_vm1, %v11620_v35, %v11520_v56 }
 0xbcb   : > { %v8711_v1 = vsel %vm1082_vm15, %v8701_v22, %v16380_v30  ;;  %v8710_v25 = vsel %vm1082_vm15, %v17076_v46, %v8701_v22  ;;  %v10394_v7 = vld [vmem:[%s16732_s9 + $0x8] sm:$0x3]  ;;  %v8975_v19 = vsel %vm1349_vm1, %v11520_v56, %v11521_v10  ;;  %v11676_v4 = vunpack.i.h.bf16 %v16521_v49 }
 0xbcc   : > { %10420 = vmatpush1.bf16.msk.msra.mxu1 %vm13082_vm12, %v10419_v23  ;;  %v10430_v22 = vpack.c.bf16 %v8977_v62, %v8975_v19  ;;  %v11675_v40 = vunpack.i.l.bf16 %v16521_v49  ;;  %v8973_v53 = vsel %vm1349_vm1, %v11645_v52, %v11646_v3  ;;  %v11671_v49 = vunpack.i.h.bf16 %v16477_v6 }
 0xbcd   : > { %10366 = vmatpush1.bf16.msk.msra.mxu0 %vm13082_vm12, %v17075_v41  ;;  %v10433_v41 = vpack.c.bf16 %v8976_v63, %v8974_v13 }
 0xbce   : > { %v16543_v45 = vpop.permute.xlu1 %11688  ;;  %v16545_v48 = vpop.permute.xlu0 %11683  ;;  %8731 = vmatprep.subr.bf16.mxu0 %v8711_v1  ;;  %v11670_v1 = vunpack.i.l.bf16 %v16477_v6  ;;  %v11681_v6 = vunpack.i.h.bf16 %v16490_v26  ;;  %v8969_v36 = vsel %vm1349_vm1, %v11675_v40, %v11676_v4 }
 0xbcf   : > { %10421 = vmatmul.mubr.msk.bf16.vlgmr.msra.gmra.mxu1 %vm2124_vm6, %v10396_v2  ;;  %v8971_v2 = vsel %vm1349_vm1, %v11640_v47, %v11641_v59  ;;  %v11691_v58 = vunpack.i.h.bf16 %v16543_v45  ;;  %v11690_v55 = vunpack.i.l.bf16 %v16543_v45 }
 0xbd0   : > { %10367 = vmatmul.mubr.msk.bf16.vlgmr.msra.gmra.mxu0 %vm2124_vm6, %v10342_v54  ;;  %9147 = vmatprep.mubr.bf16.mxu1 %v17043_v38  ;;  %v8972_v54 = vsel %vm1349_vm1, %v11651_v12, %v11645_v52  ;;  %v8967_v43 = vsel %vm1349_vm1, %v11670_v1, %v11671_v49  ;;  %v8968_v45 = vsel %vm1349_vm1, %v11681_v6, %v11675_v40 }
 0xbd1   : > { %8732 = vmatpush1.bf16.msra.mxu0 %v8710_v25  ;;  %8755 = vmatprep.mubr.bf16.mxu0 %v17043_v38  ;;  %v11685_v25 = vunpack.i.l.bf16 %v16545_v48  ;;  %v10442_v17 = vpack.c.bf16 %v8969_v36, %v8967_v43 }
 0xbd2   : > { %v16553_v30 = vpop.permute.xlu1 %11693  ;;  %v16555_v20 = vpop.permute.xlu0 %9090  ;;  %8733 = vmatprep.subr.bf16.mxu0 %v17077_v16  ;;  %v10436_v16 = vpack.c.bf16 %v8973_v53, %v8971_v2 }
 0xbd3   : > { %v11695_v51 = vunpack.i.l.bf16 %v16553_v30 }
 0xbd5   : > { %8734 = vmatpush1.bf16.msra.mxu0 %v17078_v9  ;;  %v8970_v9 = vsel %vm1349_vm1, %v11650_v14, %v11640_v47  ;;  %v9218_v35 = vsel %vm1645_vm3, %v11695_v51, %v11685_v25 }
 0xbd6   : > { %v16560_v60 = vpop.permute.xlu1 %9088  ;;  %v16562_v42 = vpop.permute.xlu0 %9086  ;;  %8735 = vmatprep.subr.bf16.mxu0 %v17079_v44  ;;  %v11680_v44 = vunpack.i.l.bf16 %v16490_v26  ;;  %v10439_v27 = vpack.c.bf16 %v8972_v54, %v8970_v9 }
 0xbd7   : > { %v9101_v62 = vsel %vm1529_vm2, %v16562_v42, %v16560_v60 }
 0xbd8   : > { %v8966_v34 = vsel %vm1349_vm1, %v11680_v44, %v11670_v1 }
 0xbd9   : > { %8736 = vmatpush1.bf16.msra.mxu0 %v17081_v50  ;;  %v9221_v50 = vsel %vm1645_vm3, %v11690_v55, %v11691_v58 }
 0xbda   : > { %v16572_v57 = vpop.permute.xlu1 %11703  ;;  %v16574_v29 = vpop.permute.xlu0 %11698  ;;  %8737 = vmatprep.subr.bf16.mxu0 %v17082_v33  ;;  %v11696_v33 = vunpack.i.h.bf16 %v16553_v30 }
 0xbdb   : > { %v11706_v5 = vunpack.i.h.bf16 %v16572_v57  ;;  %v11705_v10 = vunpack.i.l.bf16 %v16572_v57  ;;  %v11701_v56 = vunpack.i.h.bf16 %v16574_v29  ;;  %v11700_v21 = vunpack.i.l.bf16 %v16574_v29 }
 0xbdc   : > { %v9220_v30 = vsel %vm1645_vm3, %v11696_v33, %v11690_v55  ;;  %v10450_v33 = vld [vmem:[%s16732_s9 + $0x10] sm:$0x3] }
 0xbdd   : > { %8738 = vmatpush1.bf16.msra.mxu0 %v17085_v32  ;;  %v9217_v3 = vsel %vm1645_vm3, %v11705_v10, %v11706_v5  ;;  %v9215_v52 = vsel %vm1645_vm3, %v11700_v21, %v11701_v56  ;;  %v8343_v5 = vpop.f32.mrf.mxu1 }
 0xbde   : > { %v16593_v61 = vpop.permute.xlu1 %11708  ;;  %v16595_v23 = vpop.permute.xlu0 %9084  ;;  %10425 = vmatprep.subr.msk.bf16.mxu0 %vm12654_vm8, %v10424_v39  ;;  %v10445_v39 = vpack.c.bf16 %v8968_v45, %v8966_v34  ;;  %v10458_v40 = vpack.c.bf16 %v9217_v3, %v9215_v52 }
 0xbdf   : > { %v11711_v32 = vunpack.i.h.bf16 %v16593_v61  ;;  %v11710_v37 = vunpack.i.l.bf16 %v16593_v61  ;;  %v10455_v61 = vpack.c.bf16 %v9220_v30, %v9218_v35  ;;  %v9100_v2 = vsel %vm1529_vm2, %v16595_v23, %v16562_v42 }
 0xbe0   : > { %10395 = vmatmul.mubr.msk.bf16.vlgmr.msra.gmra.mxu0 %vm2124_vm6, %v10394_v7 }
 0xbe1   : > { %10428 = vmatpush1.bf16.msk.msra.mxu0 %vm12680_vm4, %v10427_v18  ;;  %9059 = vmatprep.mubr.bf16.mxu0 %v17043_v38  ;;  %v11686_v18 = vunpack.i.h.bf16 %v16545_v48  ;;  %v9214_v13 = vsel %vm1645_vm3, %v11710_v37, %v11700_v21  ;;  %v9216_v31 = vsel %vm1645_vm3, %v11711_v32, %v11705_v10  ;;  %v8345_v10 = vpop.f32.mrf.mxu1 }
 0xbe2   : > { %v16618_v46 = vpop.permute.xlu1 %9082  ;;  %v16620_v11 = vpop.permute.xlu0 %9080  ;;  %10431 = vmatprep.subr.msk.bf16.mxu0 %vm12654_vm8, %v10430_v22  ;;  %v10461_v42 = vpack.c.bf16 %v9216_v31, %v9214_v13 }
 0xbe3   : > { %v9219_v26 = vsel %vm1645_vm3, %v11685_v25, %v11686_v18  ;;  %v8347_v56 = vpop.f32.mrf.mxu1 }
 0xbe4   : > { %v10452_v28 = vpack.c.bf16 %v9221_v50, %v9219_v26  ;;  %v10448_v26 = vld [vmem:[%s16732_s9 + $0xe] sm:$0x3] }
 0xbe5   : > { %10434 = vmatpush1.bf16.msk.msra.mxu0 %vm12680_vm4, %v10433_v41  ;;  %v9099_v41 = vsel %vm1529_vm2, %v16620_v11, %v16618_v46  ;;  %v8348_v8 = vpop.f32.mrf.mxu1 }
 0xbe6   : > { %v11719_v48 = vpop.permute.xlu1 %11718  ;;  %v11714_v0 = vpop.permute.xlu0 %11713  ;;  %10437 = vmatprep.subr.msk.bf16.mxu0 %vm12654_vm8, %v10436_v16 }
 0xbe7   : > { %v11721_v7 = vunpack.i.h.bf16 %v11719_v48  ;;  %v11720_v19 = vunpack.i.l.bf16 %v11719_v48  ;;  %v11716_v63 = vunpack.i.h.bf16 %v11714_v0 }
 0xbe9   : > { %10440 = vmatpush1.bf16.msk.msra.mxu0 %vm12680_vm4, %v10439_v27  ;;  %v9213_v14 = vsel %vm1645_vm3, %v11720_v19, %v11721_v7 }
 0xbea   : > { %v11724_v59 = vpop.permute.xlu1 %11723  ;;  %v9093_v47 = vpop.permute.xlu0 %9092  ;;  %10443 = vmatprep.subr.msk.bf16.mxu0 %vm12654_vm8, %v10442_v17 }
 0xbeb   : > { %v9102_v57 = vsel %vm1529_vm2, %v16555_v20, %v9093_v47  ;;  %v9103_v29 = vsel %vm1529_vm2, %v9093_v47, %v16505_v15  ;;  %v11715_v20 = vunpack.i.l.bf16 %v11714_v0  ;;  %v10422_v15 = vld [vmem:[%s16732_s9 + $0xc] sm:$0x3]  ;;  %v11726_v12 = vunpack.i.h.bf16 %v11724_v59 }
 0xbec   : > { %9123 = vmatprep.subr.bf16.mxu1 %v9103_v29  ;;  %v11725_v4 = vunpack.i.l.bf16 %v11724_v59 }
 0xbed   : > { %10446 = vmatpush1.bf16.msk.msra.mxu0 %vm12680_vm4, %v10445_v39  ;;  %9124 = vmatpush1.bf16.msra.mxu1 %v9102_v57  ;;  %v9211_v53 = vsel %vm1645_vm3, %v11715_v20, %v11716_v63  ;;  %v9212_v54 = vsel %vm1645_vm3, %v11726_v12, %v11720_v19 }
 0xbee   : > { %v9077_v60 = vpop.permute.xlu1 %9076  ;;  %v9079_v22 = vpop.permute.xlu0 %9078  ;;  %9125 = vmatprep.subr.bf16.mxu1 %v9101_v62  ;;  %10453 = vmatprep.subr.msk.bf16.mxu0 %vm13050_vm11, %v10452_v28  ;;  %v9210_v23 = vsel %vm1645_vm3, %v11725_v4, %v11715_v20  ;;  %v10464_v58 = vpack.c.bf16 %v9213_v14, %v9211_v53 }
 0xbef   : > { %v9098_v55 = vsel %vm1529_vm2, %v9079_v22, %v16620_v11  ;;  %v10467_v16 = vpack.c.bf16 %v9212_v54, %v9210_v23 }
 0xbf0   : > { %10447 = vmatmul.mubr.msk.bf16.vlgmr.msra.gmra.mxu0 %vm2124_vm6, %v10422_v15 }
 0xbf1   : > { %9126 = vmatpush1.bf16.msra.mxu1 %v9100_v2  ;;  %10456 = vmatpush1.bf16.msk.msra.mxu0 %vm13082_vm12, %v10455_v61 }
 0xbf2   : > { %v11734_v49 = vpop.permute.xlu1 %11733  ;;  %v9075_v1 = vpop.permute.xlu0 %9074  ;;  %9127 = vmatprep.subr.bf16.mxu1 %v9099_v41  ;;  %10459 = vmatprep.subr.msk.bf16.mxu0 %vm13050_vm11, %v10458_v40 }
 0xbf3   : > { %9299 = vmatprep.mubr.bf16.mxu0 %v17043_v38  ;;  %v11736_v18 = vunpack.i.h.bf16 %v11734_v49  ;;  %v11735_v25 = vunpack.i.l.bf16 %v11734_v49  ;;  %v9097_v46 = vsel %vm1529_vm2, %v9075_v1, %v9077_v60 }
 0xbf5   : > { %9128 = vmatpush1.bf16.msra.mxu1 %v9098_v55  ;;  %10462 = vmatpush1.bf16.msk.msra.mxu0 %vm13082_vm12, %v10461_v42  ;;  %v9209_v11 = vsel %vm1645_vm3, %v11735_v25, %v11736_v18 }
 0xbf6   : > { %v11739_v6 = vpop.permute.xlu1 %11738  ;;  %v11729_v36 = vpop.permute.xlu0 %11728  ;;  %9129 = vmatprep.subr.bf16.mxu1 %v9097_v46  ;;  %10465 = vmatprep.subr.msk.bf16.mxu0 %vm13050_vm11, %v10464_v58 }
 0xbf7   : > { %v11741_v38 = vunpack.i.h.bf16 %v11739_v6  ;;  %v11740_v9 = vunpack.i.l.bf16 %v11739_v6  ;;  %v11731_v44 = vunpack.i.h.bf16 %v11729_v36  ;;  %v11730_v43 = vunpack.i.l.bf16 %v11729_v36 }
 0xbf9   : > { %v9208_v27 = vsel %vm1645_vm3, %v11741_v38, %v11735_v25  ;;  %v9206_v45 = vsel %vm1645_vm3, %v11740_v9, %v11730_v43  ;;  %v9207_v51 = vsel %vm1645_vm3, %v11730_v43, %v11731_v44  ;;  %10468 = vmatpush1.bf16.msk.msra.mxu0 %vm13082_vm12, %v10467_v16 }
 0xbfa   : > { %v10470_v48 = vpack.c.bf16 %v9209_v11, %v9207_v51  ;;  %v10473_v0 = vpack.c.bf16 %v9208_v27, %v9206_v45  ;;  %v9073_v17 = vpop.permute.xlu0 %9072 }
 0xbfb   : > { %v9096_v50 = vsel %vm1529_vm2, %v9073_v17, %v9075_v1 }
 0xbfc   : > { %9130 = vmatpush1.bf16.msra.mxu1 %v9096_v50  ;;  %10471 = vmatprep.subr.msk.bf16.mxu0 %vm13050_vm11, %v10470_v48 }
 0xbfd   : > { %10474 = vmatpush1.bf16.msk.msra.mxu0 %vm13082_vm12, %v10473_v0 }
 0xbff   : > { %10449 = vmatmul.mubr.msk.bf16.vlgmr.msra.gmra.mxu1 %vm2124_vm6, %v10448_v26 }
 0xc00   : > { %10475 = vmatmul.mubr.msk.bf16.vlgmr.msra.gmra.mxu0 %vm2124_vm6, %v10450_v33 }
 0xc07   : > { %v9314_v16 = vpop.permute.xlu0 %9313 }
 0xc78   : > { %v8669_v21 = vpop.f32.mrf.mxu1 }
 0xc7a   : > { %v8671_v34 = vpop.f32.mrf.mxu1 }
 0xc7c   : > { %v8673_v39 = vpop.f32.mrf.mxu1 }
 0xc7e   : > { %v8674_v28 = vpop.f32.mrf.mxu1 }
 0xc80   : > { %v8299_v35 = vpop.f32.mrf.mxu0 }
 0xc81   : > { %v8344_v15 = vadd.f32 %v8343_v5, %v8299_v35 }
 0xc82   : > { %v8301_v59 = vpop.f32.mrf.mxu0 }
 0xc83   : > { %v8346_v22 = vadd.f32 %v8345_v10, %v8301_v59 }
 0xc84   : > { %v8303_v24 = vpop.f32.mrf.mxu0 }
 0xc86   : > { %v8304_v47 = vpop.f32.mrf.mxu0 }
 0xc8f   : > { %v8909_v30 = vpop.f32.mrf.mxu1 }
 0xc90   : > { %v8517_v57 = vpop.f32.mrf.mxu0 }
 0xc91   : > { %v8911_v29 = vpop.f32.mrf.mxu1  ;;  %v8524_v61 = vadd.f32 %v8517_v57, %v8344_v15 }
 0xc92   : > { %v8519_v62 = vpop.f32.mrf.mxu0 }
 0xc93   : > { %v8913_v3 = vpop.f32.mrf.mxu1  ;;  %v8525_v4 = vadd.f32 %v8519_v62, %v8346_v22  ;;  %v8676_v13 = vadd.f32 %v8669_v21, %v8524_v61 }
 0xc94   : > { %v8521_v52 = vpop.f32.mrf.mxu0 }
 0xc95   : > { %v8914_v32 = vpop.f32.mrf.mxu1  ;;  %v8677_v2 = vadd.f32 %v8671_v34, %v8525_v4 }
 0xc96   : > { %v8522_v37 = vpop.f32.mrf.mxu0 }
 0xca0   : > { %v8757_v7 = vpop.f32.mrf.mxu0 }
 0xca1   : > { %v8764_v14 = vadd.f32 %v8757_v7, %v8676_v13 }
 0xca2   : > { %v8759_v19 = vpop.f32.mrf.mxu0 }
 0xca3   : > { %v8765_v53 = vadd.f32 %v8759_v19, %v8677_v2  ;;  %v8916_v41 = vadd.f32 %v8909_v30, %v8764_v14 }
 0xca4   : > { %v8761_v63 = vpop.f32.mrf.mxu0 }
 0xca5   : > { %v8917_v49 = vadd.f32 %v8911_v29, %v8765_v53 }
 0xca6   : > { %v8762_v20 = vpop.f32.mrf.mxu0 }
 0xcb0   : > { %v9061_v60 = vpop.f32.mrf.mxu0 }
 0xcb1   : > { %v9068_v1 = vadd.f32 %v9061_v60, %v8916_v41 }
 0xcb2   : > { %v9063_v12 = vpop.f32.mrf.mxu0 }
 0xcb3   : > { %v9069_v23 = vadd.f32 %v9063_v12, %v8917_v49 }
 0xcb4   : > { %v9065_v40 = vpop.f32.mrf.mxu0 }
 0xcb6   : > { %v9066_v31 = vpop.f32.mrf.mxu0 }
 0xcbf   : > { %v9149_v42 = vpop.f32.mrf.mxu1 }
 0xcc0   : > { %v9156_v54 = vadd.f32 %v9149_v42, %v9068_v1  ;;  %v9301_v58 = vpop.f32.mrf.mxu0 }
 0xcc1   : > { %v9151_v55 = vpop.f32.mrf.mxu1 }
 0xcc2   : > { %v9157_v18 = vadd.f32 %v9151_v55, %v9069_v23  ;;  %v9308_v25 = vadd.f32 %v9301_v58, %v9156_v54  ;;  %v9303_v46 = vpop.f32.mrf.mxu0 }
 0xcc3   : > { %v9153_v6 = vpop.f32.mrf.mxu1 }
 0xcc4   : > { %v9316_v36 = vadd.f32 %v9314_v16, %v9308_v25  ;;  %v9309_v38 = vadd.f32 %v9303_v46, %v9157_v18  ;;  %v9305_v9 = vpop.f32.mrf.mxu0 }
 0xcc5   : > { %v9154_v44 = vpop.f32.mrf.mxu1 }
 0xcc6   : > { %v9317_v43 = vadd.f32 %v9314_v16, %v9309_v38  ;;  %v9306_v11 = vpop.f32.mrf.mxu0  ;;  %v9318_v27 = vmax.f32 %v9316_v36, 0.0 }
 0xcc8   : > { %v9319_v45 = vmax.f32 %v9317_v43, 0.0 }
 0xcca   : > { %v9322_v51 = vcombine.low %v9318_v27, %v9319_v45 }
 0xccc   : > { %9324 = vst [vmem:[%s401_s19] sm:$0x77] %v9322_v51 }
 0xccd PF: > { %s22_s17 = sadd.s32 1, %s11923_s17  }
 0xcce   : > { %p19_p1 = scmp.ge.s32.totalorder %s22_s17, 4  }
 0xcd0   :  { %21 = sbr.rel (!%p19_p1) target bundleno = 1 (0x1), region = 139 }
 0xcd5   :  { %9346 = vsyncpa [#allocation4], 1 }
 0xcd6   :  { %9348 = vsyncpa [#allocation4 + $0x1], 1 }

</bundles_post_ra>
